<compile_context>
chip_gen: v5e
topology: v5e:2x2
jax: 0.10.0
libtpu: 0.0.40
codegen_flags: <defaults>
</compile_context>

<pallas_src>
import functools
import math

import jax
import jax.numpy as jnp
import numpy as np
from jax.experimental import pallas as pl
from jax.experimental.pallas import tpu as pltpu


# ----------------------------------------------------------------------------
# Kernel: one block of `bb` batch elements per grid step.
# ----------------------------------------------------------------------------
def _damha_kernel(q_ref, k_ref, v_ref, rel_ref,
                  wqt_ref, wkt_ref, wvt_ref, bq_ref, bk_ref, bv_ref,
                  out_ref, *, num_heads, dk, dv, scale, matmul_dtype):
    """
    q/k/v      : [bb*S, E]   (batch folded into the matmul M dimension)
    rel        : [bb, S, S]  pairwise relative distance / 224
    wqt/wkt    : [E, kdim]   head-permuted (de-interleaved) W^T
    wvt        : [E, vdim]
    bq/bk/bv   : [1, kdim] / [1, vdim]
    out        : [bb*S, vdim]
    """
    bb, S, _ = rel_ref.shape
    half = dk // 2
    mm = jnp.float32 if matmul_dtype is None else matmul_dtype

    # ---- QKV projections (MXU), batch folded into M -------------------------
    q_full = jnp.dot(q_ref[...].astype(mm), wqt_ref[...].astype(mm),
                     preferred_element_type=jnp.float32) + bq_ref[...]
    k_full = jnp.dot(k_ref[...].astype(mm), wkt_ref[...].astype(mm),
                     preferred_element_type=jnp.float32) + bk_ref[...]
    v_full = jnp.dot(v_ref[...].astype(mm), wvt_ref[...].astype(mm),
                     preferred_element_type=jnp.float32) + bv_ref[...]

    # ---- PositionalEncoding of the relative distances ----------------------
    #   div_term[m] = exp(2m * -(ln 10000) / dk); one wide sin + one wide cos.
    m_idx = jax.lax.broadcasted_iota(jnp.int32, (1, half), 1).astype(jnp.float32)
    div = jnp.exp(m_idx * (-2.0 * math.log(10000.0) / dk)).reshape(1, 1, 1, half)
    ang = rel_ref[...][..., None] * div                 # [bb, S, S, half]
    sin_pe = jnp.sin(ang)
    cos_pe = jnp.cos(ang)

    # ---- per-head attention (short static loop; all inner work is wide) ----
    for h in range(num_heads):
        q_h = q_full[:, h * dk:(h + 1) * dk].reshape(bb, S, dk)
        k_h = k_full[:, h * dk:(h + 1) * dk].reshape(bb, S, dk)
        v_h = v_full[:, h * dv:(h + 1) * dv].reshape(bb, S, dv)

        # q.k^T contracted on the last dim (no explicit transpose).  Factor 2:
        # the reference adds q.k for both the embed_keys and embed_queries path.
        logits = 2.0 * jnp.einsum('bid,bjd->bij', q_h, k_h,
                                  preferred_element_type=jnp.float32)   # [bb,S,S]

        # Relative-position bias, all frequencies at once:
        #   bias[b,i,j] = sum_m (qe[b,i,m] + ke[b,j,m]) * sin(rel*div_m)
        #               +       (qo[b,i,m] + ko[b,j,m]) * cos(rel*div_m)
        qe = q_h[:, :, None, :half]     # [bb, S, 1, half]  broadcast over j
        qo = q_h[:, :, None, half:]
        ke = k_h[:, None, :, :half]     # [bb, 1, S, half]  broadcast over i
        ko = k_h[:, None, :, half:]
        bias = jnp.sum((qe + ke) * sin_pe + (qo + ko) * cos_pe, axis=-1)

        logits = (logits + bias) * scale

        # softmax; the divide goes to the EUP via the approximate reciprocal.
        mx = jnp.max(logits, axis=-1, keepdims=True)
        p = jnp.exp(logits - mx)
        attn = p * pl.reciprocal(jnp.sum(p, axis=-1, keepdims=True), approx=True)

        out_h = jnp.einsum('bij,bjd->bid', attn, v_h,
                           preferred_element_type=jnp.float32)          # [bb,S,dv]
        out_ref[:, h * dv:(h + 1) * dv] = out_h.reshape(bb * S, dv)


# ----------------------------------------------------------------------------
# Wrapper
# ----------------------------------------------------------------------------
def distance_aware_mha(query, key, value, tile_positions,
                       wq, bq, wk, bk, wv, bv, num_heads,
                       *, batch_block=None, matmul_dtype=None):
    """Pallas port of DistanceAwareMultiheadAttention.forward (need_weights=False).

    query/key/value: [B, S, E] f32; tile_positions: [B, S, 2].
    wq/wk: [kdim, E], wv: [vdim, E] (torch nn.Linear convention); biases [kdim]/[vdim].
    matmul_dtype: optional (e.g. jnp.bfloat16) dtype for the QKV projection
    matmuls (recommended on v6e/v7x); everything else stays f32.
    Returns: [B, S, vdim].
    """
    B, S, E = query.shape
    kdim = wq.shape[0]
    vdim = wv.shape[0]
    dk = kdim // num_heads
    dv = vdim // num_heads

    if batch_block is None:
        batch_block = B            # fold the whole batch into a single grid step
    assert B % batch_block == 0
    n_blocks = B // batch_block
    bs = batch_block * S

    # Per-head de-interleave permutation (even dims first, then odd dims) so the
    # projected head vectors line up with the [sin | cos] PE halves without any
    # strided lane slicing; q.k is invariant under a shared permutation of q,k.
    perm = np.concatenate([
        np.concatenate([np.arange(h * dk, (h + 1) * dk, 2),
                        np.arange(h * dk + 1, (h + 1) * dk, 2)])
        for h in range(num_heads)
    ])
    wqt = jnp.asarray(wq)[perm].T                 # [E, kdim]
    wkt = jnp.asarray(wk)[perm].T                 # [E, kdim]
    wvt = jnp.asarray(wv).T                       # [E, vdim]
    bq2 = jnp.asarray(bq)[perm].reshape(1, kdim)
    bk2 = jnp.asarray(bk)[perm].reshape(1, kdim)
    bv2 = jnp.asarray(bv).reshape(1, vdim)

    # Fold batch into the matmul M dimension.
    q_flat = query.reshape(B * S, E)
    k_flat = key.reshape(B * S, E)
    v_flat = value.reshape(B * S, E)

    # Pairwise relative distances / 224, computed once here: passing [B,S,S]
    # replaces two heavily padded per-step DMAs of the raw [B,S,2] positions.
    # (sqrt is exactly 0 on the diagonal: fine for forward; add an eps if this
    # kernel is ever differentiated.)
    pos = tile_positions.astype(jnp.float32)
    diff = pos[:, :, None, :] - pos[:, None, :, :]
    rel = jnp.sqrt(jnp.sum(diff * diff, axis=-1)) * (1.0 / 224.0)      # [B,S,S]

    kernel = functools.partial(_damha_kernel, num_heads=num_heads, dk=dk, dv=dv,
                               scale=1.0 / math.sqrt(dk), matmul_dtype=matmul_dtype)

    out_flat = pl.pallas_call(
        kernel,
        out_shape=jax.ShapeDtypeStruct((B * S, vdim), jnp.float32),
        grid_spec=pltpu.PrefetchScalarGridSpec(
            num_scalar_prefetch=0,
            grid=(n_blocks,),
            in_specs=[
                pl.BlockSpec((bs, E), lambda b: (b, 0)),                 # query
                pl.BlockSpec((bs, E), lambda b: (b, 0)),                 # key
                pl.BlockSpec((bs, E), lambda b: (b, 0)),                 # value
                pl.BlockSpec((batch_block, S, S), lambda b: (b, 0, 0)),  # rel dist
                pl.BlockSpec((E, kdim), lambda b: (0, 0)),               # Wq^T perm
                pl.BlockSpec((E, kdim), lambda b: (0, 0)),               # Wk^T perm
                pl.BlockSpec((E, vdim), lambda b: (0, 0)),               # Wv^T
                pl.BlockSpec((1, kdim), lambda b: (0, 0)),               # bq
                pl.BlockSpec((1, kdim), lambda b: (0, 0)),               # bk
                pl.BlockSpec((1, vdim), lambda b: (0, 0)),               # bv
            ],
            out_specs=pl.BlockSpec((bs, vdim), lambda b: (b, 0)),
        ),
        compiler_params=pltpu.CompilerParams(
            # Batch blocks are independent; on v7x choose batch_block < B so the
            # grid has >= 2 parallel steps and both TensorCores are used.
            dimension_semantics=("parallel",),
            vmem_limit_bytes=64 * 1024 * 1024,
        ),
    )(q_flat, k_flat, v_flat, rel, wqt, wkt, wvt, bq2, bk2, bv2)

    return out_flat.reshape(B, S, vdim)


# ----------------------------------------------------------------------------
# Pure-JAX reference (mirrors the PyTorch forward exactly, interleaved PE)
# ----------------------------------------------------------------------------
def reference(query, key, value, tile_positions, wq, bq, wk, bk, wv, bv, num_heads):
    B, S, E = query.shape
    kdim = wq.shape[0]
    vdim = wv.shape[0]
    dk = kdim // num_heads
    dv = vdim // num_heads
    hp = 'highest'

    q = jnp.einsum('bse,ke->bsk', query, wq, precision=hp) + bq
    k = jnp.einsum('bse,ke->bsk', key, wk, precision=hp) + bk
    v = jnp.einsum('bse,ke->bsk', value, wv, precision=hp) + bv
    q = q.reshape(B, S, num_heads, dk).transpose(0, 2, 1, 3)
    k = k.reshape(B, S, num_heads, dk).transpose(0, 2, 1, 3)
    v = v.reshape(B, S, num_heads, dv).transpose(0, 2, 1, 3)

    logits = jnp.einsum('bhid,bhjd->bhij', q, k, precision=hp)

    diff = tile_positions[:, :, None, :] - tile_positions[:, None, :, :]
    rel = jnp.sqrt(jnp.sum(diff * diff, axis=-1)) / 224.0               # [B,S,S]
    div = jnp.exp(jnp.arange(0, dk, 2, dtype=jnp.float32) * -(math.log(10000.0) / dk))
    ang = rel[..., None] * div                                          # [B,S,S,dk/2]
    pe = jnp.stack([jnp.sin(ang), jnp.cos(ang)], axis=-1).reshape(B, S, S, dk)

    logits = logits + jnp.einsum('bhid,bijd->bhij', q, pe, precision=hp)  # embed_keys
    logits = logits + jnp.einsum('bhjd,bijd->bhij', k, pe, precision=hp)  # embed_queries
    logits = logits + jnp.einsum('bhid,bhjd->bhij', q, k, precision=hp)   # both
    logits = logits / math.sqrt(dk)

    attn = jax.nn.softmax(logits, axis=-1)
    out = jnp.einsum('bhij,bhjd->bhid', attn, v, precision=hp)
    return out.transpose(0, 2, 1, 3).reshape(B, S, num_heads * dv)


# ----------------------------------------------------------------------------
# Main
# ----------------------------------------------------------------------------
if __name__ == "__main__":
    # Module config: embed_keys=True, embed_queries=True, embed_values=False,
    # add_zero_attn=False, dropout=0.0 (identity).
    B, S, E = 2, 8, 32
    num_heads = 4
    kdim = vdim = E

    key0 = jax.random.PRNGKey(0)
    ks = jax.random.split(key0, 8)

    def xavier(k, shape):
        fan_out, fan_in = shape
        a = math.sqrt(6.0 / (fan_in + fan_out))
        return jax.random.uniform(k, shape, jnp.float32, -a, a)

    wq = xavier(ks[0], (kdim, E))
    wk = xavier(ks[1], (kdim, E))
    wv = xavier(ks[2], (vdim, E))
    bq = jnp.zeros((kdim,), jnp.float32)   # _reset_parameters zero-fills biases
    bk = jnp.zeros((kdim,), jnp.float32)
    bv = jnp.zeros((vdim,), jnp.float32)

    query = jax.random.normal(ks[3], (B, S, E), jnp.float32)
    key_t = jax.random.normal(ks[4], (B, S, E), jnp.float32)
    value = jax.random.normal(ks[5], (B, S, E), jnp.float32)
    tile_positions = jax.random.uniform(ks[6], (B, S, 2), jnp.float32, 0.0, 224.0)

    ref = reference(query, key_t, value, tile_positions,
                    wq, bq, wk, bk, wv, bv, num_heads)

    # f32 path: strict correctness check.
    out = distance_aware_mha(query, key_t, value, tile_positions,
                             wq, bq, wk, bk, wv, bv, num_heads)
    out = jax.block_until_ready(out)
    np.testing.assert_allclose(np.asarray(out), np.asarray(ref), rtol=2e-2, atol=2e-2)

    # bf16-projection path (v6e/v7x MXU fast path): smoke test with a loose
    # tolerance appropriate for reduced-precision projections.
    out_bf16 = distance_aware_mha(query, key_t, value, tile_positions,
                                  wq, bq, wk, bk, wv, bv, num_heads,
                                  matmul_dtype=jnp.bfloat16)
    out_bf16 = jax.block_until_ready(out_bf16)
    np.testing.assert_allclose(np.asarray(out_bf16), np.asarray(ref),
                               rtol=2.5e-1, atol=2.5e-1)

    print("KERNEL_OK")
</pallas_src>

<mosaic_0001>
module attributes {stable_mosaic.version = 11 : i64} {
  func.func @_damha_kernel(%arg0: i32, %arg1: memref<16x32xf32, #tpu.memory_space<vmem>>, %arg2: memref<16x32xf32, #tpu.memory_space<vmem>>, %arg3: memref<16x32xf32, #tpu.memory_space<vmem>>, %arg4: memref<2x8x8xf32, #tpu.memory_space<vmem>>, %arg5: memref<32x32xf32, #tpu.memory_space<vmem>>, %arg6: memref<32x32xf32, #tpu.memory_space<vmem>>, %arg7: memref<32x32xf32, #tpu.memory_space<vmem>>, %arg8: memref<1x32xf32, #tpu.memory_space<vmem>>, %arg9: memref<1x32xf32, #tpu.memory_space<vmem>>, %arg10: memref<1x32xf32, #tpu.memory_space<vmem>>, %arg11: memref<16x32xf32, #tpu.memory_space<vmem>>) attributes {dimension_semantics = [#tpu.dimension_semantics<parallel>], iteration_bounds = array<i64: 1>, scalar_prefetch = 0 : i64, scratch_operands = 0 : i64, tpu.core_type = #tpu.core_type<tc>, window_params = [{transform_indices = @transform_0, window_bounds = array<i64: 16, 32>}, {transform_indices = @transform_1, window_bounds = array<i64: 16, 32>}, {transform_indices = @transform_2, window_bounds = array<i64: 16, 32>}, {transform_indices = @transform_3, window_bounds = array<i64: 2, 8, 8>}, {pipeline_mode = #tpu.pipeline_mode<synchronous>, transform_indices = @transform_4, window_bounds = array<i64: 32, 32>}, {pipeline_mode = #tpu.pipeline_mode<synchronous>, transform_indices = @transform_5, window_bounds = array<i64: 32, 32>}, {pipeline_mode = #tpu.pipeline_mode<synchronous>, transform_indices = @transform_6, window_bounds = array<i64: 32, 32>}, {pipeline_mode = #tpu.pipeline_mode<synchronous>, transform_indices = @transform_7, window_bounds = array<i64: 1, 32>}, {pipeline_mode = #tpu.pipeline_mode<synchronous>, transform_indices = @transform_8, window_bounds = array<i64: 1, 32>}, {pipeline_mode = #tpu.pipeline_mode<synchronous>, transform_indices = @transform_9, window_bounds = array<i64: 1, 32>}, {transform_indices = @transform_10, window_bounds = array<i64: 16, 32>}]} {
    %c0 = arith.constant 0 : index
    %c0_0 = arith.constant 0 : index
    %0 = vector.load %arg1[%c0, %c0_0] : memref<16x32xf32, #tpu.memory_space<vmem>>, vector<16x32xf32>
    %c0_1 = arith.constant 0 : index
    %c0_2 = arith.constant 0 : index
    %1 = vector.load %arg5[%c0_1, %c0_2] : memref<32x32xf32, #tpu.memory_space<vmem>>, vector<32x32xf32>
    %cst = arith.constant dense<0.000000e+00> : vector<16x32xf32>
    %2 = tpu.matmul %0, %1, %cst {dimension_numbers = #tpu.dot_dimension_numbers<[1], [0], [0], [1], [0, 0, 1, 1], [], []>} : vector<16x32xf32>, vector<32x32xf32>, vector<16x32xf32> -> vector<16x32xf32>
    %c0_3 = arith.constant 0 : index
    %c0_4 = arith.constant 0 : index
    %3 = vector.load %arg8[%c0_3, %c0_4] : memref<1x32xf32, #tpu.memory_space<vmem>>, vector<1x32xf32>
    %4 = vector.broadcast %3 : vector<1x32xf32> to vector<16x32xf32>
    %5 = arith.addf %2, %4 : vector<16x32xf32>
    %c0_5 = arith.constant 0 : index
    %c0_6 = arith.constant 0 : index
    %6 = vector.load %arg2[%c0_5, %c0_6] : memref<16x32xf32, #tpu.memory_space<vmem>>, vector<16x32xf32>
    %c0_7 = arith.constant 0 : index
    %c0_8 = arith.constant 0 : index
    %7 = vector.load %arg6[%c0_7, %c0_8] : memref<32x32xf32, #tpu.memory_space<vmem>>, vector<32x32xf32>
    %cst_9 = arith.constant dense<0.000000e+00> : vector<16x32xf32>
    %8 = tpu.matmul %6, %7, %cst_9 {dimension_numbers = #tpu.dot_dimension_numbers<[1], [0], [0], [1], [0, 0, 1, 1], [], []>} : vector<16x32xf32>, vector<32x32xf32>, vector<16x32xf32> -> vector<16x32xf32>
    %c0_10 = arith.constant 0 : index
    %c0_11 = arith.constant 0 : index
    %9 = vector.load %arg9[%c0_10, %c0_11] : memref<1x32xf32, #tpu.memory_space<vmem>>, vector<1x32xf32>
    %10 = vector.broadcast %9 : vector<1x32xf32> to vector<16x32xf32>
    %11 = arith.addf %8, %10 : vector<16x32xf32>
    %c0_12 = arith.constant 0 : index
    %c0_13 = arith.constant 0 : index
    %12 = vector.load %arg3[%c0_12, %c0_13] : memref<16x32xf32, #tpu.memory_space<vmem>>, vector<16x32xf32>
    %c0_14 = arith.constant 0 : index
    %c0_15 = arith.constant 0 : index
    %13 = vector.load %arg7[%c0_14, %c0_15] : memref<32x32xf32, #tpu.memory_space<vmem>>, vector<32x32xf32>
    %cst_16 = arith.constant dense<0.000000e+00> : vector<16x32xf32>
    %14 = tpu.matmul %12, %13, %cst_16 {dimension_numbers = #tpu.dot_dimension_numbers<[1], [0], [0], [1], [0, 0, 1, 1], [], []>} : vector<16x32xf32>, vector<32x32xf32>, vector<16x32xf32> -> vector<16x32xf32>
    %c0_17 = arith.constant 0 : index
    %c0_18 = arith.constant 0 : index
    %15 = vector.load %arg10[%c0_17, %c0_18] : memref<1x32xf32, #tpu.memory_space<vmem>>, vector<1x32xf32>
    %16 = vector.broadcast %15 : vector<1x32xf32> to vector<16x32xf32>
    %17 = arith.addf %14, %16 : vector<16x32xf32>
    %18 = tpu.iota {dimensions = array<i32: 1>} : vector<1x4xi32>
    %19 = arith.sitofp %18 : vector<1x4xi32> to vector<1x4xf32>
    %cst_19 = arith.constant -2.30258512 : f32
    %20 = vector.broadcast %cst_19 : f32 to vector<1x4xf32>
    %21 = arith.mulf %19, %20 : vector<1x4xf32>
    %22 = math.exp %21 : vector<1x4xf32>
    %23 = vector.shape_cast %22 : vector<1x4xf32> to vector<1x1x1x4xf32>
    %c0_20 = arith.constant 0 : index
    %c0_21 = arith.constant 0 : index
    %c0_22 = arith.constant 0 : index
    %24 = vector.load %arg4[%c0_20, %c0_21, %c0_22] : memref<2x8x8xf32, #tpu.memory_space<vmem>>, vector<2x8x8xf32>
    %25 = vector.shape_cast %24 : vector<2x8x8xf32> to vector<2x8x8x1xf32>
    %26 = vector.broadcast %25 : vector<2x8x8x1xf32> to vector<2x8x8x4xf32>
    %27 = vector.broadcast %23 : vector<1x1x1x4xf32> to vector<2x8x8x4xf32>
    %28 = arith.mulf %26, %27 : vector<2x8x8x4xf32>
    %29 = math.sin %28 : vector<2x8x8x4xf32>
    %30 = math.cos %28 : vector<2x8x8x4xf32>
    %31 = vector.extract_strided_slice %5 {offsets = [0, 0], sizes = [16, 8], strides = [1, 1]} : vector<16x32xf32> to vector<16x8xf32>
    %32 = vector.shape_cast %31 : vector<16x8xf32> to vector<2x8x8xf32>
    %33 = vector.extract_strided_slice %11 {offsets = [0, 0], sizes = [16, 8], strides = [1, 1]} : vector<16x32xf32> to vector<16x8xf32>
    %34 = vector.shape_cast %33 : vector<16x8xf32> to vector<2x8x8xf32>
    %35 = vector.extract_strided_slice %17 {offsets = [0, 0], sizes = [16, 8], strides = [1, 1]} : vector<16x32xf32> to vector<16x8xf32>
    %36 = vector.shape_cast %35 : vector<16x8xf32> to vector<2x8x8xf32>
    "tpu.trace_start"() <{level = 10 : i32, message = "bid,bjd->bij"}> : () -> ()
    %cst_23 = arith.constant dense<0.000000e+00> : vector<2x8x8xf32>
    %37 = tpu.matmul %32, %34, %cst_23 {dimension_numbers = #tpu.dot_dimension_numbers<[2], [2], [1], [1], [0, 0, 0, 1, 1, 1], [0], [0]>} : vector<2x8x8xf32>, vector<2x8x8xf32>, vector<2x8x8xf32> -> vector<2x8x8xf32>
    "tpu.trace_stop"() : () -> ()
    %cst_24 = arith.constant 2.000000e+00 : f32
    %38 = vector.broadcast %cst_24 : f32 to vector<2x8x8xf32>
    %39 = arith.mulf %38, %37 : vector<2x8x8xf32>
    %40 = vector.extract_strided_slice %32 {offsets = [0, 0, 0], sizes = [2, 8, 4], strides = [1, 1, 1]} : vector<2x8x8xf32> to vector<2x8x4xf32>
    %41 = vector.shape_cast %40 : vector<2x8x4xf32> to vector<2x8x1x4xf32>
    %42 = vector.extract_strided_slice %32 {offsets = [0, 0, 4], sizes = [2, 8, 4], strides = [1, 1, 1]} : vector<2x8x8xf32> to vector<2x8x4xf32>
    %43 = vector.shape_cast %42 : vector<2x8x4xf32> to vector<2x8x1x4xf32>
    %44 = vector.extract_strided_slice %34 {offsets = [0, 0, 0], sizes = [2, 8, 4], strides = [1, 1, 1]} : vector<2x8x8xf32> to vector<2x8x4xf32>
    %45 = vector.shape_cast %44 : vector<2x8x4xf32> to vector<2x1x8x4xf32>
    %46 = vector.extract_strided_slice %34 {offsets = [0, 0, 4], sizes = [2, 8, 4], strides = [1, 1, 1]} : vector<2x8x8xf32> to vector<2x8x4xf32>
    %47 = vector.shape_cast %46 : vector<2x8x4xf32> to vector<2x1x8x4xf32>
    %48 = vector.broadcast %41 : vector<2x8x1x4xf32> to vector<2x8x8x4xf32>
    %49 = vector.broadcast %45 : vector<2x1x8x4xf32> to vector<2x8x8x4xf32>
    %50 = arith.addf %48, %49 : vector<2x8x8x4xf32>
    %51 = arith.mulf %50, %29 : vector<2x8x8x4xf32>
    %52 = vector.broadcast %43 : vector<2x8x1x4xf32> to vector<2x8x8x4xf32>
    %53 = vector.broadcast %47 : vector<2x1x8x4xf32> to vector<2x8x8x4xf32>
    %54 = arith.addf %52, %53 : vector<2x8x8x4xf32>
    %55 = arith.mulf %54, %30 : vector<2x8x8x4xf32>
    %56 = arith.addf %51, %55 : vector<2x8x8x4xf32>
    %cst_25 = arith.constant dense<0.000000e+00> : vector<2x8x8xf32>
    %57 = vector.multi_reduction <add>, %56, %cst_25 [3] : vector<2x8x8x4xf32> to vector<2x8x8xf32>
    %58 = arith.addf %39, %57 : vector<2x8x8xf32>
    %cst_26 = arith.constant 0.353553385 : f32
    %59 = vector.broadcast %cst_26 : f32 to vector<2x8x8xf32>
    %60 = arith.mulf %58, %59 : vector<2x8x8xf32>
    %cst_27 = arith.constant dense<0xFF800000> : vector<2x8xf32>
    %61 = vector.multi_reduction <maximumf>, %60, %cst_27 [2] : vector<2x8x8xf32> to vector<2x8xf32>
    %62 = vector.shape_cast %61 : vector<2x8xf32> to vector<2x8x1xf32>
    %63 = vector.broadcast %62 : vector<2x8x1xf32> to vector<2x8x8xf32>
    %64 = arith.subf %60, %63 : vector<2x8x8xf32>
    %65 = math.exp %64 : vector<2x8x8xf32>
    %cst_28 = arith.constant dense<0.000000e+00> : vector<2x8xf32>
    %66 = vector.multi_reduction <add>, %65, %cst_28 [2] : vector<2x8x8xf32> to vector<2x8xf32>
    %67 = vector.shape_cast %66 : vector<2x8xf32> to vector<2x8x1xf32>
    %68 = tpu.reciprocal %67 {approx = true} : vector<2x8x1xf32> -> vector<2x8x1xf32>
    %69 = vector.broadcast %68 : vector<2x8x1xf32> to vector<2x8x8xf32>
    %70 = arith.mulf %65, %69 : vector<2x8x8xf32>
    "tpu.trace_start"() <{level = 10 : i32, message = "bij,bjd->bid"}> : () -> ()
    %cst_29 = arith.constant dense<0.000000e+00> : vector<2x8x8xf32>
    %71 = tpu.matmul %70, %36, %cst_29 {dimension_numbers = #tpu.dot_dimension_numbers<[2], [1], [1], [2], [0, 0, 0, 1, 1, 2], [0], [0]>} : vector<2x8x8xf32>, vector<2x8x8xf32>, vector<2x8x8xf32> -> vector<2x8x8xf32>
    "tpu.trace_stop"() : () -> ()
    %72 = vector.shape_cast %71 : vector<2x8x8xf32> to vector<16x8xf32>
    %c0_30 = arith.constant 0 : index
    %c0_31 = arith.constant 0 : index
    %73 = vector.load %arg11[%c0_30, %c0_31] : memref<16x32xf32, #tpu.memory_space<vmem>>, vector<16x8xf32>
    tpu.vector_store %arg11[%c0_30, %c0_31], %72 {strides = array<i32>} : memref<16x32xf32, #tpu.memory_space<vmem>>, vector<16x8xf32>,
    %74 = vector.extract_strided_slice %5 {offsets = [0, 8], sizes = [16, 8], strides = [1, 1]} : vector<16x32xf32> to vector<16x8xf32>
    %75 = vector.shape_cast %74 : vector<16x8xf32> to vector<2x8x8xf32>
    %76 = vector.extract_strided_slice %11 {offsets = [0, 8], sizes = [16, 8], strides = [1, 1]} : vector<16x32xf32> to vector<16x8xf32>
    %77 = vector.shape_cast %76 : vector<16x8xf32> to vector<2x8x8xf32>
    %78 = vector.extract_strided_slice %17 {offsets = [0, 8], sizes = [16, 8], strides = [1, 1]} : vector<16x32xf32> to vector<16x8xf32>
    %79 = vector.shape_cast %78 : vector<16x8xf32> to vector<2x8x8xf32>
    "tpu.trace_start"() <{level = 10 : i32, message = "bid,bjd->bij"}> : () -> ()
    %cst_32 = arith.constant dense<0.000000e+00> : vector<2x8x8xf32>
    %80 = tpu.matmul %75, %77, %cst_32 {dimension_numbers = #tpu.dot_dimension_numbers<[2], [2], [1], [1], [0, 0, 0, 1, 1, 1], [0], [0]>} : vector<2x8x8xf32>, vector<2x8x8xf32>, vector<2x8x8xf32> -> vector<2x8x8xf32>
    "tpu.trace_stop"() : () -> ()
    %cst_33 = arith.constant 2.000000e+00 : f32
    %81 = vector.broadcast %cst_33 : f32 to vector<2x8x8xf32>
    %82 = arith.mulf %81, %80 : vector<2x8x8xf32>
    %83 = vector.extract_strided_slice %75 {offsets = [0, 0, 0], sizes = [2, 8, 4], strides = [1, 1, 1]} : vector<2x8x8xf32> to vector<2x8x4xf32>
    %84 = vector.shape_cast %83 : vector<2x8x4xf32> to vector<2x8x1x4xf32>
    %85 = vector.extract_strided_slice %75 {offsets = [0, 0, 4], sizes = [2, 8, 4], strides = [1, 1, 1]} : vector<2x8x8xf32> to vector<2x8x4xf32>
    %86 = vector.shape_cast %85 : vector<2x8x4xf32> to vector<2x8x1x4xf32>
    %87 = vector.extract_strided_slice %77 {offsets = [0, 0, 0], sizes = [2, 8, 4], strides = [1, 1, 1]} : vector<2x8x8xf32> to vector<2x8x4xf32>
    %88 = vector.shape_cast %87 : vector<2x8x4xf32> to vector<2x1x8x4xf32>
    %89 = vector.extract_strided_slice %77 {offsets = [0, 0, 4], sizes = [2, 8, 4], strides = [1, 1, 1]} : vector<2x8x8xf32> to vector<2x8x4xf32>
    %90 = vector.shape_cast %89 : vector<2x8x4xf32> to vector<2x1x8x4xf32>
    %91 = vector.broadcast %84 : vector<2x8x1x4xf32> to vector<2x8x8x4xf32>
    %92 = vector.broadcast %88 : vector<2x1x8x4xf32> to vector<2x8x8x4xf32>
    %93 = arith.addf %91, %92 : vector<2x8x8x4xf32>
    %94 = arith.mulf %93, %29 : vector<2x8x8x4xf32>
    %95 = vector.broadcast %86 : vector<2x8x1x4xf32> to vector<2x8x8x4xf32>
    %96 = vector.broadcast %90 : vector<2x1x8x4xf32> to vector<2x8x8x4xf32>
    %97 = arith.addf %95, %96 : vector<2x8x8x4xf32>
    %98 = arith.mulf %97, %30 : vector<2x8x8x4xf32>
    %99 = arith.addf %94, %98 : vector<2x8x8x4xf32>
    %cst_34 = arith.constant dense<0.000000e+00> : vector<2x8x8xf32>
    %100 = vector.multi_reduction <add>, %99, %cst_34 [3] : vector<2x8x8x4xf32> to vector<2x8x8xf32>
    %101 = arith.addf %82, %100 : vector<2x8x8xf32>
    %cst_35 = arith.constant 0.353553385 : f32
    %102 = vector.broadcast %cst_35 : f32 to vector<2x8x8xf32>
    %103 = arith.mulf %101, %102 : vector<2x8x8xf32>
    %cst_36 = arith.constant dense<0xFF800000> : vector<2x8xf32>
    %104 = vector.multi_reduction <maximumf>, %103, %cst_36 [2] : vector<2x8x8xf32> to vector<2x8xf32>
    %105 = vector.shape_cast %104 : vector<2x8xf32> to vector<2x8x1xf32>
    %106 = vector.broadcast %105 : vector<2x8x1xf32> to vector<2x8x8xf32>
    %107 = arith.subf %103, %106 : vector<2x8x8xf32>
    %108 = math.exp %107 : vector<2x8x8xf32>
    %cst_37 = arith.constant dense<0.000000e+00> : vector<2x8xf32>
    %109 = vector.multi_reduction <add>, %108, %cst_37 [2] : vector<2x8x8xf32> to vector<2x8xf32>
    %110 = vector.shape_cast %109 : vector<2x8xf32> to vector<2x8x1xf32>
    %111 = tpu.reciprocal %110 {approx = true} : vector<2x8x1xf32> -> vector<2x8x1xf32>
    %112 = vector.broadcast %111 : vector<2x8x1xf32> to vector<2x8x8xf32>
    %113 = arith.mulf %108, %112 : vector<2x8x8xf32>
    "tpu.trace_start"() <{level = 10 : i32, message = "bij,bjd->bid"}> : () -> ()
    %cst_38 = arith.constant dense<0.000000e+00> : vector<2x8x8xf32>
    %114 = tpu.matmul %113, %79, %cst_38 {dimension_numbers = #tpu.dot_dimension_numbers<[2], [1], [1], [2], [0, 0, 0, 1, 1, 2], [0], [0]>} : vector<2x8x8xf32>, vector<2x8x8xf32>, vector<2x8x8xf32> -> vector<2x8x8xf32>
    "tpu.trace_stop"() : () -> ()
    %115 = vector.shape_cast %114 : vector<2x8x8xf32> to vector<16x8xf32>
    %c0_39 = arith.constant 0 : index
    %c8 = arith.constant 8 : index
    %116 = vector.load %arg11[%c0_39, %c8] : memref<16x32xf32, #tpu.memory_space<vmem>>, vector<16x8xf32>
    tpu.vector_store %arg11[%c0_39, %c8], %115 {strides = array<i32>} : memref<16x32xf32, #tpu.memory_space<vmem>>, vector<16x8xf32>,
    %117 = vector.extract_strided_slice %5 {offsets = [0, 16], sizes = [16, 8], strides = [1, 1]} : vector<16x32xf32> to vector<16x8xf32>
    %118 = vector.shape_cast %117 : vector<16x8xf32> to vector<2x8x8xf32>
    %119 = vector.extract_strided_slice %11 {offsets = [0, 16], sizes = [16, 8], strides = [1, 1]} : vector<16x32xf32> to vector<16x8xf32>
    %120 = vector.shape_cast %119 : vector<16x8xf32> to vector<2x8x8xf32>
    %121 = vector.extract_strided_slice %17 {offsets = [0, 16], sizes = [16, 8], strides = [1, 1]} : vector<16x32xf32> to vector<16x8xf32>
    %122 = vector.shape_cast %121 : vector<16x8xf32> to vector<2x8x8xf32>
    "tpu.trace_start"() <{level = 10 : i32, message = "bid,bjd->bij"}> : () -> ()
    %cst_40 = arith.constant dense<0.000000e+00> : vector<2x8x8xf32>
    %123 = tpu.matmul %118, %120, %cst_40 {dimension_numbers = #tpu.dot_dimension_numbers<[2], [2], [1], [1], [0, 0, 0, 1, 1, 1], [0], [0]>} : vector<2x8x8xf32>, vector<2x8x8xf32>, vector<2x8x8xf32> -> vector<2x8x8xf32>
    "tpu.trace_stop"() : () -> ()
    %cst_41 = arith.constant 2.000000e+00 : f32
    %124 = vector.broadcast %cst_41 : f32 to vector<2x8x8xf32>
    %125 = arith.mulf %124, %123 : vector<2x8x8xf32>
    %126 = vector.extract_strided_slice %118 {offsets = [0, 0, 0], sizes = [2, 8, 4], strides = [1, 1, 1]} : vector<2x8x8xf32> to vector<2x8x4xf32>
    %127 = vector.shape_cast %126 : vector<2x8x4xf32> to vector<2x8x1x4xf32>
    %128 = vector.extract_strided_slice %118 {offsets = [0, 0, 4], sizes = [2, 8, 4], strides = [1, 1, 1]} : vector<2x8x8xf32> to vector<2x8x4xf32>
    %129 = vector.shape_cast %128 : vector<2x8x4xf32> to vector<2x8x1x4xf32>
    %130 = vector.extract_strided_slice %120 {offsets = [0, 0, 0], sizes = [2, 8, 4], strides = [1, 1, 1]} : vector<2x8x8xf32> to vector<2x8x4xf32>
    %131 = vector.shape_cast %130 : vector<2x8x4xf32> to vector<2x1x8x4xf32>
    %132 = vector.extract_strided_slice %120 {offsets = [0, 0, 4], sizes = [2, 8, 4], strides = [1, 1, 1]} : vector<2x8x8xf32> to vector<2x8x4xf32>
    %133 = vector.shape_cast %132 : vector<2x8x4xf32> to vector<2x1x8x4xf32>
    %134 = vector.broadcast %127 : vector<2x8x1x4xf32> to vector<2x8x8x4xf32>
    %135 = vector.broadcast %131 : vector<2x1x8x4xf32> to vector<2x8x8x4xf32>
    %136 = arith.addf %134, %135 : vector<2x8x8x4xf32>
    %137 = arith.mulf %136, %29 : vector<2x8x8x4xf32>
    %138 = vector.broadcast %129 : vector<2x8x1x4xf32> to vector<2x8x8x4xf32>
    %139 = vector.broadcast %133 : vector<2x1x8x4xf32> to vector<2x8x8x4xf32>
    %140 = arith.addf %138, %139 : vector<2x8x8x4xf32>
    %141 = arith.mulf %140, %30 : vector<2x8x8x4xf32>
    %142 = arith.addf %137, %141 : vector<2x8x8x4xf32>
    %cst_42 = arith.constant dense<0.000000e+00> : vector<2x8x8xf32>
    %143 = vector.multi_reduction <add>, %142, %cst_42 [3] : vector<2x8x8x4xf32> to vector<2x8x8xf32>
    %144 = arith.addf %125, %143 : vector<2x8x8xf32>
    %cst_43 = arith.constant 0.353553385 : f32
    %145 = vector.broadcast %cst_43 : f32 to vector<2x8x8xf32>
    %146 = arith.mulf %144, %145 : vector<2x8x8xf32>
    %cst_44 = arith.constant dense<0xFF800000> : vector<2x8xf32>
    %147 = vector.multi_reduction <maximumf>, %146, %cst_44 [2] : vector<2x8x8xf32> to vector<2x8xf32>
    %148 = vector.shape_cast %147 : vector<2x8xf32> to vector<2x8x1xf32>
    %149 = vector.broadcast %148 : vector<2x8x1xf32> to vector<2x8x8xf32>
    %150 = arith.subf %146, %149 : vector<2x8x8xf32>
    %151 = math.exp %150 : vector<2x8x8xf32>
    %cst_45 = arith.constant dense<0.000000e+00> : vector<2x8xf32>
    %152 = vector.multi_reduction <add>, %151, %cst_45 [2] : vector<2x8x8xf32> to vector<2x8xf32>
    %153 = vector.shape_cast %152 : vector<2x8xf32> to vector<2x8x1xf32>
    %154 = tpu.reciprocal %153 {approx = true} : vector<2x8x1xf32> -> vector<2x8x1xf32>
    %155 = vector.broadcast %154 : vector<2x8x1xf32> to vector<2x8x8xf32>
    %156 = arith.mulf %151, %155 : vector<2x8x8xf32>
    "tpu.trace_start"() <{level = 10 : i32, message = "bij,bjd->bid"}> : () -> ()
    %cst_46 = arith.constant dense<0.000000e+00> : vector<2x8x8xf32>
    %157 = tpu.matmul %156, %122, %cst_46 {dimension_numbers = #tpu.dot_dimension_numbers<[2], [1], [1], [2], [0, 0, 0, 1, 1, 2], [0], [0]>} : vector<2x8x8xf32>, vector<2x8x8xf32>, vector<2x8x8xf32> -> vector<2x8x8xf32>
    "tpu.trace_stop"() : () -> ()
    %158 = vector.shape_cast %157 : vector<2x8x8xf32> to vector<16x8xf32>
    %c0_47 = arith.constant 0 : index
    %c16 = arith.constant 16 : index
    %159 = vector.load %arg11[%c0_47, %c16] : memref<16x32xf32, #tpu.memory_space<vmem>>, vector<16x8xf32>
    tpu.vector_store %arg11[%c0_47, %c16], %158 {strides = array<i32>} : memref<16x32xf32, #tpu.memory_space<vmem>>, vector<16x8xf32>,
    %160 = vector.extract_strided_slice %5 {offsets = [0, 24], sizes = [16, 8], strides = [1, 1]} : vector<16x32xf32> to vector<16x8xf32>
    %161 = vector.shape_cast %160 : vector<16x8xf32> to vector<2x8x8xf32>
    %162 = vector.extract_strided_slice %11 {offsets = [0, 24], sizes = [16, 8], strides = [1, 1]} : vector<16x32xf32> to vector<16x8xf32>
    %163 = vector.shape_cast %162 : vector<16x8xf32> to vector<2x8x8xf32>
    %164 = vector.extract_strided_slice %17 {offsets = [0, 24], sizes = [16, 8], strides = [1, 1]} : vector<16x32xf32> to vector<16x8xf32>
    %165 = vector.shape_cast %164 : vector<16x8xf32> to vector<2x8x8xf32>
    "tpu.trace_start"() <{level = 10 : i32, message = "bid,bjd->bij"}> : () -> ()
    %cst_48 = arith.constant dense<0.000000e+00> : vector<2x8x8xf32>
    %166 = tpu.matmul %161, %163, %cst_48 {dimension_numbers = #tpu.dot_dimension_numbers<[2], [2], [1], [1], [0, 0, 0, 1, 1, 1], [0], [0]>} : vector<2x8x8xf32>, vector<2x8x8xf32>, vector<2x8x8xf32> -> vector<2x8x8xf32>
    "tpu.trace_stop"() : () -> ()
    %cst_49 = arith.constant 2.000000e+00 : f32
    %167 = vector.broadcast %cst_49 : f32 to vector<2x8x8xf32>
    %168 = arith.mulf %167, %166 : vector<2x8x8xf32>
    %169 = vector.extract_strided_slice %161 {offsets = [0, 0, 0], sizes = [2, 8, 4], strides = [1, 1, 1]} : vector<2x8x8xf32> to vector<2x8x4xf32>
    %170 = vector.shape_cast %169 : vector<2x8x4xf32> to vector<2x8x1x4xf32>
    %171 = vector.extract_strided_slice %161 {offsets = [0, 0, 4], sizes = [2, 8, 4], strides = [1, 1, 1]} : vector<2x8x8xf32> to vector<2x8x4xf32>
    %172 = vector.shape_cast %171 : vector<2x8x4xf32> to vector<2x8x1x4xf32>
    %173 = vector.extract_strided_slice %163 {offsets = [0, 0, 0], sizes = [2, 8, 4], strides = [1, 1, 1]} : vector<2x8x8xf32> to vector<2x8x4xf32>
    %174 = vector.shape_cast %173 : vector<2x8x4xf32> to vector<2x1x8x4xf32>
    %175 = vector.extract_strided_slice %163 {offsets = [0, 0, 4], sizes = [2, 8, 4], strides = [1, 1, 1]} : vector<2x8x8xf32> to vector<2x8x4xf32>
    %176 = vector.shape_cast %175 : vector<2x8x4xf32> to vector<2x1x8x4xf32>
    %177 = vector.broadcast %170 : vector<2x8x1x4xf32> to vector<2x8x8x4xf32>
    %178 = vector.broadcast %174 : vector<2x1x8x4xf32> to vector<2x8x8x4xf32>
    %179 = arith.addf %177, %178 : vector<2x8x8x4xf32>
    %180 = arith.mulf %179, %29 : vector<2x8x8x4xf32>
    %181 = vector.broadcast %172 : vector<2x8x1x4xf32> to vector<2x8x8x4xf32>
    %182 = vector.broadcast %176 : vector<2x1x8x4xf32> to vector<2x8x8x4xf32>
    %183 = arith.addf %181, %182 : vector<2x8x8x4xf32>
    %184 = arith.mulf %183, %30 : vector<2x8x8x4xf32>
    %185 = arith.addf %180, %184 : vector<2x8x8x4xf32>
    %cst_50 = arith.constant dense<0.000000e+00> : vector<2x8x8xf32>
    %186 = vector.multi_reduction <add>, %185, %cst_50 [3] : vector<2x8x8x4xf32> to vector<2x8x8xf32>
    %187 = arith.addf %168, %186 : vector<2x8x8xf32>
    %cst_51 = arith.constant 0.353553385 : f32
    %188 = vector.broadcast %cst_51 : f32 to vector<2x8x8xf32>
    %189 = arith.mulf %187, %188 : vector<2x8x8xf32>
    %cst_52 = arith.constant dense<0xFF800000> : vector<2x8xf32>
    %190 = vector.multi_reduction <maximumf>, %189, %cst_52 [2] : vector<2x8x8xf32> to vector<2x8xf32>
    %191 = vector.shape_cast %190 : vector<2x8xf32> to vector<2x8x1xf32>
    %192 = vector.broadcast %191 : vector<2x8x1xf32> to vector<2x8x8xf32>
    %193 = arith.subf %189, %192 : vector<2x8x8xf32>
    %194 = math.exp %193 : vector<2x8x8xf32>
    %cst_53 = arith.constant dense<0.000000e+00> : vector<2x8xf32>
    %195 = vector.multi_reduction <add>, %194, %cst_53 [2] : vector<2x8x8xf32> to vector<2x8xf32>
    %196 = vector.shape_cast %195 : vector<2x8xf32> to vector<2x8x1xf32>
    %197 = tpu.reciprocal %196 {approx = true} : vector<2x8x1xf32> -> vector<2x8x1xf32>
    %198 = vector.broadcast %197 : vector<2x8x1xf32> to vector<2x8x8xf32>
    %199 = arith.mulf %194, %198 : vector<2x8x8xf32>
    "tpu.trace_start"() <{level = 10 : i32, message = "bij,bjd->bid"}> : () -> ()
    %cst_54 = arith.constant dense<0.000000e+00> : vector<2x8x8xf32>
    %200 = tpu.matmul %199, %165, %cst_54 {dimension_numbers = #tpu.dot_dimension_numbers<[2], [1], [1], [2], [0, 0, 0, 1, 1, 2], [0], [0]>} : vector<2x8x8xf32>, vector<2x8x8xf32>, vector<2x8x8xf32> -> vector<2x8x8xf32>
    "tpu.trace_stop"() : () -> ()
    %201 = vector.shape_cast %200 : vector<2x8x8xf32> to vector<16x8xf32>
    %c0_55 = arith.constant 0 : index
    %c24 = arith.constant 24 : index
    %202 = vector.load %arg11[%c0_55, %c24] : memref<16x32xf32, #tpu.memory_space<vmem>>, vector<16x8xf32>
    tpu.vector_store %arg11[%c0_55, %c24], %201 {strides = array<i32>} : memref<16x32xf32, #tpu.memory_space<vmem>>, vector<16x8xf32>,
    return
  }
  func.func @transform_0(%arg0: i32) -> (i32, i32) {
    %c0_i32 = arith.constant 0 : i32
    %c0_i32_0 = arith.constant 0 : i32
    return %arg0, %c0_i32 : i32, i32
  }
  func.func @transform_1(%arg0: i32) -> (i32, i32) {
    %c0_i32 = arith.constant 0 : i32
    %c0_i32_0 = arith.constant 0 : i32
    return %arg0, %c0_i32 : i32, i32
  }
  func.func @transform_2(%arg0: i32) -> (i32, i32) {
    %c0_i32 = arith.constant 0 : i32
    %c0_i32_0 = arith.constant 0 : i32
    return %arg0, %c0_i32 : i32, i32
  }
  func.func @transform_3(%arg0: i32) -> (i32, i32, i32) {
    %c0_i32 = arith.constant 0 : i32
    %c0_i32_0 = arith.constant 0 : i32
    %c0_i32_1 = arith.constant 0 : i32
    return %arg0, %c0_i32, %c0_i32_0 : i32, i32, i32
  }
  func.func @transform_4(%arg0: i32) -> (i32, i32) {
    %c0_i32 = arith.constant 0 : i32
    %c0_i32_0 = arith.constant 0 : i32
    %c0_i32_1 = arith.constant 0 : i32
    return %c0_i32, %c0_i32_0 : i32, i32
  }
  func.func @transform_5(%arg0: i32) -> (i32, i32) {
    %c0_i32 = arith.constant 0 : i32
    %c0_i32_0 = arith.constant 0 : i32
    %c0_i32_1 = arith.constant 0 : i32
    return %c0_i32, %c0_i32_0 : i32, i32
  }
  func.func @transform_6(%arg0: i32) -> (i32, i32) {
    %c0_i32 = arith.constant 0 : i32
    %c0_i32_0 = arith.constant 0 : i32
    %c0_i32_1 = arith.constant 0 : i32
    return %c0_i32, %c0_i32_0 : i32, i32
  }
  func.func @transform_7(%arg0: i32) -> (i32, i32) {
    %c0_i32 = arith.constant 0 : i32
    %c0_i32_0 = arith.constant 0 : i32
    %c0_i32_1 = arith.constant 0 : i32
    return %c0_i32, %c0_i32_0 : i32, i32
  }
  func.func @transform_8(%arg0: i32) -> (i32, i32) {
    %c0_i32 = arith.constant 0 : i32
    %c0_i32_0 = arith.constant 0 : i32
    %c0_i32_1 = arith.constant 0 : i32
    return %c0_i32, %c0_i32_0 : i32, i32
  }
  func.func @transform_9(%arg0: i32) -> (i32, i32) {
    %c0_i32 = arith.constant 0 : i32
    %c0_i32_0 = arith.constant 0 : i32
    %c0_i32_1 = arith.constant 0 : i32
    return %c0_i32, %c0_i32_0 : i32, i32
  }
  func.func @transform_10(%arg0: i32) -> (i32, i32) {
    %c0_i32 = arith.constant 0 : i32
    %c0_i32_0 = arith.constant 0 : i32
    return %arg0, %c0_i32 : i32, i32
  }
}

</mosaic_0001>

<bundles_post_ra>
// kernel: tpu_custom_call.1
= control target key start
LH: loop header
LB: loop body
LE: loop exit
PB: predicated region body
PF: predicated region fallthrough
CT: control target
= control target key end

     0   :  { %15 = vsyncpa [#allocation3], 0  ;;  %s12387_s0 = inlined_call_operand.hbm [shape: f32[16,32], index: 0, kind: input, shape index: {}]   ;;  %s12388_s1 = inlined_call_operand.hbm [shape: f32[16,32], index: 1, kind: input, shape index: {}]   ;;  %s12389_s2 = inlined_call_operand.hbm [shape: f32[16,32], index: 2, kind: input, shape index: {}]   ;;  %s12390_s3 = inlined_call_operand.hbm [shape: f32[2,8,8], index: 3, kind: input, shape index: {}]   ;;  %s12391_s4 = inlined_call_operand.hbm [shape: f32[32,32], index: 4, kind: input, shape index: {}]   ;;  %s12392_s5 = inlined_call_operand.hbm [shape: f32[32,32], index: 5, kind: input, shape index: {}]   ;;  %s12393_s6 = inlined_call_operand.hbm [shape: f32[32,32], index: 6, kind: input, shape index: {}]   ;;  %s12394_s7 = inlined_call_operand.vmem [shape: f32[1,32], index: 7, kind: input, shape index: {}]   ;;  %s12395_s8 = inlined_call_operand.vmem [shape: f32[1,32], index: 8, kind: input, shape index: {}]   ;;  %s12396_s9 = inlined_call_operand.vmem [shape: f32[1,32], index: 9, kind: input, shape index: {}]   ;;  %s12397_s10 = inlined_call_operand.hbm [shape: f32[16,32], index: 10, kind: output, shape index: {}]  }
   0x1   :  { %16 = vsyncpa [#allocation6], 0 }
   0x2   :  { %17 = vsyncpa [#allocation9], 0 }
   0x3   :  { %18 = vsyncpa [#allocation12], 0 }
   0x4   :  { %19 = vsyncpa [#allocation4], 0  ;;  %s37_s15 = sshll.u32 %s12388_s1, 4  ;;  %s7804_s16 = smov [#allocation5]   ;;  %s38_s15 = int_to_ptr.hbm [resolvable:$true] %s37_s15 }
   0x5   :  { %s39_s17 = sshll.u32 %s7804_s16, 4  ;;  %s63_s20 = sshll.u32 %s12390_s3, 4  ;;  %s40_s17 = int_to_ptr.vmem [resolvable:$true] %s39_s17  ;;  %s64_s20 = int_to_ptr.hbm [resolvable:$true] %s63_s20 }
   0x6   :  { %s7805_s21 = smov 128   ;;  %s7806_s22 = smov 8  }
   0x7   :  { %45 = dma.hbm_to_vmem [thread:$0]  %s38_s15, 256, %s40_s17, [#allocation6], %s7805_s21, %s7805_s21, %s7806_s22  }
   0x8   :  { %s7807_s23 = smov [#allocation8]   ;;  %s89_s1 = sshll.u32 %s12392_s5, 4  ;;  %s90_s1 = int_to_ptr.hbm [resolvable:$true] %s89_s1 }
   0x9   :  { %s65_s24 = sshll.u32 %s7807_s23, 4  ;;  %s24_s28 = sshll.u32 %s12387_s0, 4  ;;  %s66_s24 = int_to_ptr.vmem [resolvable:$true] %s65_s24  ;;  %s25_s28 = int_to_ptr.hbm [resolvable:$true] %s24_s28 }
   0xa   :  { %71 = dma.hbm_to_vmem [thread:$0]  %s64_s20, 256, %s66_s24, [#allocation9], %s7805_s21, %s7805_s21, %s7806_s22  }
   0xb   :  { %s7808_s29 = smov [#allocation11]   ;;  %s7809_s11 = smov [#allocation2]  }
   0xc   :  { %s91_s30 = sshll.u32 %s7808_s29, 4  ;;  %s26_s5 = sshll.u32 %s7809_s11, 4  ;;  %s92_s30 = int_to_ptr.vmem [resolvable:$true] %s91_s30  ;;  %s27_s5 = int_to_ptr.vmem [resolvable:$true] %s26_s5 }
   0xd   :  { %97 = dma.hbm_to_vmem [thread:$0]  %s90_s1, 512, %s92_s30, [#allocation12], %s7805_s21, %s7805_s21, %s7806_s22  }
   0xe   :  { %s50_s14 = sshll.u32 %s12389_s2, 4  ;;  %s76_s16 = sshll.u32 %s12391_s4, 4  ;;  %s51_s14 = int_to_ptr.hbm [resolvable:$true] %s50_s14  ;;  %s77_s16 = int_to_ptr.hbm [resolvable:$true] %s76_s16 }
   0xf   :  { %32 = dma.hbm_to_vmem [thread:$0]  %s25_s28, 256, %s27_s5, [#allocation3], %s7805_s21, %s7805_s21, %s7806_s22  }
  0x10   :  { %s7810_s17 = smov [#allocation7]   ;;  %s7811_s19 = smov [#allocation10]  }
  0x11   :  { %s52_s18 = sshll.u32 %s7810_s17, 4  ;;  %s78_s2 = sshll.u32 %s7811_s19, 4  ;;  %s53_s18 = int_to_ptr.vmem [resolvable:$true] %s52_s18  ;;  %s79_s2 = int_to_ptr.vmem [resolvable:$true] %s78_s2 }
  0x12   :  { %58 = dma.hbm_to_vmem [thread:$0]  %s51_s14, 256, %s53_s18, [#allocation6], %s7805_s21, %s7805_s21, %s7806_s22  }
  0x13   :  { %s102_s24 = sshll.u32 %s12393_s6, 4  ;;  %s7812_s4 = smov [#allocation13]   ;;  %s103_s24 = int_to_ptr.hbm [resolvable:$true] %s102_s24 }
  0x14   :  { %84 = dma.hbm_to_vmem [thread:$0]  %s77_s16, 512, %s79_s2, [#allocation9], %s7805_s21, %s7805_s21, %s7806_s22  }
  0x15   :  { %s104_s25 = sshll.u32 %s7812_s4, 4  ;;  %s105_s25 = int_to_ptr.vmem [resolvable:$true] %s104_s25 }
  0x16   :  { %110 = dma.hbm_to_vmem [thread:$0]  %s103_s24, 512, %s105_s25, [#allocation12], %s7805_s21, %s7805_s21, %s7806_s22  }
  0x17   :  { %7794 = dma.done.wait [#allocation3], 256  }
  0x18   :  { %7795 = vsyncadd [#allocation3], 4294967040 }
  0x19   :  { %7796 = dma.done.wait [#allocation6], 512  }
  0x1a   :  { %7797 = vsyncadd [#allocation6], 4294966784 }
  0x1b   :  { %7798 = dma.done.wait [#allocation9], 768  }
  0x1c   :  { %7799 = vsyncadd [#allocation9], 4294966528 }
  0x1d   :  { %7800 = dma.done.wait [#allocation12], 1024  }
  0x1e   :  { %7801 = vsyncadd [#allocation12], 4294966272  ;;  %v263_v0 = vlaneseq  ;;  %v269_v2 = vld [vmem:[#allocation8] sm:$0xff]  ;;  %v270_v9 = vld [vmem:[#allocation8 + $0x8] sm:$0xff]  ;;  %vm155_vm0 = vcmask 261120   ;;  %s7819_s3 = smov 112  }
  0x1f   :  { %v299_v3 = vperm.slane %v269_v2, 4  ;;  %v285_v4 = vperm.slane %v269_v2, 2  ;;  %v271_v5 = vperm.slane %v269_v2, 0  ;;  %v306_v6 = vperm.slane %v269_v2, 5  ;;  %v150_v10 = vld [vmem:[#allocation10 + $0x18] sm:$0xff]  ;;  %v149_v11 = vld [vmem:[#allocation10 + $0x10] sm:$0xff] }
  0x20   :  { %v273_v1 = vshrl.u32 %v263_v0, 7  ;;  %v292_v7 = vperm.slane %v269_v2, 3  ;;  %v278_v8 = vperm.slane %v269_v2, 1  ;;  %v190_v12 = vld [vmem:[#allocation11 + $0x18] sm:$0xff]  ;;  %174 = vmatpush.msra.mxu0 %v150_v10  ;;  %v189_v13 = vld [vmem:[#allocation11 + $0x10] sm:$0xff]  ;;  %v148_v14 = vld [vmem:[#allocation10 + $0x8] sm:$0xff] }
  0x21   :  { %213 = vmatpush.msra.mxu1 %v190_v12  ;;  %v188_v15 = vld [vmem:[#allocation11 + $0x8] sm:$0xff]  ;;  %v327_v16 = vperm.slane %v270_v9, 0  ;;  %v320_v17 = vperm.slane %v269_v2, 7  ;;  %v229_v18 = vld [vmem:[#allocation13 + $0x18] sm:$0xff]  ;;  %v228_v19 = vld [vmem:[#allocation13 + $0x10] sm:$0xff]  ;;  %v313_v20 = vperm.slane %v269_v2, 6 }
  0x22   :  { %7554 = vset.pattern.permute.xlu2 %v273_v1  ;;  %7553 = vset.pattern.permute.xlu1 %v273_v1  ;;  %v147_v21 = vld [vmem:[#allocation10] sm:$0xff]  ;;  %v185_v24 = vld [vmem:[#allocation5] sm:$0xff]  ;;  %v227_v25 = vld [vmem:[#allocation13 + $0x8] sm:$0xff]  ;;  %v348_v28 = vperm.slane %v270_v9, 3  ;;  %v341_v29 = vperm.slane %v270_v9, 2  ;;  %v334_v30 = vperm.slane %v270_v9, 1 }
  0x23   :  { %7552 = vset.pattern.permute.xlu0 %v273_v1  ;;  %175 = vmatpush.msra.mxu0 %v149_v11  ;;  %v145_v22 = vld [vmem:[#allocation2] sm:$0xff]  ;;  %v146_v31 = vld [vmem:[#allocation2 + $0x8] sm:$0xff]  ;;  %v186_v32 = vld [vmem:[#allocation5 + $0x8] sm:$0xff]  ;;  %v369_v34 = vperm.slane %v270_v9, 6  ;;  %v362_v35 = vperm.slane %v270_v9, 5  ;;  %v355_v36 = vperm.slane %v270_v9, 4 }
  0x24   :  { %214 = vmatpush.msra.mxu1 %v189_v13  ;;  %252 = vmatpush.msra.mxu2 %v229_v18  ;;  %v187_v23 = vld [vmem:[#allocation11] sm:$0xff]  ;;  %v225_v33 = vld [vmem:[#allocation7 + $0x8] sm:$0xff]  ;;  %v376_v37 = vperm.slane %v270_v9, 7  ;;  %v7936_v38 = vand.u32 127, %v263_v0  ;;  %v12419_v62 = vmov 920167782  }
  0x25   :  { %176 = vmatpush.msra.mxu0 %v148_v14  ;;  %v226_v26 = vld [vmem:[#allocation13] sm:$0xff]  ;;  %v12407_v0 = vmov 1326507024   ;;  %v12422_v11 = vmov 2475754826   ;;  %s7820_s27 = smov 120  }
  0x26   :  { %215 = vmatpush.msra.mxu1 %v188_v15  ;;  %253 = vmatpush.msra.mxu2 %v228_v19  ;;  %v224_v27 = vld [vmem:[#allocation7] sm:$0xff]  ;;  %12747 = vst [vmem:[#allocation20_spill] sm:$0xff] %v7936_v38  ;;  %v265_v39 = vcvt.s32.f32 %v7936_v38  ;;  %v12411_v15 = vmov 683565275   ;;  %v12783_v38 = vmov 2131351028  }
  0x27   :  { %177 = vmatpush.msra.mxu0 %v147_v21  ;;  %s7823_s29 = smov 12   ;;  %s7824_s30 = smov 16  }
  0x28   :  { %7399 = vmatmul.msk.f32.vlgmr.msra.gmra.mxu0 %vm155_vm0, %v145_v22  ;;  %216 = vmatpush.msra.mxu1 %v187_v23  ;;  %v266_v40 = vmul.f32 -2.3025851, %v265_v39  ;;  %s7825_s11 = smov 124   ;;  %s7826_s5 = smov 20  }
  0x29   :  { %7401 = vmatmul.msk.f32.vlgmr.msra.gmra.mxu1 %vm155_vm0, %v185_v24  ;;  %254 = vmatpush.msra.mxu2 %v227_v25  ;;  %s7827_s12 = smov 104   ;;  %s7828_s13 = smov 28  }
  0x2a   :  { %304 = vperm.xlu2 %7554, %v299_v3   ;;  %290 = vperm.xlu1 %7553, %v285_v4   ;;  %v267_v41 = vmul.f32 1.442695, %v266_v40  ;;  %v12405_v4 = vmov 2131351028   ;;  %s7829_s14 = smov 24   ;;  %s7830_s0 = smov [#allocation14]  }
  0x2b   :  { %276 = vperm.xlu0 %7552, %v271_v5   ;;  %255 = vmatpush.msra.mxu2 %v226_v26  ;;  %s7381_s15 = sshll.u32 %s7830_s0, 4  ;;  %s7383_s18 = sshll.u32 %s12397_s10, 4  ;;  %s7382_s15 = int_to_ptr.vmem [resolvable:$true] %s7381_s15  ;;  %s7384_s18 = int_to_ptr.hbm [resolvable:$true] %s7383_s18 }
  0x2c   :  { %7403 = vmatmul.msk.f32.vlgmr.msra.gmra.mxu2 %vm155_vm0, %v224_v27  ;;  %7568 = vpow2.f32 %v267_v41 }
  0x30   :  { %7400 = vmatmul.msk.f32.gmra.mxu0 %vm155_vm0, %v146_v31 }
  0x31   :  { %7402 = vmatmul.msk.f32.gmra.mxu1 %vm155_vm0, %v186_v32 }
  0x32   :  { %311 = vperm.xlu2 %7554, %v306_v6   ;;  %297 = vperm.xlu1 %7553, %v292_v7   ;;  %v7939_v42 = vpop.eup %7568  ;;  %v12417_v6 = vmov 2102212464  }
  0x33   :  { %283 = vperm.xlu0 %7552, %v278_v8  }
  0x34   :  { %7404 = vmatmul.msk.f32.gmra.mxu2 %vm155_vm0, %v225_v33 }
  0x3a   :  { %332 = vperm.xlu2 %7554, %v327_v16   ;;  %325 = vperm.xlu1 %7553, %v320_v17  }
  0x3b   :  { %318 = vperm.xlu0 %7552, %v313_v20  }
  0x42   :  { %353 = vperm.xlu2 %7554, %v348_v28   ;;  %346 = vperm.xlu1 %7553, %v341_v29  }
  0x43   :  { %339 = vperm.xlu0 %7552, %v334_v30  }
  0x4a   :  { %374 = vperm.xlu2 %7554, %v369_v34   ;;  %367 = vperm.xlu1 %7553, %v362_v35  }
  0x4b   :  { %360 = vperm.xlu0 %7552, %v355_v36  }
  0x53   :  { %381 = vperm.xlu0 %7552, %v376_v37  }
  0x84   :  { %v305_v43 = vpop.permute.xlu2 %304 }
  0x85   :  { %v7942_v44 = vmul.f32 %v7939_v42, %v305_v43 }
  0x87   :  { %12748 = vst [vmem:[#allocation21_spill] sm:$0xff] %v7942_v44  ;;  %v1022_v45 = vand.u32 2139095040, %v7942_v44  ;;  %v12399_v59 = vand.u32 2147483647, %v7942_v44 }
  0x89   :  { %v1023_v46 = vshrl.u32 %v1022_v45, 23  ;;  %v1026_v2 = vand.u32 8388607, %v12399_v59 }
  0x8b   :  { %v7417_v47 = vadd.s32 4294967169, %v1023_v46  ;;  %v1027_v19 = vor.u32 8388608, %v1026_v2 }
  0x8c   :  { %v312_v48 = vpop.permute.xlu2 %311 }
  0x8d   :  { %v1029_v49 = vadd.s32 1, %v7417_v47  ;;  %v7946_v50 = vmul.f32 %v7939_v42, %v312_v48  ;;  %v7972_v32 = vshll.u32 %v1027_v19, 8 }
  0x8f   :  { %12749 = vst [vmem:[#allocation22_spill] sm:$0xff] %v7946_v50  ;;  %vm1030_vm1 = vcmp.gt.s32.totalorder %v1029_v49, 0  ;;  %v1177_v51 = vand.u32 2139095040, %v7946_v50  ;;  %v12400_v10 = vand.u32 2147483647, %v7946_v50 }
  0x90   :  { %v1031_v52 = vsel %vm1030_vm1, %v1029_v49, 0  ;;  %12751 = vst [vmem:[#allocation24_spill] sm:$0xff] %v7972_v32  ;;  %v7991_v49 = vand.u32 65535, %v7972_v32 }
  0x91   :  { %v1178_v53 = vshrl.u32 %v1177_v51, 23  ;;  %v1033_v54 = vand.u32 31, %v1031_v52  ;;  %v1032_v3 = vshrl.u32 %v1031_v52, 5  ;;  %v1181_v24 = vand.u32 8388607, %v12400_v10 }
  0x92   :  { %12755 = vst [vmem:[#allocation28_spill] sm:$0xff] %v7991_v49  ;;  %v7994_v51 = vshrl.u32 %v7972_v32, 16 }
  0x93   :  { %v7420_v56 = vadd.s32 4294967169, %v1178_v53  ;;  %v1034_v58 = vsub.s32 32, %v1033_v54  ;;  %v1048_v63 = vshll.u32 %v12419_v62, %v1033_v54  ;;  %v1042_v5 = vshll.u32 %v12405_v4, %v1033_v54 }
  0x94   :  { %v333_v55 = vpop.permute.xlu2 %332  ;;  %v1045_v8 = vshll.u32 %v12417_v6, %v1033_v54  ;;  %v1039_v12 = vshll.u32 %v12422_v11, %v1033_v54  ;;  %v1036_v16 = vshll.u32 %v12411_v15, %v1033_v54  ;;  %vm1054_vm3 = vcmp.lt.s32.totalorder %v1032_v3, 4  ;;  %12756 = vst [vmem:[#allocation29_spill] sm:$0xff] %v7994_v51 }
  0x95   :  { %v7950_v57 = vmul.f32 %v7939_v42, %v333_v55  ;;  %v1184_v60 = vadd.s32 1, %v7420_v56  ;;  %v1049_v1 = vshrl.u32 %v12407_v0, %v1034_v58  ;;  %v1043_v7 = vshrl.u32 %v12417_v6, %v1034_v58 }
  0x96   :  { %v1046_v9 = vshrl.u32 %v12419_v62, %v1034_v58  ;;  %v1040_v13 = vshrl.u32 %v12405_v4, %v1034_v58  ;;  %v1037_v17 = vshrl.u32 %v12422_v11, %v1034_v58  ;;  %v1035_v22 = vshrl.u32 %v12411_v15, %v1034_v58 }
  0x97   :  { %12750 = vst [vmem:[#allocation23_spill] sm:$0xff] %v7950_v57  ;;  %v1642_v61 = vand.u32 2139095040, %v7950_v57  ;;  %vm1185_vm2 = vcmp.gt.s32.totalorder %v1184_v60, 0  ;;  %v1050_v18 = vor.u32 %v1049_v1, %v1048_v63  ;;  %v1044_v20 = vor.u32 %v1043_v7, %v1042_v5 }
  0x98   :  { %v1186_v21 = vsel %vm1185_vm2, %v1184_v60, 0  ;;  %v1047_v23 = vor.u32 %v1046_v9, %v1045_v8  ;;  %v1041_v25 = vor.u32 %v1040_v13, %v1039_v12  ;;  %vm1051_vm4 = vcmp.lt.s32.totalorder %v1032_v3, 1 }
  0x99   :  { %v1643_v14 = vshrl.u32 %v1642_v61, 23  ;;  %v1056_v26 = vsel %vm1054_vm3, %v1044_v20, 2102212464  ;;  %v1038_v28 = vor.u32 %v1037_v17, %v1036_v16  ;;  %vm1053_vm5 = vcmp.lt.s32.totalorder %v1032_v3, 3 }
  0x9a   :  { %v1064_v29 = vsel %vm1054_vm3, %v1050_v18, 1326507024  ;;  %v1188_v30 = vand.u32 31, %v1186_v21  ;;  %vm1052_vm6 = vcmp.lt.s32.totalorder %v1032_v3, 2  ;;  %v1057_v34 = vsel %vm1053_vm5, %v1041_v25, %v1056_v26 }
  0x9b   :  { %v7429_v27 = vadd.s32 4294967169, %v1643_v14  ;;  %v1055_v33 = vsel %vm1051_vm4, %v1035_v22, %v1038_v28  ;;  %v1060_v35 = vsel %vm1054_vm3, %v1047_v23, 920167782  ;;  %v1182_v36 = vor.u32 8388608, %v1181_v24 }
  0x9c   :  { %v354_v31 = vpop.permute.xlu2 %353  ;;  %v1063_v37 = vsel %vm1051_vm4, %v1041_v25, %v1044_v20  ;;  %v1065_v39 = vsel %vm1053_vm5, %v1047_v23, %v1064_v29  ;;  %v1189_v43 = vsub.s32 32, %v1188_v30  ;;  %v7983_v45 = vsel %vm1052_vm6, %v1055_v33, %v1057_v34 }
  0x9d   :  { %v1649_v40 = vadd.s32 1, %v7429_v27  ;;  %v7980_v41 = vmul.f32 %v7939_v42, %v354_v31  ;;  %12753 = vst [vmem:[#allocation26_spill] sm:$0xff] %v7983_v45  ;;  %v1059_v46 = vsel %vm1051_vm4, %v1038_v28, %v1041_v25  ;;  %v1061_v47 = vsel %vm1053_vm5, %v1044_v20, %v1060_v35 }
  0x9e   :  { %v7988_v48 = vsel %vm1052_vm6, %v1063_v37, %v1065_v39  ;;  %v7996_v52 = vshll.u32 %v1182_v36, 8  ;;  %v8000_v54 = vsel %vm1052_vm6, %v1059_v46, %v1061_v47  ;;  %v1200_v56 = vshll.u32 %v12417_v6, %v1188_v30 }
  0x9f   :  { %12752 = vst [vmem:[#allocation25_spill] sm:$0xff] %v7980_v41  ;;  %vm1650_vm7 = vcmp.gt.s32.totalorder %v1649_v40, 0  ;;  %v2107_v53 = vand.u32 2139095040, %v7980_v41  ;;  %v1201_v58 = vshrl.u32 %v12419_v62, %v1189_v43  ;;  %v1071_v60 = vshrl.u32 %v7988_v48, 16 }
  0xa0   :  { %12754 = vst [vmem:[#allocation27_spill] sm:$0xff] %v7988_v48  ;;  %v1187_v61 = vshrl.u32 %v1186_v21, 5  ;;  %v1203_v63 = vshll.u32 %v12419_v62, %v1188_v30  ;;  %v1204_v1 = vshrl.u32 %v12407_v0, %v1189_v43  ;;  %v1191_v2 = vshll.u32 %v12411_v15, %v1188_v30 }
  0xa1   :  { %12757 = vst [vmem:[#allocation30_spill] sm:$0xff] %v7996_v52  ;;  %v1197_v3 = vshll.u32 %v12405_v4, %v1188_v30  ;;  %v1198_v5 = vshrl.u32 %v12417_v6, %v1189_v43  ;;  %v1651_v7 = vsel %vm1650_vm7, %v1649_v40, 0  ;;  %v1192_v8 = vshrl.u32 %v12422_v11, %v1189_v43 }
  0xa2   :  { %12758 = vst [vmem:[#allocation31_spill] sm:$0xff] %v8000_v54  ;;  %v1194_v9 = vshll.u32 %v12422_v11, %v1188_v30  ;;  %v1195_v12 = vshrl.u32 %v12405_v4, %v1189_v43  ;;  %v2108_v13 = vshrl.u32 %v2107_v53, 23  ;;  %v12401_v14 = vand.u32 65535, %v7988_v48  ;;  %v291_v30 = vpop.permute.xlu1 %290 }
  0xa3   :  { %v1093_v17 = vshrl.u32 %v8000_v54, 16  ;;  %v1202_v18 = vor.u32 %v1201_v58, %v1200_v56  ;;  %v8019_v19 = vmul.u32 %v1071_v60, %v7991_v49  ;;  %v1205_v20 = vor.u32 %v1204_v1, %v1203_v63 }
  0xa4   :  { %vm1209_vm8 = vcmp.lt.s32.totalorder %v1187_v61, 4  ;;  %v1653_v21 = vand.u32 31, %v1651_v7  ;;  %v1190_v22 = vshrl.u32 %v12411_v15, %v1189_v43  ;;  %v1199_v23 = vor.u32 %v1198_v5, %v1197_v3 }
  0xa5   :  { %12759 = vst [vmem:[#allocation32_spill] sm:$0xff] %v8019_v19  ;;  %v8023_v24 = vand.u32 65535, %v7996_v52  ;;  %v8026_v25 = vshrl.u32 %v7996_v52, 16  ;;  %v1193_v26 = vor.u32 %v1192_v8, %v1191_v2  ;;  %v1196_v27 = vor.u32 %v1195_v12, %v1194_v9 }
  0xa6   :  { %v12398_v28 = vand.u32 2147483647, %v7950_v57  ;;  %v7438_v29 = vadd.s32 4294967169, %v2108_v13  ;;  %vm1206_vm9 = vcmp.lt.s32.totalorder %v1187_v61, 1  ;;  %vm1208_vm10 = vcmp.lt.s32.totalorder %v1187_v61, 3 }
  0xa7   :  { %12760 = vst [vmem:[#allocation33_spill] sm:$0xff] %v8023_v24  ;;  %v1211_v31 = vsel %vm1209_vm8, %v1199_v23, 2102212464  ;;  %v1215_v33 = vsel %vm1209_vm8, %v1202_v18, 920167782  ;;  %v8034_v34 = vmul.u32 %v12401_v14, %v7991_v49  ;;  %v12402_v35 = vshll.u32 %v8019_v19, 16 }
  0xa8   :  { %12761 = vst [vmem:[#allocation34_spill] sm:$0xff] %v8026_v25  ;;  %v1219_v36 = vsel %vm1209_vm8, %v1205_v20, 1326507024  ;;  %v1654_v37 = vsub.s32 32, %v1653_v21  ;;  %v8039_v39 = vmul.u32 %v1071_v60, %v7994_v51  ;;  %vm1207_vm11 = vcmp.lt.s32.totalorder %v1187_v61, 2 }
  0xa9   :  { %12762 = vst [vmem:[#allocation35_spill] sm:$0xff] %v8034_v34  ;;  %v1210_v40 = vsel %vm1206_vm9, %v1190_v22, %v1193_v26  ;;  %v8043_v43 = vmul.f32 %v7939_v42, %v291_v30  ;;  %v1212_v46 = vsel %vm1208_vm10, %v1196_v27, %v1211_v31  ;;  %v1214_v47 = vsel %vm1206_vm9, %v1193_v26, %v1196_v27 }
  0xaa   :  { %12763 = vst [vmem:[#allocation36_spill] sm:$0xff] %v8039_v39  ;;  %v1216_v53 = vsel %vm1208_vm10, %v1199_v23, %v1215_v33  ;;  %v2114_v56 = vadd.s32 1, %v7438_v29  ;;  %v8049_v58 = vmul.u32 %v1093_v17, %v7991_v49  ;;  %v8052_v63 = vmul.u32 %v1093_v17, %v7994_v51 }
  0xab   :  { %12764 = vst [vmem:[#allocation37_spill] sm:$0xff] %v8043_v43  ;;  %v1218_v60 = vsel %vm1206_vm9, %v1196_v27, %v1199_v23  ;;  %v1220_v1 = vsel %vm1208_vm10, %v1202_v18, %v1219_v36  ;;  %v8059_v2 = vadd.s32 %v12402_v35, %v8034_v34  ;;  %v1646_v3 = vand.u32 8388607, %v12398_v28 }
  0xac   :  { %12765 = vst [vmem:[#allocation38_spill] sm:$0xff] %v8049_v58  ;;  %v1668_v5 = vshll.u32 %v12419_v62, %v1653_v21  ;;  %v1669_v8 = vshrl.u32 %v12407_v0, %v1654_v37  ;;  %v8066_v9 = vsel %vm1207_vm11, %v1210_v40, %v1212_v46  ;;  %v8069_v12 = vsel %vm1207_vm11, %v1214_v47, %v1216_v53 }
  0xad   :  { %12766 = vst [vmem:[#allocation39_spill] sm:$0xff] %v8052_v63  ;;  %v8071_v13 = vshrl.u32 %v1651_v7, 5  ;;  %v712_v17 = vand.u32 2139095040, %v8043_v43  ;;  %v8075_v18 = vsel %vm1207_vm11, %v1218_v60, %v1220_v1  ;;  %v1659_v20 = vshll.u32 %v12422_v11, %v1653_v21  ;;  %v277_v1 = vpop.permute.xlu0 %276 }
  0xae   :  { %12767 = vst [vmem:[#allocation40_spill] sm:$0xff] %v8059_v2  ;;  %v1662_v22 = vshll.u32 %v12405_v4, %v1653_v21  ;;  %vm2115_vm12 = vcmp.gt.s32.totalorder %v2114_v56, 0  ;;  %v1660_v23 = vshrl.u32 %v12405_v4, %v1654_v37  ;;  %v1663_v26 = vshrl.u32 %v12417_v6, %v1654_v37 }
  0xaf   :  { %12768 = vst [vmem:[#allocation41_spill] sm:$0xff] %v8066_v9  ;;  %v1665_v27 = vshll.u32 %v12417_v6, %v1653_v21  ;;  %v1666_v29 = vshrl.u32 %v12419_v62, %v1654_v37  ;;  %v12403_v7 = vand.u32 65535, %v8075_v18  ;;  %v1647_v30 = vor.u32 8388608, %v1646_v3 }
  0xb0   :  { %12769 = vst [vmem:[#allocation42_spill] sm:$0xff] %v8069_v12  ;;  %v1670_v31 = vor.u32 %v1669_v8, %v1668_v5  ;;  %v1226_v33 = vshrl.u32 %v8075_v18, 16  ;;  %vm1674_vm13 = vcmp.lt.s32.totalorder %v8071_v13, 4  ;;  %v2116_v36 = vsel %vm2115_vm12, %v2114_v56, 0 }
  0xb1   :  { %12770 = vst [vmem:[#allocation43_spill] sm:$0xff] %v8075_v18  ;;  %v713_v40 = vshrl.u32 %v712_v17, 23  ;;  %v1248_v47 = vshrl.u32 %v8069_v12, 16  ;;  %v1656_v53 = vshll.u32 %v12411_v15, %v1653_v21  ;;  %v1657_v60 = vshrl.u32 %v12422_v11, %v1654_v37 }
  0xb2   :  { %v1655_v28 = vshrl.u32 %v12411_v15, %v1654_v37  ;;  %v1661_v59 = vor.u32 %v1660_v23, %v1659_v20  ;;  %v1664_v3 = vor.u32 %v1663_v26, %v1662_v22  ;;  %v1667_v5 = vor.u32 %v1666_v29, %v1665_v27 }
  0xb3   :  { %vm1671_vm14 = vcmp.lt.s32.totalorder %v8071_v13, 1  ;;  %vm1673_vm15 = vcmp.lt.s32.totalorder %v8071_v13, 3  ;;  %v1684_v56 = vsel %vm1674_vm13, %v1670_v31, 1326507024  ;;  %v2118_v8 = vand.u32 31, %v2116_v36 }
  0xb4   :  { %v1676_v17 = vsel %vm1674_vm13, %v1664_v3, 2102212464  ;;  %v8099_v21 = vshll.u32 %v1647_v30, 8  ;;  %v7411_v55 = vadd.s32 4294967169, %v713_v40  ;;  %v8102_v16 = vmul.f32 %v7939_v42, %v277_v1 }
  0xb5   :  { %v8107_v37 = vmul.u32 %v12403_v7, %v8023_v24  ;;  %v8110_v20 = vmul.u32 %v1226_v33, %v8023_v24  ;;  %v1658_v22 = vor.u32 %v1657_v60, %v1656_v53  ;;  %v12404_v23 = vand.u32 2147483647, %v7980_v41  ;;  %v284_v54 = vpop.permute.xlu0 %283 }
  0xb6   :  { %12771 = vst [vmem:[#allocation44_spill] sm:$0xff] %v8099_v21  ;;  %v8114_v26 = vmul.u32 %v1226_v33, %v8026_v25  ;;  %vm1672_vm0 = vcmp.lt.s32.totalorder %v8071_v13, 2  ;;  %v1683_v27 = vsel %vm1671_vm14, %v1661_v59, %v1664_v3  ;;  %v1685_v29 = vsel %vm1673_vm15, %v1667_v5, %v1684_v56 }
  0xb7   :  { %12772 = vst [vmem:[#allocation45_spill] sm:$0xff] %v8102_v16  ;;  %v1675_v30 = vsel %vm1671_vm14, %v1655_v28, %v1658_v22  ;;  %v1677_v31 = vsel %vm1673_vm15, %v1661_v59, %v1676_v17  ;;  %v1680_v40 = vsel %vm1674_vm13, %v1667_v5, 920167782  ;;  %v2119_v53 = vsub.s32 32, %v2118_v8 }
  0xb8   :  { %12773 = vst [vmem:[#allocation46_spill] sm:$0xff] %v8107_v37  ;;  %v8128_v33 = vmul.u32 %v1248_v47, %v8023_v24  ;;  %v8131_v60 = vmul.u32 %v1248_v47, %v8026_v25  ;;  %v719_v1 = vadd.s32 1, %v7411_v55  ;;  %v402_v10 = vand.u32 2139095040, %v8102_v16 }
  0xb9   :  { %12774 = vst [vmem:[#allocation47_spill] sm:$0xff] %v8110_v20  ;;  %v12421_v56 = vshll.u32 %v8110_v20, 16  ;;  %v8137_v28 = vsel %vm1672_vm0, %v1683_v27, %v1685_v29  ;;  %v8140_v17 = vand.u32 65535, %v8099_v21  ;;  %v8143_v5 = vshrl.u32 %v8099_v21, 16 }
  0xba   :  { %12775 = vst [vmem:[#allocation48_spill] sm:$0xff] %v8114_v26  ;;  %v8147_v14 = vsel %vm1672_vm0, %v1675_v30, %v1677_v31  ;;  %v1679_v55 = vsel %vm1671_vm14, %v1658_v22, %v1661_v59  ;;  %v1681_v47 = vsel %vm1673_vm15, %v1664_v3, %v1680_v40  ;;  %v2111_v27 = vand.u32 8388607, %v12404_v23 }
  0xbb   :  { %12776 = vst [vmem:[#allocation49_spill] sm:$0xff] %v8128_v33  ;;  %v2127_v29 = vshll.u32 %v12405_v4, %v2118_v8  ;;  %v2128_v35 = vshrl.u32 %v12417_v6, %v2119_v53  ;;  %v2133_v61 = vshll.u32 %v12419_v62, %v2118_v8  ;;  %v2134_v46 = vshrl.u32 %v12407_v0, %v2119_v53 }
  0xbc   :  { %12777 = vst [vmem:[#allocation50_spill] sm:$0xff] %v8131_v60  ;;  %v1691_v30 = vshrl.u32 %v8137_v28, 16  ;;  %v2117_v31 = vshrl.u32 %v2116_v36, 5  ;;  %vm720_vm1 = vcmp.gt.s32.totalorder %v719_v1, 0  ;;  %v403_v7 = vshrl.u32 %v402_v10, 23 }
  0xbd   :  { %12778 = vst [vmem:[#allocation51_spill] sm:$0xff] %v8137_v28  ;;  %v2121_v59 = vshll.u32 %v12411_v15, %v2118_v8  ;;  %v2122_v3 = vshrl.u32 %v12422_v11, %v2119_v53  ;;  %v2130_v22 = vshll.u32 %v12417_v6, %v2118_v8  ;;  %v2131_v40 = vshrl.u32 %v12419_v62, %v2119_v53 }
  0xbe   :  { %12779 = vst [vmem:[#allocation52_spill] sm:$0xff] %v8140_v17  ;;  %v8167_v23 = vadd.s32 %v12421_v56, %v8107_v37  ;;  %v2112_v4 = vor.u32 8388608, %v2111_v27  ;;  %v2124_v0 = vshll.u32 %v12422_v11, %v2118_v8  ;;  %v2125_v36 = vshrl.u32 %v12783_v38, %v2119_v53 }
  0xbf   :  { %12780 = vst [vmem:[#allocation53_spill] sm:$0xff] %v8143_v5  ;;  %v8173_v10 = vsel %vm1672_vm0, %v1679_v55, %v1681_v47  ;;  %v2129_v15 = vor.u32 %v2128_v35, %v2127_v29  ;;  %v2135_v41 = vor.u32 %v2134_v46, %v2133_v61  ;;  %v721_v57 = vsel %vm720_vm1, %v719_v1, 0 }
  0xc0   :  { %12781 = vst [vmem:[#allocation54_spill] sm:$0xff] %v8147_v14  ;;  %v12427_v6 = vand.u32 65535, %v8137_v28  ;;  %vm2139_vm2 = vcmp.lt.s32.totalorder %v2117_v31, 4  ;;  %v7405_v56 = vadd.s32 4294967169, %v403_v7  ;;  %v8179_v27 = vmul.u32 %v1691_v30, %v8140_v17 }
  0xc1   :  { %12782 = vst [vmem:[#allocation55_spill] sm:$0xff] %v8167_v23  ;;  %v12786_v8 = vmov 683565275   ;;  %v2123_v44 = vor.u32 %v2122_v3, %v2121_v59  ;;  %v2132_v45 = vor.u32 %v2131_v40, %v2130_v22  ;;  %v2126_v13 = vor.u32 %v2125_v36, %v2124_v0 }
  0xc2   :  { %12784 = vst [vmem:[#allocation56_spill] sm:$0xff] %v8173_v10  ;;  %v2120_v11 = vshrl.u32 %v12786_v8, %v2119_v53  ;;  %vm2136_vm3 = vcmp.lt.s32.totalorder %v2117_v31, 1  ;;  %v12428_v35 = vand.u32 2147483647, %v8043_v43  ;;  %v723_v61 = vand.u32 31, %v721_v57  ;;  %v375_v53 = vpop.permute.xlu2 %374 }
  0xc3   :  { %12785 = vst [vmem:[#allocation57_spill] sm:$0xff] %v8179_v27  ;;  %v1713_v46 = vshrl.u32 %v8173_v10, 16  ;;  %vm2138_vm4 = vcmp.lt.s32.totalorder %v2117_v31, 3  ;;  %v2141_v1 = vsel %vm2139_vm2, %v2129_v15, 2102212464  ;;  %v8189_v7 = vmul.u32 %v12427_v6, %v8140_v17 }
  0xc4   :  { %v2149_v55 = vsel %vm2139_vm2, %v2135_v41, 1326507024  ;;  %v8192_v47 = vshll.u32 %v2112_v4, 8  ;;  %v409_v0 = vadd.s32 1, %v7405_v56  ;;  %v12431_v29 = vshll.u32 %v8179_v27, 16 }
  0xc5   :  { %12787 = vst [vmem:[#allocation58_spill] sm:$0xff] %v8189_v7  ;;  %vm2137_vm5 = vcmp.lt.s32.totalorder %v2117_v31, 2  ;;  %v2140_v59 = vsel %vm2136_vm3, %v2120_v11, %v2123_v44  ;;  %v2145_v3 = vsel %vm2139_vm2, %v2132_v45, 920167782  ;;  %v2142_v22 = vsel %vm2138_vm4, %v2126_v13, %v2141_v1 }
  0xc6   :  { %12788 = vst [vmem:[#allocation59_spill] sm:$0xff] %v8192_v47  ;;  %v2148_v41 = vsel %vm2136_vm3, %v2126_v13, %v2129_v15  ;;  %v2150_v40 = vsel %vm2138_vm4, %v2132_v45, %v2149_v55  ;;  %v724_v36 = vsub.s32 32, %v723_v61  ;;  %v8201_v62 = vmul.u32 %v1691_v30, %v8143_v5 }
  0xc7   :  { %v8204_v4 = vmul.u32 %v1713_v46, %v8140_v17  ;;  %v8207_v56 = vmul.u32 %v1713_v46, %v8143_v5  ;;  %v716_v11 = vand.u32 8388607, %v12428_v35  ;;  %v2144_v1 = vsel %vm2136_vm3, %v2123_v44, %v2126_v13 }
  0xc8   :  { %12789 = vst [vmem:[#allocation60_spill] sm:$0xff] %v8201_v62  ;;  %v2146_v6 = vsel %vm2138_vm4, %v2129_v15, %v2145_v3  ;;  %v8214_v45 = vand.u32 65535, %v8192_v47  ;;  %vm410_vm6 = vcmp.gt.s32.totalorder %v409_v0, 0  ;;  %v8217_v30 = vsel %vm2137_vm5, %v2140_v59, %v2142_v22 }
  0xc9   :  { %12790 = vst [vmem:[#allocation61_spill] sm:$0xff] %v8204_v4  ;;  %v8220_v55 = vsel %vm2137_vm5, %v2148_v41, %v2150_v40  ;;  %v8223_v46 = vshrl.u32 %v8192_v47, 16  ;;  %v8229_v44 = vadd.s32 %v12431_v29, %v8189_v7  ;;  %v12797_v15 = vmov 920167782  }
  0xca   :  { %12791 = vst [vmem:[#allocation62_spill] sm:$0xff] %v8207_v56  ;;  %v738_v13 = vshll.u32 %v12797_v15, %v723_v61  ;;  %v12798_v3 = vmov 1326507024   ;;  %v8234_v59 = vmul.f32 %v7939_v42, %v375_v53  ;;  %v8237_v22 = vsel %vm2137_vm5, %v2144_v1, %v2146_v6 }
  0xcb   :  { %12792 = vst [vmem:[#allocation63_spill] sm:$0xff] %v8214_v45  ;;  %v739_v14 = vshrl.u32 %v12798_v3, %v724_v36  ;;  %v717_v41 = vor.u32 8388608, %v716_v11  ;;  %v8239_v40 = vshrl.u32 %v721_v57, 5  ;;  %v411_v21 = vsel %vm410_vm6, %v409_v0, 0 }
  0xcc   :  { %12793 = vst [vmem:[#allocation64_spill] sm:$0xff] %v8217_v30  ;;  %v2156_v35 = vshrl.u32 %v8220_v55, 16  ;;  %v732_v56 = vshll.u32 %v12783_v38, %v723_v61  ;;  %v12801_v4 = vmov 2102212464   ;;  %v12802_v17 = vmov 2475754826  }
  0xcd   :  { %12794 = vst [vmem:[#allocation65_spill] sm:$0xff] %v8220_v55  ;;  %v733_v10 = vshrl.u32 %v12801_v4, %v724_v36  ;;  %v729_v32 = vshll.u32 %v12802_v17, %v723_v61  ;;  %v730_v53 = vshrl.u32 %v12783_v38, %v724_v36  ;;  %v735_v6 = vshll.u32 %v12801_v4, %v723_v61 }
  0xce   :  { %12795 = vst [vmem:[#allocation66_spill] sm:$0xff] %v8223_v46  ;;  %v736_v31 = vshrl.u32 %v12797_v15, %v724_v36  ;;  %v740_v0 = vor.u32 %v739_v14, %v738_v13  ;;  %v413_v11 = vand.u32 31, %v411_v21  ;;  %v2572_v1 = vand.u32 2139095040, %v8234_v59 }
  0xcf   :  { %12796 = vst [vmem:[#allocation67_spill] sm:$0xff] %v8229_v44  ;;  %v726_v30 = vshll.u32 %v12786_v8, %v723_v61  ;;  %v727_v47 = vshrl.u32 %v12802_v17, %v724_v36  ;;  %vm744_vm7 = vcmp.lt.s32.totalorder %v8239_v40, 4  ;;  %v2178_v62 = vshrl.u32 %v8237_v22, 16 }
  0xd0   :  { %12799 = vst [vmem:[#allocation68_spill] sm:$0xff] %v8234_v59  ;;  %v734_v44 = vor.u32 %v733_v10, %v732_v56  ;;  %v8257_v28 = vshll.u32 %v717_v41, 8  ;;  %v2573_v5 = vshrl.u32 %v2572_v1, 23  ;;  %v8260_v57 = vmul.u32 %v2156_v35, %v8214_v45  ;;  %v298_v56 = vpop.permute.xlu1 %297 }
  0xd1   :  { %12800 = vst [vmem:[#allocation69_spill] sm:$0xff] %v8237_v22  ;;  %v731_v14 = vor.u32 %v730_v53, %v729_v32  ;;  %v737_v13 = vor.u32 %v736_v31, %v735_v6  ;;  %v12805_v63 = vand.u32 2147483647, %v8102_v16  ;;  %vm741_vm8 = vcmp.lt.s32.totalorder %v8239_v40, 1 }
  0xd2   :  { %12803 = vst [vmem:[#allocation70_spill] sm:$0xff] %v8257_v28  ;;  %vm743_vm9 = vcmp.lt.s32.totalorder %v8239_v40, 3  ;;  %v754_v61 = vsel %vm744_vm7, %v740_v0, 1326507024  ;;  %v414_v10 = vsub.s32 32, %v413_v11  ;;  %v12806_v41 = vand.u32 65535, %v8220_v55 }
  0xd3   :  { %12804 = vst [vmem:[#allocation71_spill] sm:$0xff] %v8260_v57  ;;  %v8264_v29 = vand.u32 8388607, %v12805_v63  ;;  %v8276_v32 = vmul.u32 %v2156_v35, %v8223_v46  ;;  %v725_v63 = vshrl.u32 %v12786_v8, %v724_v36  ;;  %v728_v53 = vor.u32 %v727_v47, %v726_v30 }
  0xd4   :  { %v8273_v1 = vmul.u32 %v12806_v41, %v8214_v45  ;;  %v8280_v6 = vmul.u32 %v2178_v62, %v8214_v45  ;;  %v8283_v31 = vmul.u32 %v2178_v62, %v8223_v46  ;;  %v746_v0 = vsel %vm744_vm7, %v734_v44, 2102212464 }
  0xd5   :  { %12808 = vst [vmem:[#allocation73_spill] sm:$0xff] %v8276_v32  ;;  %v7447_v22 = vadd.s32 4294967169, %v2573_v5  ;;  %vm742_vm10 = vcmp.lt.s32.totalorder %v8239_v40, 2  ;;  %v753_v41 = vsel %vm741_vm8, %v731_v14, %v734_v44  ;;  %v755_v35 = vsel %vm743_vm9, %v737_v13, %v754_v61 }
  0xd6   :  { %12807 = vst [vmem:[#allocation72_spill] sm:$0xff] %v8273_v1  ;;  %v8293_v47 = vmul.f32 %v7939_v42, %v298_v56  ;;  %v8297_v62 = vand.u32 65535, %v8257_v28  ;;  %v8300_v30 = vshrl.u32 %v8257_v28, 16  ;;  %v429_v5 = vshrl.u32 %v12798_v3, %v414_v10 }
  0xd7   :  { %12809 = vst [vmem:[#allocation74_spill] sm:$0xff] %v8280_v6  ;;  %v747_v45 = vsel %vm743_vm9, %v731_v14, %v746_v0  ;;  %v750_v61 = vsel %vm744_vm7, %v737_v13, 920167782  ;;  %v407_v56 = vor.u32 8388608, %v8264_v29  ;;  %v8312_v36 = vsel %vm742_vm10, %v753_v41, %v755_v35 }
  0xd8   :  { %12810 = vst [vmem:[#allocation75_spill] sm:$0xff] %v8283_v31  ;;  %v745_v31 = vsel %vm741_vm8, %v725_v63, %v728_v53  ;;  %v423_v6 = vshrl.u32 %v12801_v4, %v414_v10  ;;  %v428_v32 = vshll.u32 %v12797_v15, %v413_v11  ;;  %v2579_v55 = vadd.s32 1, %v7447_v22 }
  0xd9   :  { %12811 = vst [vmem:[#allocation76_spill] sm:$0xff] %v8293_v47  ;;  %v8316_v46 = vshrl.u32 %v411_v21, 5  ;;  %v420_v63 = vshrl.u32 %v12783_v38, %v414_v10  ;;  %v426_v0 = vshrl.u32 %v12797_v15, %v414_v10  ;;  %v867_v7 = vand.u32 2139095040, %v8293_v47 }
  0xda   :  { %v8323_v29 = vsel %vm742_vm10, %v745_v31, %v747_v45  ;;  %v749_v13 = vsel %vm741_vm8, %v728_v53, %v731_v14  ;;  %v422_v41 = vshll.u32 %v12783_v38, %v413_v11  ;;  %v430_v35 = vor.u32 %v429_v5, %v428_v32 }
  0xdb   :  { %12812 = vst [vmem:[#allocation77_spill] sm:$0xff] %v8323_v29  ;;  %v751_v21 = vsel %vm743_vm9, %v734_v44, %v750_v61  ;;  %v417_v22 = vshrl.u32 %v12802_v17, %v414_v10  ;;  %v419_v27 = vshll.u32 %v12802_v17, %v413_v11  ;;  %v425_v58 = vshll.u32 %v12801_v4, %v413_v11 }
  0xdc   :  { %v761_v49 = vshrl.u32 %v8312_v36, 16  ;;  %v416_v45 = vshll.u32 %v12786_v8, %v413_v11  ;;  %v424_v31 = vor.u32 %v423_v6, %v422_v41  ;;  %vm2580_vm11 = vcmp.gt.s32.totalorder %v2579_v55, 0 }
  0xdd   :  { %v421_v14 = vor.u32 %v420_v63, %v419_v27  ;;  %v427_v53 = vor.u32 %v426_v0, %v425_v58  ;;  %vm434_vm12 = vcmp.lt.s32.totalorder %v8316_v46, 4  ;;  %v868_v32 = vshrl.u32 %v867_v7, 23 }
  0xde   :  { %v12813_v44 = vshll.u32 %v8260_v57, 16  ;;  %v8343_v61 = vsel %vm742_vm10, %v749_v13, %v751_v21  ;;  %v444_v2 = vsel %vm434_vm12, %v430_v35, 1326507024  ;;  %v8348_v11 = vmul.f32 %v7939_v42, %v284_v54 }
  0xdf   :  { %v12456_v58 = vand.u32 65535, %v8312_v36  ;;  %v418_v7 = vor.u32 %v417_v22, %v416_v45  ;;  %v2581_v6 = vsel %vm2580_vm11, %v2579_v55, 0  ;;  %v8354_v63 = vmul.u32 %v761_v49, %v8297_v62 }
  0xe0   :  { %v8339_v5 = vadd.s32 %v12813_v44, %v8273_v1  ;;  %12815 = vst [vmem:[#allocation79_spill] sm:$0xff] %v8348_v11  ;;  %vm431_vm13 = vcmp.lt.s32.totalorder %v8316_v46, 1  ;;  %vm433_vm14 = vcmp.lt.s32.totalorder %v8316_v46, 3  ;;  %v436_v40 = vsel %vm434_vm12, %v424_v31, 2102212464 }
  0xe1   :  { %v415_v54 = vshrl.u32 %v12786_v8, %v414_v10  ;;  %v443_v0 = vsel %vm431_vm13, %v421_v14, %v424_v31  ;;  %v445_v13 = vsel %vm433_vm14, %v427_v53, %v444_v2  ;;  %v7414_v41 = vadd.s32 4294967169, %v868_v32 }
  0xe2   :  { %12814 = vst [vmem:[#allocation78_spill] sm:$0xff] %v8339_v5  ;;  %v440_v35 = vsel %vm434_vm12, %v427_v53, 920167782  ;;  %v2583_v21 = vand.u32 31, %v2581_v6  ;;  %v557_v22 = vand.u32 2139095040, %v8348_v11  ;;  %v783_v45 = vshrl.u32 %v8343_v61, 16 }
  0xe3   :  { %vm432_vm15 = vcmp.lt.s32.totalorder %v8316_v46, 2  ;;  %v435_v10 = vsel %vm431_vm13, %v415_v54, %v418_v7  ;;  %v437_v44 = vsel %vm433_vm14, %v421_v14, %v436_v40  ;;  %v8380_v53 = vshll.u32 %v407_v56, 8 }
  0xe4   :  { %v8378_v32 = vsel %vm432_vm15, %v443_v0, %v445_v13  ;;  %v8386_v55 = vmul.u32 %v12456_v58, %v8297_v62  ;;  %v439_v54 = vsel %vm431_vm13, %v418_v7, %v421_v14  ;;  %v441_v40 = vsel %vm433_vm14, %v424_v31, %v440_v35 }
  0xe5   :  { %12816 = vst [vmem:[#allocation80_spill] sm:$0xff] %v8380_v53  ;;  %v874_v2 = vadd.s32 1, %v7414_v41  ;;  %v8394_v0 = vsel %vm432_vm15, %v435_v10, %v437_v44  ;;  %v2584_v56 = vsub.s32 32, %v2583_v21  ;;  %v558_v27 = vshrl.u32 %v557_v22, 23 }
  0xe6   :  { %12817 = vst [vmem:[#allocation81_spill] sm:$0xff] %v8394_v0  ;;  %v8398_v5 = vmul.u32 %v761_v49, %v8300_v30  ;;  %v8401_v58 = vmul.u32 %v783_v45, %v8297_v62  ;;  %v8404_v14 = vmul.u32 %v783_v45, %v8300_v30  ;;  %v451_v31 = vshrl.u32 %v8378_v32, 16 }
  0xe7   :  { %v12818_v7 = vshll.u32 %v8354_v63, 16  ;;  %v8414_v35 = vsel %vm432_vm15, %v439_v54, %v441_v40  ;;  %v8417_v49 = vand.u32 65535, %v8380_v53  ;;  %v12821_v22 = vand.u32 2147483647, %v8234_v59 }
  0xe8   :  { %12819 = vst [vmem:[#allocation82_spill] sm:$0xff] %v8414_v35  ;;  %v8422_v45 = vshrl.u32 %v8380_v53, 16  ;;  %vm875_vm0 = vcmp.gt.s32.totalorder %v874_v2, 0  ;;  %v2599_v46 = vshrl.u32 %v12798_v3, %v2584_v56  ;;  %v12822_v54 = vand.u32 2147483647, %v8293_v47 }
  0xe9   :  { %v8410_v41 = vadd.s32 %v12818_v7, %v8386_v55  ;;  %12820 = vst [vmem:[#allocation83_spill] sm:$0xff] %v8417_v49  ;;  %v2576_v10 = vand.u32 8388607, %v12821_v22  ;;  %v2598_v7 = vshll.u32 %v12797_v15, %v2583_v21  ;;  %v7408_v1 = vadd.s32 4294967169, %v558_v27 }
  0xea   :  { %v871_v40 = vand.u32 8388607, %v12822_v54  ;;  %v8432_v59 = vmul.u32 %v451_v31, %v8417_v49  ;;  %v473_v57 = vshrl.u32 %v8414_v35, 16  ;;  %v8436_v44 = vshrl.u32 %v2581_v6, 5 }
  0xeb   :  { %v2577_v39 = vor.u32 8388608, %v2576_v10  ;;  %v2592_v13 = vshll.u32 %v12783_v38, %v2583_v21  ;;  %v2593_v48 = vshrl.u32 %v12801_v4, %v2584_v56  ;;  %v876_v51 = vsel %vm875_vm0, %v874_v2, 0 }
  0xec   :  { %v2589_v50 = vshll.u32 %v12802_v17, %v2583_v21  ;;  %v2590_v54 = vshrl.u32 %v12783_v38, %v2584_v56  ;;  %v2595_v27 = vshll.u32 %v12801_v4, %v2583_v21  ;;  %v2596_v47 = vshrl.u32 %v12797_v15, %v2584_v56 }
  0xed   :  { %v12823_v22 = vand.u32 65535, %v8378_v32  ;;  %v2600_v6 = vor.u32 %v2599_v46, %v2598_v7  ;;  %v872_v10 = vor.u32 8388608, %v871_v40  ;;  %v564_v19 = vadd.s32 1, %v7408_v1 }
  0xee   :  { %v2586_v9 = vshll.u32 %v12786_v8, %v2583_v21  ;;  %v2587_v2 = vshrl.u32 %v12802_v17, %v2584_v56  ;;  %vm2604_vm1 = vcmp.lt.s32.totalorder %v8436_v44, 4  ;;  %v878_v52 = vand.u32 31, %v876_v51 }
  0xef   :  { %v8447_v34 = vmul.u32 %v12823_v22, %v8417_v49  ;;  %v8453_v60 = vmul.u32 %v451_v31, %v8422_v45  ;;  %v12479_v16 = vshll.u32 %v8432_v59, 16  ;;  %v2594_v43 = vor.u32 %v2593_v48, %v2592_v13 }
  0xf0   :  { %v8458_v22 = vmul.u32 %v473_v57, %v8417_v49  ;;  %v2591_v7 = vor.u32 %v2590_v54, %v2589_v50  ;;  %v2597_v1 = vor.u32 %v2596_v47, %v2595_v27  ;;  %v8460_v46 = vshll.u32 %v2577_v39, 8 }
  0xf1   :  { %vm2601_vm2 = vcmp.lt.s32.totalorder %v8436_v44, 1  ;;  %v2614_v21 = vsel %vm2604_vm1, %v2600_v6, 1326507024  ;;  %v8465_v40 = vshll.u32 %v872_v10, 8  ;;  %vm565_vm3 = vcmp.gt.s32.totalorder %v564_v19, 0 }
  0xf2   :  { %12824 = vst [vmem:[#allocation84_spill] sm:$0xff] %v8458_v22  ;;  %v8468_v31 = vmul.u32 %v473_v57, %v8422_v45  ;;  %v2585_v48 = vshrl.u32 %v12786_v8, %v2584_v56  ;;  %v2588_v13 = vor.u32 %v2587_v2, %v2586_v9  ;;  %v879_v33 = vsub.s32 32, %v878_v52 }
  0xf3   :  { %12825 = vst [vmem:[#allocation85_spill] sm:$0xff] %v8460_v46  ;;  %v8474_v50 = vadd.s32 %v12479_v16, %v8447_v34  ;;  %vm2603_vm4 = vcmp.lt.s32.totalorder %v8436_v44, 3  ;;  %v2606_v39 = vsel %vm2604_vm1, %v2594_v43, 2102212464  ;;  %v12828_v47 = vand.u32 2147483647, %v8348_v11  ;;  %v326_v16 = vpop.permute.xlu1 %325 }
  0xf4   :  { %12826 = vst [vmem:[#allocation86_spill] sm:$0xff] %v8465_v40  ;;  %v2610_v57 = vsel %vm2604_vm1, %v2597_v1, 920167782  ;;  %v2613_v9 = vsel %vm2601_vm2, %v2591_v7, %v2594_v43  ;;  %v2615_v56 = vsel %vm2603_vm4, %v2597_v1, %v2614_v21  ;;  %v566_v27 = vsel %vm565_vm3, %v564_v19, 0 }
  0xf5   :  { %12827 = vst [vmem:[#allocation87_spill] sm:$0xff] %v8468_v31  ;;  %v8481_v54 = vand.u32 8388607, %v12828_v47  ;;  %v8490_v6 = vand.u32 65535, %v8460_v46  ;;  %v8493_v10 = vshrl.u32 %v8460_v46, 16  ;;  %v8496_v2 = vand.u32 65535, %v8465_v40 }
  0xf6   :  { %v8499_v47 = vshrl.u32 %v8465_v40, 16  ;;  %vm2602_vm5 = vcmp.lt.s32.totalorder %v8436_v44, 2  ;;  %v2605_v11 = vsel %vm2601_vm2, %v2585_v48, %v2588_v13  ;;  %v2607_v19 = vsel %vm2603_vm4, %v2591_v7, %v2606_v39 }
  0xf7   :  { %12829 = vst [vmem:[#allocation88_spill] sm:$0xff] %v8490_v6  ;;  %v894_v1 = vshrl.u32 %v12798_v3, %v879_v33  ;;  %v2609_v21 = vsel %vm2601_vm2, %v2588_v13, %v2591_v7  ;;  %v2611_v24 = vsel %vm2603_vm4, %v2594_v43, %v2610_v57  ;;  %v8513_v12 = vsel %vm2602_vm5, %v2613_v9, %v2615_v56 }
  0xf8   :  { %12830 = vst [vmem:[#allocation89_spill] sm:$0xff] %v8493_v10  ;;  %v8515_v26 = vand.u32 31, %v566_v27  ;;  %v8517_v23 = vshrl.u32 %v876_v51, 5  ;;  %v893_v48 = vshll.u32 %v12797_v15, %v878_v52  ;;  %v8522_v18 = vmul.f32 %v7939_v42, %v326_v16 }
  0xf9   :  { %12831 = vst [vmem:[#allocation90_spill] sm:$0xff] %v8496_v2  ;;  %v8526_v7 = vsel %vm2602_vm5, %v2605_v11, %v2607_v19  ;;  %v885_v43 = vshrl.u32 %v12783_v38, %v879_v33  ;;  %v888_v13 = vshrl.u32 %v12801_v4, %v879_v33  ;;  %v891_v57 = vshrl.u32 %v12797_v15, %v879_v33 }
  0xfa   :  { %12832 = vst [vmem:[#allocation91_spill] sm:$0xff] %v8499_v47  ;;  %v8533_v51 = vsel %vm2602_vm5, %v2609_v21, %v2611_v24  ;;  %v2621_v56 = vshrl.u32 %v8513_v12, 16  ;;  %v895_v16 = vor.u32 %v894_v1, %v893_v48  ;;  %v884_v39 = vshll.u32 %v12802_v17, %v878_v52 }
  0xfb   :  { %12833 = vst [vmem:[#allocation92_spill] sm:$0xff] %v8513_v12  ;;  %v887_v11 = vshll.u32 %v12783_v38, %v878_v52  ;;  %v890_v19 = vshll.u32 %v12801_v4, %v878_v52  ;;  %v8541_v25 = vsub.s32 32, %v8515_v26  ;;  %v881_v24 = vshll.u32 %v12786_v8, %v878_v52 }
  0xfc   :  { %12834 = vst [vmem:[#allocation93_spill] sm:$0xff] %v8522_v18  ;;  %v882_v44 = vshrl.u32 %v12802_v17, %v879_v33  ;;  %v1487_v21 = vand.u32 2139095040, %v8522_v18  ;;  %v886_v9 = vor.u32 %v885_v43, %v884_v39  ;;  %vm899_vm6 = vcmp.lt.s32.totalorder %v8517_v23, 4 }
  0xfd   :  { %12835 = vst [vmem:[#allocation94_spill] sm:$0xff] %v8526_v7  ;;  %v889_v1 = vor.u32 %v888_v13, %v887_v11  ;;  %v892_v48 = vor.u32 %v891_v57, %v890_v19  ;;  %v880_v29 = vshrl.u32 %v12786_v8, %v879_v33  ;;  %v909_v28 = vsel %vm899_vm6, %v895_v16, 1326507024  ;;  %v319_v57 = vpop.permute.xlu0 %318 }
  0xfe   :  { %12836 = vst [vmem:[#allocation95_spill] sm:$0xff] %v8533_v51  ;;  %v1488_v37 = vshrl.u32 %v1487_v21, 23  ;;  %v12837_v52 = vand.u32 65535, %v8513_v12  ;;  %v8559_v7 = vmul.u32 %v2621_v56, %v8490_v6  ;;  %v2643_v39 = vshrl.u32 %v8533_v51, 16 }
  0xff   :  { %v584_v43 = vshrl.u32 %v12798_v3, %v8541_v25  ;;  %v883_v13 = vor.u32 %v882_v44, %v881_v24  ;;  %vm896_vm7 = vcmp.lt.s32.totalorder %v8517_v23, 1  ;;  %vm898_vm8 = vcmp.lt.s32.totalorder %v8517_v23, 3 }
 0x100   :  { %v8556_v0 = vmul.u32 %v12837_v52, %v8490_v6  ;;  %12839 = vst [vmem:[#allocation97_spill] sm:$0xff] %v8559_v7  ;;  %v7426_v33 = vadd.s32 4294967169, %v1488_v37  ;;  %v905_v16 = vsel %vm899_vm6, %v892_v48, 920167782  ;;  %v908_v11 = vsel %vm896_vm7, %v886_v9, %v889_v1 }
 0x101   :  { %v910_v19 = vsel %vm898_vm8, %v892_v48, %v909_v28  ;;  %v583_v21 = vshll.u32 %v12797_v15, %v8515_v26  ;;  %v8574_v52 = vshrl.u32 %v566_v27, 5  ;;  %v575_v24 = vshrl.u32 %v12783_v38, %v8541_v25 }
 0x102   :  { %12838 = vst [vmem:[#allocation96_spill] sm:$0xff] %v8556_v0  ;;  %v578_v37 = vshrl.u32 %v12801_v4, %v8541_v25  ;;  %v581_v44 = vshrl.u32 %v12797_v15, %v8541_v25  ;;  %v8583_v53 = vmul.u32 %v2621_v56, %v8493_v10  ;;  %vm897_vm9 = vcmp.lt.s32.totalorder %v8517_v23, 2 }
 0x103   :  { %v585_v28 = vor.u32 %v584_v43, %v583_v21  ;;  %v8587_v48 = vmul.f32 %v7939_v42, %v319_v57  ;;  %v574_v27 = vshll.u32 %v12802_v17, %v8515_v26  ;;  %v577_v46 = vshll.u32 %v12783_v38, %v8515_v26 }
 0x104   :  { %12840 = vst [vmem:[#allocation98_spill] sm:$0xff] %v8583_v53  ;;  %v580_v51 = vshll.u32 %v12801_v4, %v8515_v26  ;;  %v1494_v12 = vadd.s32 1, %v7426_v33  ;;  %v901_v56 = vsel %vm899_vm6, %v889_v1, 2102212464  ;;  %v904_v53 = vsel %vm896_vm7, %v883_v13, %v886_v9 }
 0x105   :  { %12841 = vst [vmem:[#allocation99_spill] sm:$0xff] %v8587_v48  ;;  %v906_v43 = vsel %vm898_vm8, %v889_v1, %v905_v16  ;;  %v8603_v57 = vsel %vm897_vm9, %v908_v11, %v910_v19  ;;  %v576_v21 = vor.u32 %v575_v24, %v574_v27  ;;  %v579_v20 = vor.u32 %v578_v37, %v577_v46 }
 0x106   :  { %12842 = vst [vmem:[#allocation100_spill] sm:$0xff] %v8603_v57  ;;  %v582_v31 = vor.u32 %v581_v44, %v580_v51  ;;  %vm589_vm10 = vcmp.lt.s32.totalorder %v8574_v52, 4  ;;  %v12504_v33 = vshll.u32 %v8559_v7, 16  ;;  %v572_v22 = vshrl.u32 %v12802_v17, %v8541_v25  ;;  %v347_v44 = vpop.permute.xlu1 %346 }
 0x107   :  { %v599_v49 = vsel %vm589_vm10, %v585_v28, 1326507024  ;;  %v1332_v35 = vand.u32 2139095040, %v8587_v48  ;;  %v900_v1 = vsel %vm896_vm7, %v880_v29, %v883_v13  ;;  %v902_v16 = vsel %vm898_vm8, %v886_v9, %v901_v56 }
 0x108   :  { %v8618_v46 = vsel %vm897_vm9, %v904_v53, %v906_v43  ;;  %vm1495_vm11 = vcmp.gt.s32.totalorder %v1494_v12, 0  ;;  %v916_v51 = vshrl.u32 %v8603_v57, 16  ;;  %v571_v11 = vshll.u32 %v12786_v8, %v8515_v26 }
 0x109   :  { %12843 = vst [vmem:[#allocation101_spill] sm:$0xff] %v8618_v46  ;;  %vm586_vm12 = vcmp.lt.s32.totalorder %v8574_v52, 1  ;;  %vm588_vm13 = vcmp.lt.s32.totalorder %v8574_v52, 3  ;;  %v8626_v19 = vmul.u32 %v2643_v39, %v8490_v6  ;;  %v8629_v29 = vmul.u32 %v2643_v39, %v8493_v10 }
 0x10a   :  { %v598_v53 = vsel %vm586_vm12, %v576_v21, %v579_v20  ;;  %v600_v9 = vsel %vm588_vm13, %v582_v31, %v599_v49  ;;  %v8638_v26 = vadd.s32 %v12504_v33, %v8556_v0  ;;  %v573_v13 = vor.u32 %v572_v22, %v571_v11 }
 0x10b   :  { %12844 = vst [vmem:[#allocation102_spill] sm:$0xff] %v8626_v19  ;;  %v1496_v24 = vsel %vm1495_vm11, %v1494_v12, 0  ;;  %v1333_v37 = vshrl.u32 %v1332_v35, 23  ;;  %v8642_v28 = vsel %vm897_vm9, %v900_v1, %v902_v16  ;;  %v938_v39 = vshrl.u32 %v8618_v46, 16  ;;  %v340_v19 = vpop.permute.xlu0 %339 }
 0x10c   :  { %12845 = vst [vmem:[#allocation103_spill] sm:$0xff] %v8629_v29  ;;  %vm587_vm14 = vcmp.lt.s32.totalorder %v8574_v52, 2  ;;  %v595_v49 = vsel %vm589_vm10, %v582_v31, 920167782  ;;  %v8649_v27 = vmul.u32 %v916_v51, %v8496_v2  ;;  %v591_v22 = vsel %vm589_vm10, %v579_v20, 2102212464 }
 0x10d   :  { %12846 = vst [vmem:[#allocation104_spill] sm:$0xff] %v8638_v26  ;;  %v8655_v12 = vsel %vm587_vm14, %v598_v53, %v600_v9  ;;  %v12850_v23 = vor.u32 8388608, %v8481_v54  ;;  %v570_v56 = vshrl.u32 %v12786_v8, %v8541_v25  ;;  %v8664_v31 = vand.u32 31, %v1496_v24 }
 0x10e   :  { %12847 = vst [vmem:[#allocation105_spill] sm:$0xff] %v8642_v28  ;;  %v8667_v1 = vmul.f32 %v7939_v42, %v347_v44  ;;  %v594_v11 = vsel %vm586_vm12, %v573_v13, %v576_v21  ;;  %v596_v54 = vsel %vm588_vm13, %v579_v20, %v595_v49  ;;  %v7423_v53 = vadd.s32 4294967169, %v1333_v37 }
 0x10f   :  { %12848 = vst [vmem:[#allocation106_spill] sm:$0xff] %v8649_v27  ;;  %v8659_v35 = vshll.u32 %v12850_v23, 8  ;;  %v590_v25 = vsel %vm586_vm12, %v570_v56, %v573_v13  ;;  %v592_v23 = vsel %vm588_vm13, %v576_v21, %v591_v22  ;;  %v606_v44 = vshrl.u32 %v8655_v12, 16 }
 0x110   :  { %12849 = vst [vmem:[#allocation107_spill] sm:$0xff] %v8655_v12  ;;  %v8682_v16 = vmul.u32 %v938_v39, %v8496_v2  ;;  %v8691_v37 = vsel %vm587_vm14, %v594_v11, %v596_v54  ;;  %v12856_v13 = vand.u32 2147483647, %v8522_v18  ;;  %v8696_v49 = vsub.s32 32, %v8664_v31 }
 0x111   :  { %12851 = vst [vmem:[#allocation108_spill] sm:$0xff] %v8659_v35  ;;  %v8687_v20 = vand.u32 65535, %v8659_v35  ;;  %v1952_v22 = vand.u32 2139095040, %v8667_v1  ;;  %v12857_v56 = vand.u32 65535, %v8603_v57  ;;  %v8706_v43 = vsel %vm587_vm14, %v590_v25, %v592_v23 }
 0x112   :  { %12852 = vst [vmem:[#allocation109_spill] sm:$0xff] %v8667_v1  ;;  %v1491_v21 = vand.u32 8388607, %v12856_v13  ;;  %v1339_v54 = vadd.s32 1, %v7423_v53  ;;  %v8710_v33 = vmul.u32 %v916_v51, %v8499_v47  ;;  %v8713_v13 = vmul.u32 %v938_v39, %v8499_v47 }
 0x113   :  { %12853 = vst [vmem:[#allocation110_spill] sm:$0xff] %v8682_v16  ;;  %v8702_v9 = vmul.u32 %v12857_v56, %v8496_v2  ;;  %v8716_v29 = vmul.u32 %v606_v44, %v8687_v20  ;;  %v12862_v56 = vshll.u32 %v8649_v27, 16  ;;  %v8725_v25 = vshrl.u32 %v8659_v35, 16 }
 0x114   :  { %12854 = vst [vmem:[#allocation111_spill] sm:$0xff] %v8687_v20  ;;  %v628_v51 = vshrl.u32 %v8691_v37, 16  ;;  %v1492_v23 = vor.u32 8388608, %v1491_v21  ;;  %v1514_v11 = vshrl.u32 %v12798_v3, %v8696_v49  ;;  %v1953_v6 = vshrl.u32 %v1952_v22, 23 }
 0x115   :  { %12855 = vst [vmem:[#allocation112_spill] sm:$0xff] %v8691_v37  ;;  %v8722_v52 = vadd.s32 %v12862_v56, %v8702_v9  ;;  %v12864_v56 = vand.u32 65535, %v8655_v12  ;;  %v8739_v10 = vmul.u32 %v606_v44, %v8725_v25  ;;  %vm1340_vm15 = vcmp.gt.s32.totalorder %v1339_v54, 0 }
 0x116   :  { %12858 = vst [vmem:[#allocation113_spill] sm:$0xff] %v8702_v9  ;;  %v8743_v39 = vshrl.u32 %v1496_v24, 5  ;;  %v1513_v21 = vshll.u32 %v12797_v15, %v8664_v31  ;;  %v12866_v22 = vand.u32 2147483647, %v8587_v48  ;;  %v1508_v44 = vshrl.u32 %v12801_v4, %v8696_v49 }
 0x117   :  { %12859 = vst [vmem:[#allocation114_spill] sm:$0xff] %v8706_v43  ;;  %v8736_v26 = vmul.u32 %v12864_v56, %v8687_v20  ;;  %v1505_v56 = vshrl.u32 %v12783_v38, %v8696_v49  ;;  %v1511_v18 = vshrl.u32 %v12797_v15, %v8696_v49  ;;  %v8756_v53 = vmul.f32 %v7939_v42, %v340_v19 }
 0x118   :  { %12860 = vst [vmem:[#allocation115_spill] sm:$0xff] %v8710_v33  ;;  %v1336_v7 = vand.u32 8388607, %v12866_v22  ;;  %v1515_v24 = vor.u32 %v1514_v11, %v1513_v21  ;;  %v8758_v0 = vshll.u32 %v1492_v23, 8  ;;  %v1341_v28 = vsel %vm1340_vm15, %v1339_v54, 0 }
 0x119   :  { %12861 = vst [vmem:[#allocation116_spill] sm:$0xff] %v8713_v13  ;;  %v7435_v40 = vadd.s32 4294967169, %v1953_v6  ;;  %v1504_v22 = vshll.u32 %v12802_v17, %v8664_v31  ;;  %v1507_v48 = vshll.u32 %v12783_v38, %v8664_v31  ;;  %v1510_v13 = vshll.u32 %v12801_v4, %v8664_v31 }
 0x11a   :  { %12863 = vst [vmem:[#allocation117_spill] sm:$0xff] %v8722_v52  ;;  %v12869_v16 = vand.u32 2147483647, %v8667_v1  ;;  %v8769_v19 = vmul.u32 %v628_v51, %v8687_v20  ;;  %v1502_v11 = vshrl.u32 %v12802_v17, %v8696_v49  ;;  %vm1519_vm0 = vcmp.lt.s32.totalorder %v8743_v39, 4 }
 0x11b   :  { %12865 = vst [vmem:[#allocation118_spill] sm:$0xff] %v8739_v10  ;;  %v1337_v6 = vor.u32 8388608, %v1336_v7  ;;  %v1506_v54 = vor.u32 %v1505_v56, %v1504_v22  ;;  %v1509_v23 = vor.u32 %v1508_v44, %v1507_v48  ;;  %v1512_v21 = vor.u32 %v1511_v18, %v1510_v13 }
 0x11c   :  { %12867 = vst [vmem:[#allocation119_spill] sm:$0xff] %v8756_v53  ;;  %v1956_v46 = vand.u32 8388607, %v12869_v16  ;;  %v1343_v2 = vand.u32 31, %v1341_v28  ;;  %v8775_v33 = vmul.u32 %v628_v51, %v8725_v25  ;;  %v1501_v1 = vshll.u32 %v12786_v8, %v8664_v31 }
 0x11d   :  { %12868 = vst [vmem:[#allocation120_spill] sm:$0xff] %v8758_v0  ;;  %v1529_v16 = vsel %vm1519_vm0, %v1515_v24, 1326507024  ;;  %v1959_v52 = vadd.s32 1, %v7435_v40  ;;  %v12872_v57 = vshll.u32 %v8716_v29, 16  ;;  %v8787_v7 = vand.u32 65535, %v8758_v0 }
 0x11e   :  { %12870 = vst [vmem:[#allocation121_spill] sm:$0xff] %v8769_v19  ;;  %v1957_v18 = vor.u32 8388608, %v1956_v46  ;;  %v12528_v48 = vand.u32 2147483647, %v8756_v53  ;;  %v1503_v13 = vor.u32 %v1502_v11, %v1501_v1  ;;  %vm1516_vm1 = vcmp.lt.s32.totalorder %v8743_v39, 1 }
 0x11f   :  { %12871 = vst [vmem:[#allocation122_spill] sm:$0xff] %v8775_v33  ;;  %v8784_v47 = vadd.s32 %v12872_v57, %v8736_v26  ;;  %vm1518_vm2 = vcmp.lt.s32.totalorder %v8743_v39, 3  ;;  %v8792_v31 = vshll.u32 %v1337_v6, 8  ;;  %v1528_v40 = vsel %vm1516_vm1, %v1506_v54, %v1509_v23 }
 0x120   :  { %12874 = vst [vmem:[#allocation124_spill] sm:$0xff] %v8787_v7  ;;  %v1530_v57 = vsel %vm1518_vm2, %v1512_v21, %v1529_v16  ;;  %v1344_v51 = vsub.s32 32, %v1343_v2  ;;  %vm1960_vm3 = vcmp.gt.s32.totalorder %v1959_v52, 0  ;;  %v1500_v46 = vshrl.u32 %v12786_v8, %v8696_v49 }
 0x121   :  { %12873 = vst [vmem:[#allocation123_spill] sm:$0xff] %v8784_v47  ;;  %v1521_v1 = vsel %vm1519_vm0, %v1509_v23, 2102212464  ;;  %v8803_v56 = vshrl.u32 %v8758_v0, 16  ;;  %v1797_v44 = vand.u32 2139095040, %v8756_v53  ;;  %vm1517_vm4 = vcmp.lt.s32.totalorder %v8743_v39, 2 }
 0x122   :  { %12875 = vst [vmem:[#allocation125_spill] sm:$0xff] %v8792_v31  ;;  %v1525_v24 = vsel %vm1519_vm0, %v1512_v21, 920167782  ;;  %v8809_v22 = vshll.u32 %v1957_v18, 8  ;;  %v8813_v11 = vand.u32 8388607, %v12528_v48  ;;  %v1520_v49 = vsel %vm1516_vm1, %v1500_v46, %v1503_v13 }
 0x123   :  { %12876 = vst [vmem:[#allocation126_spill] sm:$0xff] %v8803_v56  ;;  %v8819_v6 = vsel %vm1517_vm4, %v1528_v40, %v1530_v57  ;;  %v8822_v16 = vand.u32 65535, %v8792_v31  ;;  %v1961_v9 = vsel %vm1960_vm3, %v1959_v52, 0  ;;  %v1522_v21 = vsel %vm1518_vm2, %v1506_v54, %v1521_v1 }
 0x124   :  { %12877 = vst [vmem:[#allocation127_spill] sm:$0xff] %v8809_v22  ;;  %v1524_v18 = vsel %vm1516_vm1, %v1503_v13, %v1506_v54  ;;  %v1353_v48 = vshrl.u32 %v12801_v4, %v1344_v51  ;;  %v1356_v53 = vshrl.u32 %v12797_v15, %v1344_v51  ;;  %v1526_v46 = vsel %vm1518_vm2, %v1509_v23, %v1525_v24 }
 0x125   :  { %12878 = vst [vmem:[#allocation128_spill] sm:$0xff] %v8819_v6  ;;  %v8832_v27 = vshrl.u32 %v1341_v28, 5  ;;  %v1359_v40 = vshrl.u32 %v12798_v3, %v1344_v51  ;;  %v1798_v57 = vshrl.u32 %v1797_v44, 23  ;;  %v1536_v52 = vshrl.u32 %v8819_v6, 16 }
 0x126   :  { %12879 = vst [vmem:[#allocation129_spill] sm:$0xff] %v8822_v16  ;;  %v1352_v43 = vshll.u32 %v12783_v38, %v1343_v2  ;;  %v1355_v1 = vshll.u32 %v12801_v4, %v1343_v2  ;;  %v8838_v35 = vand.u32 31, %v1961_v9  ;;  %v8842_v54 = vsel %vm1517_vm4, %v1520_v49, %v1522_v21 }
 0x127   :  { %12880 = vst [vmem:[#allocation130_spill] sm:$0xff] %v8842_v54  ;;  %v1347_v13 = vshrl.u32 %v12802_v17, %v1344_v51  ;;  %v1350_v28 = vshrl.u32 %v12783_v38, %v1344_v51  ;;  %v1358_v23 = vshll.u32 %v12797_v15, %v1343_v2  ;;  %v8849_v44 = vsel %vm1517_vm4, %v1524_v18, %v1526_v46 }
 0x128   :  { %12881 = vst [vmem:[#allocation131_spill] sm:$0xff] %v8849_v44  ;;  %v12539_v24 = vand.u32 65535, %v8819_v6  ;;  %v1354_v33 = vor.u32 %v1353_v48, %v1352_v43  ;;  %v1357_v19 = vor.u32 %v1356_v53, %v1355_v1  ;;  %v1346_v37 = vshll.u32 %v12786_v8, %v1343_v2 }
 0x129   :  { %v1349_v20 = vshll.u32 %v12802_v17, %v1343_v2  ;;  %v1360_v49 = vor.u32 %v1359_v40, %v1358_v23  ;;  %v7432_v21 = vadd.s32 4294967169, %v1798_v57  ;;  %v8855_v47 = vmul.u32 %v1536_v52, %v8787_v7 }
 0x12a   :  { %vm1361_vm5 = vcmp.lt.s32.totalorder %v8832_v27, 1  ;;  %v8861_v39 = vsub.s32 32, %v8838_v35  ;;  %v1348_v53 = vor.u32 %v1347_v13, %v1346_v37  ;;  %vm1364_vm6 = vcmp.lt.s32.totalorder %v8832_v27, 4 }
 0x12b   :  { %12882 = vst [vmem:[#allocation132_spill] sm:$0xff] %v8855_v47  ;;  %v1351_v48 = vor.u32 %v1350_v28, %v1349_v20  ;;  %v8868_v2 = vmul.u32 %v12539_v24, %v8787_v7  ;;  %v1558_v18 = vshrl.u32 %v8849_v44, 16  ;;  %v1366_v46 = vsel %vm1364_vm6, %v1354_v33, 2102212464 }
 0x12c   :  { %v1370_v40 = vsel %vm1364_vm6, %v1357_v19, 920167782  ;;  %v8872_v57 = vmul.u32 %v1536_v52, %v8803_v56  ;;  %v1345_v1 = vshrl.u32 %v12786_v8, %v1344_v51  ;;  %v1374_v23 = vsel %vm1364_vm6, %v1360_v49, 1326507024 }
 0x12d   :  { %12883 = vst [vmem:[#allocation133_spill] sm:$0xff] %v8868_v2  ;;  %v1804_v10 = vadd.s32 1, %v7432_v21  ;;  %vm1362_vm7 = vcmp.lt.s32.totalorder %v8832_v27, 2  ;;  %vm1363_vm8 = vcmp.lt.s32.totalorder %v8832_v27, 3  ;;  %v1979_v37 = vshrl.u32 %v12798_v3, %v8861_v39 }
 0x12e   :  { %12884 = vst [vmem:[#allocation134_spill] sm:$0xff] %v8872_v57  ;;  %v1365_v13 = vsel %vm1361_vm5, %v1345_v1, %v1348_v53  ;;  %v1367_v28 = vsel %vm1363_vm8, %v1351_v48, %v1366_v46  ;;  %v1369_v52 = vsel %vm1361_vm5, %v1348_v53, %v1351_v48  ;;  %v1371_v43 = vsel %vm1363_vm8, %v1354_v33, %v1370_v40 }
 0x12f   :  { %v1373_v51 = vsel %vm1361_vm5, %v1351_v48, %v1354_v33  ;;  %v1375_v49 = vsel %vm1363_vm8, %v1357_v19, %v1374_v23  ;;  %v8886_v21 = vshrl.u32 %v1961_v9, 5  ;;  %v1978_v24 = vshll.u32 %v12797_v15, %v8838_v35 }
 0x130   :  { %v1970_v20 = vshrl.u32 %v12783_v38, %v8861_v39  ;;  %v1973_v1 = vshrl.u32 %v12801_v4, %v8861_v39  ;;  %v1976_v46 = vshrl.u32 %v12797_v15, %v8861_v39  ;;  %vm1805_vm9 = vcmp.gt.s32.totalorder %v1804_v10, 0 }
 0x131   :  { %v8897_v53 = vmul.u32 %v1558_v18, %v8787_v7  ;;  %v8900_v33 = vmul.u32 %v1558_v18, %v8803_v56  ;;  %v8904_v9 = vsel %vm1362_vm7, %v1369_v52, %v1371_v43  ;;  %v1980_v19 = vor.u32 %v1979_v37, %v1978_v24  ;;  %v368_v18 = vpop.permute.xlu1 %367 }
 0x132   :  { %12887 = vst [vmem:[#allocation137_spill] sm:$0xff] %v8904_v9  ;;  %v8908_v48 = vsel %vm1362_vm7, %v1373_v51, %v1375_v49  ;;  %v1969_v40 = vshll.u32 %v12802_v17, %v8838_v35  ;;  %v1972_v23 = vshll.u32 %v12783_v38, %v8838_v35  ;;  %v1975_v54 = vshll.u32 %v12801_v4, %v8838_v35 }
 0x133   :  { %12885 = vst [vmem:[#allocation135_spill] sm:$0xff] %v8897_v53  ;;  %v12889_v0 = vshll.u32 %v8855_v47, 16  ;;  %v8923_v24 = vsel %vm1362_vm7, %v1365_v13, %v1367_v28  ;;  %v1967_v37 = vshrl.u32 %v12802_v17, %v8861_v39  ;;  %v1806_v52 = vsel %vm1805_vm9, %v1804_v10, 0  ;;  %v361_v28 = vpop.permute.xlu0 %360 }
 0x134   :  { %12886 = vst [vmem:[#allocation136_spill] sm:$0xff] %v8900_v33  ;;  %v1971_v51 = vor.u32 %v1970_v20, %v1969_v40  ;;  %v1974_v49 = vor.u32 %v1973_v1, %v1972_v23  ;;  %v1977_v33 = vor.u32 %v1976_v46, %v1975_v54  ;;  %vm1984_vm10 = vcmp.lt.s32.totalorder %v8886_v21, 4 }
 0x135   :  { %12888 = vst [vmem:[#allocation138_spill] sm:$0xff] %v8908_v48  ;;  %v8919_v43 = vadd.s32 %v12889_v0, %v8868_v2  ;;  %v1381_v7 = vshrl.u32 %v8908_v48, 16  ;;  %v1403_v53 = vshrl.u32 %v8904_v9, 16  ;;  %v1994_v0 = vsel %vm1984_vm10, %v1980_v19, 1326507024 }
 0x136   :  { %12891 = vst [vmem:[#allocation140_spill] sm:$0xff] %v8923_v24  ;;  %v8933_v27 = vmul.f32 %v7939_v42, %v368_v18  ;;  %v8936_v13 = vshrl.u32 %v8792_v31, 16  ;;  %v1966_v54 = vshll.u32 %v12786_v8, %v8838_v35  ;;  %v1808_v20 = vand.u32 31, %v1806_v52 }
 0x137   :  { %12890 = vst [vmem:[#allocation139_spill] sm:$0xff] %v8919_v43  ;;  %vm1981_vm11 = vcmp.lt.s32.totalorder %v8886_v21, 1  ;;  %vm1983_vm12 = vcmp.lt.s32.totalorder %v8886_v21, 3  ;;  %v8951_v23 = vand.u32 65535, %v8809_v22  ;;  %v8954_v35 = vmul.u32 %v1381_v7, %v8822_v16 }
 0x138   :  { %12892 = vst [vmem:[#allocation141_spill] sm:$0xff] %v8933_v27  ;;  %v1968_v46 = vor.u32 %v1967_v37, %v1966_v54  ;;  %v1993_v19 = vsel %vm1981_vm11, %v1971_v51, %v1974_v49  ;;  %v1995_v40 = vsel %vm1983_vm12, %v1977_v33, %v1994_v0  ;;  %v8957_v18 = vmul.u32 %v1403_v53, %v8822_v16 }
 0x139   :  { %12893 = vst [vmem:[#allocation142_spill] sm:$0xff] %v8936_v13  ;;  %v1986_v1 = vsel %vm1984_vm10, %v1974_v49, 2102212464  ;;  %v2417_v37 = vand.u32 2139095040, %v8933_v27  ;;  %v1965_v54 = vshrl.u32 %v12786_v8, %v8861_v39  ;;  %vm1982_vm13 = vcmp.lt.s32.totalorder %v8886_v21, 2 }
 0x13a   :  { %12894 = vst [vmem:[#allocation143_spill] sm:$0xff] %v8951_v23  ;;  %v1802_v0 = vor.u32 8388608, %v8813_v11  ;;  %v1809_v10 = vsub.s32 32, %v1808_v20  ;;  %v8967_v44 = vmul.u32 %v1403_v53, %v8936_v13  ;;  %v8971_v57 = vsel %vm1982_vm13, %v1993_v19, %v1995_v40 }
 0x13b   :  { %12895 = vst [vmem:[#allocation144_spill] sm:$0xff] %v8954_v35  ;;  %v8974_v43 = vshrl.u32 %v8809_v22, 16  ;;  %v2418_v24 = vshrl.u32 %v2417_v37, 23  ;;  %v12900_v39 = vand.u32 65535, %v8908_v48  ;;  %v1985_v11 = vsel %vm1981_vm11, %v1965_v54, %v1968_v46 }
 0x13c   :  { %12896 = vst [vmem:[#allocation145_spill] sm:$0xff] %v8957_v18  ;;  %v1987_v53 = vsel %vm1983_vm12, %v1971_v51, %v1986_v1  ;;  %v1990_v6 = vsel %vm1984_vm10, %v1977_v33, 920167782  ;;  %v8988_v19 = vmul.u32 %v1381_v7, %v8936_v13  ;;  %v8992_v56 = vmul.f32 %v7939_v42, %v361_v28 }
 0x13d   :  { %12897 = vst [vmem:[#allocation146_spill] sm:$0xff] %v8967_v44  ;;  %v8979_v31 = vmul.u32 %v12900_v39, %v8822_v16  ;;  %v7444_v37 = vadd.s32 4294967169, %v2418_v24  ;;  %v2001_v39 = vshrl.u32 %v8971_v57, 16  ;;  %v1824_v2 = vshrl.u32 %v12798_v3, %v1809_v10 }
 0x13e   :  { %12898 = vst [vmem:[#allocation147_spill] sm:$0xff] %v8971_v57  ;;  %v8996_v54 = vshll.u32 %v1802_v0, 8  ;;  %v9001_v33 = vsel %vm1982_vm13, %v1985_v11, %v1987_v53  ;;  %v1989_v7 = vsel %vm1981_vm11, %v1968_v46, %v1971_v51  ;;  %v1991_v24 = vsel %vm1983_vm12, %v1974_v49, %v1990_v6 }
 0x13f   :  { %12899 = vst [vmem:[#allocation148_spill] sm:$0xff] %v8974_v43  ;;  %v2424_v28 = vadd.s32 1, %v7444_v37  ;;  %v9007_v40 = vshrl.u32 %v1806_v52, 5  ;;  %v1815_v47 = vshrl.u32 %v12783_v38, %v1809_v10  ;;  %v1818_v0 = vshrl.u32 %v12801_v4, %v1809_v10 }
 0x140   :  { %12901 = vst [vmem:[#allocation149_spill] sm:$0xff] %v8988_v19  ;;  %v1823_v44 = vshll.u32 %v12797_v15, %v1808_v20  ;;  %v1814_v1 = vshll.u32 %v12802_v17, %v1808_v20  ;;  %v1821_v11 = vshrl.u32 %v12797_v15, %v1809_v10  ;;  %v2262_v53 = vand.u32 2139095040, %v8992_v56 }
 0x141   :  { %12902 = vst [vmem:[#allocation150_spill] sm:$0xff] %v8992_v56  ;;  %vm2425_vm14 = vcmp.gt.s32.totalorder %v2424_v28, 0  ;;  %v9016_v51 = vmul.u32 %v2001_v39, %v8951_v23  ;;  %v1817_v6 = vshll.u32 %v12783_v38, %v1808_v20  ;;  %v9021_v46 = vsel %vm1982_vm13, %v1989_v7, %v1991_v24 }
 0x142   :  { %12903 = vst [vmem:[#allocation151_spill] sm:$0xff] %v8996_v54  ;;  %v1825_v52 = vor.u32 %v1824_v2, %v1823_v44  ;;  %v2426_v49 = vsel %vm2425_vm14, %v2424_v28, 0  ;;  %v1812_v37 = vshrl.u32 %v12802_v17, %v1809_v10  ;;  %v1820_v16 = vshll.u32 %v12801_v4, %v1808_v20 }
 0x143   :  { %12904 = vst [vmem:[#allocation152_spill] sm:$0xff] %v9001_v33  ;;  %v9025_v18 = vand.u32 31, %v2426_v49  ;;  %v12907_v9 = vshll.u32 %v8954_v35, 16  ;;  %v12564_v48 = vand.u32 65535, %v8971_v57  ;;  %v1816_v13 = vor.u32 %v1815_v47, %v1814_v1 }
 0x144   :  { %12905 = vst [vmem:[#allocation153_spill] sm:$0xff] %v9016_v51  ;;  %v1819_v44 = vor.u32 %v1818_v0, %v1817_v6  ;;  %v1811_v2 = vshll.u32 %v12786_v8, %v1808_v20  ;;  %v1822_v21 = vor.u32 %v1821_v11, %v1820_v16  ;;  %vm1829_vm15 = vcmp.lt.s32.totalorder %v9007_v40, 4 }
 0x145   :  { %12906 = vst [vmem:[#allocation154_spill] sm:$0xff] %v9021_v46  ;;  %v9030_v19 = vadd.s32 %v12907_v9, %v8979_v31  ;;  %v2263_v7 = vshrl.u32 %v2262_v53, 23  ;;  %v12565_v24 = vshll.u32 %v9016_v51, 16  ;;  %v2023_v28 = vshrl.u32 %v9021_v46, 16 }
 0x146   :  { %v1839_v35 = vsel %vm1829_vm15, %v1825_v52, 1326507024  ;;  %vm1826_vm0 = vcmp.lt.s32.totalorder %v9007_v40, 1  ;;  %v9042_v47 = vsub.s32 32, %v9025_v18  ;;  %v9047_v16 = vmul.u32 %v12564_v48, %v8951_v23  ;;  %v382_v52 = vpop.permute.xlu0 %381 }
 0x147   :  { %12908 = vst [vmem:[#allocation155_spill] sm:$0xff] %v9030_v19  ;;  %v1813_v19 = vor.u32 %v1812_v37, %v1811_v2  ;;  %v1810_v20 = vshrl.u32 %v12786_v8, %v1809_v10  ;;  %vm1828_vm1 = vcmp.lt.s32.totalorder %v9007_v40, 3  ;;  %v1838_v1 = vsel %vm1826_vm0, %v1816_v13, %v1819_v44 }
 0x148   :  { %12909 = vst [vmem:[#allocation156_spill] sm:$0xff] %v9047_v16  ;;  %v1831_v0 = vsel %vm1829_vm15, %v1819_v44, 2102212464  ;;  %v1835_v11 = vsel %vm1829_vm15, %v1822_v21, 920167782  ;;  %v1840_v53 = vsel %vm1828_vm1, %v1822_v21, %v1839_v35  ;;  %v7441_v6 = vadd.s32 4294967169, %v2263_v7 }
 0x149   :  { %v9056_v37 = vmul.u32 %v2001_v39, %v8974_v43  ;;  %v9061_v2 = vadd.s32 %v12565_v24, %v9047_v16  ;;  %v9064_v10 = vmul.u32 %v2023_v28, %v8951_v23  ;;  %v9067_v12 = vmul.u32 %v2023_v28, %v8974_v43  ;;  %v7565_v43 = vld [vmem:[%s12394_s7] ss:$0 sm:$0xff] }
 0x14a   :  { %vm1827_vm2 = vcmp.lt.s32.totalorder %v9007_v40, 2  ;;  %v1830_v35 = vsel %vm1826_vm0, %v1810_v20, %v1813_v19  ;;  %v1834_v39 = vsel %vm1826_vm0, %v1813_v19, %v1816_v13  ;;  %v2444_v21 = vshrl.u32 %v12798_v3, %v9042_v47 }
 0x14b   :  { %12910 = vst [vmem:[#allocation157_spill] sm:$0xff] %v9056_v37  ;;  %v1832_v7 = vsel %vm1828_vm1, %v1816_v13, %v1831_v0  ;;  %v1836_v9 = vsel %vm1828_vm1, %v1819_v44, %v1835_v11  ;;  %v9082_v28 = vsel %vm1827_vm2, %v1838_v1, %v1840_v53  ;;  %v9085_v48 = vmul.f32 %v7939_v42, %v382_v52 }
 0x14c   :  { %12911 = vst [vmem:[#allocation158_spill] sm:$0xff] %v9061_v2  ;;  %v9088_v20 = vand.u32 65535, %v8996_v54  ;;  %v2443_v19 = vshll.u32 %v12797_v15, %v9025_v18  ;;  %v2269_v33 = vadd.s32 1, %v7441_v6  ;;  %v9093_v13 = vshrl.u32 %v2426_v49, 5 }
 0x14d   :  { %12912 = vst [vmem:[#allocation159_spill] sm:$0xff] %v9064_v10  ;;  %v2435_v44 = vshrl.u32 %v12783_v38, %v9042_v47  ;;  %v2438_v1 = vshrl.u32 %v12801_v4, %v9042_v47  ;;  %v2441_v42 = vshrl.u32 %v12797_v15, %v9042_v47  ;;  %v9103_v0 = vsel %vm1827_vm2, %v1830_v35, %v1832_v7 }
 0x14e   :  { %12913 = vst [vmem:[#allocation160_spill] sm:$0xff] %v9067_v12  ;;  %v9107_v11 = vsel %vm1827_vm2, %v1834_v39, %v1836_v9  ;;  %v1846_v49 = vshrl.u32 %v9082_v28, 16  ;;  %v2445_v53 = vor.u32 %v2444_v21, %v2443_v19  ;;  %v12919_v6 = vand.u32 2147483647, %v8933_v27 }
 0x14f   :  { %12914 = vst [vmem:[#allocation161_spill] sm:$0xff] %v9082_v28  ;;  %v2434_v24 = vshll.u32 %v12802_v17, %v9025_v18  ;;  %v2437_v22 = vshll.u32 %v12783_v38, %v9025_v18  ;;  %v2440_v35 = vshll.u32 %v12801_v4, %v9025_v18  ;;  %v9119_v7 = vshrl.u32 %v8996_v54, 16  ;;  %v218_v54 = vpop.f32.mrf.mxu1 }
 0x150   :  { %12915 = vst [vmem:[#allocation162_spill] sm:$0xff] %v9085_v48  ;;  %v2421_v52 = vand.u32 8388607, %v12919_v6  ;;  %v12921_v40 = vand.u32 2147483647, %v8992_v56  ;;  %vm2270_vm3 = vcmp.gt.s32.totalorder %v2269_v33, 0  ;;  %v2432_v10 = vshrl.u32 %v12802_v17, %v9042_v47 }
 0x151   :  { %12916 = vst [vmem:[#allocation163_spill] sm:$0xff] %v9088_v20  ;;  %v2727_v39 = vand.u32 2139095040, %v9085_v48  ;;  %v2436_v21 = vor.u32 %v2435_v44, %v2434_v24  ;;  %v2439_v19 = vor.u32 %v2438_v1, %v2437_v22  ;;  %v2442_v6 = vor.u32 %v2441_v42, %v2440_v35 }
 0x152   :  { %12917 = vst [vmem:[#allocation164_spill] sm:$0xff] %v9103_v0  ;;  %v2266_v9 = vand.u32 8388607, %v12921_v40  ;;  %vm2449_vm4 = vcmp.lt.s32.totalorder %v9093_v13, 4  ;;  %v12575_v27 = vand.u32 65535, %v9082_v28  ;;  %v9132_v40 = vmul.u32 %v1846_v49, %v9088_v20 }
 0x153   :  { %12918 = vst [vmem:[#allocation165_spill] sm:$0xff] %v9107_v11  ;;  %v2459_v37 = vsel %vm2449_vm4, %v2445_v53, 1326507024  ;;  %v1868_v56 = vshrl.u32 %v9107_v11, 16  ;;  %v2422_v24 = vor.u32 8388608, %v2421_v52  ;;  %v2431_v44 = vshll.u32 %v12786_v8, %v9025_v18 }
 0x154   :  { %12920 = vst [vmem:[#allocation166_spill] sm:$0xff] %v9119_v7  ;;  %vm2446_vm5 = vcmp.lt.s32.totalorder %v9093_v13, 1  ;;  %vm2448_vm6 = vcmp.lt.s32.totalorder %v9093_v13, 3  ;;  %v2271_v1 = vsel %vm2270_vm3, %v2269_v33, 0  ;;  %v2267_v35 = vor.u32 8388608, %v2266_v9 }
 0x155   :  { %v2458_v42 = vsel %vm2446_vm5, %v2436_v21, %v2439_v19  ;;  %v2460_v53 = vsel %vm2448_vm6, %v2442_v6, %v2459_v37  ;;  %v2728_v12 = vshrl.u32 %v2727_v39, 23  ;;  %v9148_v52 = vmul.u32 %v12575_v27, %v9088_v20 }
 0x156   :  { %v9151_v18 = vmul.u32 %v1846_v49, %v9119_v7  ;;  %v2433_v33 = vor.u32 %v2432_v10, %v2431_v44  ;;  %vm2447_vm7 = vcmp.lt.s32.totalorder %v9093_v13, 2  ;;  %v9157_v46 = vshll.u32 %v2422_v24, 8 }
 0x157   :  { %v2273_v37 = vand.u32 31, %v2271_v1  ;;  %v2430_v9 = vshrl.u32 %v12786_v8, %v9042_v47  ;;  %v2451_v39 = vsel %vm2449_vm4, %v2439_v19, 2102212464  ;;  %v2455_v49 = vsel %vm2449_vm4, %v2442_v6, 920167782 }
 0x158   :  { %12922 = vst [vmem:[#allocation167_spill] sm:$0xff] %v9151_v18  ;;  %v9167_v22 = vsel %vm2447_vm7, %v2458_v42, %v2460_v53  ;;  %v9170_v10 = vmul.u32 %v1868_v56, %v9088_v20  ;;  %v9172_v44 = vshll.u32 %v2267_v35, 8  ;;  %v7450_v24 = vadd.s32 4294967169, %v2728_v12 }
 0x159   :  { %12923 = vst [vmem:[#allocation168_spill] sm:$0xff] %v9157_v46  ;;  %v12927_v27 = vand.u32 2147483647, %v9085_v48  ;;  %v9179_v47 = vmul.u32 %v1868_v56, %v9119_v7  ;;  %v2450_v6 = vsel %vm2446_vm5, %v2430_v9, %v2433_v33  ;;  %v2454_v42 = vsel %vm2446_vm5, %v2433_v33, %v2436_v21  ;;  %v179_v48 = vpop.f32.mrf.mxu0 }
 0x15a   :  { %12924 = vst [vmem:[#allocation169_spill] sm:$0xff] %v9167_v22  ;;  %v12930_v53 = vand.u32 65535, %v8312_v36  ;;  %v2452_v12 = vsel %vm2448_vm6, %v2436_v21, %v2451_v39  ;;  %v2466_v56 = vshrl.u32 %v9167_v22, 16  ;;  %v2274_v35 = vsub.s32 32, %v2273_v37  ;;  %v9206_v21 = vpop.f32.mrf.mxu2 }
 0x15b   :  { %12925 = vst [vmem:[#allocation170_spill] sm:$0xff] %v9170_v10  ;;  %v9176_v2 = vand.u32 8388607, %v12927_v27  ;;  %v2456_v27 = vsel %vm2448_vm6, %v2439_v19, %v2455_v49  ;;  %v12931_v9 = vshll.u32 %v9132_v40, 16  ;;  %v9201_v36 = vand.u32 65535, %v9157_v46 }
 0x15c   :  { %12926 = vst [vmem:[#allocation171_spill] sm:$0xff] %v9172_v44  ;;  %v9188_v0 = vmul.u32 %v12930_v53, %v8300_v30  ;;  %v9204_v53 = vshrl.u32 %v9157_v46, 16  ;;  %v9209_v19 = vand.u32 65535, %v9172_v44  ;;  %v9212_v39 = vshrl.u32 %v9172_v44, 16  ;;  %v7566_v46 = vld [vmem:[%s12395_s8] ss:$0 sm:$0xff] }
 0x15d   :  { %12928 = vst [vmem:[#allocation172_spill] sm:$0xff] %v9176_v2  ;;  %v9198_v33 = vadd.s32 %v12931_v9, %v9148_v52  ;;  %v9215_v23 = vadd.s32 1, %v7450_v24  ;;  %v9219_v9 = vsel %vm2447_vm7, %v2450_v6, %v2452_v12  ;;  %v9223_v57 = vsel %vm2447_vm7, %v2454_v42, %v2456_v27 }
 0x15e   :  { %12929 = vst [vmem:[#allocation173_spill] sm:$0xff] %v9179_v47  ;;  %v768_v16 = vshll.u32 %v9188_v0, 16  ;;  %v12938_v49 = vshll.u32 %v8354_v63, 16  ;;  %v9239_v13 = vmul.u32 %v2466_v56, %v9201_v36  ;;  %v2286_v42 = vshrl.u32 %v12797_v15, %v2274_v35 }
 0x15f   :  { %12932 = vst [vmem:[#allocation174_spill] sm:$0xff] %v9198_v33  ;;  %v9243_v27 = vshrl.u32 %v2271_v1, 5  ;;  %v2276_v47 = vshll.u32 %v12786_v8, %v2273_v37  ;;  %v2277_v51 = vshrl.u32 %v12802_v17, %v2274_v35  ;;  %v2283_v20 = vshrl.u32 %v12801_v4, %v2274_v35 }
 0x160   :  { %12933 = vst [vmem:[#allocation175_spill] sm:$0xff] %v9201_v36  ;;  %vm9233_vm8 = vc.u32 %v8386_v55, %v12938_v49  ;;  %v2280_v55 = vshrl.u32 %v12783_v38, %v2274_v35  ;;  %v2488_v49 = vshrl.u32 %v9223_v57, 16  ;;  %v2285_v11 = vshll.u32 %v12801_v4, %v2273_v37 }
 0x161   :  { %12934 = vst [vmem:[#allocation176_spill] sm:$0xff] %v9204_v53  ;;  %v2275_v10 = vshrl.u32 %v12786_v8, %v2274_v35  ;;  %v2279_v1 = vshll.u32 %v12802_v17, %v2273_v37  ;;  %v2289_v12 = vshrl.u32 %v12798_v3, %v2274_v35  ;;  %v9256_v18 = vadd.f32 %v7565_v43, %v179_v48 }
 0x162   :  { %12935 = vst [vmem:[#allocation177_spill] sm:$0xff] %v9209_v19  ;;  %v12943_v33 = vand.u32 65535, %v9167_v22  ;;  %v2282_v6 = vshll.u32 %v12783_v38, %v2273_v37  ;;  %v12945_v7 = vshll.u32 %v8432_v59, 16  ;;  %v2288_v28 = vshll.u32 %v12797_v15, %v2273_v37  ;;  %v221_v37 = vpop.f32.mrf.mxu1 }
 0x163   :  { %12936 = vst [vmem:[#allocation178_spill] sm:$0xff] %v9219_v9  ;;  %v2287_v9 = vor.u32 %v2286_v42, %v2285_v11  ;;  %v2281_v22 = vor.u32 %v2280_v55, %v2279_v1  ;;  %6347 = vrot.lane.b32.xlu0 %v9256_v18, %s7819_s3  ;;  %5814 = vrot.lane.b32.xlu1 %v9256_v18, %s7820_s27  ;;  %v7567_v42 = vld [vmem:[%s12396_s9] ss:$0 sm:$0xff]  ;;  %vm2291_vm10 = vcmp.lt.s32.totalorder %v9243_v27, 1  ;;  %vm2292_vm11 = vcmp.lt.s32.totalorder %v9243_v27, 2  ;;  %s7822_s9 = smov 4  }
 0x164   :  { %12937 = vst [vmem:[#allocation179_spill] sm:$0xff] %v9223_v57  ;;  %v9261_v2 = vmul.u32 %v12943_v33, %v9201_v36  ;;  %vm9271_vm9 = vc.u32 %v8447_v34, %v12945_v7  ;;  %v2278_v33 = vor.u32 %v2277_v51, %v2276_v47  ;;  %v9282_v11 = vmul.u32 %v2466_v56, %v9204_v53  ;;  %v182_v47 = vpop.f32.mrf.mxu0  ;;  %v260_v56 = vpop.f32.mrf.mxu2  ;;  %v13011_v57 = vld [vmem:[#allocation45_spill] sm:$0xff] }
 0x165   :  { %12941 = vst [vmem:[#allocation180_spill] sm:$0xff] %v9239_v13  ;;  %v9285_v34 = vmul.u32 %v2488_v49, %v9201_v36  ;;  %v9288_v7 = vmul.u32 %v2488_v49, %v9204_v53  ;;  %v2284_v51 = vor.u32 %v2283_v20, %v2282_v6  ;;  %v2290_v55 = vor.u32 %v2289_v12, %v2288_v28 }
 0x166   :  { %12942 = vst [vmem:[#allocation181_spill] sm:$0xff] %v9256_v18  ;;  %vm2294_vm12 = vcmp.lt.s32.totalorder %v9243_v27, 4  ;;  %v12951_v1 = vshll.u32 %v9239_v13, 16  ;;  %vm2293_vm13 = vcmp.lt.s32.totalorder %v9243_v27, 3  ;;  %v9304_v6 = vadd.f32 %v7566_v46, %v218_v54 }
 0x167   :  { %12944 = vst [vmem:[#allocation182_spill] sm:$0xff] %v9261_v2  ;;  %v2300_v20 = vsel %vm2294_vm12, %v2287_v9, 920167782  ;;  %v2295_v28 = vsel %vm2291_vm10, %v2275_v10, %v2278_v33  ;;  %v2299_v12 = vsel %vm2291_vm10, %v2278_v33, %v2281_v22  ;;  %v9310_v35 = vadd.f32 %v7565_v43, %v182_v47 }
 0x168   :  { %12948 = vst [vmem:[#allocation183_spill] sm:$0xff] %v9282_v11  ;;  %v9299_v49 = vadd.s32 %v12951_v1, %v9261_v2  ;;  %v2296_v1 = vsel %vm2294_vm12, %v2284_v51, 2102212464  ;;  %vm2735_vm14 = vcmp.gt.s32.totalorder %v9215_v23, 0  ;;  %5816 = vrot.lane.b32.xlu2 %v9304_v6, %s7820_s27  ;;  %vm12721_vm15 = vcmask 64512  }
 0x169   :  { %12949 = vst [vmem:[#allocation184_spill] sm:$0xff] %v9285_v34  ;;  %v9319_v54 = vadd.f32 %v7567_v42, %v260_v56  ;;  %v2301_v10 = vsel %vm2293_vm13, %v2284_v51, %v2300_v20  ;;  %v2304_v43 = vsel %vm2294_vm12, %v2290_v55, 1326507024  ;;  %7501 = vmatpush.xpose.msk.msra.mxu3 %vm12721_vm15, %v9304_v6  ;;  %vm774_vm0 = vc.u32 %v8410_v41, %v768_v16 }
 0x16a   :  { %12950 = vst [vmem:[#allocation185_spill] sm:$0xff] %v9288_v7  ;;  %v9312_v7 = vadd.f32 %v7566_v46, %v221_v37  ;;  %v12607_v46 = vmov 0   ;;  %v2303_v47 = vsel %vm2291_vm10, %v2281_v22, %v2284_v51  ;;  %v12957_v56 = vand.u32 65535, %v8343_v61 }
 0x16b   :  { %12952 = vst [vmem:[#allocation186_spill] sm:$0xff] %v9299_v49  ;;  %v771_v33 = vsel %vm9233_vm8, 1, %v12607_v46  ;;  %v775_v55 = vsel %vm774_vm0, 1, %v12607_v46  ;;  %5807 = vmatpush.msrb.mxu0 %v9319_v54  ;;  %v2297_v24 = vsel %vm2293_vm13, %v2281_v22, %v2296_v1  ;;  %5842 = vrot.lane.b32.xlu0 %v9310_v35, %s7820_s27  ;;  %v9348_v41 = vadd.f32 %v7567_v42, %v9206_v21 }
 0x16c   :  { %12953 = vst [vmem:[#allocation187_spill] sm:$0xff] %v9304_v6  ;;  %v773_v37 = vadd.s32 %v771_v33, %v8398_v5  ;;  %v786_v20 = vmul.u32 %v12957_v56, %v8300_v30  ;;  %5844 = vrot.lane.b32.xlu1 %v9312_v7, %s7820_s27  ;;  %v12959_v5 = vmov %v12957_v56  ;;  %v788_v30 = vshll.u32 %v8401_v58, 16  ;;  %7502 = vmatmul.msk.f32.vlgmr.msra.gmra.mxu3 %vm12721_vm15, %v9256_v18 }
 0x16d   :  { %12954 = vst [vmem:[#allocation188_spill] sm:$0xff] %v9310_v35  ;;  %7503 = vmatpush.xpose.msk.msrb.mxu3 %vm12721_vm15, %v9312_v7  ;;  %v784_v16 = vmul.u32 %v12959_v5, %v8297_v62  ;;  %v9356_v51 = vsel %vm2292_vm11, %v2299_v12, %v2301_v10  ;;  %v2305_v22 = vsel %vm2293_vm13, %v2287_v9, %v2304_v43  ;;  %v9363_v1 = vsel %vm2735_vm14, %v9215_v23, 0 }
 0x16e   :  { %12955 = vst [vmem:[#allocation189_spill] sm:$0xff] %v9312_v7  ;;  %v777_v21 = vadd.s32 %v775_v55, %v773_v37  ;;  %v12960_v62 = vshll.u32 %v8716_v29, 16  ;;  %v790_v42 = vshll.u32 %v786_v20, 16  ;;  %v12963_v23 = vand.u32 65535, %v8378_v32 }
 0x16f   :  { %12956 = vst [vmem:[#allocation190_spill] sm:$0xff] %v9319_v54  ;;  %vm792_vm2 = vc.u32 %v784_v16, %v788_v30  ;;  %v794_v9 = vadd.s32 %v788_v30, %v784_v16  ;;  %v9380_v10 = vsel %vm2292_vm11, %v2295_v28, %v2297_v24  ;;  %v12965_v43 = vshrl.u32 %v8354_v63, 16 }
 0x170   :  { %12958 = vst [vmem:[#allocation191_spill] sm:$0xff] %v9348_v41  ;;  %vm9370_vm1 = vc.u32 %v8736_v26, %v12960_v62  ;;  %v454_v12 = vmul.u32 %v12963_v23, %v8422_v45  ;;  %v793_v26 = vsel %vm792_vm2, 1, %v12607_v46  ;;  %v461_v37 = vsel %vm9271_vm9, 1, %v12607_v46  ;;  %6349 = vrot.lane.b32.xlu2 %v9304_v6, %s7819_s3  ;;  %v12969_v62 = vld [vmem:[#allocation83_spill] sm:$0xff] }
 0x171   :  { %5784 = vmatpush.msra.mxu3 %v9348_v41  ;;  %12964 = vst [vmem:[#allocation192_spill] sm:$0xff] %v9380_v10  ;;  %v778_v33 = vadd.s32 %v777_v21, %v12965_v43  ;;  %v9389_v55 = vshrl.u32 %v9363_v1, 5  ;;  %v795_v56 = vadd.s32 %v793_v26, %v8404_v14  ;;  %vm796_vm3 = vc.u32 %v794_v9, %v790_v42  ;;  %v12966_v14 = vld [vmem:[#allocation82_spill] sm:$0xff] }
 0x172   :  { %v458_v32 = vshll.u32 %v454_v12, 16  ;;  %v9394_v28 = vsel %vm2292_vm11, %v2303_v47, %v2305_v22  ;;  %v797_v24 = vsel %vm796_vm3, 1, %v12607_v46  ;;  %v463_v48 = vadd.s32 %v461_v37, %v8453_v60  ;;  %v12971_v60 = vld [vmem:[#allocation84_spill] sm:$0xff] }
 0x173   :  { %v789_v5 = vshrl.u32 %v8401_v58, 16  ;;  %v799_v16 = vadd.s32 %v797_v24, %v795_v56  ;;  %v12967_v30 = vand.u32 65535, %v12966_v14  ;;  %v12968_v47 = vshrl.u32 %v9188_v0, 16  ;;  %6375 = vrot.lane.b32.xlu0 %v9310_v35, %s7819_s3 }
 0x174   :  { %vm464_vm4 = vc.u32 %v8474_v50, %v458_v32  ;;  %v478_v26 = vshll.u32 %v12971_v60, 16  ;;  %6377 = vrot.lane.b32.xlu1 %v9312_v7, %s7819_s3  ;;  %v791_v58 = vshrl.u32 %v786_v20, 16  ;;  %v457_v50 = vshrl.u32 %v8432_v59, 16  ;;  %7504 = vmatmul.msk.f32.vlgmr.msrb.gmra.mxu3 %vm12721_vm15, %v9310_v35  ;;  %v12972_v20 = vld [vmem:[#allocation87_spill] sm:$0xff] }
 0x175   :  { %v476_v27 = vmul.u32 %v12967_v30, %v8422_v45  ;;  %v9408_v22 = vadd.s32 %v778_v33, %v12968_v47  ;;  %v465_v21 = vsel %vm464_vm4, 1, %v12607_v46  ;;  %v12970_v23 = vmov %v12967_v30 }
 0x176   :  { %v474_v43 = vmul.u32 %v12970_v23, %v12969_v62  ;;  %v800_v45 = vadd.s32 %v799_v16, %v789_v5  ;;  %v467_v0 = vadd.s32 %v465_v21, %v463_v48  ;;  %v9422_v33 = vadd.s32 %v794_v9, %v790_v42  ;;  %v12973_v48 = vld [vmem:[#allocation107_spill] sm:$0xff] }
 0x177   :  { %v480_v37 = vshll.u32 %v476_v27, 16  ;;  %v2333_v32 = vshrl.u32 %v9356_v51, 16  ;;  %v12974_v5 = vand.u32 65535, %v12973_v48  ;;  %v9434_v9 = vpack.i.bf16 %v9319_v54, %v9348_v41  ;;  %v12995_v41 = vld [vmem:[#allocation34_spill] sm:$0xff] }
 0x178   :  { %vm482_vm5 = vc.u32 %v474_v43, %v478_v26  ;;  %v484_v56 = vadd.s32 %v478_v26, %v474_v43  ;;  %v801_v24 = vadd.s32 %v800_v45, %v791_v58  ;;  %v468_v14 = vadd.s32 %v467_v0, %v457_v50  ;;  %v12976_v0 = vld [vmem:[#allocation118_spill] sm:$0xff] }
 0x179   :  { %v483_v30 = vsel %vm482_vm5, 1, %v12607_v46  ;;  %vm804_vm6 = vc.u32 %v9408_v22, %v9422_v33  ;;  %v609_v42 = vmul.u32 %v12974_v5, %v8725_v25  ;;  %12975 = vst [vmem:[#allocation82_spill] sm:$0xff] %v9434_v9  ;;  %v459_v47 = vshrl.u32 %v454_v12, 16  ;;  %v12979_v5 = vld [vmem:[#allocation46_spill] sm:$0xff] }
 0x17a   :  { %v485_v59 = vadd.s32 %v483_v30, %v12972_v20  ;;  %vm486_vm7 = vc.u32 %v484_v56, %v480_v37  ;;  %v805_v16 = vadd.s32 1, %v801_v24  ;;  %v479_v62 = vshrl.u32 %v12971_v60, 16  ;;  %v12977_v20 = vld [vmem:[#allocation47_spill] sm:$0xff]  ;;  %v12982_v60 = vld [vmem:[#allocation70_spill] sm:$0xff] }
 0x17b   :  { %v487_v21 = vsel %vm486_vm7, 1, %v12607_v46  ;;  %v613_v43 = vshll.u32 %v609_v42, 16  ;;  %v616_v26 = vsel %vm9370_vm1, 1, %v12607_v46  ;;  %v9441_v45 = vadd.s32 %v468_v14, %v459_v47  ;;  %7556 = vrot.lane.b32.xlu0 %v9434_v9, %s7820_s27  ;;  %v12986_v14 = vld [vmem:[#allocation111_spill] sm:$0xff] }
 0x17c   :  { %v489_v23 = vadd.s32 %v487_v21, %v485_v59  ;;  %v806_v58 = vsel %vm804_vm6, %v805_v16, %v801_v24  ;;  %v481_v50 = vshrl.u32 %v476_v27, 16  ;;  %v618_v30 = vadd.s32 %v616_v26, %v12976_v0  ;;  %v12983_v59 = vld [vmem:[#allocation77_spill] sm:$0xff]  ;;  %v12985_v24 = vld [vmem:[#allocation123_spill] sm:$0xff]  ;;  %v12987_v16 = vld [vmem:[#allocation112_spill] sm:$0xff] }
 0x17d   :  { %v12978_v48 = vshll.u32 %v12977_v20, 16  ;;  %v12984_v21 = vmul.u32 %v12982_v60, %v12983_v59  ;;  %v9454_v54 = vadd.s32 %v484_v56, %v480_v37  ;;  %vm619_vm9 = vc.u32 %v12985_v24, %v613_v43  ;;  %v12996_v9 = vld [vmem:[#allocation43_spill] sm:$0xff] }
 0x17e   :  { %v490_v61 = vadd.s32 %v489_v23, %v479_v62  ;;  %v620_v27 = vsel %vm619_vm9, 1, %v12607_v46  ;;  %v12988_v47 = vand.u32 65535, %v12987_v16  ;;  %v612_v24 = vshrl.u32 %v8716_v29, 16  ;;  %v12992_v29 = vld [vmem:[#allocation80_spill] sm:$0xff] }
 0x17f   :  { %vm9447_vm8 = vc.u32 %v12979_v5, %v12978_v48  ;;  %v807_v63 = vadd.s32 %v806_v58, %v12984_v21  ;;  %v12990_v5 = vld [vmem:[#allocation121_spill] sm:$0xff]  ;;  %v622_v23 = vadd.s32 %v620_v27, %v618_v30  ;;  %vm494_vm10 = vc.u32 %v9441_v45, %v9454_v54 }
 0x180   :  { %v629_v26 = vmul.u32 %v12988_v47, %v12986_v14  ;;  %v12989_v0 = vmov %v12988_v47  ;;  %v633_v58 = vshll.u32 %v12990_v5, 16  ;;  %v491_v62 = vadd.s32 %v490_v61, %v481_v50  ;;  %v12991_v47 = vld [vmem:[#allocation122_spill] sm:$0xff] }
 0x181   :  { %v631_v48 = vmul.u32 %v12989_v0, %v8725_v25  ;;  %v808_v56 = vadd.s32 536870912, %v807_v63  ;;  %v2311_v16 = vshrl.u32 %v9394_v28, 16  ;;  %v9479_v30 = vand.u32 31, %v9363_v1 }
 0x182   :  { %vm637_vm11 = vc.u32 %v629_v26, %v633_v58  ;;  %v639_v60 = vadd.s32 %v633_v58, %v629_v26  ;;  %v495_v21 = vadd.s32 1, %v491_v62  ;;  %v623_v26 = vadd.s32 %v622_v23, %v612_v24  ;;  %v12993_v58 = vld [vmem:[#allocation81_spill] sm:$0xff] }
 0x183   :  { %v635_v43 = vshll.u32 %v631_v48, 16  ;;  %v9471_v59 = vshrl.u32 %v808_v56, 30  ;;  %v638_v25 = vsel %vm637_vm11, 1, %v12607_v46  ;;  %v9483_v0 = vmul.u32 %v2333_v32, %v9209_v19 }
 0x184   :  { %v640_v50 = vadd.s32 %v638_v25, %v12991_v47  ;;  %v496_v27 = vsel %vm494_vm10, %v495_v21, %v491_v62  ;;  %v12994_v56 = vmul.u32 %v12992_v29, %v12993_v58  ;;  %v12997_v25 = vand.u32 65535, %v12996_v9 }
 0x185   :  { %vm641_vm12 = vc.u32 %v639_v60, %v635_v43  ;;  %v810_v61 = vshll.u32 %v9471_v59, 30  ;;  %v614_v7 = vshrl.u32 %v609_v42, 16  ;;  %v634_v62 = vshrl.u32 %v12990_v5, 16 }
 0x186   :  { %v497_v37 = vadd.s32 %v496_v27, %v12994_v56  ;;  %v642_v14 = vsel %vm641_vm12, 1, %v12607_v46  ;;  %v9492_v47 = vmul.u32 %v12997_v25, %v12995_v41  ;;  %v12998_v21 = vand.u32 65535, %v9394_v28 }
 0x187   :  { %v9494_v1 = vsub.s32 %v807_v63, %v810_v61  ;;  %v644_v23 = vadd.s32 %v642_v14, %v640_v50  ;;  %v9503_v27 = vmul.u32 %v2333_v32, %v9212_v39  ;;  %v9508_v9 = vadd.s32 %v623_v26, %v614_v7  ;;  %v13000_v7 = vld [vmem:[#allocation55_spill] sm:$0xff] }
 0x188   :  { %v9500_v24 = vmul.u32 %v12998_v21, %v9209_v19  ;;  %v498_v29 = vadd.s32 536870912, %v497_v37  ;;  %v1233_v58 = vshll.u32 %v9492_v47, 16  ;;  %v9511_v5 = vmul.u32 %v2311_v16, %v9209_v19 }
 0x189   :  { %12999 = vst [vmem:[#allocation83_spill] sm:$0xff] %v9503_v27  ;;  %vm812_vm13 = vcmp.lt.s32.totalorder %v9494_v1, 0  ;;  %v813_v63 = vsub.s32 0, %v9494_v1  ;;  %v645_v42 = vadd.s32 %v644_v23, %v634_v62  ;;  %v636_v50 = vshrl.u32 %v631_v48, 16 }
 0x18a   :  { %v9513_v14 = vshrl.u32 %v498_v29, 30  ;;  %v1236_v32 = vsel %vm9447_vm8, 1, %v12607_v46  ;;  %v9519_v61 = vmul.u32 %v2311_v16, %v9212_v39  ;;  %v9522_v25 = vadd.s32 %v639_v60, %v635_v43  ;;  %v13001_v43 = vld [vmem:[#allocation48_spill] sm:$0xff] }
 0x18b   :  { %v814_v56 = vsel %vm812_vm13, %v813_v63, %v9494_v1  ;;  %vm1239_vm14 = vc.u32 %v13000_v7, %v1233_v58  ;;  %v9526_v26 = vsub.s32 32, %v9479_v30  ;;  %v646_v48 = vadd.s32 %v645_v42, %v636_v50  ;;  %v13002_v7 = vld [vmem:[#allocation42_spill] sm:$0xff] }
 0x18c   :  { %v815_v62 = vclz %v814_v56  ;;  %v500_v23 = vshll.u32 %v9513_v14, 30  ;;  %v9531_v12 = vshll.u32 %v12786_v8, %v9479_v30  ;;  %v9535_v16 = vshll.u32 %v12802_v17, %v9479_v30 }
 0x18d   :  { %vm649_vm0 = vc.u32 %v9508_v9, %v9522_v25  ;;  %v1238_v60 = vadd.s32 %v1236_v32, %v13001_v43  ;;  %v650_v58 = vadd.s32 1, %v646_v48  ;;  %v1240_v63 = vsel %vm1239_vm14, 1, %v12607_v46  ;;  %v13004_v32 = vld [vmem:[#allocation33_spill] sm:$0xff] }
 0x18e   :  { %v7412_v21 = vadd.s32 4294967294, %v815_v62  ;;  %v9540_v29 = vsub.s32 %v497_v37, %v500_v23  ;;  %v9545_v42 = vshll.u32 %v12783_v38, %v9479_v30  ;;  %v803_v50 = vadd.s32 %v9422_v33, %v9408_v22  ;;  %v13006_v22 = vld [vmem:[#allocation49_spill] sm:$0xff] }
 0x18f   :  { %v1232_v56 = vshrl.u32 %v12977_v20, 16  ;;  %v13003_v35 = vand.u32 65535, %v13002_v7  ;;  %v651_v46 = vsel %vm649_vm0, %v650_v58, %v646_v48  ;;  %v1242_v18 = vadd.s32 %v1240_v63, %v1238_v60  ;;  %v13008_v58 = vld [vmem:[#allocation108_spill] sm:$0xff]  ;;  %v13009_v63 = vld [vmem:[#allocation114_spill] sm:$0xff] }
 0x190   :  { %vm7413_vm1 = vcmp.lt.s32.totalorder %v7412_v21, 0  ;;  %vm502_vm2 = vcmp.lt.s32.totalorder %v9540_v29, 0  ;;  %v503_v37 = vsub.s32 0, %v9540_v29  ;;  %v1253_v33 = vshll.u32 %v13006_v22, 16 }
 0x191   :  { %v9553_v6 = vmul.u32 %v13003_v35, %v12995_v41  ;;  %v13005_v62 = vmov %v13003_v35  ;;  %v818_v43 = vsel %vm7413_vm1, 0, %v7412_v21  ;;  %v493_v35 = vadd.s32 %v9454_v54, %v9441_v45 }
 0x192   :  { %v1249_v23 = vmul.u32 %v13005_v62, %v13004_v32  ;;  %v819_v20 = vsub.s32 32, %v818_v43  ;;  %v823_v10 = vsub.s32 4294967266, %v818_v43  ;;  %v504_v41 = vsel %vm502_vm2, %v503_v37, %v9540_v29  ;;  %v13007_v32 = vld [vmem:[#allocation37_spill] sm:$0xff] }
 0x193   :  { %v833_v44 = vsub.s32 4, %v9471_v59  ;;  %v505_v34 = vclz %v504_v41  ;;  %v1234_v11 = vshrl.u32 %v9492_v47, 16  ;;  %v1255_v7 = vshll.u32 %v9553_v6, 16 }
 0x194   :  { %vm711_vm3 = vcmp.lt.s32.totalorder %v13007_v32, 0  ;;  %v820_v48 = vshll.u32 %v9494_v1, %v818_v43  ;;  %v821_v60 = vshrl.u32 %v803_v50, %v819_v20  ;;  %v824_v21 = vadd.s32 127, %v823_v10 }
 0x195   :  { %v13010_v62 = vmul.u32 %v13008_v58, %v13009_v63  ;;  %v7406_v54 = vadd.s32 4294967294, %v505_v34  ;;  %v1243_v45 = vadd.s32 %v1242_v18, %v1232_v56  ;;  %vm1257_vm4 = vc.u32 %v1249_v23, %v1253_v33  ;;  %v13016_v34 = vld [vmem:[#allocation50_spill] sm:$0xff] }
 0x196   :  { %v1259_v37 = vadd.s32 %v1253_v33, %v1249_v23  ;;  %vm401_vm5 = vcmp.lt.s32.totalorder %v13011_v57, 0  ;;  %v822_v41 = vor.u32 %v821_v60, %v820_v48  ;;  %v825_v47 = vshll.u32 %v824_v21, 23 }
 0x197   :  { %v652_v49 = vadd.s32 %v651_v46, %v13010_v62  ;;  %v13012_v53 = vmov 0   ;;  %v13013_v2 = vand.u32 2147483647, %v13007_v32  ;;  %vm7407_vm7 = vcmp.lt.s32.totalorder %v7406_v54, 0 }
 0x198   :  { %v1258_v27 = vsel %vm1257_vm4, 1, %v13012_v53  ;;  %v523_v46 = vsub.s32 4, %v9513_v14  ;;  %vm1261_vm8 = vc.u32 %v1259_v37, %v1255_v7  ;;  %v826_v10 = vor.u32 4788187, %v825_v47 }
 0x199   :  { %v653_v36 = vadd.s32 536870912, %v652_v49  ;;  %vm9576_vm6 = vcmp.le.f32.partialorder %v13013_v2, 0.7853982  ;;  %v1260_v18 = vadd.s32 %v1258_v27, %v13016_v34  ;;  %v508_v50 = vsel %vm7407_vm7, 0, %v7406_v54 }
 0x19a   :  { %v1254_v23 = vshrl.u32 %v13006_v22, 16  ;;  %v509_v43 = vsub.s32 32, %v508_v50  ;;  %v513_v33 = vsub.s32 4294967266, %v508_v50  ;;  %v9585_v20 = vadd.s32 %v1243_v45, %v1234_v11 }
 0x19b   :  { %v9582_v56 = vshrl.u32 %v653_v36, 30  ;;  %v1262_v2 = vsel %vm1261_vm8, 1, %v13012_v53  ;;  %v827_v48 = vand.u32 2147483647, %v826_v10  ;;  %v829_v60 = vcvt.s32.f32 %v822_v41 }
 0x19c   :  { %v1264_v58 = vadd.s32 %v1262_v2, %v1260_v18  ;;  %v510_v27 = vshll.u32 %v9540_v29, %v508_v50  ;;  %v511_v63 = vshrl.u32 %v493_v35, %v509_v43  ;;  %v514_v62 = vadd.s32 127, %v513_v33  ;;  %v13033_v35 = vld [vmem:[#allocation79_spill] sm:$0xff] }
 0x19d   :  { %v655_v21 = vshll.u32 %v9582_v56, 30  ;;  %v1256_v36 = vshrl.u32 %v9553_v6, 16  ;;  %v830_v54 = vmul.f32 %v829_v60, %v827_v48  ;;  %v9593_v22 = vadd.s32 %v1259_v37, %v1255_v7  ;;  %v13017_v6 = vld [vmem:[#allocation106_spill] sm:$0xff]  ;;  %v13019_v37 = vld [vmem:[#allocation113_spill] sm:$0xff] }
 0x19e   :  { %v1265_v11 = vadd.s32 %v1264_v58, %v1254_v23  ;;  %v9597_v45 = vshll.u32 %v12801_v4, %v9479_v30  ;;  %v834_v41 = vsel %vm711_vm3, %v833_v44, %v9471_v59  ;;  %v512_v34 = vor.u32 %v511_v63, %v510_v27 }
 0x19f   :  { %v9591_v47 = vsub.s32 %v652_v49, %v655_v21  ;;  %v515_v29 = vshll.u32 %v514_v62, 23  ;;  %v831_v18 = vxor.u32 2147483648, %v830_v54  ;;  %v13018_v7 = vshll.u32 %v13017_v6, 16 }
 0x1a0   :  { %v13022_v50 = vand.u32 2147483647, %v13011_v57  ;;  %v524_v23 = vsel %vm401_vm5, %v523_v46, %v9513_v14  ;;  %v1266_v43 = vadd.s32 %v1265_v11, %v1256_v36  ;;  %v9625_v2 = vsel %vm9576_vm6, 0, %v834_v41 }
 0x1a1   :  { %vm657_vm9 = vcmp.lt.s32.totalorder %v9591_v47, 0  ;;  %v658_v49 = vsub.s32 0, %v9591_v47  ;;  %vm9608_vm10 = vc.u32 %v13019_v37, %v13018_v7  ;;  %v516_v59 = vor.u32 4788187, %v515_v29  ;;  %13025 = vst [vmem:[#allocation84_spill] sm:$0xff] %v9625_v2  ;;  %v13028_v7 = vld [vmem:[#allocation41_spill] sm:$0xff] }
 0x1a2   :  { %vm9614_vm11 = vcmp.le.f32.partialorder %v13022_v50, 0.7853982  ;;  %v832_v33 = vsel %vm711_vm3, %v831_v18, %v830_v54  ;;  %vm1269_vm12 = vc.u32 %v9585_v20, %v9593_v22  ;;  %v519_v14 = vcvt.s32.f32 %v512_v34 }
 0x1a3   :  { %v659_v48 = vsel %vm657_vm9, %v658_v49, %v9591_v47  ;;  %v9633_v60 = vsel %vm9576_vm6, %v13007_v32, %v832_v33  ;;  %v517_v21 = vand.u32 2147483647, %v516_v59  ;;  %v9637_v58 = vshrl.u32 %v12786_v8, %v9526_v26 }
 0x1a4   :  { %v660_v46 = vclz %v659_v48  ;;  %v837_v27 = vmul.f32 %v9633_v60, %v9633_v60  ;;  %v9643_v63 = vsel %vm9614_vm11, 0, %v524_v23  ;;  %v1270_v62 = vadd.s32 1, %v1266_v43 }
 0x1a5   :  { %13026 = vst [vmem:[#allocation87_spill] sm:$0xff] %v9643_v63  ;;  %v9647_v1 = vshrl.u32 %v12802_v17, %v9526_v26  ;;  %v520_v36 = vmul.f32 %v519_v14, %v517_v21  ;;  %v648_v54 = vadd.s32 %v9522_v25, %v9508_v9  ;;  %v9652_v34 = vand.u32 3, %v9625_v2  ;;  %v13027_v17 = vld [vmem:[#allocation30_spill] sm:$0xff]  ;;  %v13031_v14 = vld [vmem:[#allocation100_spill] sm:$0xff] }
 0x1a6   :  { %v7409_v11 = vadd.s32 4294967294, %v660_v46  ;;  %v838_v41 = vmul.f32 -0.001358992, %v837_v27  ;;  %v845_v8 = vmul.f32 -0.00019511016, %v837_v27  ;;  %v1271_v29 = vsel %vm1269_vm12, %v1270_v62, %v1266_v43  ;;  %v13030_v43 = vld [vmem:[#allocation91_spill] sm:$0xff] }
 0x1a7   :  { %v521_v18 = vxor.u32 2147483648, %v520_v36  ;;  %v9658_v49 = vand.u32 3, %v9643_v63  ;;  %v13029_v37 = vmul.u32 %v13027_v17, %v13028_v7  ;;  %v678_v23 = vsub.s32 4, %v9582_v56 }
 0x1a8   :  { %vm7410_vm13 = vcmp.lt.s32.totalorder %v7409_v11, 0  ;;  %v839_v9 = vadd.f32 0.041655596, %v838_v41  ;;  %v846_v25 = vadd.f32 0.008332121, %v845_v8  ;;  %v13032_v46 = vand.u32 65535, %v13031_v14 }
 0x1a9   :  { %v1272_v50 = vadd.s32 %v1271_v29, %v13029_v37  ;;  %v663_v59 = vsel %vm7410_vm13, 0, %v7409_v11  ;;  %v522_v33 = vsel %vm401_vm5, %v521_v18, %v520_v36  ;;  %vm556_vm14 = vcmp.lt.s32.totalorder %v13033_v35, 0 }
 0x1aa   :  { %v664_v48 = vsub.s32 32, %v663_v59  ;;  %v668_v21 = vsub.s32 4294967266, %v663_v59  ;;  %v9669_v62 = vmul.u32 %v13032_v46, %v13030_v43  ;;  %v840_v2 = vmul.f32 %v839_v9, %v837_v27 }
 0x1ab   :  { %v847_v17 = vmul.f32 %v846_v25, %v837_v27  ;;  %v9675_v11 = vsel %vm9614_vm11, %v13011_v57, %v522_v33  ;;  %v1273_v41 = vadd.s32 536870912, %v1272_v50  ;;  %v665_v8 = vshll.u32 %v9591_v47, %v663_v59  ;;  %v13045_v47 = vld [vmem:[#allocation90_spill] sm:$0xff] }
 0x1ac   :  { %v527_v36 = vmul.f32 %v9675_v11, %v9675_v11  ;;  %v666_v29 = vshrl.u32 %v648_v54, %v664_v48  ;;  %v669_v18 = vadd.s32 127, %v668_v21  ;;  %v841_v7 = vadd.f32 -0.4999988, %v840_v2 }
 0x1ad   :  { %v848_v37 = vadd.f32 -0.16666654, %v847_v17  ;;  %v9680_v14 = vshrl.u32 %v1273_v41, 30  ;;  %v926_v9 = vsel %vm9608_vm10, 1, %v13012_v53  ;;  %vm3333_vm0 = vcmp.eq.s32.totalorder %v9652_v34, 0 }
 0x1ae   :  { %vm3336_vm1 = vcmp.eq.s32.totalorder %v9652_v34, 2  ;;  %v528_v44 = vmul.f32 -0.001358992, %v527_v36  ;;  %v535_v25 = vmul.f32 -0.00019511016, %v527_v36  ;;  %v667_v2 = vor.u32 %v666_v29, %v665_v8  ;;  %v13038_v8 = vld [vmem:[#allocation117_spill] sm:$0xff] }
 0x1af   :  { %v13034_v33 = vand.u32 2147483647, %v13033_v35  ;;  %v670_v54 = vshll.u32 %v669_v18, 23  ;;  %v842_v59 = vmul.f32 %v841_v7, %v837_v27  ;;  %v849_v48 = vmul.f32 %v848_v37, %v837_v27 }
 0x1b0   :  { %vm3332_vm3 = vcmp.lt.s32.totalorder %v9652_v34, 2  ;;  %v1275_v10 = vshll.u32 %v9680_v14, 30  ;;  %v923_v21 = vshll.u32 %v9669_v62, 16  ;;  %vm12695_vm4 = vweird.f32 %v13007_v32  ;;  %v13056_v32 = vld [vmem:[#allocation22_spill] sm:$0xff] }
 0x1b1   :  { %vm9689_vm2 = vcmp.le.f32.partialorder %v13034_v33, 0.7853982  ;;  %v529_v46 = vadd.f32 0.041655596, %v528_v44  ;;  %v536_v17 = vadd.f32 0.008332121, %v535_v25  ;;  %v674_v37 = vcvt.s32.f32 %v667_v2 }
 0x1b2   :  { %v671_v41 = vor.u32 4788187, %v670_v54  ;;  %v9697_v63 = vadd.f32 1.0, %v842_v59  ;;  %v850_v33 = vadd.f32 1.0, %v849_v48  ;;  %v9699_v13 = vsub.s32 %v1272_v50, %v1275_v10  ;;  %v13042_v10 = vld [vmem:[#allocation115_spill] sm:$0xff] }
 0x1b3   :  { %vm9702_vm5 = vc.u32 %v13038_v8, %v923_v21  ;;  %v530_v27 = vmul.f32 %v529_v46, %v527_v36  ;;  %v537_v18 = vmul.f32 %v536_v17, %v527_v36  ;;  %vm3028_vm7 = vcmp.eq.s32.totalorder %v9658_v49, 2 }
 0x1b4   :  { %13037 = vst [vmem:[#allocation107_spill] sm:$0xff] %v9697_v63  ;;  %v672_v7 = vand.u32 2147483647, %v671_v41  ;;  %v9707_v19 = vmul.f32 %v850_v33, %v9633_v60  ;;  %v12625_v44 = vxor.u32 2147483648, %v9697_v63  ;;  %vm1277_vm6 = vcmp.lt.s32.totalorder %v9699_v13, 0 }
 0x1b5   :  { %v1278_v25 = vsub.s32 0, %v9699_v13  ;;  %v531_v50 = vadd.f32 -0.4999988, %v530_v27  ;;  %v538_v54 = vadd.f32 -0.16666654, %v537_v18  ;;  %v679_v48 = vsel %vm556_vm14, %v678_v23, %v9582_v56 }
 0x1b6   :  { %13041 = vst [vmem:[#allocation118_spill] sm:$0xff] %v9707_v19  ;;  %v675_v59 = vmul.f32 %v674_v37, %v672_v7  ;;  %v12626_v2 = vxor.u32 2147483648, %v9707_v19  ;;  %vm3025_vm8 = vcmp.eq.s32.totalorder %v9658_v49, 0  ;;  %v928_v21 = vadd.s32 %v926_v9, %v13042_v10 }
 0x1b7   :  { %v1279_v60 = vsel %vm1277_vm6, %v1278_v25, %v9699_v13  ;;  %v930_v46 = vsel %vm9702_vm5, 1, %v13012_v53  ;;  %v532_v17 = vmul.f32 %v531_v50, %v527_v36  ;;  %v539_v41 = vmul.f32 %v538_v54, %v527_v36 }
 0x1b8   :  { %vm3024_vm9 = vcmp.lt.s32.totalorder %v9658_v49, 2  ;;  %v676_v33 = vxor.u32 2147483648, %v675_v59  ;;  %v1280_v8 = vclz %v1279_v60  ;;  %v3335_v56 = vsel %vm3333_vm0, %v9697_v63, %v12626_v2 }
 0x1b9   :  { %v3338_v23 = vsel %vm3336_vm1, %v12625_v44, %v9707_v19  ;;  %vm542_vm10 = vweird.f32 %v13011_v57  ;;  %v9737_v36 = vsel %vm9689_vm2, 0, %v679_v48  ;;  %v1268_v9 = vadd.s32 %v9593_v22, %v9585_v20  ;;  %v13046_v48 = vld [vmem:[#allocation101_spill] sm:$0xff] }
 0x1ba   :  { %13043 = vst [vmem:[#allocation47_spill] sm:$0xff] %v9737_v36  ;;  %v3339_v29 = vsel %vm3332_vm3, %v3335_v56, %v3338_v23  ;;  %v9743_v27 = vadd.f32 1.0, %v532_v17  ;;  %v540_v18 = vadd.f32 1.0, %v539_v41  ;;  %v677_v7 = vsel %vm556_vm14, %v676_v33, %v675_v59  ;;  %v13049_v17 = vld [vmem:[#allocation110_spill] sm:$0xff]  ;;  %v13050_v41 = vld [vmem:[#allocation32_spill] sm:$0xff] }
 0x1bb   :  { %v9749_v37 = vsel %vm12695_vm4, nan, %v3339_v29  ;;  %v9754_v25 = vsel %vm9689_vm2, %v13033_v35, %v677_v7  ;;  %v7421_v50 = vadd.s32 4294967294, %v1280_v8  ;;  %v932_v20 = vadd.s32 %v930_v46, %v928_v21  ;;  %v13052_v8 = vld [vmem:[#allocation35_spill] sm:$0xff] }
 0x1bc   :  { %13044 = vst [vmem:[#allocation46_spill] sm:$0xff] %v9749_v37  ;;  %5496 = vrot.lane.b32.xlu0 %v9749_v37, %s7822_s9  ;;  %v9759_v22 = vmul.f32 %v540_v18, %v9675_v11  ;;  %v12627_v34 = vxor.u32 2147483648, %v9743_v27  ;;  %v682_v54 = vmul.f32 %v9754_v25, %v9754_v25  ;;  %v922_v59 = vshrl.u32 %v13017_v6, 16 }
 0x1bd   :  { %vm7422_vm11 = vcmp.lt.s32.totalorder %v7421_v50, 0  ;;  %v13047_v60 = vand.u32 65535, %v13046_v48  ;;  %v943_v11 = vshll.u32 %v13049_v17, 16  ;;  %v13051_v33 = vshll.u32 %v13050_v41, 16 }
 0x1be   :  { %v12631_v6 = vxor.u32 2147483648, %v9759_v22  ;;  %v683_v23 = vmul.f32 -0.001358992, %v682_v54  ;;  %v690_v29 = vmul.f32 -0.00019511016, %v682_v54  ;;  %v9783_v18 = vand.u32 3, %v9737_v36 }
 0x1bf   :  { %v939_v10 = vmul.u32 %v13047_v60, %v13045_v47  ;;  %v13048_v21 = vmov %v13047_v60  ;;  %vm9777_vm12 = vc.u32 %v13052_v8, %v13051_v33  ;;  %v1283_v7 = vsel %vm7422_vm11, 0, %v7421_v50 }
 0x1c0   :  { %v9771_v46 = vmul.u32 %v13048_v21, %v13030_v43  ;;  %v3030_v43 = vsel %vm3028_vm7, %v12627_v34, %v9759_v22  ;;  %v933_v47 = vadd.s32 %v932_v20, %v922_v59  ;;  %v3027_v48 = vsel %vm3025_vm8, %v9743_v27, %v12631_v6 }
 0x1c1   :  { %vm947_vm13 = vc.u32 %v939_v10, %v943_v11  ;;  %v684_v60 = vadd.f32 0.041655596, %v683_v23  ;;  %v691_v21 = vadd.f32 0.008332121, %v690_v29  ;;  %v1284_v33 = vsub.s32 32, %v1283_v7 }
 0x1c2   :  { %v3031_v8 = vsel %vm3024_vm9, %v3027_v48, %v3030_v43  ;;  %v1288_v44 = vsub.s32 4294967266, %v1283_v7  ;;  %v945_v2 = vshll.u32 %v9771_v46, 16  ;;  %v948_v34 = vsel %vm947_vm13, 1, %v13012_v53  ;;  %v13057_v43 = vld [vmem:[#allocation116_spill] sm:$0xff] }
 0x1c3   :  { %v9801_v50 = vsel %vm542_vm10, nan, %v3031_v8  ;;  %v685_v20 = vmul.f32 %v684_v60, %v682_v54  ;;  %v692_v59 = vmul.f32 %v691_v21, %v682_v54  ;;  %v1286_v37 = vshrl.u32 %v1268_v9, %v1284_v33  ;;  %v13058_v21 = vld [vmem:[#allocation29_spill] sm:$0xff]  ;;  %v13059_v33 = vld [vmem:[#allocation27_spill] sm:$0xff] }
 0x1c4   :  { %13055 = vst [vmem:[#allocation70_spill] sm:$0xff] %v9801_v50  ;;  %vm1176_vm14 = vcmp.lt.s32.totalorder %v13056_v32, 0  ;;  %5492 = vrot.lane.b32.xlu1 %v9801_v50, %s7822_s9  ;;  %v1285_v49 = vshll.u32 %v9699_v13, %v1283_v7  ;;  %v1289_v23 = vadd.s32 127, %v1288_v44  ;;  %v949_v29 = vadd.s32 %v943_v11, %v939_v10 }
 0x1c5   :  { %v950_v48 = vadd.s32 %v948_v34, %v13057_v43  ;;  %v686_v6 = vadd.f32 -0.4999988, %v685_v20  ;;  %v693_v63 = vadd.f32 -0.16666654, %v692_v59  ;;  %v1298_v19 = vsub.s32 4, %v9680_v14 }
 0x1c6   :  { %v924_v8 = vshrl.u32 %v9669_v62, 16  ;;  %vm3179_vm0 = vcmp.eq.s32.totalorder %v9783_v18, 0  ;;  %vm3182_vm1 = vcmp.eq.s32.totalorder %v9783_v18, 2  ;;  %v1287_v9 = vor.u32 %v1286_v37, %v1285_v49  ;;  %v13083_v37 = vld [vmem:[#allocation39_spill] sm:$0xff] }
 0x1c7   :  { %v1290_v60 = vshll.u32 %v1289_v23, 23  ;;  %vm951_vm2 = vc.u32 %v949_v29, %v945_v2  ;;  %v13060_v13 = vand.u32 65535, %v13059_v33  ;;  %v687_v10 = vmul.f32 %v686_v6, %v682_v54 }
 0x1c8   :  { %v694_v34 = vmul.f32 %v693_v63, %v682_v54  ;;  %vm3178_vm3 = vcmp.lt.s32.totalorder %v9783_v18, 2  ;;  %v9818_v11 = vadd.s32 %v933_v47, %v924_v8  ;;  %v952_v62 = vsel %vm951_vm2, 1, %v13012_v53  ;;  %v13081_v18 = vld [vmem:[#allocation105_spill] sm:$0xff] }
 0x1c9   :  { %v9815_v44 = vmul.u32 %v13060_v13, %v13058_v21  ;;  %vm697_vm5 = vweird.f32 %v13033_v35  ;;  %v13061_v7 = vand.u32 2147483647, %v13056_v32  ;;  %v1291_v20 = vor.u32 4788187, %v1290_v60 }
 0x1ca   :  { %v944_v59 = vshrl.u32 %v13049_v17, 16  ;;  %v946_v6 = vshrl.u32 %v9771_v46, 16  ;;  %v954_v63 = vadd.s32 %v952_v62, %v950_v48  ;;  %v9830_v54 = vadd.f32 1.0, %v687_v10  ;;  %v13066_v17 = vld [vmem:[#allocation36_spill] sm:$0xff] }
 0x1cb   :  { %vm9824_vm6 = vcmp.le.f32.partialorder %v13061_v7, 0.7853982  ;;  %v695_v47 = vadd.f32 1.0, %v694_v34  ;;  %v9832_v49 = vadd.s32 %v949_v29, %v945_v2  ;;  %v1078_v23 = vshll.u32 %v9815_v44, 16  ;;  %v13067_v10 = vld [vmem:[#allocation40_spill] sm:$0xff] }
 0x1cc   :  { %13064 = vst [vmem:[#allocation77_spill] sm:$0xff] %v9830_v54  ;;  %v1292_v43 = vand.u32 2147483647, %v1291_v20  ;;  %v1294_v8 = vcvt.s32.f32 %v1287_v9  ;;  %v955_v33 = vadd.s32 %v954_v63, %v944_v59  ;;  %v1081_v13 = vsel %vm9777_vm12, 1, %v13012_v53  ;;  %v13068_v62 = vld [vmem:[#allocation28_spill] sm:$0xff]  ;;  %v13069_v9 = vld [vmem:[#allocation31_spill] sm:$0xff] }
 0x1cd   :  { %v9839_v60 = vmul.f32 %v695_v47, %v9754_v25  ;;  %v12636_v46 = vxor.u32 2147483648, %v9830_v54  ;;  %v1083_v48 = vadd.s32 %v1081_v13, %v13066_v17  ;;  %vm1084_vm7 = vc.u32 %v13067_v10, %v1078_v23  ;;  %v13075_v17 = vld [vmem:[#allocation58_spill] sm:$0xff]  ;;  %v13089_v10 = vld [vmem:[#allocation60_spill] sm:$0xff] }
 0x1ce   :  { %v1295_v2 = vmul.f32 %v1294_v8, %v1292_v43  ;;  %v956_v29 = vadd.s32 %v955_v33, %v946_v6  ;;  %v1085_v34 = vsel %vm1084_vm7, 1, %v13012_v53  ;;  %v13070_v7 = vand.u32 65535, %v13069_v9  ;;  %v13072_v43 = vld [vmem:[#allocation38_spill] sm:$0xff]  ;;  %v13073_v33 = vld [vmem:[#allocation57_spill] sm:$0xff] }
 0x1cf   :  { %13065 = vst [vmem:[#allocation123_spill] sm:$0xff] %v9839_v60  ;;  %v12637_v56 = vxor.u32 2147483648, %v9839_v60  ;;  %v1299_v25 = vsel %vm1176_vm14, %v1298_v19, %v9680_v14  ;;  %vm959_vm8 = vc.u32 %v9818_v11, %v9832_v49  ;;  %v1077_v23 = vshrl.u32 %v13050_v41, 16 }
 0x1d0   :  { %v1094_v20 = vmul.u32 %v13070_v7, %v13068_v62  ;;  %v13071_v59 = vmov %v13070_v7  ;;  %v1296_v6 = vxor.u32 2147483648, %v1295_v2  ;;  %v960_v47 = vadd.s32 1, %v956_v29 }
 0x1d1   :  { %v1096_v63 = vmul.u32 %v13071_v59, %v13058_v21  ;;  %v1098_v8 = vshll.u32 %v13072_v43, 16  ;;  %v13074_v13 = vshll.u32 %v13073_v33, 16  ;;  %v3181_v19 = vsel %vm3179_vm0, %v9830_v54, %v12637_v56 }
 0x1d2   :  { %v3184_v14 = vsel %vm3182_vm1, %v12636_v46, %v9839_v60  ;;  %v1087_v41 = vadd.s32 %v1085_v34, %v1083_v48  ;;  %v1297_v9 = vsel %vm1176_vm14, %v1296_v6, %v1295_v2  ;;  %v961_v7 = vsel %vm959_vm8, %v960_v47, %v956_v29  ;;  %v13080_v34 = vld [vmem:[#allocation86_spill] sm:$0xff] }
 0x1d3   :  { %vm9862_vm9 = vc.u32 %v13075_v17, %v13074_v13  ;;  %v1100_v21 = vshll.u32 %v1096_v63, 16  ;;  %v3185_v62 = vsel %vm3178_vm3, %v3181_v19, %v3184_v14  ;;  %vm1102_vm11 = vc.u32 %v1094_v20, %v1098_v8 }
 0x1d4   :  { %v9882_v59 = vsel %vm697_vm5, nan, %v3185_v62  ;;  %v1300_v13 = vsel %vm9824_vm6, %v13056_v32, %v1297_v9  ;;  %v9889_v48 = vsel %vm9824_vm6, 0, %v1299_v25  ;;  %v13082_v17 = vmul.u32 %v13080_v34, %v13081_v18  ;;  %v13084_v34 = vld [vmem:[#allocation53_spill] sm:$0xff] }
 0x1d5   :  { %13078 = vst [vmem:[#allocation111_spill] sm:$0xff] %v9882_v59  ;;  %5494 = vrot.lane.b32.xlu2 %v9882_v59, %s7822_s9  ;;  %v1302_v2 = vmul.f32 %v1300_v13, %v1300_v13  ;;  %v1079_v29 = vshrl.u32 %v9815_v44, 16  ;;  %v1103_v6 = vsel %vm1102_vm11, 1, %v13012_v53  ;;  %v1104_v47 = vadd.s32 %v1098_v8, %v1094_v20 }
 0x1d6   :  { %13079 = vst [vmem:[#allocation112_spill] sm:$0xff] %v9889_v48  ;;  %v962_v19 = vadd.s32 %v961_v7, %v13082_v17  ;;  %v1088_v62 = vadd.s32 %v1087_v41, %v1077_v23  ;;  %v1099_v9 = vshrl.u32 %v13072_v43, 16  ;;  %v1105_v25 = vadd.s32 %v1103_v6, %v13083_v37  ;;  %v13085_v7 = vld [vmem:[#allocation51_spill] sm:$0xff] }
 0x1d7   :  { %v1303_v46 = vmul.f32 -0.001358992, %v1302_v2  ;;  %v1310_v56 = vmul.f32 -0.00019511016, %v1302_v2  ;;  %vm1106_vm12 = vc.u32 %v1104_v47, %v1100_v21  ;;  %v13086_v18 = vand.u32 65535, %v13085_v7 }
 0x1d8   :  { %v963_v14 = vadd.s32 536870912, %v962_v19  ;;  %v9907_v44 = vshrl.u32 %v12783_v38, %v9526_v26  ;;  %v9911_v20 = vshrl.u32 %v12801_v4, %v9526_v26  ;;  %v1107_v43 = vsel %vm1106_vm12, 1, %v13012_v53 }
 0x1d9   :  { %v9903_v17 = vmul.u32 %v13086_v18, %v13084_v34  ;;  %v1304_v8 = vadd.f32 0.041655596, %v1303_v46  ;;  %v1311_v41 = vadd.f32 0.008332121, %v1310_v56  ;;  %v1101_v6 = vshrl.u32 %v1096_v63, 16 }
 0x1da   :  { %v9913_v23 = vshrl.u32 %v963_v14, 30  ;;  %v1109_v37 = vadd.s32 %v1107_v43, %v1105_v25  ;;  %v3793_v7 = vand.u32 3, %v9889_v48  ;;  %v9918_v59 = vadd.s32 %v1088_v62, %v1079_v29 }
 0x1db   :  { %v9920_v38 = vadd.s32 %v1104_v47, %v1100_v21  ;;  %v1305_v50 = vmul.f32 %v1304_v8, %v1302_v2  ;;  %v1312_v35 = vmul.f32 %v1311_v41, %v1302_v2  ;;  %v1698_v14 = vshll.u32 %v9903_v17, 16 }
 0x1dc   :  { %v965_v18 = vshll.u32 %v9913_v23, 30  ;;  %v1110_v4 = vadd.s32 %v1109_v37, %v1099_v9  ;;  %v9925_v54 = vshrl.u32 %v12797_v15, %v9526_v26  ;;  %v9929_v46 = vshll.u32 %v12797_v15, %v9479_v30  ;;  %v13091_v37 = vld [vmem:[#allocation24_spill] sm:$0xff] }
 0x1dd   :  { %v9933_v56 = vshrl.u32 %v12798_v3, %v9526_v26  ;;  %v1306_v21 = vadd.f32 -0.4999988, %v1305_v50  ;;  %v1313_v29 = vadd.f32 -0.16666654, %v1312_v35  ;;  %v1701_v62 = vsel %vm9862_vm9, 1, %v13012_v53  ;;  %v13088_v35 = vld [vmem:[#allocation67_spill] sm:$0xff] }
 0x1de   :  { %v9935_v63 = vsub.s32 %v962_v19, %v965_v18  ;;  %v1111_v47 = vadd.s32 %v1110_v4, %v1101_v6  ;;  %v13087_v9 = vshll.u32 %v9511_v5, 16  ;;  %vm1114_vm14 = vc.u32 %v9918_v59, %v9920_v38  ;;  %v13092_v18 = vld [vmem:[#allocation26_spill] sm:$0xff] }
 0x1df   :  { %v1307_v3 = vmul.f32 %v1306_v21, %v1302_v2  ;;  %v1314_v30 = vmul.f32 %v1313_v29, %v1302_v2  ;;  %vm3794_vm0 = vcmp.lt.s32.totalorder %v3793_v7, 2  ;;  %vm1704_vm1 = vc.u32 %v13088_v35, %v1698_v14  ;;  %v13094_v14 = vld [vmem:[#allocation52_spill] sm:$0xff] }
 0x1e0   :  { %v9943_v25 = vadd.s32 %v13087_v9, %v9500_v24  ;;  %vm967_vm13 = vcmp.lt.s32.totalorder %v9935_v63, 0  ;;  %v968_v15 = vsub.s32 0, %v9935_v63  ;;  %v1115_v26 = vadd.s32 1, %v1111_v47  ;;  %v13095_v29 = vld [vmem:[#allocation56_spill] sm:$0xff] }
 0x1e1   :  { %vm12673_vm2 = vweird.f32 %v13056_v32  ;;  %vm3795_vm3 = vcmp.eq.s32.totalorder %v3793_v7, 0  ;;  %vm3798_vm6 = vcmp.eq.s32.totalorder %v3793_v7, 2  ;;  %v1703_v19 = vadd.s32 %v1701_v62, %v13089_v10 }
 0x1e2   :  { %v969_v50 = vsel %vm967_vm13, %v968_v15, %v9935_v63  ;;  %v9953_v43 = vadd.f32 1.0, %v1307_v3  ;;  %v1315_v8 = vadd.f32 1.0, %v1314_v30  ;;  %v1116_v6 = vsel %vm1114_vm14, %v1115_v26, %v1111_v47  ;;  %v13099_v30 = vld [vmem:[#allocation61_spill] sm:$0xff] }
 0x1e3   :  { %v970_v41 = vclz %v969_v50  ;;  %v13093_v2 = vmul.u32 %v13091_v37, %v13092_v18  ;;  %v1705_v21 = vsel %vm1704_vm1, 1, %v13012_v53  ;;  %v13096_v9 = vand.u32 65535, %v13095_v29  ;;  %v13100_v18 = vld [vmem:[#allocation76_spill] sm:$0xff] }
 0x1e4   :  { %13090 = vst [vmem:[#allocation121_spill] sm:$0xff] %v9953_v43  ;;  %v9967_v62 = vmul.f32 %v1315_v8, %v1300_v13  ;;  %v12649_v3 = vxor.u32 2147483648, %v9953_v43  ;;  %v1718_v26 = vshll.u32 %v13099_v30, 16  ;;  %v958_v50 = vadd.s32 %v9832_v49, %v9818_v11 }
 0x1e5   :  { %v1117_v4 = vadd.s32 %v1116_v6, %v13093_v2  ;;  %v1714_v35 = vmul.u32 %v13096_v9, %v13094_v14  ;;  %v13097_v15 = vmov %v13096_v9  ;;  %v7415_v47 = vadd.s32 4294967294, %v970_v41  ;;  %v13101_v2 = vld [vmem:[#allocation144_spill] sm:$0xff] }
 0x1e6   :  { %v9965_v48 = vmul.u32 %v13097_v15, %v13084_v34  ;;  %13098 = vst [vmem:[#allocation122_spill] sm:$0xff] %v9967_v62  ;;  %v988_v10 = vsub.s32 4, %v9913_v23  ;;  %v1697_v37 = vshrl.u32 %v13073_v33, 16  ;;  %vm866_vm7 = vcmp.lt.s32.totalorder %v13100_v18, 0 }
 0x1e7   :  { %v1118_v6 = vadd.s32 536870912, %v1117_v4  ;;  %v13102_v34 = vshll.u32 %v13101_v2, 16  ;;  %v12646_v8 = vxor.u32 2147483648, %v9967_v62  ;;  %vm7416_vm9 = vcmp.lt.s32.totalorder %v7415_v47, 0 }
 0x1e8   :  { %v1707_v41 = vadd.s32 %v1705_v21, %v1703_v19  ;;  %v1720_v11 = vshll.u32 %v9965_v48, 16  ;;  %v973_v49 = vsel %vm7416_vm9, 0, %v7415_v47  ;;  %vm1722_vm11 = vc.u32 %v1714_v35, %v1718_v26 }
 0x1e9   :  { %vm9979_vm8 = vc.u32 %v8979_v31, %v13102_v34  ;;  %v9985_v14 = vshrl.u32 %v1118_v6, 30  ;;  %v1724_v33 = vadd.s32 %v1718_v26, %v1714_v35  ;;  %v3797_v29 = vsel %vm3795_vm3, %v9953_v43, %v12646_v8  ;;  %v13106_v8 = vld [vmem:[#allocation62_spill] sm:$0xff] }
 0x1ea   :  { %v3800_v31 = vsel %vm3798_vm6, %v12649_v3, %v9967_v62  ;;  %v974_v9 = vsub.s32 32, %v973_v49  ;;  %v978_v15 = vsub.s32 4294967266, %v973_v49  ;;  %v975_v21 = vshll.u32 %v9935_v63, %v973_v49 }
 0x1eb   :  { %v3801_v19 = vsel %vm3794_vm0, %v3797_v29, %v3800_v31  ;;  %v1120_v47 = vshll.u32 %v9985_v14, 30  ;;  %v1723_v35 = vsel %vm1722_vm11, 1, %v13012_v53  ;;  %v1699_v7 = vshrl.u32 %v9903_v17, 16 }
 0x1ec   :  { %v10001_v26 = vsel %vm12673_vm2, nan, %v3801_v19  ;;  %v976_v6 = vshrl.u32 %v958_v50, %v974_v9  ;;  %v979_v34 = vadd.s32 127, %v978_v15  ;;  %v1725_v43 = vadd.s32 %v1723_v35, %v13106_v8 }
 0x1ed   :  { %13105 = vst [vmem:[#allocation80_spill] sm:$0xff] %v10001_v26  ;;  %5502 = vrot.lane.b32.xlu0 %v10001_v26, %s7822_s9  ;;  %v10006_v3 = vsub.s32 %v1117_v4, %v1120_v47  ;;  %v1708_v63 = vadd.s32 %v1707_v41, %v1697_v37  ;;  %vm1726_vm12 = vc.u32 %v1724_v33, %v1720_v11  ;;  %v1719_v31 = vshrl.u32 %v13099_v30, 16  ;;  %v13108_v47 = vld [vmem:[#allocation138_spill] sm:$0xff] }
 0x1ee   :  { %v977_v49 = vor.u32 %v976_v6, %v975_v21  ;;  %v980_v29 = vshll.u32 %v979_v34, 23  ;;  %v1727_v19 = vsel %vm1726_vm12, 1, %v13012_v53  ;;  %v10013_v50 = vor.u32 %v9647_v1, %v9531_v12 }
 0x1ef   :  { %vm1122_vm13 = vcmp.lt.s32.totalorder %v10006_v3, 0  ;;  %v1123_v8 = vsub.s32 0, %v10006_v3  ;;  %v1729_v4 = vadd.s32 %v1727_v19, %v1725_v43  ;;  %v10019_v17 = vor.u32 %v9907_v44, %v9535_v16 }
 0x1f0   :  { %v10023_v37 = vor.u32 %v9911_v20, %v9545_v42  ;;  %v981_v30 = vor.u32 4788187, %v980_v29  ;;  %v1721_v41 = vshrl.u32 %v9965_v48, 16  ;;  %v989_v12 = vsel %vm866_vm7, %v988_v10, %v9913_v23  ;;  %v13107_v20 = vld [vmem:[#allocation142_spill] sm:$0xff]  ;;  %v13113_v29 = vld [vmem:[#allocation149_spill] sm:$0xff] }
 0x1f1   :  { %v1124_v1 = vsel %vm1122_vm13, %v1123_v8, %v10006_v3  ;;  %v10030_v9 = vadd.s32 %v1708_v63, %v1699_v7  ;;  %v10032_v43 = vadd.s32 %v1724_v33, %v1720_v11  ;;  %v984_v16 = vcvt.s32.f32 %v977_v49  ;;  %v13114_v8 = vld [vmem:[#allocation155_spill] sm:$0xff] }
 0x1f2   :  { %v982_v15 = vand.u32 2147483647, %v981_v30  ;;  %v1125_v44 = vclz %v1124_v1  ;;  %v1730_v21 = vadd.s32 %v1729_v4, %v1719_v31  ;;  %v10036_v42 = vor.u32 %v9925_v54, %v9597_v45  ;;  %v13115_v4 = vld [vmem:[#allocation137_spill] sm:$0xff] }
 0x1f3   :  { %v13109_v23 = vand.u32 65535, %v13108_v47  ;;  %v1391_v11 = vsel %vm9979_vm8, 1, %v13012_v53  ;;  %v13110_v33 = vand.u32 2147483647, %v13100_v18  ;;  %vm2756_vm0 = vcmp.lt.s32.totalorder %v9389_v55, 1 }
 0x1f4   :  { %v985_v45 = vmul.f32 %v984_v16, %v982_v15  ;;  %v7418_v54 = vadd.s32 4294967294, %v1125_v44  ;;  %v1731_v6 = vadd.s32 %v1730_v21, %v1721_v41  ;;  %v1113_v7 = vadd.s32 %v9920_v38, %v9918_v59  ;;  %v13118_v16 = vld [vmem:[#allocation129_spill] sm:$0xff] }
 0x1f5   :  { %v10043_v10 = vmul.u32 %v13109_v23, %v13107_v20  ;;  %vm10050_vm14 = vcmp.le.f32.partialorder %v13110_v33, 0.7853982  ;;  %vm1734_vm1 = vc.u32 %v10030_v9, %v10032_v43  ;;  %v1393_v31 = vadd.s32 %v1391_v11, %v13113_v29 }
 0x1f6   :  { %v10057_v34 = vsel %vm10050_vm14, 0, %v989_v12  ;;  %v986_v63 = vxor.u32 2147483648, %v985_v45  ;;  %vm7419_vm3 = vcmp.lt.s32.totalorder %v7418_v54, 0  ;;  %v1735_v49 = vadd.s32 1, %v1731_v6  ;;  %v13117_v12 = vld [vmem:[#allocation145_spill] sm:$0xff] }
 0x1f7   :  { %v1388_v13 = vshll.u32 %v10043_v10, 16  ;;  %v1128_v19 = vsel %vm7419_vm3, 0, %v7418_v54  ;;  %v13116_v30 = vand.u32 65535, %v13115_v4  ;;  %v1408_v1 = vshll.u32 %v13117_v12, 16 }
 0x1f8   :  { %v987_v59 = vsel %vm866_vm7, %v986_v63, %v985_v45  ;;  %v1129_v38 = vsub.s32 32, %v1128_v19  ;;  %v1133_v15 = vsub.s32 4294967266, %v1128_v19  ;;  %v1130_v23 = vshll.u32 %v10006_v3, %v1128_v19  ;;  %v13121_v63 = vld [vmem:[#allocation54_spill] sm:$0xff] }
 0x1f9   :  { %vm1394_vm6 = vc.u32 %v13114_v8, %v1388_v13  ;;  %v1406_v41 = vmul.u32 %v13116_v30, %v13107_v20  ;;  %v13119_v44 = vmov %v13116_v30  ;;  %v10078_v47 = vsel %vm10050_vm14, %v13100_v18, %v987_v59  ;;  %v13120_v13 = vld [vmem:[#allocation44_spill] sm:$0xff] }
 0x1fa   :  { %v1404_v21 = vmul.u32 %v13119_v44, %v13118_v16  ;;  %v1736_v20 = vsel %vm1734_vm1, %v1735_v49, %v1731_v6  ;;  %v1395_v11 = vsel %vm1394_vm6, 1, %v13012_v53  ;;  %v992_v33 = vmul.f32 %v10078_v47, %v10078_v47  ;;  %v13123_v6 = vld [vmem:[#allocation21_spill] sm:$0xff] }
 0x1fb   :  { %v1131_v45 = vshrl.u32 %v1113_v7, %v1129_v38  ;;  %v1134_v54 = vadd.s32 127, %v1133_v15  ;;  %v13122_v29 = vmul.u32 %v13120_v13, %v13121_v63  ;;  %v1397_v35 = vadd.s32 %v1395_v11, %v1393_v31 }
 0x1fc   :  { %v1410_v4 = vshll.u32 %v1406_v41, 16  ;;  %vm1412_vm7 = vc.u32 %v1404_v21, %v1408_v1  ;;  %v1414_v30 = vadd.s32 %v1408_v1, %v1404_v21  ;;  %v993_v3 = vmul.f32 -0.001358992, %v992_v33 }
 0x1fd   :  { %v1737_v8 = vadd.s32 %v1736_v20, %v13122_v29  ;;  %v1000_v19 = vmul.f32 -0.00019511016, %v992_v33  ;;  %v1132_v59 = vor.u32 %v1131_v45, %v1130_v23  ;;  %v1135_v16 = vshll.u32 %v1134_v54, 23  ;;  %v13124_v20 = vld [vmem:[#allocation146_spill] sm:$0xff] }
 0x1fe   :  { %vm1021_vm8 = vcmp.lt.s32.totalorder %v13123_v6, 0  ;;  %v1387_v44 = vshrl.u32 %v13101_v2, 16  ;;  %v1413_v7 = vsel %vm1412_vm7, 1, %v13012_v53  ;;  %vm1416_vm9 = vc.u32 %v1414_v30, %v1410_v4 }
 0x1ff   :  { %v1738_v49 = vadd.s32 536870912, %v1737_v8  ;;  %v10097_v31 = vsel %vm2756_vm0, %v9637_v58, %v10013_v50  ;;  %v994_v38 = vadd.f32 0.041655596, %v993_v3  ;;  %v1001_v1 = vadd.f32 0.008332121, %v1000_v19 }
 0x200   :  { %v1136_v15 = vor.u32 4788187, %v1135_v16  ;;  %v1398_v23 = vadd.s32 %v1397_v35, %v1387_v44  ;;  %v1415_v11 = vadd.s32 %v1413_v7, %v13124_v20  ;;  %v1417_v45 = vsel %vm1416_vm9, 1, %v13012_v53 }
 0x201   :  { %v10099_v21 = vshrl.u32 %v1738_v49, 30  ;;  %v995_v2 = vmul.f32 %v994_v38, %v992_v33  ;;  %v1002_v54 = vmul.f32 %v1001_v1, %v992_v33  ;;  %v1139_v63 = vcvt.s32.f32 %v1132_v59 }
 0x202   :  { %v1137_v13 = vand.u32 2147483647, %v1136_v15  ;;  %v1389_v48 = vshrl.u32 %v10043_v10, 16  ;;  %v1409_v58 = vshrl.u32 %v13117_v12, 16  ;;  %v1419_v3 = vadd.s32 %v1417_v45, %v1415_v11  ;;  %v13125_v10 = vld [vmem:[#allocation132_spill] sm:$0xff]  ;;  %v13127_v12 = vld [vmem:[#allocation133_spill] sm:$0xff] }
 0x203   :  { %v1740_v29 = vshll.u32 %v10099_v21, 30  ;;  %v996_v19 = vadd.f32 -0.4999988, %v995_v2  ;;  %v1003_v16 = vadd.f32 -0.16666654, %v1002_v54  ;;  %v1143_v35 = vsub.s32 4, %v9985_v14 }
 0x204   :  { %v1140_v49 = vmul.f32 %v1139_v63, %v1137_v13  ;;  %v10109_v7 = vadd.s32 %v1398_v23, %v1389_v48  ;;  %v1411_v38 = vshrl.u32 %v1406_v41, 16  ;;  %v1420_v1 = vadd.s32 %v1419_v3, %v1409_v58 }
 0x205   :  { %v10107_v44 = vsub.s32 %v1737_v8, %v1740_v29  ;;  %v997_v15 = vmul.f32 %v996_v19, %v992_v33  ;;  %v1004_v59 = vmul.f32 %v1003_v16, %v992_v33  ;;  %v3485_v20 = vand.u32 3, %v10057_v34 }
 0x206   :  { %v1141_v26 = vxor.u32 2147483648, %v1140_v49  ;;  %v13126_v32 = vshll.u32 %v13125_v10, 16  ;;  %vm1007_vm12 = vweird.f32 %v13100_v18  ;;  %v10122_v41 = vadd.s32 %v1414_v30, %v1410_v4 }
 0x207   :  { %vm1742_vm13 = vcmp.lt.s32.totalorder %v10107_v44, 0  ;;  %v1743_v48 = vsub.s32 0, %v10107_v44  ;;  %v1421_v8 = vadd.s32 %v1420_v1, %v1411_v38  ;;  %v10124_v33 = vadd.f32 1.0, %v997_v15  ;;  %v13133_v38 = vld [vmem:[#allocation128_spill] sm:$0xff] }
 0x208   :  { %vm10115_vm11 = vc.u32 %v13127_v12, %v13126_v32  ;;  %v1005_v23 = vadd.f32 1.0, %v1004_v59  ;;  %v13130_v45 = vand.u32 2147483647, %v13123_v6  ;;  %v1142_v32 = vsel %vm1021_vm8, %v1141_v26, %v1140_v49  ;;  %v13135_v59 = vld [vmem:[#allocation23_spill] sm:$0xff] }
 0x209   :  { %v1144_v2 = vsel %vm1021_vm8, %v1143_v35, %v9985_v14  ;;  %v1744_v4 = vsel %vm1742_vm13, %v1743_v48, %v10107_v44  ;;  %vm1424_vm1 = vc.u32 %v10109_v7, %v10122_v41  ;;  %v12653_v13 = vxor.u32 2147483648, %v10124_v33  ;;  %v13132_v35 = vld [vmem:[#allocation126_spill] sm:$0xff] }
 0x20a   :  { %vm1020_vm14 = vcmp.le.f32.partialorder %v13130_v45, 0.7853982  ;;  %v10140_v30 = vmul.f32 %v1005_v23, %v10078_v47  ;;  %v1745_v63 = vclz %v1744_v4  ;;  %vm3486_vm3 = vcmp.lt.s32.totalorder %v3485_v20, 2  ;;  %v13136_v45 = vld [vmem:[#allocation125_spill] sm:$0xff] }
 0x20b   :  { %v10134_v54 = vsel %vm1020_vm14, %v13123_v6, %v1142_v32  ;;  %vm3487_vm6 = vcmp.eq.s32.totalorder %v3485_v20, 0  ;;  %vm3490_vm7 = vcmp.eq.s32.totalorder %v3485_v20, 2  ;;  %v1425_v14 = vadd.s32 1, %v1421_v8  ;;  %v13137_v32 = vld [vmem:[#allocation140_spill] sm:$0xff] }
 0x20c   :  { %v1147_v26 = vmul.f32 %v10134_v54, %v10134_v54  ;;  %v12654_v29 = vxor.u32 2147483648, %v10140_v30  ;;  %v10146_v58 = vsel %vm1020_vm14, 0, %v1144_v2  ;;  %v3492_v47 = vsel %vm3490_vm7, %v12653_v13, %v10140_v30 }
 0x20d   :  { %13131 = vst [vmem:[#allocation81_spill] sm:$0xff] %v10146_v58  ;;  %v7430_v16 = vadd.s32 4294967294, %v1745_v63  ;;  %v1426_v49 = vsel %vm1424_vm1, %v1425_v14, %v1421_v8  ;;  %v13134_v1 = vand.u32 65535, %v13133_v38  ;;  %vm1641_vm8 = vcmp.lt.s32.totalorder %v13135_v59, 0 }
 0x20e   :  { %v1148_v3 = vmul.f32 -0.001358992, %v1147_v26  ;;  %v1155_v19 = vmul.f32 -0.00019511016, %v1147_v26  ;;  %v3489_v12 = vsel %vm3487_vm6, %v10124_v33, %v12654_v29  ;;  %v13138_v2 = vmul.u32 %v13136_v45, %v13137_v32 }
 0x20f   :  { %v10154_v15 = vmul.u32 %v13134_v1, %v13132_v35  ;;  %v3493_v63 = vsel %vm3486_vm3, %v3489_v12, %v3492_v47  ;;  %v3639_v8 = vand.u32 3, %v10146_v58  ;;  %v1733_v14 = vadd.s32 %v10032_v43, %v10030_v9  ;;  %v13174_v58 = vld [vmem:[#allocation74_spill] sm:$0xff] }
 0x210   :  { %v1149_v48 = vadd.f32 0.041655596, %v1148_v3  ;;  %v1156_v23 = vadd.f32 0.008332121, %v1155_v19  ;;  %v1427_v4 = vadd.s32 %v1426_v49, %v13138_v2  ;;  %vm7431_vm9 = vcmp.lt.s32.totalorder %v7430_v16, 0 }
 0x211   :  { %v10169_v38 = vsel %vm1007_vm12, nan, %v3493_v63  ;;  %v1748_v3 = vsel %vm7431_vm9, 0, %v7430_v16  ;;  %v13140_v19 = vand.u32 2147483647, %v13135_v59  ;;  %v1763_v9 = vsub.s32 4, %v10099_v21 }
 0x212   :  { %13139 = vst [vmem:[#allocation34_spill] sm:$0xff] %v10169_v38  ;;  %v1150_v1 = vmul.f32 %v1149_v48, %v1147_v26  ;;  %v1157_v13 = vmul.f32 %v1156_v23, %v1147_v26  ;;  %5498 = vrot.lane.b32.xlu1 %v10169_v38, %s7822_s9  ;;  %v1749_v47 = vsub.s32 32, %v1748_v3  ;;  %v1753_v49 = vsub.s32 4294967266, %v1748_v3  ;;  %v13143_v38 = vld [vmem:[#allocation139_spill] sm:$0xff] }
 0x213   :  { %vm10175_vm13 = vcmp.le.f32.partialorder %v13140_v19, 0.7853982  ;;  %v1428_v43 = vadd.s32 536870912, %v1427_v4  ;;  %v1543_v48 = vshll.u32 %v10154_v15, 16  ;;  %v1546_v16 = vsel %vm10115_vm11, 1, %v13012_v53 }
 0x214   :  { %v1151_v12 = vadd.f32 -0.4999988, %v1150_v1  ;;  %v1158_v45 = vadd.f32 -0.16666654, %v1157_v13  ;;  %v1750_v23 = vshll.u32 %v10107_v44, %v1748_v3  ;;  %v1751_v32 = vshrl.u32 %v1733_v14, %v1749_v47  ;;  %v13145_v3 = vld [vmem:[#allocation134_spill] sm:$0xff] }
 0x215   :  { %v1754_v2 = vadd.s32 127, %v1753_v49  ;;  %v10185_v63 = vshrl.u32 %v1428_v43, 30  ;;  %vm3640_vm14 = vcmp.lt.s32.totalorder %v3639_v8, 2  ;;  %vm3641_vm1 = vcmp.eq.s32.totalorder %v3639_v8, 0 }
 0x216   :  { %v1152_v19 = vmul.f32 %v1151_v12, %v1147_v26  ;;  %v1159_v29 = vmul.f32 %v1158_v45, %v1147_v26  ;;  %vm1549_vm3 = vc.u32 %v13143_v38, %v1543_v48  ;;  %vm1162_vm6 = vweird.f32 %v13123_v6 }
 0x217   :  { %vm3644_vm7 = vcmp.eq.s32.totalorder %v3639_v8, 2  ;;  %v1752_v13 = vor.u32 %v1751_v32, %v1750_v23  ;;  %v1755_v1 = vshll.u32 %v1754_v2, 23  ;;  %v1430_v11 = vshll.u32 %v10185_v63, 30 }
 0x218   :  { %v10190_v62 = vadd.f32 1.0, %v1152_v19  ;;  %v1160_v44 = vadd.f32 1.0, %v1159_v29  ;;  %v1423_v14 = vadd.s32 %v10122_v41, %v10109_v7  ;;  %v1548_v47 = vadd.s32 %v1546_v16, %v13145_v3  ;;  %v13147_v29 = vld [vmem:[#allocation131_spill] sm:$0xff] }
 0x219   :  { %v1756_v26 = vor.u32 4788187, %v1755_v1  ;;  %v1764_v38 = vsel %vm1641_vm8, %v1763_v9, %v10099_v21  ;;  %v1431_v49 = vsub.s32 %v1427_v4, %v1430_v11  ;;  %v1550_v43 = vsel %vm1549_vm3, 1, %v13012_v53  ;;  %v13149_v7 = vld [vmem:[#allocation135_spill] sm:$0xff]  ;;  %v13152_v4 = vld [vmem:[#allocation72_spill] sm:$0xff] }
 0x21a   :  { %13144 = vst [vmem:[#allocation43_spill] sm:$0xff] %v10190_v62  ;;  %v10200_v12 = vmul.f32 %v1160_v44, %v10134_v54  ;;  %v12659_v45 = vxor.u32 2147483648, %v10190_v62  ;;  %v13148_v48 = vand.u32 65535, %v13147_v29  ;;  %v1563_v41 = vshll.u32 %v13149_v7, 16  ;;  %v13150_v19 = vld [vmem:[#allocation71_spill] sm:$0xff]  ;;  %v13156_v11 = vld [vmem:[#allocation124_spill] sm:$0xff] }
 0x21b   :  { %v1757_v16 = vand.u32 2147483647, %v1756_v26  ;;  %v1759_v32 = vcvt.s32.f32 %v1752_v13  ;;  %vm1432_vm11 = vcmp.lt.s32.totalorder %v1431_v49, 0  ;;  %v1433_v2 = vsub.s32 0, %v1431_v49 }
 0x21c   :  { %13146 = vst [vmem:[#allocation55_spill] sm:$0xff] %v10200_v12  ;;  %v1561_v23 = vmul.u32 %v13148_v48, %v13132_v35  ;;  %v13151_v21 = vshll.u32 %v13150_v19, 16  ;;  %v12660_v54 = vxor.u32 2147483648, %v10200_v12  ;;  %v10217_v1 = vsel %vm10175_vm13, 0, %v1764_v38 }
 0x21d   :  { %13155 = vst [vmem:[#allocation48_spill] sm:$0xff] %v10217_v1  ;;  %v1552_v35 = vadd.s32 %v1550_v43, %v1548_v47  ;;  %v13157_v44 = vmov %v13148_v48  ;;  %v3646_v3 = vsel %vm3644_vm7, %v12659_v45, %v10200_v12  ;;  %v1760_v26 = vmul.f32 %v1759_v32, %v1757_v16 }
 0x21e   :  { %vm10210_vm9 = vc.u32 %v13152_v4, %v13151_v21  ;;  %v1559_v13 = vmul.u32 %v13157_v44, %v13156_v11  ;;  %v1434_v48 = vsel %vm1432_vm11, %v1433_v2, %v1431_v49  ;;  %v1542_v21 = vshrl.u32 %v13125_v10, 16  ;;  %v13159_v2 = vld [vmem:[#allocation136_spill] sm:$0xff] }
 0x21f   :  { %v3643_v38 = vsel %vm3641_vm1, %v10190_v62, %v12660_v54  ;;  %v1435_v4 = vclz %v1434_v48  ;;  %v1565_v47 = vshll.u32 %v1561_v23, 16  ;;  %v1761_v29 = vxor.u32 2147483648, %v1760_v26 }
 0x220   :  { %vm1567_vm3 = vc.u32 %v1559_v13, %v1563_v41  ;;  %v3647_v43 = vsel %vm3640_vm14, %v3643_v38, %v3646_v3  ;;  %v1569_v44 = vadd.s32 %v1563_v41, %v1559_v13  ;;  %v1553_v10 = vadd.s32 %v1552_v35, %v1542_v21  ;;  %v13160_v13 = vld [vmem:[#allocation66_spill] sm:$0xff]  ;;  %v13161_v21 = vld [vmem:[#allocation65_spill] sm:$0xff] }
 0x221   :  { %v1568_v11 = vsel %vm1567_vm3, 1, %v13012_v53  ;;  %v10235_v16 = vsel %vm1162_vm6, nan, %v3647_v43  ;;  %v7424_v32 = vadd.s32 4294967294, %v1435_v4  ;;  %v1762_v48 = vsel %vm1641_vm8, %v1761_v29, %v1760_v26 }
 0x222   :  { %13158 = vst [vmem:[#allocation42_spill] sm:$0xff] %v10235_v16  ;;  %v1570_v45 = vadd.s32 %v1568_v11, %v13159_v2  ;;  %5500 = vrot.lane.b32.xlu2 %v10235_v16, %s7822_s9  ;;  %v10243_v8 = vand.u32 3, %v10217_v1  ;;  %v1544_v3 = vshrl.u32 %v10154_v15, 16  ;;  %vm1571_vm14 = vc.u32 %v1569_v44, %v1565_v47  ;;  %v13163_v11 = vld [vmem:[#allocation99_spill] sm:$0xff] }
 0x223   :  { %v10249_v41 = vsel %vm10175_vm13, %v13135_v59, %v1762_v48  ;;  %vm7425_vm1 = vcmp.lt.s32.totalorder %v7424_v32, 0  ;;  %v1572_v35 = vsel %vm1571_vm14, 1, %v13012_v53  ;;  %v13162_v38 = vand.u32 65535, %v13161_v21 }
 0x224   :  { %v1767_v26 = vmul.f32 %v10249_v41, %v10249_v41  ;;  %v1438_v43 = vsel %vm7425_vm1, 0, %v7424_v32  ;;  %v1564_v15 = vshrl.u32 %v13149_v7, 16  ;;  %v1574_v29 = vadd.s32 %v1572_v35, %v1570_v45 }
 0x225   :  { %v10255_v4 = vmul.u32 %v13162_v38, %v13160_v13  ;;  %vm1331_vm8 = vcmp.lt.s32.totalorder %v13163_v11, 0  ;;  %v1439_v20 = vsub.s32 32, %v1438_v43  ;;  %v1443_v2 = vsub.s32 4294967266, %v1438_v43 }
 0x226   :  { %v10261_v48 = vadd.s32 %v1553_v10, %v1544_v3  ;;  %v1566_v54 = vshrl.u32 %v1561_v23, 16  ;;  %v1768_v16 = vmul.f32 -0.001358992, %v1767_v26  ;;  %v1775_v1 = vmul.f32 -0.00019511016, %v1767_v26  ;;  %v13164_v23 = vld [vmem:[#allocation78_spill] sm:$0xff] }
 0x227   :  { %v10263_v6 = vadd.s32 %v1569_v44, %v1565_v47  ;;  %v1575_v21 = vadd.s32 %v1574_v29, %v1564_v15  ;;  %v1440_v38 = vshll.u32 %v1431_v49, %v1438_v43  ;;  %v1441_v62 = vshrl.u32 %v1423_v14, %v1439_v20 }
 0x228   :  { %v1444_v12 = vadd.s32 127, %v1443_v2  ;;  %v2163_v32 = vshll.u32 %v10255_v4, 16  ;;  %v1769_v60 = vadd.f32 0.041655596, %v1768_v16  ;;  %v1776_v7 = vadd.f32 0.008332121, %v1775_v1 }
 0x229   :  { %v1576_v45 = vadd.s32 %v1575_v21, %v1566_v54  ;;  %v2166_v35 = vsel %vm10210_vm9, 1, %v13012_v53  ;;  %v1442_v10 = vor.u32 %v1441_v62, %v1440_v38  ;;  %vm1579_vm13 = vc.u32 %v10261_v48, %v10263_v6  ;;  %v13168_v1 = vld [vmem:[#allocation73_spill] sm:$0xff] }
 0x22a   :  { %v1445_v3 = vshll.u32 %v1444_v12, 23  ;;  %vm2169_vm7 = vc.u32 %v13164_v23, %v2163_v32  ;;  %v1770_v47 = vmul.f32 %v1769_v60, %v1767_v26  ;;  %v1777_v49 = vmul.f32 %v1776_v7, %v1767_v26  ;;  %v13169_v60 = vld [vmem:[#allocation69_spill] sm:$0xff]  ;;  %v13171_v32 = vld [vmem:[#allocation120_spill] sm:$0xff]  ;;  %v13172_v7 = vld [vmem:[#allocation130_spill] sm:$0xff] }
 0x22b   :  { %v1453_v14 = vsub.s32 4, %v10185_v63  ;;  %v1580_v44 = vadd.s32 1, %v1576_v45  ;;  %v13165_v16 = vand.u32 2147483647, %v13163_v11  ;;  %v2168_v62 = vadd.s32 %v2166_v35, %v13168_v1 }
 0x22c   :  { %v1446_v9 = vor.u32 4788187, %v1445_v3  ;;  %v2170_v12 = vsel %vm2169_vm7, 1, %v13012_v53  ;;  %v1771_v43 = vadd.f32 -0.4999988, %v1770_v47  ;;  %v13170_v20 = vand.u32 65535, %v13169_v60 }
 0x22d   :  { %vm10275_vm11 = vcmp.le.f32.partialorder %v13165_v16, 0.7853982  ;;  %v1778_v15 = vadd.f32 -0.16666654, %v1777_v49  ;;  %v1581_v29 = vsel %vm1579_vm13, %v1580_v44, %v1576_v45  ;;  %v1449_v38 = vcvt.s32.f32 %v1442_v10  ;;  %v13175_v47 = vld [vmem:[#allocation63_spill] sm:$0xff] }
 0x22e   :  { %v10284_v2 = vmul.u32 %v13170_v20, %v13160_v13  ;;  %v1447_v21 = vand.u32 2147483647, %v1446_v9  ;;  %v13173_v23 = vmul.u32 %v13171_v32, %v13172_v7  ;;  %v2183_v3 = vshll.u32 %v13174_v58, 16 }
 0x22f   :  { %v1772_v18 = vmul.f32 %v1771_v43, %v1767_v26  ;;  %v1779_v35 = vmul.f32 %v1778_v15, %v1767_v26  ;;  %vm4256_vm9 = vcmp.lt.s32.totalorder %v10243_v8, 2  ;;  %v1454_v45 = vsel %vm1331_vm8, %v1453_v14, %v10185_v63 }
 0x230   :  { %v1582_v16 = vadd.s32 %v1581_v29, %v13173_v23  ;;  %v13176_v13 = vmov %v13170_v20  ;;  %vm12684_vm3 = vweird.f32 %v13135_v59  ;;  %v1450_v10 = vmul.f32 %v1449_v38, %v1447_v21  ;;  %v13182_v21 = vld [vmem:[#allocation75_spill] sm:$0xff] }
 0x231   :  { %v2179_v49 = vmul.u32 %v13176_v13, %v13175_v47  ;;  %v2172_v9 = vadd.s32 %v2170_v12, %v2168_v62  ;;  %v2185_v1 = vshll.u32 %v10284_v2, 16  ;;  %v10299_v29 = vadd.f32 1.0, %v1772_v18 }
 0x232   :  { %v1583_v44 = vadd.s32 536870912, %v1582_v16  ;;  %v1780_v26 = vadd.f32 1.0, %v1779_v35  ;;  %v13178_v15 = vshll.u32 %v9132_v40, 16  ;;  %v1451_v14 = vxor.u32 2147483648, %v1450_v10 }
 0x233   :  { %13177 = vst [vmem:[#allocation33_spill] sm:$0xff] %v10299_v29  ;;  %vm2187_vm14 = vc.u32 %v2179_v49, %v2183_v3  ;;  %v2189_v43 = vadd.s32 %v2183_v3, %v2179_v49  ;;  %v2162_v20 = vshrl.u32 %v13150_v19, 16  ;;  %v12674_v12 = vxor.u32 2147483648, %v10299_v29 }
 0x234   :  { %vm10304_vm1 = vc.u32 %v9148_v52, %v13178_v15  ;;  %v10308_v60 = vshrl.u32 %v1583_v44, 30  ;;  %v2188_v62 = vsel %vm2187_vm14, 1, %v13012_v53  ;;  %v10313_v18 = vmul.f32 %v1780_v26, %v10249_v41 }
 0x235   :  { %v2190_v38 = vadd.s32 %v2188_v62, %v13182_v21  ;;  %vm2191_vm13 = vc.u32 %v2189_v43, %v2185_v1  ;;  %vm4257_vm7 = vcmp.eq.s32.totalorder %v10243_v8, 0  ;;  %v1452_v52 = vsel %vm1331_vm8, %v1451_v14, %v1450_v10  ;;  %v13185_v62 = vld [vmem:[#allocation166_spill] sm:$0xff]  ;;  %v13186_v21 = vld [vmem:[#allocation161_spill] sm:$0xff] }
 0x236   :  { %13181 = vst [vmem:[#allocation49_spill] sm:$0xff] %v10313_v18  ;;  %v1585_v32 = vshll.u32 %v10308_v60, 30  ;;  %v2192_v7 = vsel %vm2191_vm13, 1, %v13012_v53  ;;  %v12675_v19 = vxor.u32 2147483648, %v10313_v18  ;;  %vm4260_vm14 = vcmp.eq.s32.totalorder %v10243_v8, 2 }
 0x237   :  { %v10327_v41 = vsel %vm10275_vm11, %v13163_v11, %v1452_v52  ;;  %v2173_v23 = vadd.s32 %v2172_v9, %v2162_v20  ;;  %vm2759_vm2 = vcmp.lt.s32.totalorder %v9389_v55, 4  ;;  %v10332_v3 = vsel %vm10275_vm11, 0, %v1454_v45 }
 0x238   :  { %13183 = vst [vmem:[#allocation108_spill] sm:$0xff] %v10332_v3  ;;  %v1457_v35 = vmul.f32 %v10327_v41, %v10327_v41  ;;  %v10336_v47 = vsub.s32 %v1582_v16, %v1585_v32  ;;  %v2194_v13 = vadd.s32 %v2192_v7, %v2190_v38  ;;  %v4259_v49 = vsel %vm4257_vm7, %v10299_v29, %v12675_v19  ;;  %v13196_v19 = vld [vmem:[#allocation167_spill] sm:$0xff] }
 0x239   :  { %v4262_v10 = vsel %vm4260_vm14, %v12674_v12, %v10313_v18  ;;  %v2164_v44 = vshrl.u32 %v10255_v4, 16  ;;  %v2184_v54 = vshrl.u32 %v13174_v58, 16  ;;  %v2186_v8 = vshrl.u32 %v10284_v2, 16  ;;  %v13207_v18 = vld [vmem:[#allocation156_spill] sm:$0xff] }
 0x23a   :  { %v4263_v45 = vsel %vm4256_vm9, %v4259_v49, %v4262_v10  ;;  %v1458_v9 = vmul.f32 -0.001358992, %v1457_v35  ;;  %v1465_v26 = vmul.f32 -0.00019511016, %v1457_v35  ;;  %vm1587_vm8 = vcmp.lt.s32.totalorder %v10336_v47, 0 }
 0x23b   :  { %v10351_v16 = vsel %vm12684_vm3, nan, %v4263_v45  ;;  %v1588_v15 = vsub.s32 0, %v10336_v47  ;;  %v10354_v14 = vadd.s32 %v2173_v23, %v2164_v44  ;;  %v2195_v20 = vadd.s32 %v2194_v13, %v2184_v54  ;;  %v13188_v54 = vld [vmem:[#allocation172_spill] sm:$0xff] }
 0x23c   :  { %13184 = vst [vmem:[#allocation114_spill] sm:$0xff] %v10351_v16  ;;  %5508 = vrot.lane.b32.xlu0 %v10351_v16, %s7822_s9  ;;  %v1459_v58 = vadd.f32 0.041655596, %v1458_v9  ;;  %v1466_v4 = vadd.f32 0.008332121, %v1465_v26  ;;  %v13187_v38 = vand.u32 65535, %v13186_v21  ;;  %v10368_v32 = vsel %vm2756_vm0, %v10013_v50, %v10019_v17 }
 0x23d   :  { %v3947_v7 = vand.u32 3, %v10332_v3  ;;  %v1589_v23 = vsel %vm1587_vm8, %v1588_v15, %v10336_v47  ;;  %v10372_v13 = vadd.s32 %v2189_v43, %v2185_v1  ;;  %v2196_v44 = vadd.s32 %v2195_v20, %v2186_v8  ;;  %v13190_v8 = vld [vmem:[#allocation174_spill] sm:$0xff] }
 0x23e   :  { %v10362_v52 = vmul.u32 %v13187_v38, %v13185_v62  ;;  %v1460_v49 = vmul.f32 %v1459_v58, %v1457_v35  ;;  %v1467_v10 = vmul.f32 %v1466_v4, %v1457_v35  ;;  %v1590_v2 = vclz %v1589_v23 }
 0x23f   :  { %v13189_v45 = vor.u32 8388608, %v13188_v54  ;;  %vm2199_vm11 = vc.u32 %v10354_v14, %v10372_v13  ;;  %v1856_v26 = vsel %vm10304_vm1, 1, %v13012_v53  ;;  %v2200_v58 = vadd.s32 1, %v2196_v44  ;;  %v13194_v54 = vld [vmem:[#allocation64_spill] sm:$0xff] }
 0x240   :  { %v1853_v50 = vshll.u32 %v10362_v52, 16  ;;  %v1461_v15 = vadd.f32 -0.4999988, %v1460_v49  ;;  %v1468_v1 = vadd.f32 -0.16666654, %v1467_v10  ;;  %v7427_v43 = vadd.s32 4294967294, %v1590_v2 }
 0x241   :  { %v10376_v9 = vshll.u32 %v13189_v45, 8  ;;  %v2761_v20 = vsel %vm2759_vm2, %v10023_v37, 2102212464  ;;  %v10390_v4 = vsel %vm2759_vm2, %v10036_v42, 920167782  ;;  %vm3949_vm9 = vcmp.eq.s32.totalorder %v3947_v7, 0 }
 0x242   :  { %vm10393_vm13 = vc.u32 %v13190_v8, %v1853_v50  ;;  %v1462_v63 = vmul.f32 %v1461_v15, %v1457_v35  ;;  %v1469_v38 = vmul.f32 %v1468_v1, %v1457_v35  ;;  %vm3948_vm1 = vcmp.lt.s32.totalorder %v3947_v7, 2  ;;  %v13193_v2 = vld [vmem:[#allocation59_spill] sm:$0xff]  ;;  %v13198_v35 = vld [vmem:[#allocation170_spill] sm:$0xff] }
 0x243   :  { %vm7428_vm7 = vcmp.lt.s32.totalorder %v7427_v43, 0  ;;  %v2201_v23 = vsel %vm2199_vm11, %v2200_v58, %v2196_v44  ;;  %vm1472_vm14 = vweird.f32 %v13163_v11  ;;  %v1578_v49 = vadd.s32 %v10263_v6, %v10261_v48  ;;  %v13199_v48 = vld [vmem:[#allocation165_spill] sm:$0xff] }
 0x244   :  { %v1593_v10 = vsel %vm7428_vm7, 0, %v7427_v43  ;;  %v13195_v45 = vmul.u32 %v13193_v2, %v13194_v54  ;;  %v1858_v50 = vadd.s32 %v1856_v26, %v13196_v19  ;;  %v10404_v8 = vadd.f32 1.0, %v1462_v63  ;;  %v13201_v19 = vld [vmem:[#allocation93_spill] sm:$0xff]  ;;  %v13203_v2 = vld [vmem:[#allocation163_spill] sm:$0xff] }
 0x245   :  { %v1470_v16 = vadd.f32 1.0, %v1469_v38  ;;  %v1594_v15 = vsub.s32 32, %v1593_v10  ;;  %v1873_v1 = vshll.u32 %v13198_v35, 16  ;;  %vm2758_vm8 = vcmp.lt.s32.totalorder %v9389_v55, 3 }
 0x246   :  { %v2202_v12 = vadd.s32 %v2201_v23, %v13195_v45  ;;  %13197 = vst [vmem:[#allocation45_spill] sm:$0xff] %v10404_v8  ;;  %v1598_v44 = vsub.s32 4294967266, %v1593_v10  ;;  %v1860_v6 = vsel %vm10393_vm13, 1, %v13012_v53  ;;  %v13200_v43 = vand.u32 65535, %v13199_v48 }
 0x247   :  { %vm1486_vm11 = vcmp.lt.s32.totalorder %v13201_v19, 0  ;;  %v10418_v26 = vmul.f32 %v1470_v16, %v10327_v41  ;;  %v12685_v63 = vxor.u32 2147483648, %v10404_v8  ;;  %v1596_v38 = vshrl.u32 %v1578_v49, %v1594_v15 }
 0x248   :  { %v2203_v58 = vadd.s32 536870912, %v2202_v12  ;;  %v10414_v23 = vmul.u32 %v13200_v43, %v13185_v62  ;;  %v13204_v54 = vmov %v13200_v43  ;;  %vm3952_vm7 = vcmp.eq.s32.totalorder %v3947_v7, 2  ;;  %v13205_v62 = vld [vmem:[#allocation153_spill] sm:$0xff] }
 0x249   :  { %13202 = vst [vmem:[#allocation50_spill] sm:$0xff] %v10418_v26  ;;  %v1869_v45 = vmul.u32 %v13204_v54, %v13203_v2  ;;  %v1595_v21 = vshll.u32 %v10336_v47, %v1593_v10  ;;  %v1599_v59 = vadd.s32 127, %v1598_v44  ;;  %v13206_v43 = vshll.u32 %v13205_v62, 16 }
 0x24a   :  { %v10425_v29 = vshrl.u32 %v2203_v58, 30  ;;  %v12686_v41 = vxor.u32 2147483648, %v10418_v26  ;;  %v1852_v16 = vshrl.u32 %v9132_v40, 16  ;;  %v1862_v49 = vadd.s32 %v1860_v6, %v1858_v50 }
 0x24b   :  { %vm10430_vm13 = vc.u32 %v13207_v18, %v13206_v43  ;;  %vm1877_vm3 = vc.u32 %v1869_v45, %v1873_v1  ;;  %v1597_v15 = vor.u32 %v1596_v38, %v1595_v21  ;;  %v1600_v48 = vshll.u32 %v1599_v59, 23  ;;  %v13211_v21 = vld [vmem:[#allocation173_spill] sm:$0xff] }
 0x24c   :  { %v2205_v47 = vshll.u32 %v10425_v29, 30  ;;  %v1875_v10 = vshll.u32 %v10414_v23, 16  ;;  %v3951_v18 = vsel %vm3949_vm9, %v10404_v8, %v12686_v41  ;;  %v3954_v44 = vsel %vm3952_vm7, %v12685_v63, %v10418_v26 }
 0x24d   :  { %v1878_v58 = vsel %vm1877_vm3, 1, %v13012_v53  ;;  %v1879_v40 = vadd.s32 %v1873_v1, %v1869_v45  ;;  %v3955_v50 = vsel %vm3948_vm1, %v3951_v18, %v3954_v44  ;;  %v1601_v6 = vor.u32 4788187, %v1600_v48 }
 0x24e   :  { %v1608_v59 = vsub.s32 4, %v10308_v60  ;;  %v2206_v38 = vsub.s32 %v2202_v12, %v2205_v47  ;;  %v10450_v2 = vsel %vm1472_vm14, nan, %v3955_v50  ;;  %v1863_v54 = vadd.s32 %v1862_v49, %v1852_v16 }
 0x24f   :  { %13210 = vst [vmem:[#allocation106_spill] sm:$0xff] %v10450_v2  ;;  %v1880_v43 = vadd.s32 %v1878_v58, %v13211_v21  ;;  %vm1881_vm9 = vc.u32 %v1879_v40, %v1875_v10  ;;  %5504 = vrot.lane.b32.xlu1 %v10450_v2, %s7822_s9  ;;  %v1602_v63 = vand.u32 2147483647, %v1601_v6  ;;  %v1604_v41 = vcvt.s32.f32 %v1597_v15  ;;  %v13215_v58 = vld [vmem:[#allocation147_spill] sm:$0xff] }
 0x250   :  { %vm2207_vm3 = vcmp.lt.s32.totalorder %v2206_v38, 0  ;;  %v2208_v7 = vsub.s32 0, %v2206_v38  ;;  %v10458_v1 = vsel %vm2758_vm8, %v10019_v17, %v2761_v20  ;;  %v10464_v12 = vsel %vm2756_vm0, %v10019_v17, %v10023_v37 }
 0x251   :  { %v13212_v45 = vor.u32 %v9933_v56, %v9929_v46  ;;  %v1882_v49 = vsel %vm1881_vm9, 1, %v13012_v53  ;;  %v1605_v15 = vmul.f32 %v1604_v41, %v1602_v63  ;;  %v1609_v20 = vsel %vm1486_vm11, %v1608_v59, %v10308_v60  ;;  %v13214_v60 = vld [vmem:[#allocation148_spill] sm:$0xff] }
 0x252   :  { %v2209_v48 = vsel %vm2207_vm3, %v2208_v7, %v2206_v38  ;;  %v1854_v47 = vshrl.u32 %v10362_v52, 16  ;;  %v10482_v17 = vsel %vm2758_vm8, %v10023_v37, %v10390_v4  ;;  %v1874_v56 = vshrl.u32 %v13198_v35, 16 }
 0x253   :  { %v10471_v16 = vsel %vm2759_vm2, %v13212_v45, 1326507024  ;;  %v2210_v46 = vclz %v2209_v48  ;;  %v1884_v18 = vadd.s32 %v1882_v49, %v1880_v43  ;;  %v13213_v44 = vand.u32 2147483647, %v13201_v19 }
 0x254   :  { %v1606_v63 = vxor.u32 2147483648, %v1605_v15  ;;  %v10487_v41 = vadd.s32 %v1863_v54, %v1854_v47  ;;  %v13216_v50 = vand.u32 65535, %v13215_v58  ;;  %v1876_v37 = vshrl.u32 %v10414_v23, 16  ;;  %v13220_v47 = vld [vmem:[#allocation158_spill] sm:$0xff] }
 0x255   :  { %vm1485_vm2 = vcmp.le.f32.partialorder %v13213_v44, 0.7853982  ;;  %v7439_v59 = vadd.s32 4294967294, %v2210_v46  ;;  %v1885_v4 = vadd.s32 %v1884_v18, %v1874_v56  ;;  %v2198_v21 = vadd.s32 %v10372_v13, %v10354_v14  ;;  %v13217_v14 = vld [vmem:[#allocation143_spill] sm:$0xff]  ;;  %v13218_v13 = vld [vmem:[#allocation154_spill] sm:$0xff]  ;;  %v13221_v18 = vld [vmem:[#allocation157_spill] sm:$0xff] }
 0x256   :  { %v10492_v52 = vmul.u32 %v13216_v50, %v13214_v60  ;;  %v10494_v6 = vsel %vm1485_vm2, 0, %v1609_v20  ;;  %v1607_v35 = vsel %vm1486_vm11, %v1606_v63, %v1605_v15  ;;  %v10501_v43 = vadd.s32 %v1879_v40, %v1875_v10  ;;  %v13222_v63 = vld [vmem:[#allocation159_spill] sm:$0xff] }
 0x257   :  { %v2011_v54 = vsel %vm10430_vm13, 1, %v13012_v53  ;;  %v10507_v7 = vsel %vm1485_vm2, %v13201_v19, %v1607_v35  ;;  %vm7440_vm0 = vcmp.lt.s32.totalorder %v7439_v59, 0  ;;  %v1886_v45 = vadd.s32 %v1885_v4, %v1876_v37  ;;  %v13223_v35 = vld [vmem:[#allocation25_spill] sm:$0xff] }
 0x258   :  { %v2008_v23 = vshll.u32 %v10492_v52, 16  ;;  %v1612_v49 = vmul.f32 %v10507_v7, %v10507_v7  ;;  %v2213_v15 = vsel %vm7440_vm0, 0, %v7439_v59  ;;  %vm1889_vm1 = vc.u32 %v10487_v41, %v10501_v43 }
 0x259   :  { %v13219_v10 = vand.u32 65535, %v13218_v13  ;;  %v2214_v3 = vsub.s32 32, %v2213_v15  ;;  %v2218_v20 = vsub.s32 4294967266, %v2213_v15  ;;  %v1890_v48 = vadd.s32 1, %v1886_v45 }
 0x25a   :  { %vm2014_vm11 = vc.u32 %v13220_v47, %v2008_v23  ;;  %v1613_v46 = vmul.f32 -0.001358992, %v1612_v49  ;;  %v1620_v56 = vmul.f32 -0.00019511016, %v1612_v49  ;;  %v2013_v44 = vadd.s32 %v2011_v54, %v13221_v18 }
 0x25b   :  { %v2024_v40 = vmul.u32 %v13219_v10, %v13217_v14  ;;  %v2028_v58 = vshll.u32 %v13222_v63, 16  ;;  %v2215_v50 = vshll.u32 %v2206_v38, %v2213_v15  ;;  %v2216_v59 = vshrl.u32 %v2198_v21, %v2214_v3  ;;  %v13224_v14 = vld [vmem:[#allocation151_spill] sm:$0xff]  ;;  %v13225_v10 = vld [vmem:[#allocation164_spill] sm:$0xff] }
 0x25c   :  { %v2219_v37 = vadd.s32 127, %v2218_v20  ;;  %v1891_v4 = vsel %vm1889_vm1, %v1890_v48, %v1886_v45  ;;  %vm2106_vm7 = vcmp.lt.s32.totalorder %v13223_v35, 0  ;;  %v1614_v2 = vadd.f32 0.041655596, %v1613_v46 }
 0x25d   :  { %v1621_v11 = vadd.f32 0.008332121, %v1620_v56  ;;  %v13226_v8 = vmul.u32 %v13224_v14, %v13225_v10  ;;  %v2015_v23 = vsel %vm2014_vm11, 1, %v13012_v53  ;;  %v4101_v47 = vand.u32 3, %v10494_v6  ;;  %v13231_v14 = vld [vmem:[#allocation97_spill] sm:$0xff] }
 0x25e   :  { %v2217_v36 = vor.u32 %v2216_v59, %v2215_v50  ;;  %v2220_v54 = vshll.u32 %v2219_v37, 23  ;;  %v13227_v38 = vand.u32 65535, %v13218_v13  ;;  %v1615_v45 = vmul.f32 %v1614_v2, %v1612_v49 }
 0x25f   :  { %v1892_v26 = vadd.s32 %v1891_v4, %v13226_v8  ;;  %v1622_v15 = vmul.f32 %v1621_v11, %v1612_v49  ;;  %vm2032_vm13 = vc.u32 %v2024_v40, %v2028_v58  ;;  %v13228_v20 = vand.u32 2147483647, %v13223_v35 }
 0x260   :  { %v10529_v21 = vmul.u32 %v13227_v38, %v13214_v60  ;;  %v2221_v8 = vor.u32 4788187, %v2220_v54  ;;  %v2228_v46 = vsub.s32 4, %v10425_v29  ;;  %v2017_v56 = vadd.s32 %v2015_v23, %v2013_v44  ;;  %v13233_v38 = vld [vmem:[#allocation96_spill] sm:$0xff] }
 0x261   :  { %v1893_v3 = vadd.s32 536870912, %v1892_v26  ;;  %vm10533_vm9 = vcmp.le.f32.partialorder %v13228_v20, 0.7853982  ;;  %v2033_v18 = vsel %vm2032_vm13, 1, %v13012_v53  ;;  %v1616_v50 = vadd.f32 -0.4999988, %v1615_v45 }
 0x262   :  { %v1623_v13 = vadd.f32 -0.16666654, %v1622_v15  ;;  %v2034_v2 = vadd.s32 %v2028_v58, %v2024_v40  ;;  %v2222_v11 = vand.u32 2147483647, %v2221_v8  ;;  %v2224_v59 = vcvt.s32.f32 %v2217_v36 }
 0x263   :  { %v10539_v60 = vshrl.u32 %v1893_v3, 30  ;;  %v2007_v37 = vshrl.u32 %v13205_v62, 16  ;;  %v2030_v4 = vshll.u32 %v10529_v21, 16  ;;  %v13232_v10 = vshll.u32 %v13231_v14, 16  ;;  %v13236_v62 = vld [vmem:[#allocation160_spill] sm:$0xff] }
 0x264   :  { %v1617_v44 = vmul.f32 %v1616_v50, %v1612_v49  ;;  %v1624_v23 = vmul.f32 %v1623_v13, %v1612_v49  ;;  %vm4102_vm2 = vcmp.lt.s32.totalorder %v4101_v47, 2  ;;  %vm4103_vm0 = vcmp.eq.s32.totalorder %v4101_v47, 0 }
 0x265   :  { %vm10546_vm3 = vc.u32 %v13233_v38, %v13232_v10  ;;  %v1895_v45 = vshll.u32 %v10539_v60, 30  ;;  %vm12703_vm1 = vweird.f32 %v13201_v19  ;;  %v2225_v36 = vmul.f32 %v2224_v59, %v2222_v11  ;;  %v13237_v10 = vld [vmem:[#allocation89_spill] sm:$0xff]  ;;  %v13238_v38 = vld [vmem:[#allocation92_spill] sm:$0xff] }
 0x266   :  { %v2018_v40 = vadd.s32 %v2017_v56, %v2007_v37  ;;  %v2035_v58 = vadd.s32 %v2033_v18, %v13236_v62  ;;  %vm2036_vm11 = vc.u32 %v2034_v2, %v2030_v4  ;;  %v10553_v15 = vadd.f32 1.0, %v1617_v44 }
 0x267   :  { %v1625_v3 = vadd.f32 1.0, %v1624_v23  ;;  %vm4106_vm13 = vcmp.eq.s32.totalorder %v4101_v47, 2  ;;  %v10555_v20 = vsub.s32 %v1892_v26, %v1895_v45  ;;  %v2226_v8 = vxor.u32 2147483648, %v2225_v36 }
 0x268   :  { %v2229_v49 = vsel %vm2106_vm7, %v2228_v46, %v10425_v29  ;;  %v2009_v50 = vshrl.u32 %v10492_v52, 16  ;;  %v2037_v13 = vsel %vm2036_vm11, 1, %v13012_v53  ;;  %v12696_v18 = vxor.u32 2147483648, %v10553_v15 }
 0x269   :  { %v10563_v56 = vmul.f32 %v1625_v3, %v10507_v7  ;;  %vm1897_vm4 = vcmp.lt.s32.totalorder %v10555_v20, 0  ;;  %v1898_v11 = vsub.s32 0, %v10555_v20  ;;  %v2227_v26 = vsel %vm2106_vm7, %v2226_v8, %v2225_v36 }
 0x26a   :  { %v10570_v59 = vadd.s32 %v2018_v40, %v2009_v50  ;;  %v2029_v29 = vshrl.u32 %v13222_v63, 16  ;;  %v2039_v46 = vadd.s32 %v2037_v13, %v2035_v58  ;;  %v10577_v7 = vsel %vm10533_vm9, %v13223_v35, %v2227_v26 }
 0x26b   :  { %v12697_v52 = vxor.u32 2147483648, %v10563_v56  ;;  %v1899_v37 = vsel %vm1897_vm4, %v1898_v11, %v10555_v20  ;;  %v13239_v44 = vand.u32 65535, %v13238_v38  ;;  %v10587_v45 = vsel %vm10533_vm9, 0, %v2229_v49 }
 0x26c   :  { %13240 = vst [vmem:[#allocation113_spill] sm:$0xff] %v10587_v45  ;;  %v2232_v63 = vmul.f32 %v10577_v7, %v10577_v7  ;;  %v1900_v36 = vclz %v1899_v37  ;;  %v2031_v40 = vshrl.u32 %v10529_v21, 16  ;;  %v4108_v58 = vsel %vm4106_vm13, %v12696_v18, %v10563_v56 }
 0x26d   :  { %v10583_v23 = vmul.u32 %v13239_v44, %v13237_v10  ;;  %v4105_v62 = vsel %vm4103_vm0, %v10553_v15, %v12697_v52  ;;  %v10600_v3 = vadd.s32 %v2034_v2, %v2030_v4  ;;  %v2040_v48 = vadd.s32 %v2039_v46, %v2029_v29 }
 0x26e   :  { %v4109_v8 = vsel %vm4102_vm2, %v4105_v62, %v4108_v58  ;;  %v2233_v49 = vmul.f32 -0.001358992, %v2232_v63  ;;  %v2240_v50 = vmul.f32 -0.00019511016, %v2232_v63  ;;  %v7433_v13 = vadd.s32 4294967294, %v1900_v36  ;;  %v13242_v62 = vld [vmem:[#allocation104_spill] sm:$0xff] }
 0x26f   :  { %v10605_v21 = vsel %vm12703_vm1, nan, %v4109_v8  ;;  %v2041_v11 = vadd.s32 %v2040_v48, %v2031_v40  ;;  %vm2044_vm4 = vc.u32 %v10570_v59, %v10600_v3  ;;  %v2628_v26 = vshll.u32 %v10583_v23, 16  ;;  %v13243_v8 = vld [vmem:[#allocation98_spill] sm:$0xff] }
 0x270   :  { %13241 = vst [vmem:[#allocation30_spill] sm:$0xff] %v10605_v21  ;;  %5506 = vrot.lane.b32.xlu2 %v10605_v21, %s7822_s9  ;;  %v2234_v2 = vadd.f32 0.041655596, %v2233_v49  ;;  %v2241_v4 = vadd.f32 0.008332121, %v2240_v50  ;;  %vm7434_vm7 = vcmp.lt.s32.totalorder %v7433_v13, 0  ;;  %v10619_v29 = vsel %vm2758_vm8, %v10036_v42, %v10471_v16 }
 0x271   :  { %v2631_v47 = vsel %vm10546_vm3, 1, %v13012_v53  ;;  %v1888_v46 = vadd.s32 %v10501_v43, %v10487_v41  ;;  %v1903_v37 = vsel %vm7434_vm7, 0, %v7433_v13  ;;  %v2045_v38 = vadd.s32 1, %v2041_v11  ;;  %v13244_v41 = vld [vmem:[#allocation127_spill] sm:$0xff]  ;;  %v13245_v43 = vld [vmem:[#allocation152_spill] sm:$0xff] }
 0x272   :  { %v2235_v44 = vmul.f32 %v2234_v2, %v2232_v63  ;;  %v2242_v36 = vmul.f32 %v2241_v4, %v2232_v63  ;;  %v1904_v40 = vsub.s32 32, %v1903_v37  ;;  %vm2634_vm9 = vc.u32 %v13242_v62, %v2628_v26  ;;  %v13247_v62 = vld [vmem:[#allocation102_spill] sm:$0xff] }
 0x273   :  { %v4717_v58 = vand.u32 3, %v10587_v45  ;;  %v1908_v54 = vsub.s32 4294967266, %v1903_v37  ;;  %v2046_v48 = vsel %vm2044_vm4, %v2045_v38, %v2041_v11  ;;  %v2633_v42 = vadd.s32 %v2631_v47, %v13243_v8  ;;  %v13248_v11 = vld [vmem:[#allocation95_spill] sm:$0xff] }
 0x274   :  { %v2236_v16 = vadd.f32 -0.4999988, %v2235_v44  ;;  %v2243_v49 = vadd.f32 -0.16666654, %v2242_v36  ;;  %v1906_v50 = vshrl.u32 %v1888_v46, %v1904_v40  ;;  %v13246_v13 = vmul.u32 %v13244_v41, %v13245_v43  ;;  %v13250_v46 = vld [vmem:[#allocation119_spill] sm:$0xff] }
 0x275   :  { %v1905_v4 = vshll.u32 %v10555_v20, %v1903_v37  ;;  %v1909_v18 = vadd.s32 127, %v1908_v54  ;;  %v2635_v26 = vsel %vm2634_vm9, 1, %v13012_v53  ;;  %v2648_v52 = vshll.u32 %v13247_v62, 16  ;;  %v13251_v37 = vld [vmem:[#allocation88_spill] sm:$0xff] }
 0x276   :  { %v2047_v2 = vadd.s32 %v2046_v48, %v13246_v13  ;;  %v2237_v21 = vmul.f32 %v2236_v16, %v2232_v63  ;;  %v2244_v45 = vmul.f32 %v2243_v49, %v2232_v63  ;;  %v13249_v47 = vand.u32 65535, %v13248_v11 }
 0x277   :  { %vm1796_vm8 = vcmp.lt.s32.totalorder %v13250_v46, 0  ;;  %vm12702_vm3 = vweird.f32 %v13223_v35  ;;  %vm4718_vm2 = vcmp.lt.s32.totalorder %v4717_v58, 2  ;;  %v1907_v44 = vor.u32 %v1906_v50, %v1905_v4 }
 0x278   :  { %v2048_v19 = vadd.s32 536870912, %v2047_v2  ;;  %v10638_v38 = vmul.u32 %v13249_v47, %v13237_v10  ;;  %v1910_v20 = vshll.u32 %v1909_v18, 23  ;;  %v13252_v36 = vmov %v13249_v47 }
 0x279   :  { %v2644_v40 = vmul.u32 %v13252_v36, %v13251_v37  ;;  %v10645_v54 = vadd.f32 1.0, %v2237_v21  ;;  %v2245_v63 = vadd.f32 1.0, %v2244_v45  ;;  %vm4719_vm0 = vcmp.eq.s32.totalorder %v4717_v58, 0 }
 0x27a   :  { %v10647_v48 = vshrl.u32 %v2048_v19, 30  ;;  %vm2757_vm11 = vcmp.lt.s32.totalorder %v9389_v55, 2  ;;  %v1911_v10 = vor.u32 4788187, %v1910_v20  ;;  %v2627_v8 = vshrl.u32 %v13231_v14, 16 }
 0x27b   :  { %13253 = vst [vmem:[#allocation41_spill] sm:$0xff] %v10645_v54  ;;  %v2637_v16 = vadd.s32 %v2635_v26, %v2633_v42  ;;  %vm2652_vm13 = vc.u32 %v2644_v40, %v2648_v52  ;;  %v10652_v49 = vmul.f32 %v2245_v63, %v10577_v7  ;;  %v12704_v18 = vxor.u32 2147483648, %v10645_v54  ;;  %v13254_v26 = vld [vmem:[#allocation103_spill] sm:$0xff] }
 0x27c   :  { %v2050_v50 = vshll.u32 %v10647_v48, 30  ;;  %v2650_v21 = vshll.u32 %v10638_v38, 16  ;;  %v1912_v45 = vand.u32 2147483647, %v1911_v10  ;;  %v1914_v41 = vcvt.s32.f32 %v1907_v44 }
 0x27d   :  { %v2653_v19 = vsel %vm2652_vm13, 1, %v13012_v53  ;;  %v2654_v43 = vadd.s32 %v2648_v52, %v2644_v40  ;;  %v12705_v13 = vxor.u32 2147483648, %v10652_v49  ;;  %vm4722_vm4 = vcmp.eq.s32.totalorder %v4717_v58, 2 }
 0x27e   :  { %v1918_v14 = vsub.s32 4, %v10539_v60  ;;  %v10660_v42 = vsub.s32 %v2047_v2, %v2050_v50  ;;  %v1915_v7 = vmul.f32 %v1914_v41, %v1912_v45  ;;  %v2638_v4 = vadd.s32 %v2637_v16, %v2627_v8 }
 0x27f   :  { %v2655_v11 = vadd.s32 %v2653_v19, %v13254_v26  ;;  %vm2656_vm7 = vc.u32 %v2654_v43, %v2650_v21  ;;  %v4721_v47 = vsel %vm4719_vm0, %v10645_v54, %v12705_v13  ;;  %v4724_v52 = vsel %vm4722_vm4, %v12704_v18, %v10652_v49 }
 0x280   :  { %vm2052_vm9 = vcmp.lt.s32.totalorder %v10660_v42, 0  ;;  %v2053_v44 = vsub.s32 0, %v10660_v42  ;;  %v13255_v2 = vshll.u32 %v9511_v5, 16  ;;  %v4725_v37 = vsel %vm4718_vm2, %v4721_v47, %v4724_v52 }
 0x281   :  { %v13258_v36 = vand.u32 2147483647, %v13250_v46  ;;  %v1916_v63 = vxor.u32 2147483648, %v1915_v7  ;;  %v2657_v10 = vsel %vm2656_vm7, 1, %v13012_v53  ;;  %v10689_v8 = vsel %vm12702_vm3, nan, %v4725_v37 }
 0x282   :  { %vm10675_vm13 = vc.u32 %v9500_v24, %v13255_v2  ;;  %13261 = vst [vmem:[#allocation91_spill] sm:$0xff] %v10689_v8  ;;  %v1919_v24 = vsel %vm1796_vm8, %v1918_v14, %v10539_v60  ;;  %v2054_v58 = vsel %vm2052_vm9, %v2053_v44, %v10660_v42  ;;  %v2629_v16 = vshrl.u32 %v10583_v23, 16  ;;  %5514 = vrot.lane.b32.xlu0 %v10689_v8, %s7822_s9  ;;  %v13262_v44 = vld [vmem:[#allocation109_spill] sm:$0xff] }
 0x283   :  { %vm10682_vm0 = vcmp.le.f32.partialorder %v13258_v36, 0.7853982  ;;  %v1917_v50 = vsel %vm1796_vm8, %v1916_v63, %v1915_v7  ;;  %v2055_v45 = vclz %v2054_v58  ;;  %v2649_v41 = vshrl.u32 %v13247_v62, 16 }
 0x284   :  { %v2659_v19 = vadd.s32 %v2657_v10, %v2655_v11  ;;  %v10705_v26 = vsel %vm2757_vm11, %v10464_v12, %v10619_v29  ;;  %v10708_v60 = vand.u32 65535, %v10376_v9  ;;  %v10713_v23 = vsel %vm10682_vm0, %v13250_v46, %v1917_v50 }
 0x285   :  { %v10715_v14 = vadd.s32 %v2638_v4, %v2629_v16  ;;  %v1922_v62 = vmul.f32 %v10713_v23, %v10713_v23  ;;  %v7436_v7 = vadd.s32 4294967294, %v2055_v45  ;;  %v2651_v11 = vshrl.u32 %v10638_v38, 16 }
 0x286   :  { %v2660_v47 = vadd.s32 %v2659_v19, %v2649_v41  ;;  %v10724_v12 = vsel %vm2757_vm11, %v10368_v32, %v10482_v17  ;;  %v10727_v29 = vshrl.u32 %v10376_v9, 16  ;;  %v10731_v4 = vsel %vm10682_vm0, 0, %v1919_v24 }
 0x287   :  { %v10733_v52 = vadd.s32 %v2654_v43, %v2650_v21  ;;  %vm1951_vm8 = vcmp.lt.s32.totalorder %v13262_v44, 0  ;;  %v1923_v2 = vmul.f32 -0.001358992, %v1922_v62  ;;  %v1930_v38 = vmul.f32 -0.00019511016, %v1922_v62 }
 0x288   :  { %vm7437_vm2 = vcmp.lt.s32.totalorder %v7436_v7, 0  ;;  %v2661_v37 = vadd.s32 %v2660_v47, %v2651_v11  ;;  %v12708_v36 = vshrl.u32 %v10705_v26, 16  ;;  %v2043_v32 = vadd.s32 %v10600_v3, %v10570_v59 }
 0x289   :  { %v2058_v17 = vsel %vm7437_vm2, 0, %v7436_v7  ;;  %v13263_v63 = vand.u32 65535, %v9394_v28  ;;  %v1924_v10 = vadd.f32 0.041655596, %v1923_v2  ;;  %v1931_v21 = vadd.f32 0.008332121, %v1930_v38 }
 0x28a   :  { %v2059_v43 = vsub.s32 32, %v2058_v17  ;;  %vm2664_vm4 = vc.u32 %v10715_v14, %v10733_v52  ;;  %v4409_v24 = vand.u32 3, %v10731_v4  ;;  %v2063_v58 = vsub.s32 4294967266, %v2058_v17 }
 0x28b   :  { %v10742_v40 = vmul.u32 %v13263_v63, %v9212_v39  ;;  %v2073_v16 = vsub.s32 4, %v10647_v48  ;;  %v2665_v50 = vadd.s32 1, %v2661_v37  ;;  %v1925_v45 = vmul.f32 %v1924_v10, %v1922_v62 }
 0x28c   :  { %v1932_v59 = vmul.f32 %v1931_v21, %v1922_v62  ;;  %v2060_v3 = vshll.u32 %v10660_v42, %v2058_v17  ;;  %v2061_v41 = vshrl.u32 %v2043_v32, %v2059_v43  ;;  %v2064_v28 = vadd.s32 127, %v2063_v58  ;;  %v13267_v21 = vld [vmem:[#allocation85_spill] sm:$0xff]  ;;  %v13268_v42 = vld [vmem:[#allocation94_spill] sm:$0xff] }
 0x28d   :  { %v2666_v19 = vsel %vm2664_vm4, %v2665_v50, %v2661_v37  ;;  %v2318_v7 = vshll.u32 %v10742_v40, 16  ;;  %v2321_v11 = vsel %vm10675_vm13, 1, %v13012_v53  ;;  %v1926_v47 = vadd.f32 -0.4999988, %v1925_v45 }
 0x28e   :  { %v1933_v2 = vadd.f32 -0.16666654, %v1932_v59  ;;  %v13264_v38 = vand.u32 2147483647, %v13262_v44  ;;  %v2062_v10 = vor.u32 %v2061_v41, %v2060_v3  ;;  %v13269_v32 = vmul.u32 %v13267_v21, %v13268_v42  ;;  %v13271_v41 = vld [vmem:[#allocation177_spill] sm:$0xff]  ;;  %v13273_v42 = vld [vmem:[#allocation180_spill] sm:$0xff] }
 0x28f   :  { %v2065_v37 = vshll.u32 %v2064_v28, 23  ;;  %v2323_v43 = vadd.s32 %v2321_v11, %v9519_v61  ;;  %vm2324_vm9 = vc.u32 %v9943_v25, %v2318_v7  ;;  %v2338_v20 = vshll.u32 %v9483_v0, 16 }
 0x290   :  { %vm10755_vm7 = vcmp.le.f32.partialorder %v13264_v38, 0.7853982  ;;  %v2667_v17 = vadd.s32 %v2666_v19, %v13269_v32  ;;  %v1927_v58 = vmul.f32 %v1926_v47, %v1922_v62  ;;  %v1934_v50 = vmul.f32 %v1933_v2, %v1922_v62 }
 0x291   :  { %vm4410_vm13 = vcmp.lt.s32.totalorder %v4409_v24, 2  ;;  %v13270_v59 = vand.u32 65535, %v9356_v51  ;;  %vm12722_vm0 = vweird.f32 %v13250_v46  ;;  %v2066_v3 = vor.u32 4788187, %v2065_v37  ;;  %v13275_v37 = vld [vmem:[#allocation182_spill] sm:$0xff] }
 0x292   :  { %v2668_v45 = vadd.s32 536870912, %v2667_v17  ;;  %v2074_v61 = vsel %vm1951_vm8, %v2073_v16, %v10647_v48  ;;  %v2325_v25 = vsel %vm2324_vm9, 1, %v13012_v53  ;;  %v10778_v19 = vadd.f32 1.0, %v1927_v58  ;;  %v13288_v48 = vld [vmem:[#allocation184_spill] sm:$0xff] }
 0x293   :  { %v10768_v38 = vmul.u32 %v13270_v59, %v9212_v39  ;;  %v13272_v28 = vmov %v13270_v59  ;;  %v1935_v7 = vadd.f32 1.0, %v1934_v50  ;;  %v2069_v11 = vcvt.s32.f32 %v2062_v10 }
 0x294   :  { %v2334_v62 = vmul.u32 %v13272_v28, %v13271_v41  ;;  %v10780_v47 = vshrl.u32 %v2668_v45, 30  ;;  %v2067_v39 = vand.u32 2147483647, %v2066_v3  ;;  %v2327_v2 = vadd.s32 %v2325_v25, %v2323_v43  ;;  %v13278_v28 = vld [vmem:[#allocation83_spill] sm:$0xff] }
 0x295   :  { %v13274_v32 = vshll.u32 %v13273_v42, 16  ;;  %v10790_v51 = vmul.f32 %v1935_v7, %v10713_v23  ;;  %v12706_v16 = vxor.u32 2147483648, %v10778_v19  ;;  %v2340_v58 = vshll.u32 %v10768_v38, 16 }
 0x296   :  { %vm2342_vm2 = vc.u32 %v2334_v62, %v2338_v20  ;;  %v2344_v21 = vadd.s32 %v2338_v20, %v2334_v62  ;;  %v2670_v10 = vshll.u32 %v10780_v47, 30  ;;  %vm4411_vm9 = vcmp.eq.s32.totalorder %v4409_v24, 0 }
 0x297   :  { %vm10785_vm4 = vc.u32 %v13275_v37, %v13274_v32  ;;  %v2070_v43 = vmul.f32 %v2069_v11, %v2067_v39  ;;  %v2317_v20 = vshrl.u32 %v9511_v5, 16  ;;  %v2343_v50 = vsel %vm2342_vm2, 1, %v13012_v53 }
 0x298   :  { %v12707_v45 = vxor.u32 2147483648, %v10790_v51  ;;  %vm4414_vm3 = vcmp.eq.s32.totalorder %v4409_v24, 2  ;;  %v10798_v59 = vsub.s32 %v2667_v17, %v2670_v10  ;;  %vm2346_vm1 = vc.u32 %v2344_v21, %v2340_v58  ;;  %v13280_v10 = vld [vmem:[#allocation176_spill] sm:$0xff]  ;;  %v13281_v24 = vld [vmem:[#allocation169_spill] sm:$0xff] }
 0x299   :  { %v4416_v23 = vsel %vm4414_vm3, %v12706_v16, %v10790_v51  ;;  %v2071_v3 = vxor.u32 2147483648, %v2070_v43  ;;  %v10805_v25 = vsel %vm10755_vm7, 0, %v2074_v61  ;;  %v2328_v41 = vadd.s32 %v2327_v2, %v2317_v20 }
 0x29a   :  { %v4413_v5 = vsel %vm4411_vm9, %v10778_v19, %v12707_v45  ;;  %vm2672_vm2 = vcmp.lt.s32.totalorder %v10798_v59, 0  ;;  %v2673_v17 = vsub.s32 0, %v10798_v59  ;;  %v2345_v62 = vadd.s32 %v2343_v50, %v13278_v28 }
 0x29b   :  { %v4417_v7 = vsel %vm4410_vm13, %v4413_v5, %v4416_v23  ;;  %v2072_v11 = vsel %vm1951_vm8, %v2071_v3, %v2070_v43  ;;  %v2319_v39 = vshrl.u32 %v10742_v40, 16  ;;  %v2347_v61 = vsel %vm2346_vm1, 1, %v13012_v53 }
 0x29c   :  { %v10820_v2 = vsel %vm12722_vm0, nan, %v4417_v7  ;;  %v2075_v32 = vsel %vm10755_vm7, %v13262_v44, %v2072_v11  ;;  %v2674_v37 = vsel %vm2672_vm2, %v2673_v17, %v10798_v59  ;;  %v13282_v20 = vand.u32 65535, %v13281_v24 }
 0x29d   :  { %13279 = vst [vmem:[#allocation100_spill] sm:$0xff] %v10820_v2  ;;  %v10835_v40 = vmul.u32 %v12708_v36, %v10708_v60  ;;  %5510 = vrot.lane.b32.xlu1 %v10820_v2, %s7822_s9  ;;  %v2077_v23 = vmul.f32 %v2075_v32, %v2075_v32  ;;  %v2675_v63 = vclz %v2674_v37  ;;  %v10840_v3 = vand.u32 3, %v10805_v25 }
 0x29e   :  { %v10829_v50 = vmul.u32 %v13282_v20, %v13280_v10  ;;  %v10842_v5 = vadd.s32 %v2328_v41, %v2319_v39  ;;  %v2339_v17 = vshrl.u32 %v9483_v0, 16  ;;  %v2349_v28 = vadd.s32 %v2347_v61, %v2345_v62 }
 0x29f   :  { %v2078_v7 = vmul.f32 -0.001358992, %v2077_v23  ;;  %v2085_v11 = vmul.f32 -0.00019511016, %v2077_v23  ;;  %v2663_v24 = vadd.s32 %v10733_v52, %v10715_v14  ;;  %v7448_v20 = vadd.s32 4294967294, %v2675_v63  ;;  %v13283_v14 = vld [vmem:[#allocation175_spill] sm:$0xff] }
 0x2a0   :  { %v2341_v18 = vshrl.u32 %v10768_v38, 16  ;;  %v10848_v13 = vadd.s32 %v2344_v21, %v2340_v58  ;;  %v2350_v16 = vadd.s32 %v2349_v28, %v2339_v17  ;;  %v2473_v37 = vshll.u32 %v10829_v50, 16  ;;  %v13284_v52 = vld [vmem:[#allocation179_spill] sm:$0xff]  ;;  %v13286_v63 = vld [vmem:[#allocation186_spill] sm:$0xff] }
 0x2a1   :  { %v2079_v45 = vadd.f32 0.041655596, %v2078_v7  ;;  %v2086_v36 = vadd.f32 0.008332121, %v2085_v11  ;;  %vm7449_vm1 = vcmp.lt.s32.totalorder %v7448_v20, 0  ;;  %v2476_v0 = vsel %vm10785_vm4, 1, %v13012_v53 }
 0x2a2   :  { %v2678_v41 = vsel %vm7449_vm1, 0, %v7448_v20  ;;  %v2351_v62 = vadd.s32 %v2350_v16, %v2341_v18  ;;  %vm2354_vm3 = vc.u32 %v10842_v5, %v10848_v13  ;;  %v13285_v38 = vand.u32 65535, %v13284_v52  ;;  %v13287_v7 = vld [vmem:[#allocation183_spill] sm:$0xff] }
 0x2a3   :  { %v2080_v58 = vmul.f32 %v2079_v45, %v2077_v23  ;;  %v2087_v39 = vmul.f32 %v2086_v36, %v2077_v23  ;;  %v2679_v61 = vsub.s32 32, %v2678_v41  ;;  %vm2479_vm8 = vc.u32 %v13286_v63, %v2473_v37 }
 0x2a4   :  { %v2489_v21 = vmul.u32 %v13285_v38, %v13283_v14  ;;  %v2683_v17 = vsub.s32 4294967266, %v2678_v41  ;;  %v2355_v28 = vadd.s32 1, %v2351_v62  ;;  %v2478_v11 = vadd.s32 %v2476_v0, %v13287_v7 }
 0x2a5   :  { %v2493_v43 = vshll.u32 %v13288_v48, 16  ;;  %v2081_v20 = vadd.f32 -0.4999988, %v2080_v58  ;;  %v2088_v18 = vadd.f32 -0.16666654, %v2087_v39  ;;  %v2681_v16 = vshrl.u32 %v2663_v24, %v2679_v61  ;;  %v13290_v58 = vld [vmem:[#allocation171_spill] sm:$0xff] }
 0x2a6   :  { %v13289_v2 = vmov %v13285_v38  ;;  %v2680_v45 = vshll.u32 %v10798_v59, %v2678_v41  ;;  %v2684_v36 = vadd.s32 127, %v2683_v17  ;;  %v2356_v37 = vsel %vm2354_vm3, %v2355_v28, %v2351_v62  ;;  %v13291_v24 = vld [vmem:[#allocation192_spill] sm:$0xff] }
 0x2a7   :  { %v10865_v8 = vmul.u32 %v13289_v2, %v13280_v10  ;;  %v2480_v14 = vsel %vm2479_vm8, 1, %v13012_v53  ;;  %v2082_v0 = vmul.f32 %v2081_v20, %v2077_v23  ;;  %v2089_v38 = vmul.f32 %v2088_v18, %v2077_v23  ;;  %v13293_v41 = vld [vmem:[#allocation68_spill] sm:$0xff] }
 0x2a8   :  { %vm4564_vm7 = vcmp.lt.s32.totalorder %v10840_v3, 2  ;;  %v13292_v39 = vmul.u32 %v13290_v58, %v13291_v24  ;;  %vm12720_vm13 = vweird.f32 %v13262_v44  ;;  %v2682_v2 = vor.u32 %v2681_v16, %v2680_v45 }
 0x2a9   :  { %v2685_v10 = vshll.u32 %v2684_v36, 23  ;;  %v2472_v59 = vshrl.u32 %v13273_v42, 16  ;;  %vm2497_vm4 = vc.u32 %v2489_v21, %v2493_v43  ;;  %vm2571_vm9 = vcmp.lt.s32.totalorder %v13293_v41, 0  ;;  %v13294_v42 = vld [vmem:[#allocation185_spill] sm:$0xff] }
 0x2aa   :  { %v2357_v61 = vadd.s32 %v2356_v37, %v13292_v39  ;;  %v10879_v62 = vadd.f32 1.0, %v2082_v0  ;;  %v2090_v52 = vadd.f32 1.0, %v2089_v38  ;;  %v2482_v23 = vadd.s32 %v2480_v14, %v2478_v11 }
 0x2ab   :  { %v2686_v17 = vor.u32 4788187, %v2685_v10  ;;  %v2495_v28 = vshll.u32 %v10865_v8, 16  ;;  %v2498_v7 = vsel %vm2497_vm4, 1, %v13012_v53  ;;  %v2499_v20 = vadd.s32 %v2493_v43, %v2489_v21 }
 0x2ac   :  { %v2358_v63 = vadd.s32 536870912, %v2357_v61  ;;  %v10883_v18 = vmul.f32 %v2090_v52, %v2075_v32  ;;  %v12713_v16 = vxor.u32 2147483648, %v10879_v62  ;;  %v2500_v36 = vadd.s32 %v2498_v7, %v13294_v42 }
 0x2ad   :  { %vm4565_vm2 = vcmp.eq.s32.totalorder %v10840_v3, 0  ;;  %v2687_v37 = vand.u32 2147483647, %v2686_v17  ;;  %v2689_v0 = vcvt.s32.f32 %v2682_v2  ;;  %vm2501_vm1 = vc.u32 %v2499_v20, %v2495_v28 }
 0x2ae   :  { %v10886_v45 = vshrl.u32 %v2358_v63, 30  ;;  %v12714_v11 = vxor.u32 2147483648, %v10883_v18  ;;  %vm4568_vm3 = vcmp.eq.s32.totalorder %v10840_v3, 2  ;;  %v2483_v43 = vadd.s32 %v2482_v23, %v2472_v59 }
 0x2af   :  { %v2690_v32 = vmul.f32 %v2689_v0, %v2687_v37  ;;  %v2693_v21 = vsub.s32 4, %v10780_v47  ;;  %v2474_v38 = vshrl.u32 %v10829_v50, 16  ;;  %v2502_v58 = vsel %vm2501_vm1, 1, %v13012_v53 }
 0x2b0   :  { %v2360_v14 = vshll.u32 %v10886_v45, 30  ;;  %v4567_v24 = vsel %vm4565_vm2, %v10879_v62, %v12714_v11  ;;  %v4570_v39 = vsel %vm4568_vm3, %v12713_v16, %v10883_v18  ;;  %v2504_v10 = vadd.s32 %v2502_v58, %v2500_v36 }
 0x2b1   :  { %v4571_v59 = vsel %vm4564_vm7, %v4567_v24, %v4570_v39  ;;  %v13295_v52 = vand.u32 2147483647, %v13293_v41  ;;  %v2691_v63 = vxor.u32 2147483648, %v2690_v32  ;;  %v2494_v23 = vshrl.u32 %v13288_v48, 16 }
 0x2b2   :  { %v10902_v2 = vsub.s32 %v2357_v61, %v2360_v14  ;;  %v10915_v17 = vsel %vm12720_vm13, nan, %v4571_v59  ;;  %v10919_v7 = vadd.s32 %v2483_v43, %v2474_v38  ;;  %v2694_v48 = vsel %vm2571_vm9, %v2693_v21, %v10780_v47 }
 0x2b3   :  { %vm10908_vm8 = vcmp.le.f32.partialorder %v13295_v52, 0.7853982  ;;  %13298 = vst [vmem:[#allocation117_spill] sm:$0xff] %v10915_v17  ;;  %5512 = vrot.lane.b32.xlu2 %v10915_v17, %s7822_s9  ;;  %v2692_v3 = vsel %vm2571_vm9, %v2691_v63, %v2690_v32  ;;  %v2496_v42 = vshrl.u32 %v10865_v8, 16  ;;  %v2505_v36 = vadd.s32 %v2504_v10, %v2494_v23  ;;  %v13307_v32 = vld [vmem:[#allocation87_spill] sm:$0xff] }
 0x2b4   :  { %vm2362_vm4 = vcmp.lt.s32.totalorder %v10902_v2, 0  ;;  %v2363_v61 = vsub.s32 0, %v10902_v2  ;;  %v2781_v37 = vshll.u32 %v10835_v40, 16  ;;  %v10933_v0 = vsel %vm10908_vm8, %v13293_v41, %v2692_v3 }
 0x2b5   :  { %v10936_v43 = vadd.s32 %v2499_v20, %v2495_v28  ;;  %v2697_v38 = vmul.f32 %v10933_v0, %v10933_v0  ;;  %v2506_v21 = vadd.s32 %v2505_v36, %v2496_v42  ;;  %v13299_v8 = vand.u32 65535, %v10705_v26 }
 0x2b6   :  { %v2364_v14 = vsel %vm2362_vm4, %v2363_v61, %v10902_v2  ;;  %v2798_v24 = vshrl.u32 %v10724_v12, 16  ;;  %v10947_v39 = vsel %vm10908_vm8, 0, %v2694_v48  ;;  %v13300_v52 = vshrl.u32 %v10705_v26, 16 }
 0x2b7   :  { %v2365_v47 = vclz %v2364_v14  ;;  %v2777_v58 = vmul.u32 %v13299_v8, %v10708_v60  ;;  %vm2509_vm7 = vc.u32 %v10919_v7, %v10936_v43  ;;  %v2698_v28 = vmul.f32 -0.001358992, %v2697_v38 }
 0x2b8   :  { %v2705_v20 = vmul.f32 -0.00019511016, %v2697_v38  ;;  %v2510_v59 = vadd.s32 1, %v2506_v21  ;;  %v2780_v63 = vmul.u32 %v13300_v52, %v10727_v29  ;;  %v13303_v50 = vmov %v13299_v8  ;;  %v13304_v8 = vld [vmem:[#allocation168_spill] sm:$0xff]  ;;  %v13305_v52 = vld [vmem:[#allocation178_spill] sm:$0xff] }
 0x2b9   :  { %v7442_v10 = vadd.s32 4294967294, %v2365_v47  ;;  %vm10954_vm9 = vc.u32 %v2777_v58, %v2781_v37  ;;  %v2787_v61 = vadd.s32 %v2781_v37, %v2777_v58  ;;  %v10961_v3 = vmul.u32 %v13303_v50, %v10727_v29 }
 0x2ba   :  { %v2699_v48 = vadd.f32 0.041655596, %v2698_v28  ;;  %v2706_v42 = vadd.f32 0.008332121, %v2705_v20  ;;  %v2511_v36 = vsel %vm2509_vm7, %v2510_v59, %v2506_v21  ;;  %v10964_v14 = vand.u32 3, %v10947_v39 }
 0x2bb   :  { %vm7443_vm2 = vcmp.lt.s32.totalorder %v7442_v10, 0  ;;  %v13306_v16 = vmul.u32 %v13304_v8, %v13305_v52  ;;  %v543_v17 = vadd.s32 3, %v13307_v32  ;;  %v2353_v26 = vadd.s32 %v10848_v13, %v10842_v5 }
 0x2bc   :  { %v2368_v47 = vsel %vm7443_vm2, 0, %v7442_v10  ;;  %v2700_v37 = vmul.f32 %v2699_v48, %v2697_v38  ;;  %v2707_v58 = vmul.f32 %v2706_v42, %v2697_v38  ;;  %v10973_v28 = vmul.u32 %v2798_v24, %v10708_v60 }
 0x2bd   :  { %v2512_v11 = vadd.s32 %v2511_v36, %v13306_v16  ;;  %v2369_v50 = vsub.s32 32, %v2368_v47  ;;  %v2802_v21 = vmul.u32 %v2798_v24, %v10727_v29  ;;  %v2373_v20 = vsub.s32 4294967266, %v2368_v47 }
 0x2be   :  { %v2701_v10 = vadd.f32 -0.4999988, %v2700_v37  ;;  %v2708_v35 = vadd.f32 -0.16666654, %v2707_v58  ;;  %v2783_v16 = vshll.u32 %v10961_v3, 16  ;;  %vm5181_vm1 = vcmp.eq.s32.totalorder %v10964_v14, 0 }
 0x2bf   :  { %v2513_v59 = vadd.s32 536870912, %v2512_v11  ;;  %v2371_v54 = vshrl.u32 %v2353_v26, %v2369_v50  ;;  %vm5184_vm3 = vcmp.eq.s32.totalorder %v10964_v14, 2  ;;  %v2370_v32 = vshll.u32 %v10902_v2, %v2368_v47  ;;  %v13308_v37 = vld [vmem:[#allocation150_spill] sm:$0xff] }
 0x2c0   :  { %v2374_v13 = vadd.s32 127, %v2373_v20  ;;  %v2786_v24 = vsel %vm10954_vm9, 1, %v13012_v53  ;;  %v2702_v48 = vmul.f32 %v2701_v10, %v2697_v38  ;;  %v2709_v42 = vmul.f32 %v2708_v35, %v2697_v38 }
 0x2c1   :  { %v10980_v5 = vshrl.u32 %v2513_v59, 30  ;;  %vm5180_vm8 = vcmp.lt.s32.totalorder %v10964_v14, 2  ;;  %v10986_v36 = vand.u32 3, %v543_v17  ;;  %vm2789_vm4 = vc.u32 %v2787_v61, %v2783_v16 }
 0x2c2   :  { %vm2712_vm7 = vweird.f32 %v13293_v41  ;;  %v2372_v8 = vor.u32 %v2371_v54, %v2370_v32  ;;  %v2375_v52 = vshll.u32 %v2374_v13, 23  ;;  %v2383_v2 = vsub.s32 4, %v10886_v45 }
 0x2c3   :  { %v2515_v47 = vshll.u32 %v10980_v5, 30  ;;  %vm2261_vm2 = vcmp.lt.s32.totalorder %v13308_v37, 0  ;;  %v10992_v58 = vadd.f32 1.0, %v2702_v48  ;;  %v2710_v23 = vadd.f32 1.0, %v2709_v42 }
 0x2c4   :  { %v2788_v26 = vadd.s32 %v2786_v24, %v2780_v63  ;;  %v2803_v35 = vshll.u32 %v10973_v28, 16  ;;  %v13309_v17 = vand.u32 2147483647, %v13308_v37  ;;  %v2376_v54 = vor.u32 4788187, %v2375_v52 }
 0x2c5   :  { %v2516_v61 = vsub.s32 %v2512_v11, %v2515_v47  ;;  %v2790_v50 = vsel %vm2789_vm4, 1, %v13012_v53  ;;  %v13312_v20 = vand.u32 65535, %v10724_v12  ;;  %v11006_v10 = vmul.f32 %v2710_v23, %v10933_v0 }
 0x2c6   :  { %vm10997_vm9 = vcmp.le.f32.partialorder %v13309_v17, 0.7853982  ;;  %v2720_v63 = vxor.u32 2147483648, %v10992_v58  ;;  %v2508_v16 = vadd.s32 %v10936_v43, %v10919_v7  ;;  %v2377_v24 = vand.u32 2147483647, %v2376_v54 }
 0x2c7   :  { %v2801_v59 = vmul.u32 %v13312_v20, %v10727_v29  ;;  %v13313_v32 = vmov %v13312_v20  ;;  %v2379_v11 = vcvt.s32.f32 %v2372_v8  ;;  %vm2517_vm13 = vcmp.lt.s32.totalorder %v2516_v61, 0 }
 0x2c8   :  { %v2799_v13 = vmul.u32 %v13313_v32, %v10708_v60  ;;  %v2518_v48 = vsub.s32 0, %v2516_v61  ;;  %vm545_vm4 = vcmp.lt.s32.totalorder %v10986_v36, 2  ;;  %v2717_v29 = vxor.u32 2147483648, %v11006_v10 }
 0x2c9   :  { %vm546_vm15 = vcmp.eq.s32.totalorder %v10986_v36, 0  ;;  %v2792_v0 = vadd.s32 %v2790_v50, %v2788_v26  ;;  %v2380_v42 = vmul.f32 %v2379_v11, %v2377_v24  ;;  %v2782_v7 = vshrl.u32 %v10835_v40, 16 }
 0x2ca   :  { %vm2807_vm0 = vc.u32 %v2799_v13, %v2803_v35  ;;  %v2519_v52 = vsel %vm2517_vm13, %v2518_v48, %v2516_v61  ;;  %v2805_v43 = vshll.u32 %v2801_v59, 16  ;;  %v5183_v60 = vsel %vm5181_vm1, %v10992_v58, %v2717_v29 }
 0x2cb   :  { %v5186_v12 = vsel %vm5184_vm3, %v2720_v63, %v11006_v10  ;;  %v2520_v8 = vclz %v2519_v52  ;;  %v2808_v47 = vsel %vm2807_vm0, 1, %v13012_v53  ;;  %v2381_v40 = vxor.u32 2147483648, %v2380_v42 }
 0x2cc   :  { %v5187_v23 = vsel %vm5180_vm8, %v5183_v60, %v5186_v12  ;;  %v2809_v26 = vadd.s32 %v2803_v35, %v2799_v13  ;;  %v2810_v17 = vadd.s32 %v2808_v47, %v2802_v21  ;;  %vm549_vm13 = vcmp.eq.s32.totalorder %v10986_v36, 2 }
 0x2cd   :  { %v11033_v54 = vsel %vm2712_vm7, nan, %v5187_v23  ;;  %v7445_v50 = vadd.s32 4294967294, %v2520_v8  ;;  %v2793_v20 = vadd.s32 %v2792_v0, %v2782_v7  ;;  %v2382_v32 = vsel %vm2261_vm2, %v2381_v40, %v2380_v42 }
 0x2ce   :  { %13314 = vst [vmem:[#allocation115_spill] sm:$0xff] %v11033_v54  ;;  %5520 = vrot.lane.b32.xlu0 %v11033_v54, %s7822_s9  ;;  %v13315_v14 = vxor.u32 2147483648, %v9759_v22  ;;  %v13316_v35 = vxor.u32 2147483648, %v9743_v27  ;;  %vm2811_vm0 = vc.u32 %v2809_v26, %v2805_v43  ;;  %v2385_v24 = vsel %vm10997_vm9, %v13308_v37, %v2382_v32 }
 0x2cf   :  { %vm7446_vm1 = vcmp.lt.s32.totalorder %v7445_v50, 0  ;;  %v2784_v11 = vshrl.u32 %v10961_v3, 16  ;;  %v2812_v48 = vsel %vm2811_vm0, 1, %v13012_v53  ;;  %v2387_v0 = vmul.f32 %v2385_v24, %v2385_v24 }
 0x2d0   :  { %v548_v21 = vsel %vm546_vm15, %v9743_v27, %v13315_v14  ;;  %v551_v13 = vsel %vm549_vm13, %v13316_v35, %v9759_v22  ;;  %v2523_v42 = vsel %vm7446_vm1, 0, %v7445_v50  ;;  %v2804_v52 = vshrl.u32 %v10973_v28, 16 }
 0x2d1   :  { %v2814_v7 = vadd.s32 %v2812_v48, %v2810_v17  ;;  %v2524_v60 = vsub.s32 32, %v2523_v42  ;;  %v2528_v12 = vsub.s32 4294967266, %v2523_v42  ;;  %v552_v27 = vsel %vm545_vm4, %v548_v21, %v551_v13 }
 0x2d2   :  { %v11056_v22 = vadd.s32 %v2793_v20, %v2784_v11  ;;  %v2388_v8 = vmul.f32 -0.001358992, %v2387_v0  ;;  %v2395_v47 = vmul.f32 -0.00019511016, %v2387_v0  ;;  %v2806_v23 = vshrl.u32 %v2801_v59, 16 }
 0x2d3   :  { %v2815_v40 = vadd.s32 %v2814_v7, %v2804_v52  ;;  %v2525_v32 = vshll.u32 %v2516_v61, %v2523_v42  ;;  %v2526_v3 = vshrl.u32 %v2508_v16, %v2524_v60  ;;  %v2529_v14 = vadd.s32 127, %v2528_v12 }
 0x2d4   :  { %v11058_v53 = vadd.s32 %v2809_v26, %v2805_v43  ;;  %v2763_v28 = vsel %vm2757_vm11, %v10097_v31, %v10458_v1  ;;  %v2389_v17 = vadd.f32 0.041655596, %v2388_v8  ;;  %v2396_v50 = vadd.f32 0.008332121, %v2395_v47  ;;  %v13317_v47 = vld [vmem:[#allocation141_spill] sm:$0xff] }
 0x2d5   :  { %v2816_v36 = vadd.s32 %v2815_v40, %v2806_v23  ;;  %v2527_v21 = vor.u32 %v2526_v3, %v2525_v32  ;;  %v2530_v20 = vshll.u32 %v2529_v14, 23  ;;  %v11066_v35 = vsel %vm542_vm10, nan, %v552_v27 }
 0x2d6   :  { %vm2819_vm15 = vc.u32 %v11056_v22, %v11058_v53  ;;  %v2384_v61 = vsel %vm2261_vm2, %v2383_v2, %v10886_v45  ;;  %v2390_v55 = vmul.f32 %v2389_v17, %v2387_v0  ;;  %v2397_v31 = vmul.f32 %v2396_v50, %v2387_v0  ;;  %5888 = vrot.lane.b32.xlu0 %v11066_v35, %s7806_s22 }
 0x2d7   :  { %v2820_v1 = vadd.s32 1, %v2816_v36  ;;  %v2817_v59 = vmul.u32 %v10376_v9, %v2763_v28  ;;  %v2531_v57 = vor.u32 4788187, %v2530_v20  ;;  %v11080_v13 = vsel %vm10997_vm9, 0, %v2384_v61 }
 0x2d8   :  { %v2391_v16 = vadd.f32 -0.4999988, %v2390_v55  ;;  %v2398_v43 = vadd.f32 -0.16666654, %v2397_v31  ;;  %v2534_v48 = vcvt.s32.f32 %v2527_v21  ;;  %v4871_v9 = vand.u32 3, %v11080_v13 }
 0x2d9   :  { %v2821_v26 = vsel %vm2819_vm15, %v2820_v1, %v2816_v36  ;;  %v2532_v11 = vand.u32 2147483647, %v2531_v57  ;;  %vm2416_vm10 = vcmp.lt.s32.totalorder %v13317_v47, 0  ;;  %v13318_v40 = vand.u32 2147483647, %v13317_v47 }
 0x2da   :  { %v2822_v42 = vadd.s32 %v2821_v26, %v2817_v59  ;;  %v2392_v45 = vmul.f32 %v2391_v16, %v2387_v0  ;;  %v2399_v2 = vmul.f32 %v2398_v43, %v2387_v0  ;;  %vm4873_vm3 = vcmp.eq.s32.totalorder %v4871_v9, 0 }
 0x2db   :  { %v2535_v52 = vmul.f32 %v2534_v48, %v2532_v11  ;;  %vm11093_vm11 = vcmp.le.f32.partialorder %v13318_v40, 0.7853982  ;;  %vm4876_vm8 = vcmp.eq.s32.totalorder %v4871_v9, 2  ;;  %v2538_v28 = vsub.s32 4, %v10980_v5 }
 0x2dc   :  { %v2823_v7 = vadd.s32 536870912, %v2822_v42  ;;  %v11082_v60 = vadd.f32 1.0, %v2392_v45  ;;  %v2400_v12 = vadd.f32 1.0, %v2399_v2  ;;  %v1008_v36 = vadd.s32 3, %v10057_v34 }
 0x2dd   :  { %v2536_v27 = vxor.u32 2147483648, %v2535_v52  ;;  %vm2402_vm2 = vweird.f32 %v13308_v37  ;;  %vm4872_vm9 = vcmp.lt.s32.totalorder %v4871_v9, 2  ;;  %v2539_v59 = vsel %vm2416_vm10, %v2538_v28, %v10980_v5 }
 0x2de   :  { %v11085_v8 = vshrl.u32 %v2823_v7, 30  ;;  %v11088_v38 = vmul.f32 %v2400_v12, %v2385_v24  ;;  %v2410_v23 = vxor.u32 2147483648, %v11082_v60  ;;  %v1009_v43 = vand.u32 3, %v1008_v36 }
 0x2df   :  { %v2537_v32 = vsel %vm2416_vm10, %v2536_v27, %v2535_v52  ;;  %v11124_v45 = vsel %vm11093_vm11, 0, %v2539_v59  ;;  %v13322_v12 = vxor.u32 2147483648, %v10140_v30  ;;  %v13323_v40 = vxor.u32 2147483648, %v10124_v33 }
 0x2e0   :  { %v2825_v3 = vshll.u32 %v11085_v8, 30  ;;  %v2407_v14 = vxor.u32 2147483648, %v11088_v38  ;;  %v2540_v24 = vsel %vm11093_vm11, %v13317_v47, %v2537_v32  ;;  %v4878_v20 = vsel %vm4876_vm8, %v2410_v23, %v11088_v38 }
 0x2e1   :  { %v2542_v17 = vmul.f32 %v2540_v24, %v2540_v24  ;;  %vm1011_vm13 = vcmp.eq.s32.totalorder %v1009_v43, 0  ;;  %vm1010_vm0 = vcmp.lt.s32.totalorder %v1009_v43, 2  ;;  %vm1014_vm1 = vcmp.eq.s32.totalorder %v1009_v43, 2 }
 0x2e2   :  { %v2826_v50 = vsub.s32 %v2822_v42, %v2825_v3  ;;  %v4875_v21 = vsel %vm4873_vm3, %v11082_v60, %v2407_v14  ;;  %v1013_v5 = vsel %vm1011_vm13, %v10124_v33, %v13322_v12  ;;  %v1016_v32 = vsel %vm1014_vm1, %v13323_v40, %v10140_v30 }
 0x2e3   :  { %v4879_v61 = vsel %vm4872_vm9, %v4875_v21, %v4878_v20  ;;  %v2543_v55 = vmul.f32 -0.001358992, %v2542_v17  ;;  %v2550_v31 = vmul.f32 -0.00019511016, %v2542_v17  ;;  %v5025_v0 = vand.u32 3, %v11124_v45 }
 0x2e4   :  { %vm2827_vm4 = vcmp.lt.s32.totalorder %v2826_v50, 0  ;;  %v11115_v1 = vsel %vm2402_vm2, nan, %v4879_v61  ;;  %v2828_v34 = vsub.s32 0, %v2826_v50  ;;  %v1017_v28 = vsel %vm1010_vm0, %v1013_v5, %v1016_v32  ;;  %v13329_v32 = vld [vmem:[#allocation123_spill] sm:$0xff] }
 0x2e5   :  { %13321 = vst [vmem:[#allocation90_spill] sm:$0xff] %v11115_v1  ;;  %5516 = vrot.lane.b32.xlu1 %v11115_v1, %s7822_s9  ;;  %v2544_v57 = vadd.f32 0.041655596, %v2543_v55  ;;  %v2551_v16 = vadd.f32 0.008332121, %v2550_v31  ;;  %v2818_v20 = vadd.s32 %v11058_v53, %v11056_v22  ;;  %v13324_v31 = vld [vmem:[#allocation47_spill] sm:$0xff]  ;;  %vm2557_vm3 = vweird.f32 %v13317_v47 }
 0x2e6   :  { %v2829_v26 = vsel %vm2827_vm4, %v2828_v34, %v2826_v50  ;;  %v698_v34 = vadd.s32 3, %v13324_v31  ;;  %v11140_v59 = vsel %vm1007_vm12, nan, %v1017_v28  ;;  %vm5027_vm10 = vcmp.eq.s32.totalorder %v5025_v0, 0  ;;  %v13326_v53 = vld [vmem:[#allocation108_spill] sm:$0xff]  ;;  %v13382_v47 = vld [vmem:[#allocation113_spill] sm:$0xff] }
 0x2e7   :  { %v2545_v11 = vmul.f32 %v2544_v57, %v2542_v17  ;;  %v2552_v48 = vmul.f32 %v2551_v16, %v2542_v17  ;;  %v2830_v42 = vclz %v2829_v26  ;;  %5894 = vrot.lane.b32.xlu0 %v11140_v59, %s7806_s22  ;;  %v1473_v26 = vadd.s32 3, %v13326_v53  ;;  %v13336_v53 = vld [vmem:[#allocation45_spill] sm:$0xff] }
 0x2e8   :  { %vm5030_vm11 = vcmp.eq.s32.totalorder %v5025_v0, 2  ;;  %vm5026_vm12 = vcmp.lt.s32.totalorder %v5025_v0, 2  ;;  %v13330_v0 = vxor.u32 2147483648, %v13329_v32  ;;  %v13359_v37 = vxor.u32 2147483648, %v10883_v18 }
 0x2e9   :  { %v2546_v2 = vadd.f32 -0.4999988, %v2545_v11  ;;  %v2553_v52 = vadd.f32 -0.16666654, %v2552_v48  ;;  %v7451_v7 = vadd.s32 4294967294, %v2830_v42  ;;  %v699_v42 = vand.u32 3, %v698_v34 }
 0x2eb   :  { %v2547_v9 = vmul.f32 %v2546_v2, %v2542_v17  ;;  %v2554_v27 = vmul.f32 %v2553_v52, %v2542_v17  ;;  %vm7452_vm15 = vcmp.lt.s32.totalorder %v7451_v7, 0  ;;  %vm701_vm8 = vcmp.eq.s32.totalorder %v699_v42, 0 }
 0x2ec   :  { %v2833_v3 = vsel %vm7452_vm15, 0, %v7451_v7  ;;  %v13327_v7 = vld [vmem:[#allocation81_spill] sm:$0xff]  ;;  %vm704_vm9 = vcmp.eq.s32.totalorder %v699_v42, 2  ;;  %vm700_vm4 = vcmp.lt.s32.totalorder %v699_v42, 2  ;;  %v1938_v17 = vadd.s32 3, %v10731_v4 }
 0x2ed   :  { %v11133_v36 = vadd.f32 1.0, %v2547_v9  ;;  %v2555_v21 = vadd.f32 1.0, %v2554_v27  ;;  %v2834_v61 = vsub.s32 32, %v2833_v3  ;;  %v2838_v55 = vsub.s32 4294967266, %v2833_v3 }
 0x2ee   :  { %v2835_v16 = vshll.u32 %v2826_v50, %v2833_v3  ;;  %v1163_v12 = vadd.s32 3, %v13327_v7  ;;  %v1474_v9 = vand.u32 3, %v1473_v26  ;;  %v13331_v3 = vld [vmem:[#allocation77_spill] sm:$0xff] }
 0x2ef   :  { %v11142_v33 = vmul.f32 %v2555_v21, %v2540_v24  ;;  %v2565_v30 = vxor.u32 2147483648, %v11133_v36  ;;  %v2836_v57 = vshrl.u32 %v2818_v20, %v2834_v61  ;;  %v2839_v43 = vadd.s32 127, %v2838_v55 }
 0x2f0   :  { %v703_v28 = vsel %vm701_vm8, %v13331_v3, %v13330_v0  ;;  %v1164_v20 = vand.u32 3, %v1163_v12  ;;  %v13332_v61 = vxor.u32 2147483648, %v13331_v3  ;;  %vm1476_vm13 = vcmp.eq.s32.totalorder %v1474_v9, 0  ;;  %v13345_v3 = vld [vmem:[#allocation43_spill] sm:$0xff] }
 0x2f1   :  { %v2562_v22 = vxor.u32 2147483648, %v11142_v33  ;;  %v2837_v11 = vor.u32 %v2836_v57, %v2835_v16  ;;  %v2840_v48 = vshll.u32 %v2839_v43, 23  ;;  %v5032_v2 = vsel %vm5030_vm11, %v2565_v30, %v11142_v33  ;;  %v13333_v57 = vld [vmem:[#allocation162_spill] sm:$0xff] }
 0x2f2   :  { %v706_v55 = vsel %vm704_vm9, %v13332_v61, %v13329_v32  ;;  %vm1479_vm0 = vcmp.eq.s32.totalorder %v1474_v9, 2  ;;  %vm2726_vm1 = vcmp.lt.s32.totalorder %v13333_v57, 0  ;;  %vm1475_vm15 = vcmp.lt.s32.totalorder %v1474_v9, 2  ;;  %v13334_v16 = vld [vmem:[#allocation50_spill] sm:$0xff]  ;;  %v13343_v32 = vld [vmem:[#allocation55_spill] sm:$0xff] }
 0x2f3   :  { %v5029_v24 = vsel %vm5027_vm10, %v11133_v36, %v2562_v22  ;;  %v2841_v52 = vor.u32 4788187, %v2840_v48  ;;  %v2844_v40 = vcvt.s32.f32 %v2837_v11  ;;  %v707_v34 = vsel %vm700_vm4, %v703_v28, %v706_v55 }
 0x2f4   :  { %v5033_v50 = vsel %vm5026_vm12, %v5029_v24, %v5032_v2  ;;  %v13335_v43 = vxor.u32 2147483648, %v13334_v16  ;;  %v13337_v11 = vxor.u32 2147483648, %v13336_v53  ;;  %v13338_v42 = vand.u32 2147483647, %v13333_v57 }
 0x2f5   :  { %v11159_v5 = vsel %vm2557_vm3, nan, %v5033_v50  ;;  %v2842_v27 = vand.u32 2147483647, %v2841_v52  ;;  %vm1166_vm11 = vcmp.eq.s32.totalorder %v1164_v20, 0  ;;  %v11190_v7 = vsel %vm697_vm5, nan, %v707_v34 }
 0x2f6   :  { %13328 = vst [vmem:[#allocation101_spill] sm:$0xff] %v11159_v5  ;;  %5518 = vrot.lane.b32.xlu2 %v11159_v5, %s7822_s9  ;;  %v1478_v26 = vsel %vm1476_vm13, %v13336_v53, %v13335_v43  ;;  %v1481_v48 = vsel %vm1479_vm0, %v13337_v11, %v13334_v16  ;;  %vm11179_vm10 = vcmp.le.f32.partialorder %v13338_v42, 0.7853982  ;;  %v13344_v0 = vxor.u32 2147483648, %v13343_v32 }
 0x2f7   :  { %v2845_v21 = vmul.f32 %v2844_v40, %v2842_v27  ;;  %v1482_v2 = vsel %vm1475_vm15, %v1478_v26, %v1481_v48  ;;  %v1628_v27 = vadd.s32 3, %v10494_v6  ;;  %vm1165_vm5 = vcmp.lt.s32.totalorder %v1164_v20, 2 }
 0x2f8   :  { %v11194_v9 = vsel %vm1472_vm14, nan, %v1482_v2  ;;  %v1168_v28 = vsel %vm1166_vm11, %v13345_v3, %v13344_v0  ;;  %vm1169_vm12 = vcmp.eq.s32.totalorder %v1164_v20, 2  ;;  %v2848_v61 = vsub.s32 4, %v11085_v8 }
 0x2f9   :  { %v2846_v31 = vxor.u32 2147483648, %v2845_v21  ;;  %5900 = vrot.lane.b32.xlu0 %v11194_v9, %s7806_s22  ;;  %v13346_v6 = vxor.u32 2147483648, %v13345_v3  ;;  %v1629_v43 = vand.u32 3, %v1628_v27  ;;  %v2403_v53 = vadd.s32 3, %v11080_v13 }
 0x2fa   :  { %v13348_v48 = vxor.u32 2147483648, %v10778_v19  ;;  %vm13350_vm4 = vweird.f32 %v13250_v46  ;;  %v2093_v0 = vadd.s32 3, %v10805_v25  ;;  %v13352_v46 = vxor.u32 2147483648, %v10563_v56 }
 0x2fb   :  { %v2847_v4 = vsel %vm2726_vm1, %v2846_v31, %v2845_v21  ;;  %v1939_v21 = vand.u32 3, %v1938_v17  ;;  %v1171_v34 = vsel %vm1169_vm12, %v13346_v6, %v13343_v32  ;;  %v13347_v17 = vxor.u32 2147483648, %v10790_v51 }
 0x2fc   :  { %v2850_v50 = vsel %vm11179_vm10, %v13333_v57, %v2847_v4  ;;  %v1172_v16 = vsel %vm1165_vm5, %v1168_v28, %v1171_v34  ;;  %v2849_v4 = vsel %vm2726_vm1, %v2848_v61, %v11085_v8  ;;  %v2404_v3 = vand.u32 3, %v2403_v53  ;;  %v13351_v28 = vld [vmem:[#allocation84_spill] sm:$0xff] }
 0x2fd   :  { %v2852_v40 = vmul.f32 %v2850_v50, %v2850_v50  ;;  %vm1941_vm14 = vcmp.eq.s32.totalorder %v1939_v21, 0  ;;  %vm1944_vm8 = vcmp.eq.s32.totalorder %v1939_v21, 2  ;;  %vm1940_vm9 = vcmp.lt.s32.totalorder %v1939_v21, 2 }
 0x2fe   :  { %5890 = vrot.lane.b32.xlu2 %v11190_v7, %s7806_s22  ;;  %v1943_v20 = vsel %vm1941_vm14, %v10778_v19, %v13347_v17  ;;  %v1946_v42 = vsel %vm1944_vm8, %v13348_v48, %v10790_v51  ;;  %v11220_v27 = vsel %vm1162_vm6, nan, %v1172_v16  ;;  %vm1631_vm13 = vcmp.eq.s32.totalorder %v1629_v43, 0  ;;  %v5817_v17 = vpop.permute.xlu2 %5816  ;;  %v13355_v48 = vld [vmem:[#allocation93_spill] sm:$0xff] }
 0x2ff   :  { %v2853_v55 = vmul.f32 -0.001358992, %v2852_v40  ;;  %v2860_v31 = vmul.f32 -0.00019511016, %v2852_v40  ;;  %v1947_v13 = vsel %vm1940_vm9, %v1943_v20, %v1946_v42  ;;  %v2851_v8 = vsel %vm11179_vm10, 0, %v2849_v4 }
 0x300   :  { %v11224_v32 = vsel %vm13350_vm4, nan, %v1947_v13  ;;  %v853_v21 = vadd.s32 3, %v13351_v28  ;;  %v1633_v61 = vsel %vm1631_vm13, %v10553_v15, %v13352_v46  ;;  %vm1630_vm6 = vcmp.lt.s32.totalorder %v1629_v43, 2 }
 0x301   :  { %v2854_v26 = vadd.f32 0.041655596, %v2853_v55  ;;  %v2861_v11 = vadd.f32 0.008332121, %v2860_v31  ;;  %5906 = vrot.lane.b32.xlu0 %v11224_v32, %s7806_s22  ;;  %vm1634_vm0 = vcmp.eq.s32.totalorder %v1629_v43, 2  ;;  %v13353_v31 = vxor.u32 2147483648, %v10553_v15 }
 0x302   :  { %v2094_v34 = vand.u32 3, %v2093_v0  ;;  %vm2406_vm1 = vcmp.eq.s32.totalorder %v2404_v3, 0  ;;  %vm2409_vm15 = vcmp.eq.s32.totalorder %v2404_v3, 2  ;;  %vm2405_vm10 = vcmp.lt.s32.totalorder %v2404_v3, 2 }
 0x303   :  { %v2855_v2 = vmul.f32 %v2854_v26, %v2852_v40  ;;  %v2862_v52 = vmul.f32 %v2861_v11, %v2852_v40  ;;  %v1636_v6 = vsel %vm1634_vm0, %v13353_v31, %v10563_v56  ;;  %v2868_v26 = vadd.s32 3, %v2851_v8 }
 0x304   :  { %v1637_v53 = vsel %vm1630_vm6, %v1633_v61, %v1636_v6  ;;  %v5333_v11 = vand.u32 3, %v2851_v8  ;;  %v2411_v43 = vsel %vm2409_vm15, %v2410_v23, %v11088_v38  ;;  %vm13354_vm11 = vcmask 64512   ;;  %v13358_v23 = vld [vmem:[#allocation112_spill] sm:$0xff]  ;;  %v13362_v61 = vld [vmem:[#allocation118_spill] sm:$0xff] }
 0x305   :  { %v2856_v19 = vadd.f32 -0.4999988, %v2855_v2  ;;  %v2863_v51 = vadd.f32 -0.16666654, %v2862_v52  ;;  %7507 = vmatpush.xpose.msk.msrb.mxu1 %vm13354_vm11, %v5817_v17  ;;  %vm2867_vm5 = vweird.f32 %v13333_v57  ;;  %vm13356_vm12 = vweird.f32 %v13355_v48  ;;  %v13375_v48 = vld [vmem:[#allocation121_spill] sm:$0xff] }
 0x306   :  { %5896 = vrot.lane.b32.xlu2 %v11220_v27, %s7806_s22  ;;  %v11250_v42 = vsel %vm13356_vm12, nan, %v1637_v53  ;;  %vm2096_vm14 = vcmp.eq.s32.totalorder %v2094_v34, 0  ;;  %v2869_v38 = vand.u32 3, %v2868_v26  ;;  %vm5335_vm8 = vcmp.eq.s32.totalorder %v5333_v11, 0  ;;  %v6350_v28 = vpop.permute.xlu2 %6349  ;;  %v13370_v26 = vld [vmem:[#allocation37_spill] sm:$0xff] }
 0x307   :  { %v2857_v25 = vmul.f32 %v2856_v19, %v2852_v40  ;;  %v2864_v55 = vmul.f32 %v2863_v51, %v2852_v40  ;;  %v2408_v40 = vsel %vm2406_vm1, %v11082_v60, %v2407_v14  ;;  %v2558_v14 = vadd.s32 3, %v11124_v45 }
 0x308   :  { %v2412_v20 = vsel %vm2405_vm10, %v2408_v40, %v2411_v43  ;;  %v854_v60 = vand.u32 3, %v853_v21  ;;  %vm5338_vm9 = vcmp.eq.s32.totalorder %v5333_v11, 2  ;;  %v2098_v52 = vsel %vm2096_vm14, %v10879_v62, %v13359_v37  ;;  %vm13365_vm10 = vmmov %vm13354_vm11  ;;  %v13372_v40 = vld [vmem:[#allocation48_spill] sm:$0xff] }
 0x309   :  { %v2858_v16 = vadd.f32 1.0, %v2857_v25  ;;  %v2865_v24 = vadd.f32 1.0, %v2864_v55  ;;  %v11254_v4 = vsel %vm2402_vm2, nan, %v2412_v20  ;;  %vm5334_vm2 = vcmp.lt.s32.totalorder %v5333_v11, 2  ;;  %7513 = vmatpush.xpose.msk.msra.mxu1 %vm13365_vm10, %v6350_v28  ;;  %v13388_v28 = vld [vmem:[#allocation70_spill] sm:$0xff] }
 0x30a   :  { %13357 = vst [vmem:[#allocation110_spill] sm:$0xff] %v11254_v4  ;;  %5912 = vrot.lane.b32.xlu0 %v11254_v4, %s7806_s22  ;;  %vm2099_vm4 = vcmp.eq.s32.totalorder %v2094_v34, 2  ;;  %vm2095_vm13 = vcmp.lt.s32.totalorder %v2094_v34, 2  ;;  %v13360_v0 = vxor.u32 2147483648, %v10879_v62  ;;  %v2559_v19 = vand.u32 3, %v2558_v14  ;;  %v13364_v62 = vld [vmem:[#allocation107_spill] sm:$0xff] }
 0x30b   :  { %v2866_v15 = vmul.f32 %v2865_v24, %v2850_v50  ;;  %v2875_v56 = vxor.u32 2147483648, %v2858_v16  ;;  %v1318_v50 = vadd.s32 3, %v13358_v23  ;;  %vm2871_vm6 = vcmp.eq.s32.totalorder %v2869_v38, 0  ;;  %v13380_v23 = vld [vmem:[#allocation22_spill] sm:$0xff] }
 0x30c   :  { %v2101_v3 = vsel %vm2099_vm4, %v13360_v0, %v10883_v18  ;;  %vm2874_vm0 = vcmp.eq.s32.totalorder %v2869_v38, 2  ;;  %vm856_vm1 = vcmp.eq.s32.totalorder %v854_v60, 0  ;;  %vm2870_vm15 = vcmp.lt.s32.totalorder %v2869_v38, 2  ;;  %v13385_v0 = vld [vmem:[#allocation33_spill] sm:$0xff] }
 0x30d   :  { %v2872_v2 = vxor.u32 2147483648, %v2866_v15  ;;  %v5340_v13 = vsel %vm5338_vm9, %v2875_v56, %v2866_v15  ;;  %v2102_v8 = vsel %vm2095_vm13, %v2098_v52, %v2101_v3  ;;  %v2876_v46 = vsel %vm2874_vm0, %v2875_v56, %v2866_v15  ;;  %v6348_v15 = vpop.permute.xlu0 %6347  ;;  %v5815_v56 = vpop.permute.xlu1 %5814  ;;  %vm13376_vm13 = vmmov %vm13365_vm10 }
 0x30e   :  { %5902 = vrot.lane.b32.xlu2 %v11250_v42, %s7806_s22  ;;  %v13363_v25 = vxor.u32 2147483648, %v13362_v61  ;;  %vm859_vm11 = vcmp.eq.s32.totalorder %v854_v60, 2  ;;  %vm13366_vm12 = vweird.f32 %v13262_v44  ;;  %vm855_vm14 = vcmp.lt.s32.totalorder %v854_v60, 2  ;;  %7508 = vmatmul.msk.f32.vlgmr.msrb.gmra.mxu1 %vm13376_vm13, %v5815_v56 }
 0x30f   :  { %v5337_v45 = vsel %vm5335_vm8, %v2858_v16, %v2872_v2  ;;  %v2873_v21 = vsel %vm2871_vm6, %v2858_v16, %v2872_v2  ;;  %v11280_v31 = vsel %vm13366_vm12, nan, %v2102_v8  ;;  %v13369_v34 = vxor.u32 2147483648, %v13364_v62  ;;  %v13379_v2 = vld [vmem:[#allocation46_spill] sm:$0xff] }
 0x310   :  { %v5341_v12 = vsel %vm5334_vm2, %v5337_v45, %v5340_v13  ;;  %v858_v18 = vsel %vm856_vm1, %v13364_v62, %v13363_v25  ;;  %v2877_v55 = vsel %vm2870_vm15, %v2873_v21, %v2876_v46  ;;  %13367 = vst [vmem:[#allocation35_spill] sm:$0xff] %v11280_v31  ;;  %vm2561_vm8 = vcmp.eq.s32.totalorder %v2559_v19, 0  ;;  %v13383_v13 = vld [vmem:[#allocation49_spill] sm:$0xff]  ;;  %vm13386_vm15 = vmmov %vm13365_vm10  ;;  %v13389_v21 = vld [vmem:[#allocation80_spill] sm:$0xff] }
 0x311   :  { %v11270_v51 = vsel %vm2867_vm5, nan, %v5341_v12  ;;  %v11284_v6 = vsel %vm2867_vm5, nan, %v2877_v55  ;;  %v861_v16 = vsel %vm859_vm11, %v13369_v34, %v13362_v61  ;;  %v1319_v44 = vand.u32 3, %v1318_v50  ;;  %v13391_v25 = vld [vmem:[#allocation23_spill] sm:$0xff]  ;;  %v11348_v55 = vpop.permute.xlu2 %5494 }
 0x312   :  { %13361 = vst [vmem:[#allocation32_spill] sm:$0xff] %v11270_v51  ;;  %5522 = vrot.lane.b32.xlu1 %v11270_v51, %s7822_s9  ;;  %5918 = vrot.lane.b32.xlu0 %v11284_v6, %s7806_s22  ;;  %v862_v24 = vsel %vm855_vm14, %v858_v18, %v861_v16  ;;  %v2563_v57 = vsel %vm2561_vm8, %v11133_v36, %v2562_v22  ;;  %vm2564_vm5 = vcmp.eq.s32.totalorder %v2559_v19, 2  ;;  %vm2560_vm9 = vcmp.lt.s32.totalorder %v2559_v19, 2  ;;  %v13373_v22 = vld [vmem:[#allocation122_spill] sm:$0xff]  ;;  %vm13390_vm14 = vmmov %vm13365_vm10 }
 0x313   :  { %13368 = vst [vmem:[#allocation116_spill] sm:$0xff] %v11284_v6  ;;  %v2566_v53 = vsel %vm2564_vm5, %v2565_v30, %v11142_v33  ;;  %vm13371_vm2 = vweird.f32 %v13370_v26  ;;  %vm1321_vm4 = vcmp.eq.s32.totalorder %v1319_v44, 0  ;;  %v1783_v43 = vadd.s32 3, %v13372_v40 }
 0x314   :  { %v11301_v11 = vsel %vm13371_vm2, nan, %v862_v24  ;;  %v2567_v17 = vsel %vm2560_vm9, %v2563_v57, %v2566_v53  ;;  %v13374_v20 = vxor.u32 2147483648, %v13373_v22  ;;  %vm1324_vm6 = vcmp.eq.s32.totalorder %v1319_v44, 2  ;;  %v13395_v24 = vld [vmem:[#allocation41_spill] sm:$0xff]  ;;  %vm13396_vm2 = vmmov %vm13365_vm10 }
 0x315   :  { %v11312_v36 = vsel %vm2557_vm3, nan, %v2567_v17  ;;  %vm1320_vm0 = vcmp.lt.s32.totalorder %v1319_v44, 2  ;;  %v13378_v33 = vxor.u32 2147483648, %v13375_v48  ;;  %v1784_v38 = vand.u32 3, %v1783_v43  ;;  %v5843_v52 = vpop.permute.xlu0 %5842  ;;  %v5845_v45 = vpop.permute.xlu1 %5844  ;;  %v13398_v17 = vld [vmem:[#allocation34_spill] sm:$0xff]  ;;  %vm13400_vm13 = vmmov %vm13396_vm2 }
 0x316   :  { %5908 = vrot.lane.b32.xlu2 %v11280_v31, %s7806_s22  ;;  %v1323_v14 = vsel %vm1321_vm4, %v13375_v48, %v13374_v20  ;;  %13377 = vst [vmem:[#allocation29_spill] sm:$0xff] %v11312_v36  ;;  %vm13381_vm1 = vweird.f32 %v13380_v23  ;;  %v2248_v37 = vadd.s32 3, %v13382_v47  ;;  %v13384_v12 = vxor.u32 2147483648, %v13383_v13  ;;  %7509 = vmatpush.xpose.msk.msrb.mxu2 %vm13386_vm15, %v5845_v45 }
 0x317   :  { %v1326_v30 = vsel %vm1324_vm6, %v13378_v33, %v13373_v22  ;;  %vm1786_vm3 = vcmp.eq.s32.totalorder %v1784_v38, 0  ;;  %7514 = vmatmul.msk.f32.vlgmr.msra.gmra.mxu1 %vm13365_vm10, %v6348_v15  ;;  %vm1789_vm11 = vcmp.eq.s32.totalorder %v1784_v38, 2  ;;  %vm1785_vm12 = vcmp.lt.s32.totalorder %v1784_v38, 2  ;;  %v13401_v15 = vld [vmem:[#allocation25_spill] sm:$0xff] }
 0x318   :  { %v1327_v60 = vsel %vm1320_vm0, %v1323_v14, %v1326_v30  ;;  %v1788_v3 = vsel %vm1786_vm3, %v13385_v0, %v13384_v12  ;;  %v13387_v19 = vxor.u32 2147483648, %v13385_v0  ;;  %v2249_v61 = vand.u32 3, %v2248_v37  ;;  %v13404_v30 = vld [vmem:[#allocation106_spill] sm:$0xff] }
 0x319   :  { %v11323_v50 = vsel %vm13381_vm1, nan, %v1327_v60  ;;  %7510 = vmatmul.msk.f32.vlgmr.msrb.gmra.mxu2 %vm13390_vm14, %v5843_v52  ;;  %vm13392_vm8 = vweird.f32 %v13391_v25  ;;  %v2713_v18 = vadd.s32 3, %v10947_v39  ;;  %v13394_v16 = vxor.u32 2147483648, %v10652_v49  ;;  %v13399_v39 = vld [vmem:[#allocation114_spill] sm:$0xff]  ;;  %v5501_v22 = vpop.permute.xlu2 %5500  ;;  %v13405_v60 = vld [vmem:[#allocation91_spill] sm:$0xff] }
 0x31a   :  { %5892 = vrot.lane.b32.xlu1 %v11301_v11, %s7806_s22  ;;  %5956 = vrot.lane.b32.xlu0 %v13379_v2, %s7823_s29  ;;  %v1791_v8 = vsel %vm1789_vm11, %v13387_v19, %v13383_v13  ;;  %vm2251_vm5 = vcmp.eq.s32.totalorder %v2249_v61, 0  ;;  %vm2254_vm9 = vcmp.eq.s32.totalorder %v2249_v61, 2  ;;  %vm2250_vm4 = vcmp.lt.s32.totalorder %v2249_v61, 2  ;;  %v13409_v37 = vld [vmem:[#allocation42_spill] sm:$0xff]  ;;  %v13411_v19 = vld [vmem:[#allocation181_spill] sm:$0xff] }
 0x31b   :  { %v1792_v46 = vsel %vm1785_vm12, %v1788_v3, %v1791_v8  ;;  %v2253_v44 = vsel %vm2251_vm5, %v13395_v24, %v13394_v16  ;;  %v13397_v53 = vxor.u32 2147483648, %v13395_v24  ;;  %v2714_v43 = vand.u32 3, %v2713_v18  ;;  %v13410_v13 = vld [vmem:[#allocation30_spill] sm:$0xff]  ;;  %v13413_v16 = vld [vmem:[#allocation187_spill] sm:$0xff] }
 0x31c   :  { %v11343_v62 = vsel %vm13392_vm8, nan, %v1792_v46  ;;  %vm13402_vm6 = vweird.f32 %v13401_v15  ;;  %v5398_v8 = vrot.slane %v13411_v19, 1  ;;  %v13412_v46 = vld [vmem:[#allocation117_spill] sm:$0xff]  ;;  %vm5717_vm15 = vcmask 1041409  }
 0x31d   :  { %13393 = vst [vmem:[#allocation27_spill] sm:$0xff] %v11343_v62  ;;  %v6376_v34 = vpop.permute.xlu0 %6375  ;;  %v6378_v57 = vpop.permute.xlu1 %6377  ;;  %v2256_v26 = vsel %vm2254_vm9, %v13397_v53, %v10652_v49  ;;  %vm2716_vm0 = vcmp.eq.s32.totalorder %v2714_v43, 0  ;;  %vm2719_vm1 = vcmp.eq.s32.totalorder %v2714_v43, 2  ;;  %vm2715_vm3 = vcmp.lt.s32.totalorder %v2714_v43, 2  ;;  %vm13454_vm9 = vmmov %vm13396_vm2 }
 0x31e   :  { %5914 = vrot.lane.b32.xlu2 %v11312_v36, %s7806_s22  ;;  %7515 = vmatpush.xpose.msk.msra.mxu2 %vm13396_vm2, %v6378_v57  ;;  %v2257_v40 = vsel %vm2250_vm4, %v2253_v44, %v2256_v26  ;;  %v2718_v20 = vsel %vm2716_vm0, %v10992_v58, %v2717_v29  ;;  %v2721_v33 = vsel %vm2719_vm1, %v2720_v63, %v11006_v10  ;;  %v13407_v58 = vld [vmem:[#allocation100_spill] sm:$0xff]  ;;  %v13408_v10 = vld [vmem:[#allocation111_spill] sm:$0xff]  ;;  %v5413_v18 = vperm.slane %v5398_v8, 0  ;;  %vm13463_vm4 = vmmov %vm13396_vm2 }
 0x31f   :  { %v11364_v56 = vsel %vm13402_vm6, nan, %v2257_v40  ;;  %v2722_v38 = vsel %vm2715_vm3, %v2718_v20, %v2721_v33  ;;  %v5401_v44 = vrot.slane %v13411_v19, 4  ;;  %v13414_v8 = vld [vmem:[#allocation188_spill] sm:$0xff]  ;;  %vm5719_vm10 = vcmask 1042434   ;;  %vm13465_vm6 = vmmov %vm13396_vm2 }
 0x320   :  { %13403 = vst [vmem:[#allocation36_spill] sm:$0xff] %v11364_v56  ;;  %v11380_v29 = vsel %vm2712_vm7, nan, %v2722_v38  ;;  %v11430_v24 = vadd.f32 %v5413_v18, %v13413_v16  ;;  %v5406_v18 = vrot.slane %v13414_v8, 2  ;;  %vm5636_vm7 = vcmask 31744   ;;  %vm13466_vm0 = vmmov %vm13396_vm2 }
 0x321   :  { %7516 = vmatmul.msk.f32.vlgmr.msra.gmra.mxu2 %vm13400_vm13, %v6376_v34  ;;  %13406 = vst [vmem:[#allocation40_spill] sm:$0xff] %v11380_v29  ;;  %v5507_v23 = vpop.permute.xlu2 %5506  ;;  %v5416_v26 = vperm.slane %v5401_v44, 0  ;;  %v5412_v44 = vperm.slane %v13411_v19, 0  ;;  %vm5721_vm11 = vcmask 1043459   ;;  %vm5723_vm12 = vcmask 1044484   ;;  %vm13464_vm13 = vmmov %vm13396_vm2 }
 0x322   :  { %5898 = vrot.lane.b32.xlu1 %v11323_v50, %s7806_s22  ;;  %5962 = vrot.lane.b32.xlu0 %v13389_v21, %s7823_s29  ;;  %v5541_v57 = vmul.f32 %v11348_v55, %v11430_v24  ;;  %vm5725_vm14 = vcmask 1045509   ;;  %vm5727_vm8 = vcmask 1046534   ;;  %vm5729_vm5 = vcmask 1047559   ;;  %vm13467_vm1 = vmmov %vm13466_vm0 }
 0x323   :  { %v11445_v15 = vadd.f32 %v5416_v26, %v13413_v16  ;;  %vm13468_vm3 = vmmov %vm13466_vm0 }
 0x325   :  { %v7557_v49 = vpop.permute.xlu0 %7556  ;;  %v5493_v12 = vpop.permute.xlu1 %5492  ;;  %v5544_v55 = vmul.f32 %v5501_v22, %v11445_v15 }
 0x326   :  { %5952 = vrot.lane.b32.xlu2 %v13388_v28, %s7823_s29  ;;  %v7559_v48 = vunpack.i.h.bf16 %v7557_v49  ;;  %v7558_v14 = vunpack.i.l.bf16 %v7557_v49  ;;  %v5404_v49 = vrot.slane %v13411_v19, 7 }
 0x328   :  { %6331 = vmatpush.msra.mxu0 %v7559_v48  ;;  %6304 = vmatpush.msrb.mxu3 %v7558_v14  ;;  %v5419_v20 = vperm.slane %v5404_v49, 0 }
 0x329   :  { %v5513_v41 = vpop.permute.xlu2 %5512 }
 0x32a   :  { %5904 = vrot.lane.b32.xlu1 %v11343_v62, %s7806_s22  ;;  %5968 = vrot.lane.b32.xlu0 %v13399_v39, %s7823_s29  ;;  %v11459_v38 = vadd.f32 %v5419_v20, %v13413_v16  ;;  %v13415_v20 = vld [vmem:[#allocation189_spill] sm:$0xff] }
 0x32c   :  { %v5547_v22 = vmul.f32 %v5507_v23, %v11459_v38  ;;  %v5400_v23 = vrot.slane %v13411_v19, 3 }
 0x32d   :  { %v11384_v47 = vpop.permute.xlu0 %5496  ;;  %v5499_v25 = vpop.permute.xlu1 %5498 }
 0x32e   :  { %5958 = vrot.lane.b32.xlu2 %v13398_v17, %s7823_s29 }
 0x332   :  { %5910 = vrot.lane.b32.xlu1 %v11364_v56, %s7806_s22  ;;  %5974 = vrot.lane.b32.xlu0 %v13405_v60, %s7823_s29 }
 0x335   :  { %v11392_v63 = vpop.permute.xlu0 %5502  ;;  %v5505_v40 = vpop.permute.xlu1 %5504 }
 0x336   :  { %5964 = vrot.lane.b32.xlu2 %v13404_v30, %s7823_s29 }
 0x33a   :  { %5916 = vrot.lane.b32.xlu1 %v11380_v29, %s7806_s22  ;;  %5980 = vrot.lane.b32.xlu0 %v11033_v54, %s7823_s29  ;;  %v5409_v54 = vrot.slane %v13414_v8, 5 }
 0x33c   :  { %v5425_v60 = vperm.slane %v5409_v54, 0 }
 0x33d   :  { %v11400_v52 = vpop.permute.xlu0 %5508  ;;  %v5511_v33 = vpop.permute.xlu1 %5510 }
 0x33e   :  { %5970 = vrot.lane.b32.xlu2 %v13407_v58, %s7823_s29  ;;  %v11494_v21 = vadd.f32 %v5425_v60, %v13415_v20  ;;  %v5402_v60 = vrot.slane %v13411_v19, 5 }
 0x342   :  { %5954 = vrot.lane.b32.xlu1 %v13408_v10, %s7823_s29  ;;  %6407 = vrot.lane.b32.xlu0 %v11190_v7, %s7824_s30 }
 0x345   :  { %v11410_v0 = vpop.permute.xlu0 %5514 }
 0x346   :  { %5976 = vrot.lane.b32.xlu2 %v11115_v1, %s7823_s29  ;;  %v5415_v1 = vperm.slane %v5400_v23, 0 }
 0x348   :  { %v11491_v39 = vadd.f32 %v5415_v1, %v13413_v16 }
 0x34a   :  { %5960 = vrot.lane.b32.xlu1 %v13409_v37, %s7823_s29  ;;  %6413 = vrot.lane.b32.xlu0 %v11220_v27, %s7824_s30  ;;  %v5543_v54 = vmul.f32 %v5499_v25, %v11491_v39 }
 0x34d   :  { %v11421_v61 = vpop.permute.xlu0 %5520 }
 0x34e   :  { %5982 = vrot.lane.b32.xlu2 %v11270_v51, %s7823_s29 }
 0x350   :  { %v11406_v45 = vpop.permute.xlu2 %5518 }
 0x352   :  { %5966 = vrot.lane.b32.xlu1 %v13410_v13, %s7823_s29  ;;  %6419 = vrot.lane.b32.xlu0 %v11250_v42, %s7824_s30 }
 0x355   :  { %v11437_v53 = vpop.permute.xlu0 %5888 }
 0x356   :  { %6405 = vrot.lane.b32.xlu2 %v11066_v35, %s7824_s30 }
 0x358   :  { %v11416_v3 = vpop.permute.xlu2 %5890 }
 0x35a   :  { %5972 = vrot.lane.b32.xlu1 %v13412_v46, %s7823_s29  ;;  %6425 = vrot.lane.b32.xlu0 %v11280_v31, %s7824_s30 }
 0x35d   :  { %v11453_v48 = vpop.permute.xlu0 %5894 }
 0x35e   :  { %6411 = vrot.lane.b32.xlu2 %v11140_v59, %s7824_s30 }
 0x360   :  { %v11427_v34 = vpop.permute.xlu2 %5896 }
 0x362   :  { %5978 = vrot.lane.b32.xlu1 %v11159_v5, %s7823_s29  ;;  %5574 = vrot.lane.b32.xlu0 %v5541_v57, %s7825_s11  ;;  %v5422_v57 = vperm.slane %v5406_v18, 0  ;;  %v5517_v18 = vpop.permute.xlu1 %5516 }
 0x364   :  { %v11477_v51 = vadd.f32 %v5422_v57, %v13415_v20 }
 0x366   :  { %6417 = vrot.lane.b32.xlu2 %v11194_v9, %s7824_s30  ;;  %v5550_v5 = vmul.f32 %v5513_v41, %v11477_v51 }
 0x368   :  { %v11442_v43 = vpop.permute.xlu2 %5902 }
 0x36a   :  { %6409 = vrot.lane.b32.xlu1 %v11301_v11, %s7824_s30  ;;  %5580 = vrot.lane.b32.xlu0 %v5544_v55, %s7825_s11  ;;  %v11474_v55 = vadd.f32 %v5412_v44, %v13413_v16  ;;  %v5399_v44 = vrot.slane %v13411_v19, 2 }
 0x36b   :  { %v11471_v49 = vpop.permute.xlu0 %5900 }
 0x36c   :  { %v5414_v41 = vperm.slane %v5399_v44, 0 }
 0x36e   :  { %6423 = vrot.lane.b32.xlu2 %v11224_v32, %s7824_s30  ;;  %v11507_v1 = vadd.f32 %v5414_v41, %v13413_v16 }
 0x370   :  { %v11456_v14 = vpop.permute.xlu2 %5908  ;;  %v5542_v13 = vmul.f32 %v11384_v47, %v11507_v1 }
 0x372   :  { %6415 = vrot.lane.b32.xlu1 %v11323_v50, %s7824_s30  ;;  %5586 = vrot.lane.b32.xlu0 %v5547_v22, %s7825_s11  ;;  %v5540_v22 = vmul.f32 %v5493_v12, %v11474_v55  ;;  %v5403_v12 = vrot.slane %v13411_v19, 6 }
 0x373   :  { %v11497_v46 = vpop.permute.xlu0 %5906 }
 0x376   :  { %6429 = vrot.lane.b32.xlu2 %v11254_v4, %s7824_s30 }
 0x378   :  { %v11469_v26 = vpop.permute.xlu2 %5914 }
 0x37a   :  { %6421 = vrot.lane.b32.xlu1 %v11343_v62, %s7824_s30  ;;  %5592 = vrot.lane.b32.xlu0 %v5550_v5, %s7825_s11  ;;  %v5553_v5 = vmul.f32 %v11406_v45, %v11494_v21  ;;  %v5405_v45 = vrot.slane %v13414_v8, 1 }
 0x37c   :  { %v5421_v19 = vperm.slane %v5405_v45, 0 }
 0x37e   :  { %5572 = vrot.lane.b32.xlu2 %v5540_v22, %s7825_s11  ;;  %v5418_v22 = vperm.slane %v5403_v12, 0  ;;  %v5417_v12 = vperm.slane %v5402_v60, 0  ;;  %v11531_v60 = vadd.f32 %v5421_v19, %v13415_v20  ;;  %v5407_v19 = vrot.slane %v13414_v8, 3 }
 0x380   :  { %v11488_v57 = vpop.permute.xlu2 %5952  ;;  %v11515_v25 = vadd.f32 %v5418_v22, %v13413_v16  ;;  %v11526_v58 = vadd.f32 %v5417_v12, %v13413_v16  ;;  %v5549_v45 = vmul.f32 %v5511_v33, %v11531_v60  ;;  %v5411_v33 = vrot.slane %v13414_v8, 7 }
 0x381   :  { %v5423_v2 = vperm.slane %v5407_v19, 0 }
 0x382   :  { %6427 = vrot.lane.b32.xlu1 %v11364_v56, %s7824_s30  ;;  %5598 = vrot.lane.b32.xlu0 %v5553_v5, %s7825_s11  ;;  %v11520_v5 = vpop.permute.xlu0 %5912  ;;  %v5545_v22 = vmul.f32 %v11392_v63, %v11526_v58 }
 0x383   :  { %v11558_v28 = vadd.f32 %v5423_v2, %v13415_v20 }
 0x384   :  { %v5523_v23 = vpop.permute.xlu1 %5522 }
 0x385   :  { %v5551_v37 = vmul.f32 %v11410_v0, %v11558_v28 }
 0x386   :  { %5578 = vrot.lane.b32.xlu2 %v5543_v54, %s7825_s11  ;;  %v5546_v54 = vmul.f32 %v5505_v40, %v11515_v25  ;;  %v5420_v40 = vperm.slane %v13414_v8, 0 }
 0x388   :  { %v11510_v44 = vpop.permute.xlu2 %5958  ;;  %v11543_v63 = vadd.f32 %v5420_v40, %v13415_v20  ;;  %v5427_v40 = vperm.slane %v5411_v33, 0 }
 0x38a   :  { %5576 = vrot.lane.b32.xlu1 %v5542_v13, %s7825_s11  ;;  %v5408_v13 = vrot.slane %v13414_v8, 4  ;;  %v11539_v12 = vpop.permute.xlu0 %5918  ;;  %v5548_v17 = vmul.f32 %v11400_v52, %v11543_v63  ;;  %v5410_v52 = vrot.slane %v13414_v8, 6  ;;  %v11564_v19 = vadd.f32 %v5427_v40, %v13415_v20 }
 0x38c   :  { %v11522_v41 = vpop.permute.xlu1 %5892 }
 0x38e   :  { %5584 = vrot.lane.b32.xlu2 %v5546_v54, %s7825_s11  ;;  %v5424_v54 = vperm.slane %v5408_v13, 0 }
 0x390   :  { %v5965_v47 = vpop.permute.xlu2 %5964 }
 0x392   :  { %5582 = vrot.lane.b32.xlu1 %v5545_v22, %s7825_s11  ;;  %v11549_v22 = vadd.f32 %v5424_v54, %v13415_v20  ;;  %v5957_v6 = vpop.permute.xlu0 %5956 }
 0x393   :  { %v6002_v40 = vmul.f32 %v5957_v6, %v11507_v1 }
 0x394   :  { %v11537_v30 = vpop.permute.xlu1 %5898  ;;  %v5552_v13 = vmul.f32 %v5517_v18, %v11549_v22  ;;  %v5555_v18 = vmul.f32 %v5523_v23, %v11564_v19  ;;  %v6000_v23 = vmul.f32 %v11488_v57, %v11474_v55 }
 0x396   :  { %5590 = vrot.lane.b32.xlu2 %v5549_v45, %s7825_s11 }
 0x398   :  { %v5971_v16 = vpop.permute.xlu2 %5970 }
 0x39a   :  { %5588 = vrot.lane.b32.xlu1 %v5548_v17, %s7825_s11  ;;  %v5426_v17 = vperm.slane %v5410_v52, 0  ;;  %v5963_v0 = vpop.permute.xlu0 %5962 }
 0x39c   :  { %v11554_v45 = vpop.permute.xlu1 %5904  ;;  %v11572_v2 = vadd.f32 %v5426_v17, %v13415_v20  ;;  %v6005_v17 = vmul.f32 %v5963_v0, %v11526_v58 }
 0x39e   :  { %5596 = vrot.lane.b32.xlu2 %v5552_v13, %s7825_s11  ;;  %v5554_v8 = vmul.f32 %v11421_v61, %v11572_v2 }
 0x3a0   :  { %v5977_v54 = vpop.permute.xlu2 %5976 }
 0x3a2   :  { %5594 = vrot.lane.b32.xlu1 %v5551_v37, %s7825_s11 }
 0x3a4   :  { %v11568_v33 = vpop.permute.xlu1 %5910 }
 0x3a6   :  { %5602 = vrot.lane.b32.xlu2 %v5555_v18, %s7825_s11  ;;  %v5969_v18 = vpop.permute.xlu0 %5968 }
 0x3a7   :  { %v6008_v57 = vmul.f32 %v5969_v18, %v11543_v63 }
 0x3a8   :  { %v5983_v13 = vpop.permute.xlu2 %5982 }
 0x3aa   :  { %5600 = vrot.lane.b32.xlu1 %v5554_v8, %s7825_s11  ;;  %v6003_v8 = vmul.f32 %v11510_v44, %v11491_v39 }
 0x3ac   :  { %v11578_v52 = vpop.permute.xlu1 %5916 }
 0x3ae   :  { %6036 = vrot.lane.b32.xlu2 %v6002_v40, %s7825_s11 }
 0x3b0   :  { %v11581_v37 = vpop.permute.xlu2 %6405 }
 0x3b1   :  { %13416 = vst [vmem:[#allocation28_spill] sm:$0xff] %v11581_v37  ;;  %v5941_v37 = vmul.f32 %v11537_v30, %v11526_v58  ;;  %v5947_v30 = vmul.f32 %v11568_v33, %v11558_v28  ;;  %v5937_v33 = vmul.f32 %v11416_v3, %v11430_v24  ;;  %v5942_v3 = vmul.f32 %v11471_v49, %v11515_v25 }
 0x3b2   :  { %6032 = vrot.lane.b32.xlu1 %v6000_v23, %s7825_s11  ;;  %v5975_v23 = vpop.permute.xlu0 %5974  ;;  %v5946_v49 = vmul.f32 %v11456_v14, %v11477_v51 }
 0x3b3   :  { %v6011_v44 = vmul.f32 %v5975_v23, %v11558_v28 }
 0x3b4   :  { %v5955_v61 = vpop.permute.xlu1 %5954 }
 0x3b5   :  { %v6001_v20 = vmul.f32 %v5955_v61, %v11430_v24 }
 0x3b6   :  { %6042 = vrot.lane.b32.xlu2 %v6005_v17, %s7825_s11 }
 0x3b7   :  { %6034 = vrot.lane.b32.xlu0 %v6001_v20, %s7825_s11  ;;  %v6006_v20 = vmul.f32 %v5965_v47, %v11515_v25 }
 0x3b8   :  { %v11590_v6 = vpop.permute.xlu2 %6411 }
 0x3b9   :  { %13417 = vst [vmem:[#allocation31_spill] sm:$0xff] %v11590_v6 }
 0x3ba   :  { %6038 = vrot.lane.b32.xlu1 %v6003_v8, %s7825_s11  ;;  %v5981_v18 = vpop.permute.xlu0 %5980 }
 0x3bb   :  { %v6014_v47 = vmul.f32 %v5981_v18, %v11572_v2 }
 0x3bc   :  { %v5961_v40 = vpop.permute.xlu1 %5960 }
 0x3bd   :  { %v6004_v0 = vmul.f32 %v5961_v40, %v11445_v15 }
 0x3be   :  { %6048 = vrot.lane.b32.xlu2 %v6008_v57, %s7825_s11  ;;  %v6009_v57 = vmul.f32 %v5971_v16, %v11531_v60 }
 0x3bf   :  { %6040 = vrot.lane.b32.xlu0 %v6004_v0, %s7825_s11 }
 0x3c0   :  { %v11599_v17 = vpop.permute.xlu2 %6417 }
 0x3c1   :  { %13418 = vst [vmem:[#allocation38_spill] sm:$0xff] %v11599_v17 }
 0x3c2   :  { %6044 = vrot.lane.b32.xlu1 %v6006_v20, %s7825_s11 }
 0x3c4   :  { %v5967_v61 = vpop.permute.xlu1 %5966 }
 0x3c5   :  { %v6007_v8 = vmul.f32 %v5967_v61, %v11459_v38  ;;  %v11618_v61 = vpop.permute.xlu0 %6407 }
 0x3c6   :  { %6054 = vrot.lane.b32.xlu2 %v6011_v44, %s7825_s11  ;;  %v6012_v44 = vmul.f32 %v5977_v54, %v11549_v22  ;;  %13421 = vst [vmem:[#allocation86_spill] sm:$0xff] %v11618_v61 }
 0x3c7   :  { %6046 = vrot.lane.b32.xlu0 %v6007_v8, %s7825_s11 }
 0x3c8   :  { %v11607_v40 = vpop.permute.xlu2 %6423 }
 0x3c9   :  { %13419 = vst [vmem:[#allocation57_spill] sm:$0xff] %v11607_v40 }
 0x3ca   :  { %6050 = vrot.lane.b32.xlu1 %v6009_v57, %s7825_s11  ;;  %v6015_v57 = vmul.f32 %v5983_v13, %v11564_v19 }
 0x3cc   :  { %v5973_v0 = vpop.permute.xlu1 %5972 }
 0x3cd   :  { %v6010_v20 = vmul.f32 %v5973_v0, %v11477_v51 }
 0x3ce   :  { %6060 = vrot.lane.b32.xlu2 %v6014_v47, %s7825_s11  ;;  %v11627_v47 = vpop.permute.xlu0 %6413 }
 0x3cf   :  { %6052 = vrot.lane.b32.xlu0 %v6010_v20, %s7825_s11  ;;  %13422 = vst [vmem:[#allocation105_spill] sm:$0xff] %v11627_v47 }
 0x3d0   :  { %v11615_v23 = vpop.permute.xlu2 %6429 }
 0x3d1   :  { %13420 = vst [vmem:[#allocation58_spill] sm:$0xff] %v11615_v23 }
 0x3d2   :  { %6056 = vrot.lane.b32.xlu1 %v6012_v44, %s7825_s11 }
 0x3d4   :  { %v5979_v16 = vpop.permute.xlu1 %5978 }
 0x3d5   :  { %v6013_v8 = vmul.f32 %v5979_v16, %v11494_v21 }
 0x3d6   :  { %v11635_v44 = vpop.permute.xlu0 %6419 }
 0x3d7   :  { %6058 = vrot.lane.b32.xlu0 %v6013_v8, %s7825_s11  ;;  %13425 = vst [vmem:[#allocation51_spill] sm:$0xff] %v11635_v44 }
 0x3d8   :  { %v11623_v18 = vpop.permute.xlu2 %5572 }
 0x3da   :  { %6062 = vrot.lane.b32.xlu1 %v6015_v57, %s7825_s11 }
 0x3dc   :  { %v11629_v0 = vpop.permute.xlu1 %6409 }
 0x3dd   :  { %13423 = vst [vmem:[#allocation39_spill] sm:$0xff] %v11629_v0 }
 0x3de   :  { %v11641_v8 = vpop.permute.xlu0 %6425 }
 0x3df   :  { %13427 = vst [vmem:[#allocation60_spill] sm:$0xff] %v11641_v8 }
 0x3e0   :  { %v11631_v54 = vpop.permute.xlu2 %5578 }
 0x3e4   :  { %v11633_v20 = vpop.permute.xlu1 %6415 }
 0x3e5   :  { %13424 = vst [vmem:[#allocation53_spill] sm:$0xff] %v11633_v20 }
 0x3e6   :  { %v11649_v17 = vpop.permute.xlu0 %5574 }
 0x3e8   :  { %v11637_v23 = vpop.permute.xlu2 %5584 }
 0x3ec   :  { %v11639_v16 = vpop.permute.xlu1 %6421 }
 0x3ed   :  { %13426 = vst [vmem:[#allocation67_spill] sm:$0xff] %v11639_v16  ;;  %v5938_v16 = vmul.f32 %v11522_v41, %v11507_v1  ;;  %v5944_v41 = vmul.f32 %v11554_v45, %v11543_v63  ;;  %v5936_v45 = vmul.f32 %v11437_v53, %v11474_v55 }
 0x3ee   :  { %v11655_v20 = vpop.permute.xlu0 %5580 }
 0x3f0   :  { %v11643_v40 = vpop.permute.xlu2 %5590 }
 0x3f4   :  { %v11645_v13 = vpop.permute.xlu1 %6427 }
 0x3f5   :  { %13428 = vst [vmem:[#allocation24_spill] sm:$0xff] %v11645_v13 }
 0x3f6   :  { %v11664_v61 = vpop.permute.xlu0 %5586 }
 0x3f8   :  { %v11647_v57 = vpop.permute.xlu2 %5596 }
 0x3f9   :  { %13429 = vst [vmem:[#allocation26_spill] sm:$0xff] %v11647_v57 }
 0x3fc   :  { %v11651_v0 = vpop.permute.xlu1 %5576 }
 0x3fe   :  { %v11673_v4 = vpop.permute.xlu0 %5592 }
 0x3ff   :  { %13431 = vst [vmem:[#allocation56_spill] sm:$0xff] %v11673_v4 }
 0x400   :  { %v11653_v47 = vpop.permute.xlu2 %5602 }
 0x401   :  { %13430 = vst [vmem:[#allocation52_spill] sm:$0xff] %v11653_v47 }
 0x404   :  { %v11657_v44 = vpop.permute.xlu1 %5582 }
 0x408   :  { %v6037_v8 = vpop.permute.xlu2 %6036 }
 0x409   :  { %v6082_v6 = vadd.f32 %v6037_v8, %v5938_v16 }
 0x40b   :  { %6116 = vrot.lane.b32.xlu1 %v6082_v6, %s7820_s27 }
 0x40c   :  { %v11662_v13 = vpop.permute.xlu1 %5588 }
 0x410   :  { %v6043_v36 = vpop.permute.xlu2 %6042 }
 0x411   :  { %v6085_v47 = vadd.f32 %v6043_v36, %v5941_v37  ;;  %v11680_v37 = vpop.permute.xlu0 %5598 }
 0x413   :  { %6122 = vrot.lane.b32.xlu1 %v6085_v47, %s7820_s27 }
 0x414   :  { %v11669_v57 = vpop.permute.xlu1 %5594 }
 0x418   :  { %v6049_v16 = vpop.permute.xlu2 %6048 }
 0x419   :  { %v6088_v6 = vadd.f32 %v6049_v16, %v5944_v41  ;;  %v5950_v41 = vmul.f32 %v11578_v52, %v11572_v2 }
 0x41b   :  { %6128 = vrot.lane.b32.xlu1 %v6088_v6, %s7820_s27 }
 0x41c   :  { %v11676_v8 = vpop.permute.xlu1 %5600 }
 0x420   :  { %v6055_v10 = vpop.permute.xlu2 %6054 }
 0x421   :  { %v6091_v36 = vadd.f32 %v6055_v10, %v5947_v30 }
 0x423   :  { %6134 = vrot.lane.b32.xlu1 %v6091_v36, %s7820_s27  ;;  %v5939_v36 = vmul.f32 %v11453_v48, %v11491_v39  ;;  %v5943_v48 = vmul.f32 %v11442_v43, %v11459_v38 }
 0x424   :  { %v6033_v47 = vpop.permute.xlu1 %6032 }
 0x425   :  { %v6080_v4 = vadd.f32 %v6033_v47, %v5936_v45 }
 0x427   :  { %6112 = vrot.lane.b32.xlu0 %v6080_v4, %s7820_s27  ;;  %v5940_v4 = vmul.f32 %v11427_v34, %v11445_v15 }
 0x428   :  { %v6061_v16 = vpop.permute.xlu2 %6060 }
 0x429   :  { %v6094_v6 = vadd.f32 %v6061_v16, %v5950_v41  ;;  %v6035_v10 = vpop.permute.xlu0 %6034 }
 0x42a   :  { %v6081_v30 = vadd.f32 %v6035_v10, %v5937_v33  ;;  %v5945_v10 = vmul.f32 %v11497_v46, %v11531_v60  ;;  %v5949_v46 = vmul.f32 %v11469_v26, %v11494_v21  ;;  %v5465_v26 = vmul.f32 %v11526_v58, %v11323_v50 }
 0x42b   :  { %6140 = vrot.lane.b32.xlu1 %v6094_v6, %s7820_s27 }
 0x42c   :  { %v6039_v53 = vpop.permute.xlu1 %6038  ;;  %6114 = vrot.lane.b32.xlu2 %v6081_v30, %s7820_s27 }
 0x42d   :  { %v6083_v45 = vadd.f32 %v6039_v53, %v5939_v36 }
 0x42f   :  { %6118 = vrot.lane.b32.xlu0 %v6083_v45, %s7820_s27  ;;  %v5948_v45 = vmul.f32 %v11520_v5, %v11549_v22  ;;  %v5461_v5 = vmul.f32 %v11430_v24, %v11190_v7 }
 0x431   :  { %v6041_v52 = vpop.permute.xlu0 %6040 }
 0x432   :  { %v6084_v47 = vadd.f32 %v6041_v52, %v5940_v4 }
 0x434   :  { %v6045_v41 = vpop.permute.xlu1 %6044  ;;  %6120 = vrot.lane.b32.xlu2 %v6084_v47, %s7820_s27 }
 0x435   :  { %v6086_v16 = vadd.f32 %v6045_v41, %v5942_v3  ;;  %v5951_v3 = vmul.f32 %v11539_v12, %v11564_v19  ;;  %v5625_v12 = vadd.f32 %v11657_v44, %v5465_v26  ;;  %v5462_v44 = vmul.f32 %v11507_v1, %v11301_v11 }
 0x437   :  { %6124 = vrot.lane.b32.xlu0 %v6086_v16, %s7820_s27  ;;  %v5621_v16 = vadd.f32 %v11649_v17, %v5461_v5 }
 0x439   :  { %v6047_v33 = vpop.permute.xlu0 %6046 }
 0x43a   :  { %v6087_v6 = vadd.f32 %v6047_v33, %v5943_v48  ;;  %v5640_v48 = vsel %vm5636_vm7, %v5621_v16, 0.0  ;;  %v5652_v33 = vsel %vm5636_vm7, %v5625_v12, 0.0  ;;  %v5470_v16 = vmul.f32 %v11477_v51, %v11280_v31  ;;  %v13433_v12 = vld [vmem:[#allocation111_spill] sm:$0xff] }
 0x43c   :  { %v6051_v34 = vpop.permute.xlu1 %6050  ;;  %6126 = vrot.lane.b32.xlu2 %v6087_v6, %s7820_s27  ;;  %v5468_v6 = vmul.f32 %v11543_v63, %v11343_v62 }
 0x43d   :  { %v6089_v30 = vadd.f32 %v6051_v34, %v5945_v10  ;;  %v5471_v34 = vmul.f32 %v11558_v28, %v11364_v56 }
 0x43e   :  { %v5628_v10 = vadd.f32 %v11662_v13, %v5468_v6 }
 0x43f   :  { %6130 = vrot.lane.b32.xlu0 %v6089_v30, %s7820_s27  ;;  %v5631_v30 = vadd.f32 %v11669_v57, %v5471_v34  ;;  %v13436_v34 = vld [vmem:[#allocation29_spill] sm:$0xff] }
 0x440   :  { %v5661_v17 = vsel %vm5636_vm7, %v5628_v10, 0.0  ;;  %v13435_v10 = vld [vmem:[#allocation26_spill] sm:$0xff] }
 0x441   :  { %v6053_v36 = vpop.permute.xlu0 %6052 }
 0x442   :  { %v6090_v53 = vadd.f32 %v6053_v36, %v5946_v49  ;;  %v5670_v49 = vsel %vm5636_vm7, %v5631_v30, 0.0  ;;  %v5622_v36 = vadd.f32 %v11651_v0, %v5462_v44  ;;  %v5473_v30 = vmul.f32 %v11494_v21, %v13436_v34 }
 0x444   :  { %v6057_v43 = vpop.permute.xlu1 %6056  ;;  %6132 = vrot.lane.b32.xlu2 %v6090_v53, %s7820_s27  ;;  %v5460_v53 = vmul.f32 %v11474_v55, %v11066_v35 }
 0x445   :  { %v6092_v4 = vadd.f32 %v6057_v43, %v5948_v45  ;;  %v5643_v45 = vsel %vm5636_vm7, %v5622_v36, 0.0  ;;  %v5463_v43 = vmul.f32 %v11491_v39, %v11140_v59  ;;  %v13437_v36 = vld [vmem:[#allocation42_spill] sm:$0xff] }
 0x446   :  { %v5620_v13 = vadd.f32 %v11623_v18, %v5460_v53  ;;  %v5466_v18 = vmul.f32 %v11515_v25, %v11194_v9 }
 0x447   :  { %6136 = vrot.lane.b32.xlu0 %v6092_v4, %s7820_s27  ;;  %v5623_v57 = vadd.f32 %v11631_v54, %v5463_v43  ;;  %v5467_v54 = vmul.f32 %v11459_v38, %v11250_v42  ;;  %v5474_v43 = vmul.f32 %v11572_v2, %v11380_v29 }
 0x448   :  { %v5637_v4 = vsel %vm5636_vm7, %v5620_v13, 0.0  ;;  %v13438_v13 = vld [vmem:[#allocation116_spill] sm:$0xff] }
 0x449   :  { %v6059_v52 = vpop.permute.xlu0 %6058 }
 0x44a   :  { %v6093_v47 = vadd.f32 %v6059_v52, %v5949_v46  ;;  %v5464_v46 = vmul.f32 %v11445_v15, %v11220_v27  ;;  %v5646_v52 = vsel %vm5636_vm7, %v5623_v57, 0.0  ;;  %v5634_v57 = vadd.f32 %v11676_v8, %v5474_v43  ;;  %v13445_v8 = vld [vmem:[#allocation52_spill] sm:$0xff] }
 0x44c   :  { %v6063_v14 = vpop.permute.xlu1 %6062  ;;  %6138 = vrot.lane.b32.xlu2 %v6093_v47, %s7820_s27  ;;  %v5624_v0 = vadd.f32 %v11655_v20, %v5464_v46  ;;  %v5626_v47 = vadd.f32 %v11637_v23, %v5466_v18  ;;  %v5469_v20 = vmul.f32 %v11531_v60, %v11224_v32  ;;  %v5679_v46 = vsel %vm5636_vm7, %v5634_v57, 0.0 }
 0x44d   :  { %v6095_v41 = vadd.f32 %v6063_v14, %v5951_v3  ;;  %v5627_v14 = vadd.f32 %v11664_v61, %v5467_v54  ;;  %v13444_v54 = vld [vmem:[#allocation30_spill] sm:$0xff] }
 0x44e   :  { %v5649_v3 = vsel %vm5636_vm7, %v5624_v0, 0.0  ;;  %v5655_v5 = vsel %vm5636_vm7, %v5626_v47, 0.0  ;;  %v13442_v0 = vld [vmem:[#allocation106_spill] sm:$0xff]  ;;  %v5475_v47 = vmul.f32 %v11564_v19, %v13438_v13 }
 0x44f   :  { %6142 = vrot.lane.b32.xlu0 %v6095_v41, %s7820_s27  ;;  %v5629_v41 = vadd.f32 %v11643_v40, %v5469_v20  ;;  %v5658_v23 = vsel %vm5636_vm7, %v5627_v14, 0.0  ;;  %v13446_v20 = vld [vmem:[#allocation117_spill] sm:$0xff] }
 0x450   :  { %v5635_v14 = vadd.f32 %v13445_v8, %v5475_v47 }
 0x451   :  { %v5664_v61 = vsel %vm5636_vm7, %v5629_v41, 0.0 }
 0x455   :  { %5641 = vadd.xlane.f32.xlu1 %v5640_v48  ;;  %v13432_v48 = vld [vmem:[#allocation56_spill] sm:$0xff] }
 0x456   :  { %v5630_v26 = vadd.f32 %v13432_v48, %v5470_v16 }
 0x45d   :  { %5653 = vadd.xlane.f32.xlu1 %v5652_v33  ;;  %v13434_v33 = vld [vmem:[#allocation110_spill] sm:$0xff] }
 0x45e   :  { %v5472_v6 = vmul.f32 %v11549_v22, %v13434_v33 }
 0x460   :  { %v5632_v40 = vadd.f32 %v13435_v10, %v5472_v6  ;;  %v13447_v6 = vld [vmem:[#allocation80_spill] sm:$0xff] }
 0x462   :  { %v5673_v44 = vsel %vm5636_vm7, %v5632_v40, 0.0 }
 0x465   :  { %5662 = vadd.xlane.f32.xlu1 %v5661_v17  ;;  %v5667_v17 = vsel %vm5636_vm7, %v5630_v26, 0.0 }
 0x46d   :  { %5671 = vadd.xlane.f32.xlu1 %v5670_v49  ;;  %v5633_v49 = vadd.f32 %v11680_v37, %v5473_v30  ;;  %v13440_v37 = vld [vmem:[#allocation46_spill] sm:$0xff] }
 0x46f   :  { %v5676_v53 = vsel %vm5636_vm7, %v5633_v49, 0.0 }
 0x475   :  { %5644 = vadd.xlane.f32.xlu2 %v5643_v45  ;;  %v13439_v45 = vld [vmem:[#allocation70_spill] sm:$0xff] }
 0x479   :  { %5638 = vadd.xlane.f32.xlu0 %v5637_v4  ;;  %v13441_v4 = vld [vmem:[#allocation34_spill] sm:$0xff] }
 0x47d   :  { %5647 = vadd.xlane.f32.xlu2 %v5646_v52  ;;  %v13443_v52 = vld [vmem:[#allocation100_spill] sm:$0xff] }
 0x481   :  { %5650 = vadd.xlane.f32.xlu0 %v5649_v3 }
 0x485   :  { %5656 = vadd.xlane.f32.xlu2 %v5655_v5  ;;  %v5682_v5 = vsel %vm5636_vm7, %v5635_v14, 0.0 }
 0x486   :  { %6433 = vrot.lane.b32.xlu1 %v11380_v29, %s7824_s30  ;;  %v6115_v48 = vpop.permute.xlu2 %6114  ;;  %v13452_v29 = vld [vmem:[#allocation20_spill] sm:$0xff] }
 0x487   :  { %v6163_v8 = vsel %vm5636_vm7, %v6115_v48, 0.0 }
 0x489   :  { %5659 = vadd.xlane.f32.xlu0 %v5658_v23  ;;  %v6117_v23 = vpop.permute.xlu1 %6116 }
 0x48a   :  { %v6166_v10 = vsel %vm5636_vm7, %v6117_v23, 0.0 }
 0x48d   :  { %5665 = vadd.xlane.f32.xlu2 %v5664_v61 }
 0x48e   :  { %6471 = vrot.lane.b32.xlu1 %v13433_v12, %s7826_s5  ;;  %v6121_v40 = vpop.permute.xlu2 %6120 }
 0x491   :  { %5668 = vadd.xlane.f32.xlu0 %v5667_v17  ;;  %v6123_v26 = vpop.permute.xlu1 %6122  ;;  %v13448_v17 = vld [vmem:[#allocation114_spill] sm:$0xff] }
 0x492   :  { %v6175_v30 = vsel %vm5636_vm7, %v6123_v26, 0.0 }
 0x495   :  { %5674 = vadd.xlane.f32.xlu2 %v5673_v44 }
 0x496   :  { %6477 = vrot.lane.b32.xlu1 %v13437_v36, %s7826_s5  ;;  %v6127_v57 = vpop.permute.xlu2 %6126 }
 0x499   :  { %5677 = vadd.xlane.f32.xlu0 %v5676_v53  ;;  %v6113_v18 = vpop.permute.xlu0 %6112  ;;  %v6129_v49 = vpop.permute.xlu1 %6128  ;;  %v13449_v53 = vld [vmem:[#allocation91_spill] sm:$0xff] }
 0x49a   :  { %v6184_v43 = vsel %vm5636_vm7, %v6129_v49, 0.0  ;;  %v6181_v49 = vsel %vm5636_vm7, %v6127_v57, 0.0 }
 0x49e   :  { %v6133_v23 = vpop.permute.xlu2 %6132 }
 0x49f   :  { %v6190_v48 = vsel %vm5636_vm7, %v6133_v23, 0.0 }
 0x4a1   :  { %v6119_v3 = vpop.permute.xlu0 %6118  ;;  %v6135_v47 = vpop.permute.xlu1 %6134 }
 0x4a2   :  { %v6193_v14 = vsel %vm5636_vm7, %v6135_v47, 0.0 }
 0x4a9   :  { %v6125_v41 = vpop.permute.xlu0 %6124 }
 0x4ad   :  { %6431 = vrot.lane.b32.xlu0 %v13436_v34, %s7824_s30  ;;  %6435 = vrot.lane.b32.xlu2 %v13438_v13, %s7824_s30  ;;  %v6178_v34 = vsel %vm5636_vm7, %v6125_v41, 0.0  ;;  %v13453_v41 = vld [vmem:[#allocation101_spill] sm:$0xff] }
 0x4b1   :  { %v11807_v16 = vpop.permute.xlu0 %6130 }
 0x4b5   :  { %6469 = vrot.lane.b32.xlu0 %v13439_v45, %s7826_s5  ;;  %6473 = vrot.lane.b32.xlu2 %v13440_v37, %s7826_s5 }
 0x4b9   :  { %v11809_v61 = vpop.permute.xlu0 %6136 }
 0x4bd   :  { %6475 = vrot.lane.b32.xlu0 %v13441_v4, %s7826_s5 }
 0x4c0   :  { %5680 = vadd.xlane.f32.xlu1 %v5679_v46 }
 0x4c1   :  { %v11817_v44 = vpop.permute.xlu0 %6142 }
 0x4c5   :  { %6481 = vrot.lane.b32.xlu0 %v13442_v0, %s7826_s5 }
 0x4cd   :  { %6487 = vrot.lane.b32.xlu0 %v13443_v52, %s7826_s5 }
 0x4d9   :  { %6483 = vrot.lane.b32.xlu1 %v13444_v54, %s7826_s5 }
 0x4de   :  { %5683 = vadd.xlane.f32.xlu2 %v5682_v5  ;;  %v6172_v5 = vsel %vm5636_vm7, %v6121_v40, 0.0 }
 0x4e1   :  { %6489 = vrot.lane.b32.xlu1 %v13446_v20, %s7826_s5 }
 0x4ec   :  { %v5639_v46 = vpop.xlane.xlu0 %5638 }
 0x4f4   :  { %v5651_v26 = vpop.xlane.xlu0 %5650 }
 0x4f6   :  { %6479 = vrot.lane.b32.xlu2 %v13447_v6, %s7826_s5 }
 0x4f7   :  { %6167 = vadd.xlane.f32.xlu0 %v6166_v10  ;;  %v6141_v10 = vpop.permute.xlu1 %6140 }
 0x4fc   :  { %v5660_v13 = vpop.xlane.xlu0 %5659 }
 0x4fe   :  { %6485 = vrot.lane.b32.xlu2 %v13448_v17, %s7826_s5 }
 0x4ff   :  { %6176 = vadd.xlane.f32.xlu0 %v6175_v30  ;;  %v6202_v30 = vsel %vm5636_vm7, %v6141_v10, 0.0  ;;  %v6160_v10 = vsel %vm5636_vm7, %v6113_v18, 0.0 }
 0x504   :  { %v11828_v47 = vpop.xlane.xlu0 %5668 }
 0x506   :  { %6491 = vrot.lane.b32.xlu2 %v13449_v53, %s7826_s5 }
 0x507   :  { %6185 = vadd.xlane.f32.xlu0 %v6184_v43  ;;  %v6139_v43 = vpop.permute.xlu2 %6138 }
 0x508   :  { %v6199_v40 = vsel %vm5636_vm7, %v6139_v43, 0.0  ;;  %v5701_v43 = vperm.slane %v5639_v46, %v13452_v29 }
 0x50b   :  { %6164 = vadd.xlane.f32.xlu1 %v6163_v8 }
 0x50c   :  { %v11834_v57 = vpop.xlane.xlu0 %5677 }
 0x50f   :  { %6194 = vadd.xlane.f32.xlu0 %v6193_v14  ;;  %v5645_v8 = vpop.xlane.xlu2 %5644  ;;  %v13450_v14 = vld [vmem:[#allocation90_spill] sm:$0xff] }
 0x513   :  { %6173 = vadd.xlane.f32.xlu1 %v6172_v5 }
 0x517   :  { %6203 = vadd.xlane.f32.xlu0 %v6202_v30  ;;  %v5648_v5 = vpop.xlane.xlu2 %5647  ;;  %v5642_v30 = vpop.xlane.xlu1 %5641 }
 0x51b   :  { %6182 = vadd.xlane.f32.xlu1 %v6181_v49  ;;  %v6169_v49 = vsel %vm5636_vm7, %v6119_v3, 0.0  ;;  %v5703_v3 = vperm.slane %v5645_v8, %v13452_v29 }
 0x51f   :  { %v5657_v23 = vpop.xlane.xlu2 %5656  ;;  %v5654_v33 = vpop.xlane.xlu1 %5653 }
 0x520   :  { %v5706_v8 = vperm.slane %v5654_v33, %v13452_v29 }
 0x523   :  { %6191 = vadd.xlane.f32.xlu1 %v6190_v48  ;;  %v11837_v48 = vpop.permute.xlu0 %6431 }
 0x524   :  { %13451 = vst [vmem:[#allocation61_spill] sm:$0xff] %v11837_v48 }
 0x527   :  { %v5666_v46 = vpop.xlane.xlu2 %5665  ;;  %v5663_v62 = vpop.xlane.xlu1 %5662 }
 0x52b   :  { %6200 = vadd.xlane.f32.xlu1 %v6199_v40  ;;  %6493 = vrot.lane.b32.xlu0 %v13450_v14, %s7826_s5  ;;  %v5702_v40 = vperm.slane %v5642_v30, %v13452_v29  ;;  %v6470_v31 = vpop.permute.xlu0 %6469 }
 0x52d   :  { %v5718_v18 = vsel %vm5717_vm15, %v5702_v40, %v5701_v43  ;;  %v5367_v40 = vpop.f32.mrf.mxu3 }
 0x52e   :  { %v5720_v48 = vsel %vm5719_vm10, %v5703_v3, %v5718_v18 }
 0x52f   :  { %6161 = vadd.xlane.f32.xlu2 %v6160_v10  ;;  %v5704_v10 = vperm.slane %v5648_v5, %v13452_v29  ;;  %v6187_v5 = vsel %vm5636_vm7, %v11807_v16, 0.0  ;;  %v5675_v33 = vpop.xlane.xlu2 %5674  ;;  %v6196_v16 = vsel %vm5636_vm7, %v11809_v61, 0.0 }
 0x531   :  { %v5722_v30 = vsel %vm5721_vm11, %v5704_v10, %v5720_v48  ;;  %v6517_v10 = vmul.f32 %v6470_v31, %v11474_v55 }
 0x537   :  { %6170 = vadd.xlane.f32.xlu2 %v6169_v49  ;;  %v5705_v49 = vperm.slane %v5651_v26, %v13452_v29  ;;  %v5708_v26 = vperm.slane %v5660_v13, %v13452_v29 }
 0x539   :  { %v5724_v43 = vsel %vm5723_vm12, %v5705_v49, %v5722_v30  ;;  %v6476_v49 = vpop.permute.xlu0 %6475  ;;  %v5672_v30 = vpop.xlane.xlu1 %5671 }
 0x53a   :  { %v5726_v48 = vsel %vm5725_vm14, %v5706_v8, %v5724_v43  ;;  %v6520_v43 = vmul.f32 %v6476_v49, %v11491_v39  ;;  %v11871_v8 = vpop.permute.xlu2 %6435  ;;  %v5711_v49 = vperm.slane %v11828_v47, %v13452_v29 }
 0x53b   :  { %13456 = vst [vmem:[#allocation62_spill] sm:$0xff] %v11871_v8  ;;  %v5713_v8 = vperm.slane %v5675_v33, %v13452_v29 }
 0x53f   :  { %6179 = vadd.xlane.f32.xlu2 %v6178_v34  ;;  %v5707_v34 = vperm.slane %v5657_v23, %v13452_v29  ;;  %v5396_v23 = vmul.f32 2.0, %v5367_v40 }
 0x541   :  { %v5728_v18 = vsel %vm5727_vm8, %v5707_v34, %v5726_v48  ;;  %v11869_v34 = vpop.permute.xlu1 %6433  ;;  %v13457_v48 = vld [vmem:[#allocation115_spill] sm:$0xff] }
 0x542   :  { %v5730_v3 = vsel %vm5729_vm5, %v5708_v26, %v5728_v18  ;;  %13455 = vst [vmem:[#allocation144_spill] sm:$0xff] %v11869_v34  ;;  %v6482_v26 = vpop.permute.xlu0 %6481  ;;  %v6474_v61 = vpop.permute.xlu2 %6473  ;;  %v5712_v34 = vperm.slane %v5672_v30, %v13452_v29 }
 0x543   :  { %v5740_v13 = vadd.f32 %v5730_v3, %v5396_v23  ;;  %v5710_v23 = vperm.slane %v5666_v46, %v13452_v29  ;;  %v5714_v46 = vperm.slane %v11834_v57, %v13452_v29 }
 0x544   :  { %6495 = vrot.lane.b32.xlu1 %v13453_v41, %s7826_s5 }
 0x545   :  { %v11863_v56 = vmul.f32 0.35355338, %v5740_v13  ;;  %v6519_v13 = vmul.f32 %v6474_v61, %v11507_v1 }
 0x547   :  { %6188 = vadd.xlane.f32.xlu2 %v6187_v5  ;;  %v5744_v31 = vsel %vm13454_vm9, %v11863_v56, -inf  ;;  %v6523_v5 = vmul.f32 %v6482_v26, %v11515_v25  ;;  %vm13469_vm9 = vmmov %vm13466_vm0 }
 0x549   :  { %v6472_v40 = vpop.permute.xlu1 %6471 }
 0x54c   :  { %6549 = vrot.lane.b32.xlu1 %v6517_v10, %s7825_s11  ;;  %v13458_v10 = vld [vmem:[#allocation32_spill] sm:$0xff] }
 0x54f   :  { %6197 = vadd.xlane.f32.xlu2 %v6196_v16  ;;  %v5709_v16 = vperm.slane %v5663_v62, %v13452_v29 }
 0x551   :  { %v5684_v18 = vpop.xlane.xlu2 %5683  ;;  %v6478_v3 = vpop.permute.xlu1 %6477 }
 0x554   :  { %6555 = vrot.lane.b32.xlu1 %v6520_v43, %s7825_s11  ;;  %v5731_v43 = vsel %vm5717_vm15, %v5710_v23, %v5709_v16  ;;  %v5393_v23 = vpop.f32.mrf.mxu3 }
 0x555   :  { %5745 = vmax.xlane.f32.xlu0 %v5744_v31  ;;  %v5397_v30 = vmul.f32 2.0, %v5393_v23  ;;  %v13461_v23 = vld [vmem:[#allocation189_spill] sm:$0xff] }
 0x559   :  { %v5681_v31 = vpop.xlane.xlu1 %5680  ;;  %v6480_v26 = vpop.permute.xlu2 %6479 }
 0x55a   :  { %v5715_v47 = vperm.slane %v5681_v31, %v13452_v29 }
 0x55c   :  { %6561 = vrot.lane.b32.xlu1 %v6523_v5, %s7825_s11  ;;  %v5732_v5 = vsel %vm5719_vm10, %v5711_v49, %v5731_v43  ;;  %v5716_v49 = vperm.slane %v5684_v18, %v13452_v29  ;;  %v13459_v18 = vld [vmem:[#allocation187_spill] sm:$0xff] }
 0x55d   :  { %v5733_v61 = vsel %vm5721_vm11, %v5712_v34, %v5732_v5 }
 0x55e   :  { %v5734_v62 = vsel %vm5723_vm12, %v5713_v8, %v5733_v61 }
 0x55f   :  { %v5735_v16 = vsel %vm5725_vm14, %v5714_v46, %v5734_v62  ;;  %v6488_v46 = vpop.permute.xlu0 %6487 }
 0x560   :  { %v5736_v33 = vsel %vm5727_vm8, %v5715_v47, %v5735_v16  ;;  %v13460_v47 = vld [vmem:[#allocation188_spill] sm:$0xff]  ;;  %v6521_v16 = vmul.f32 %v6478_v3, %v11445_v15 }
 0x561   :  { %v6486_v43 = vpop.permute.xlu2 %6485  ;;  %v5737_v57 = vsel %vm5729_vm5, %v5716_v49, %v5736_v33  ;;  %v6484_v62 = vpop.permute.xlu1 %6483 }
 0x562   :  { %v5741_v31 = vadd.f32 %v5737_v57, %v5397_v30  ;;  %v6525_v34 = vmul.f32 %v6486_v43, %v11543_v63  ;;  %v13462_v43 = vld [vmem:[#allocation181_spill] sm:$0xff] }
 0x564   :  { %v11901_v5 = vmul.f32 0.35355338, %v5741_v31 }
 0x566   :  { %v5747_v8 = vsel %vm13396_vm2, %v11901_v5, -inf  ;;  %vm13470_vm2 = vmmov %vm13466_vm0 }
 0x567   :  { %6497 = vrot.lane.b32.xlu2 %v13457_v48, %s7826_s5 }
 0x569   :  { %6499 = vrot.lane.b32.xlu0 %v13458_v10, %s7826_s5  ;;  %v6492_v49 = vpop.permute.xlu2 %6491 }
 0x56a   :  { %v11914_v61 = vpop.xlane.xlu0 %6167 }
 0x571   :  { %6553 = vrot.lane.b32.xlu0 %v6519_v13, %s7825_s11  ;;  %v6522_v13 = vmul.f32 %v6480_v26, %v11526_v58  ;;  %v6205_v26 = vsel %vm5636_vm7, %v11817_v44, 0.0  ;;  %v6518_v44 = vmul.f32 %v6472_v40, %v11430_v24  ;;  %v6524_v40 = vmul.f32 %v6484_v62, %v11459_v38 }
 0x579   :  { %6559 = vrot.lane.b32.xlu0 %v6522_v13, %s7825_s11  ;;  %v11920_v13 = vpop.xlane.xlu0 %6176 }
 0x581   :  { %6565 = vrot.lane.b32.xlu0 %v6525_v34, %s7825_s11 }
 0x586   :  { %5748 = vmax.xlane.f32.xlu1 %v5747_v8 }
 0x589   :  { %6864 = vrot.lane.b32.xlu0 %v13459_v18, %s7827_s12 }
 0x590   :  { %6206 = vadd.xlane.f32.xlu2 %v6205_v26 }
 0x591   :  { %6990 = vrot.lane.b32.xlu0 %v13441_v4, %s7828_s13  ;;  %v6490_v4 = vpop.permute.xlu1 %6489 }
 0x599   :  { %6890 = vrot.lane.b32.xlu0 %v13460_v47, %s7827_s12 }
 0x59f   :  { %6984 = vrot.lane.b32.xlu1 %v13439_v45, %s7828_s13  ;;  %v6186_v45 = vpop.xlane.xlu0 %6185 }
 0x5a0   :  { %v6232_v26 = vperm.slane %v6186_v45, %v13452_v29 }
 0x5a1   :  { %6998 = vrot.lane.b32.xlu0 %v13444_v54, %s7828_s13  ;;  %v11934_v54 = vpop.xlane.xlu1 %6164 }
 0x5a2   :  { %v11956_v30 = vpop.xlane.xlu2 %6161 }
 0x5a7   :  { %6892 = vrot.lane.b32.xlu1 %v13461_v23, %s7827_s12  ;;  %v6195_v3 = vpop.xlane.xlu0 %6194 }
 0x5a8   :  { %6551 = vrot.lane.b32.xlu2 %v6518_v44, %s7825_s11 }
 0x5a9   :  { %7004 = vrot.lane.b32.xlu0 %v13446_v20, %s7828_s13  ;;  %v6526_v20 = vmul.f32 %v6488_v46, %v11531_v60 }
 0x5aa   :  { %v11966_v57 = vpop.xlane.xlu2 %6170 }
 0x5af   :  { %6992 = vrot.lane.b32.xlu1 %v13437_v36, %s7828_s13  ;;  %v11942_v36 = vpop.xlane.xlu1 %6173 }
 0x5b0   :  { %6557 = vrot.lane.b32.xlu2 %v6521_v16, %s7825_s11  ;;  %v6528_v16 = vmul.f32 %v6492_v49, %v11558_v28 }
 0x5b1   :  { %7010 = vrot.lane.b32.xlu0 %v13453_v41, %s7828_s13  ;;  %v6527_v41 = vmul.f32 %v6490_v4, %v11477_v51  ;;  %v6235_v4 = vperm.slane %v6195_v3, %v13452_v29  ;;  %v5867_v3 = vpop.f32.mrf.mxu2 }
 0x5b2   :  { %v11976_v31 = vpop.xlane.xlu2 %6179 }
 0x5b7   :  { %6994 = vrot.lane.b32.xlu1 %v13447_v6, %s7828_s13  ;;  %v6204_v6 = vpop.xlane.xlu0 %6203  ;;  %v11950_v33 = vpop.xlane.xlu1 %6182 }
 0x5b8   :  { %6563 = vrot.lane.b32.xlu2 %v6524_v40, %s7825_s11 }
 0x5b9   :  { %6567 = vrot.lane.b32.xlu0 %v6526_v20, %s7825_s11 }
 0x5ba   :  { %v6189_v8 = vpop.xlane.xlu2 %6188 }
 0x5bf   :  { %7000 = vrot.lane.b32.xlu1 %v13448_v17, %s7828_s13  ;;  %v11960_v17 = vpop.permute.xlu0 %6493 }
 0x5c0   :  { %6986 = vrot.lane.b32.xlu2 %v13433_v12, %s7828_s13  ;;  %v6192_v12 = vpop.xlane.xlu1 %6191 }
 0x5c1   :  { %6569 = vrot.lane.b32.xlu0 %v6527_v41, %s7825_s11 }
 0x5c2   :  { %v6198_v18 = vpop.xlane.xlu2 %6197 }
 0x5c7   :  { %7006 = vrot.lane.b32.xlu1 %v13449_v53, %s7828_s13 }
 0x5c8   :  { %6988 = vrot.lane.b32.xlu2 %v13440_v37, %s7828_s13  ;;  %v11968_v53 = vpop.xlane.xlu0 %5745 }
 0x5c9   :  { %6926 = vrot.lane.b32.xlu0 %v11140_v59, %s7829_s14  ;;  %v6201_v59 = vpop.xlane.xlu1 %6200 }
 0x5ca   :  { %v12006_v44 = vpop.permute.xlu2 %6497 }
 0x5cf   :  { %7012 = vrot.lane.b32.xlu1 %v13457_v48, %s7828_s13 }
 0x5d0   :  { %6862 = vrot.lane.b32.xlu2 %v13462_v43, %s7827_s12 }
 0x5d1   :  { %v11982_v48 = vpop.permute.xlu1 %6495 }
 0x5d7   :  { %6920 = vrot.lane.b32.xlu1 %v11066_v35, %s7829_s14 }
 0x5d8   :  { %6996 = vrot.lane.b32.xlu2 %v13442_v0, %s7828_s13 }
 0x5d9   :  { %v11990_v0 = vpop.permute.xlu1 %6549 }
 0x5db   :  { %v11974_v37 = vpop.permute.xlu0 %6499 }
 0x5df   :  { %6924 = vrot.lane.b32.xlu1 %v11301_v11, %s7829_s14 }
 0x5e0   :  { %7002 = vrot.lane.b32.xlu2 %v13443_v52, %s7828_s13  ;;  %v6233_v52 = vperm.slane %v6189_v8, %v13452_v29 }
 0x5e1   :  { %v11998_v46 = vpop.permute.xlu1 %6555 }
 0x5e2   :  { %v6247_v47 = vsel %vm5717_vm15, %v6233_v52, %v6232_v26 }
 0x5e3   :  { %v11984_v34 = vpop.permute.xlu0 %6553 }
 0x5e8   :  { %7008 = vrot.lane.b32.xlu2 %v13450_v14, %s7828_s13  ;;  %v6234_v14 = vperm.slane %v6192_v12, %v13452_v29  ;;  %v6238_v12 = vperm.slane %v6204_v6, %v13452_v29 }
 0x5e9   :  { %v12014_v20 = vpop.permute.xlu1 %6561 }
 0x5ea   :  { %v6248_v62 = vsel %vm5719_vm10, %v6234_v14, %v6247_v47 }
 0x5eb   :  { %v11988_v35 = vpop.permute.xlu0 %6559  ;;  %v6249_v45 = vsel %vm5721_vm11, %v6235_v4, %v6248_v62 }
 0x5f0   :  { %7014 = vrot.lane.b32.xlu2 %v13458_v10, %s7828_s13  ;;  %v6236_v10 = vperm.slane %v6198_v18, %v13452_v29  ;;  %v5871_v18 = vmul.f32 2.0, %v5867_v3  ;;  %v6227_v3 = vperm.slane %v11966_v57, %v13452_v29  ;;  %v6230_v57 = vperm.slane %v11976_v31, %v13452_v29 }
 0x5f2   :  { %v6250_v40 = vsel %vm5723_vm12, %v6236_v10, %v6249_v45 }
 0x5f3   :  { %v11994_v11 = vpop.permute.xlu0 %6565 }
 0x5f8   :  { %6922 = vrot.lane.b32.xlu2 %v11190_v7, %s7829_s14  ;;  %v6237_v7 = vperm.slane %v6201_v59, %v13452_v29 }
 0x5f9   :  { %v5749_v47 = vpop.xlane.xlu1 %5748 }
 0x5fa   :  { %v6251_v41 = vsel %vm5725_vm14, %v6237_v7, %v6250_v40  ;;  %v6529_v7 = vmul.f32 %v11960_v17, %v11549_v22 }
 0x5fb   :  { %v6865_v23 = vpop.permute.xlu0 %6864  ;;  %v6252_v49 = vsel %vm5727_vm8, %v6238_v12, %v6251_v41  ;;  %v6224_v41 = vperm.slane %v11956_v30, %v13452_v29  ;;  %v6225_v12 = vperm.slane %v11934_v54, %v13452_v29  ;;  %v6228_v54 = vperm.slane %v11942_v36, %v13452_v29 }
 0x5fc   :  { %7519 = vmatpush.xpose.msk.msrb.mxu1 %vm13463_vm4, %v6865_v23  ;;  %v6231_v36 = vperm.slane %v11950_v33, %v13452_v29  ;;  %v5750_v33 = vsub.f32 %v11863_v56, %v11968_v53  ;;  %v6530_v56 = vmul.f32 %v11982_v48, %v11494_v21  ;;  %v6531_v53 = vmul.f32 %v12006_v44, %v11572_v2  ;;  %vm13489_vm4 = vmmov %vm13466_vm0 }
 0x600   :  { %6571 = vrot.lane.b32.xlu2 %v6528_v16, %s7825_s11 }
 0x603   :  { %v6207_v43 = vpop.xlane.xlu2 %6206  ;;  %v6991_v10 = vpop.permute.xlu0 %6990 }
 0x604   :  { %v6239_v8 = vperm.slane %v6207_v43, %v13452_v29  ;;  %v6240_v43 = vsel %vm5717_vm15, %v6225_v12, %v6224_v41  ;;  %v5751_v41 = vsub.f32 %v11901_v5, %v5749_v47 }
 0x606   :  { %v6253_v52 = vsel %vm5729_vm5, %v6239_v8, %v6252_v49 }
 0x607   :  { %v6257_v26 = vadd.f32 %v6253_v52, %v5871_v18  ;;  %v6226_v18 = vperm.slane %v11914_v61, %v13452_v29 }
 0x609   :  { %v12022_v59 = vmul.f32 0.35355338, %v6257_v26  ;;  %v6241_v17 = vsel %vm5719_vm10, %v6226_v18, %v6240_v43  ;;  %v6229_v26 = vperm.slane %v11920_v13, %v13452_v29  ;;  %v5754_v43 = vmul.f32 1.442695, %v5751_v41  ;;  %v13475_v41 = vld [vmem:[#allocation40_spill] sm:$0xff] }
 0x60a   :  { %v6242_v30 = vsel %vm5721_vm11, %v6227_v3, %v6241_v17  ;;  %v5752_v18 = vmul.f32 1.442695, %v5750_v33 }
 0x60b   :  { %v12024_v14 = vpop.permute.xlu2 %6551  ;;  %v6263_v62 = vsel %vm13464_vm13, %v12022_v59, -inf  ;;  %v6891_v45 = vpop.permute.xlu0 %6890  ;;  %v6243_v52 = vsel %vm5723_vm12, %v6228_v54, %v6242_v30  ;;  %7570 = vpow2.f32 %v5754_v43  ;;  %v7035_v30 = vmul.f32 %v6991_v10, %v11491_v39  ;;  %v13476_v43 = vld [vmem:[#allocation110_spill] sm:$0xff]  ;;  %vm13493_vm13 = vmmov %vm13466_vm0 }
 0x60c   :  { %6264 = vmax.xlane.f32.xlu0 %v6263_v62  ;;  %7572 = vpow2.f32 %v5752_v18 }
 0x611   :  { %v6985_v6 = vpop.permute.xlu1 %6984 }
 0x612   :  { %v7032_v23 = vmul.f32 %v6985_v6, %v11474_v55  ;;  %v6244_v6 = vsel %vm5725_vm14, %v6229_v26, %v6243_v52  ;;  %v13472_v52 = vld [vmem:[#allocation27_spill] sm:$0xff] }
 0x613   :  { %v12029_v4 = vpop.permute.xlu2 %6557  ;;  %v6999_v48 = vpop.permute.xlu0 %6998 }
 0x614   :  { %7064 = vrot.lane.b32.xlu1 %v7032_v23, %s7825_s11  ;;  %v6245_v23 = vsel %vm5727_vm8, %v6230_v57, %v6244_v6  ;;  %v13473_v6 = vld [vmem:[#allocation35_spill] sm:$0xff] }
 0x619   :  { %v6893_v16 = vpop.permute.xlu1 %6892 }
 0x61a   :  { %7521 = vmatpush.xpose.msk.msrb.mxu2 %vm13465_vm6, %v6893_v16  ;;  %v5839_v16 = vpop.f32.mrf.mxu1  ;;  %vm13496_vm6 = vmmov %vm13466_vm0 }
 0x61b   :  { %v12033_v40 = vpop.permute.xlu2 %6563  ;;  %v7005_v10 = vpop.permute.xlu0 %7004 }
 0x61d   :  { %7522 = vmatmul.msk.f32.vlgmr.msrb.gmra.mxu2 %vm13466_vm0, %v6891_v45  ;;  %v6246_v45 = vsel %vm5729_vm5, %v6231_v36, %v6245_v23  ;;  %v7042_v23 = vmul.f32 %v7005_v10, %v11477_v51  ;;  %v7039_v36 = vmul.f32 %v6999_v48, %v11459_v38  ;;  %v13480_v10 = vld [vmem:[#allocation31_spill] sm:$0xff] }
 0x620   :  { %6573 = vrot.lane.b32.xlu0 %v6529_v7, %s7825_s11  ;;  %v5870_v7 = vmul.f32 2.0, %v5839_v16  ;;  %v13474_v16 = vld [vmem:[#allocation29_spill] sm:$0xff] }
 0x621   :  { %v6993_v17 = vpop.permute.xlu1 %6992 }
 0x622   :  { %v6256_v13 = vadd.f32 %v6246_v45, %v5870_v7  ;;  %v7036_v54 = vmul.f32 %v6993_v17, %v11445_v15 }
 0x623   :  { %v6987_v8 = vpop.permute.xlu2 %6986 }
 0x624   :  { %v7033_v49 = vmul.f32 %v6987_v8, %v11430_v24  ;;  %v12068_v12 = vmul.f32 0.35355338, %v6256_v13  ;;  %v12074_v8 = vpop.eup %7570 }
 0x625   :  { %v12078_v5 = vpop.eup %7572 }
 0x626   :  { %7066 = vrot.lane.b32.xlu2 %v7033_v49, %s7825_s11  ;;  %v6260_v3 = vsel %vm13468_vm3, %v12068_v12, -inf  ;;  %v5759_v49 = vsel %vm13469_vm9, %v12074_v8, 0.0  ;;  %v5756_v47 = vsel %vm13470_vm2, %v12078_v5, 0.0  ;;  %vm13498_vm3 = vmmov %vm13466_vm0 }
 0x627   :  { %vm13499_vm9 = vmmov %vm13466_vm0 }
 0x628   :  { %vm13500_vm2 = vmmov %vm13466_vm0 }
 0x62b   :  { %v6989_v61 = vpop.permute.xlu2 %6988 }
 0x62c   :  { %v7034_v62 = vmul.f32 %v6989_v61, %v11507_v1 }
 0x62e   :  { %7068 = vrot.lane.b32.xlu2 %v7034_v62, %s7825_s11  ;;  %v7011_v62 = vpop.permute.xlu0 %7010 }
 0x62f   :  { %v7045_v18 = vmul.f32 %v7011_v62, %v11494_v21 }
 0x633   :  { %v6863_v31 = vpop.permute.xlu2 %6862 }
 0x634   :  { %7520 = vmatmul.msk.f32.vlgmr.msrb.gmra.mxu1 %vm13467_vm1, %v6863_v31  ;;  %vm13497_vm1 = vmmov %vm13466_vm0 }
 0x636   :  { %v6568_v7 = vpop.permute.xlu0 %6567 }
 0x63e   :  { %6261 = vmax.xlane.f32.xlu1 %v6260_v3  ;;  %v6570_v33 = vpop.permute.xlu0 %6569 }
 0x64a   :  { %5760 = vadd.xlane.f32.xlu0 %v5759_v49 }
 0x657   :  { %6928 = vrot.lane.b32.xlu1 %v11220_v27, %s7829_s14  ;;  %5757 = vadd.xlane.f32.xlu2 %v5756_v47  ;;  %v6532_v27 = vmul.f32 %v11974_v37, %v11564_v19 }
 0x65e   :  { %6575 = vrot.lane.b32.xlu0 %v6530_v56, %s7825_s11 }
 0x65f   :  { %6930 = vrot.lane.b32.xlu1 %v11323_v50, %s7829_s14  ;;  %v6995_v50 = vpop.permute.xlu1 %6994 }
 0x660   :  { %v7037_v44 = vmul.f32 %v6995_v50, %v11526_v58 }
 0x666   :  { %6577 = vrot.lane.b32.xlu0 %v6531_v53, %s7825_s11  ;;  %v13477_v53 = vld [vmem:[#allocation28_spill] sm:$0xff] }
 0x667   :  { %6932 = vrot.lane.b32.xlu1 %v11194_v9, %s7829_s14  ;;  %v6997_v9 = vpop.permute.xlu2 %6996  ;;  %v7001_v26 = vpop.permute.xlu1 %7000  ;;  %v6453_v17 = vmul.f32 %v13477_v53, %v11474_v55 }
 0x668   :  { %v7038_v37 = vmul.f32 %v6997_v9, %v11515_v25  ;;  %v7040_v61 = vmul.f32 %v7001_v26, %v11543_v63 }
 0x669   :  { %v6597_v50 = vadd.f32 %v11990_v0, %v6453_v17 }
 0x66e   :  { %6579 = vrot.lane.b32.xlu0 %v6532_v27, %s7825_s11  ;;  %v13478_v27 = vld [vmem:[#allocation86_spill] sm:$0xff] }
 0x66f   :  { %6934 = vrot.lane.b32.xlu1 %v11250_v42, %s7829_s14  ;;  %7070 = vrot.lane.b32.xlu2 %v7035_v30, %s7825_s11  ;;  %v13471_v42 = vld [vmem:[#allocation36_spill] sm:$0xff]  ;;  %v7003_v57 = vpop.permute.xlu2 %7002  ;;  %v7007_v45 = vpop.permute.xlu1 %7006  ;;  %v6454_v30 = vmul.f32 %v13478_v27, %v11430_v24 }
 0x670   :  { %v7043_v56 = vmul.f32 %v7007_v45, %v11558_v28 }
 0x671   :  { %v6598_v48 = vadd.f32 %v12024_v14, %v6454_v30 }
 0x676   :  { %6938 = vrot.lane.b32.xlu0 %v11224_v32, %s7829_s14  ;;  %v7041_v32 = vmul.f32 %v7003_v57, %v11531_v60 }
 0x677   :  { %7074 = vrot.lane.b32.xlu1 %v7037_v44, %s7825_s11  ;;  %7072 = vrot.lane.b32.xlu2 %v7036_v54, %s7825_s11  ;;  %v7009_v31 = vpop.permute.xlu2 %7008  ;;  %v7013_v3 = vpop.permute.xlu1 %7012 }
 0x678   :  { %v7044_v13 = vmul.f32 %v7009_v31, %v11549_v22  ;;  %v7046_v47 = vmul.f32 %v7013_v3, %v11572_v2  ;;  %v12143_v44 = vpop.permute.xlu0 %6926 }
 0x67e   :  { %7076 = vrot.lane.b32.xlu0 %v7038_v37, %s7825_s11  ;;  %v13479_v37 = vld [vmem:[#allocation116_spill] sm:$0xff] }
 0x67f   :  { %6942 = vrot.lane.b32.xlu1 %v13471_v42, %s7829_s14  ;;  %6936 = vrot.lane.b32.xlu2 %v13472_v52, %s7829_s14  ;;  %v7015_v49 = vpop.permute.xlu2 %7014  ;;  %v6921_v9 = vpop.permute.xlu1 %6920  ;;  %v6456_v42 = vmul.f32 %v13480_v10, %v11491_v39  ;;  %v13481_v52 = vld [vmem:[#allocation105_spill] sm:$0xff] }
 0x680   :  { %v6457_v57 = vmul.f32 %v13481_v52, %v11445_v15  ;;  %v7047_v26 = vmul.f32 %v7015_v49, %v11564_v19 }
 0x681   :  { %v6600_v0 = vadd.f32 %v11998_v46, %v6456_v42 }
 0x682   :  { %v6601_v14 = vadd.f32 %v12029_v4, %v6457_v57  ;;  %v13484_v4 = vld [vmem:[#allocation39_spill] sm:$0xff] }
 0x686   :  { %7080 = vrot.lane.b32.xlu0 %v7040_v61, %s7825_s11 }
 0x687   :  { %7082 = vrot.lane.b32.xlu1 %v7041_v32, %s7825_s11  ;;  %6940 = vrot.lane.b32.xlu2 %v13473_v6, %s7829_s14  ;;  %v6923_v54 = vpop.permute.xlu2 %6922  ;;  %v12156_v32 = vpop.xlane.xlu0 %6264  ;;  %v13482_v6 = vld [vmem:[#allocation38_spill] sm:$0xff] }
 0x688   :  { %v6925_v62 = vpop.permute.xlu1 %6924 }
 0x68e   :  { %7084 = vrot.lane.b32.xlu0 %v7042_v23, %s7825_s11  ;;  %v6459_v23 = vmul.f32 %v13482_v6, %v11515_v25 }
 0x68f   :  { %6946 = vrot.lane.b32.xlu1 %v13474_v16, %s7829_s14  ;;  %7078 = vrot.lane.b32.xlu2 %v7039_v36, %s7825_s11  ;;  %v6572_v61 = vpop.permute.xlu2 %6571  ;;  %v13483_v36 = vld [vmem:[#allocation51_spill] sm:$0xff]  ;;  %v6455_v16 = vmul.f32 %v13484_v4, %v11507_v1  ;;  %v13492_v4 = vld [vmem:[#allocation58_spill] sm:$0xff] }
 0x690   :  { %v6460_v46 = vmul.f32 %v13483_v36, %v11459_v38  ;;  %v6603_v45 = vadd.f32 %v12014_v20, %v6459_v23  ;;  %v7065_v3 = vpop.permute.xlu1 %7064  ;;  %v13487_v20 = vld [vmem:[#allocation53_spill] sm:$0xff] }
 0x692   :  { %v6604_v31 = vadd.f32 %v12033_v40, %v6460_v46  ;;  %v6458_v40 = vmul.f32 %v13487_v20, %v11526_v58 }
 0x694   :  { %v6602_v17 = vadd.f32 %v11988_v35, %v6458_v40 }
 0x696   :  { %6948 = vrot.lane.b32.xlu0 %v13475_v41, %s7829_s14  ;;  %v6574_v41 = vpop.permute.xlu0 %6573 }
 0x697   :  { %7088 = vrot.lane.b32.xlu1 %v7044_v13, %s7825_s11  ;;  %6944 = vrot.lane.b32.xlu2 %v13476_v43, %s7829_s14  ;;  %v6599_v13 = vadd.f32 %v11984_v34, %v6455_v16  ;;  %v7067_v43 = vpop.permute.xlu2 %7066  ;;  %v6465_v16 = vmul.f32 %v13492_v4, %v11549_v22 }
 0x69e   :  { %7090 = vrot.lane.b32.xlu0 %v7045_v18, %s7825_s11  ;;  %v13485_v18 = vld [vmem:[#allocation57_spill] sm:$0xff] }
 0x69f   :  { %7092 = vrot.lane.b32.xlu1 %v7046_v47, %s7825_s11  ;;  %7086 = vrot.lane.b32.xlu2 %v7043_v56, %s7825_s11  ;;  %v6462_v49 = vmul.f32 %v13485_v18, %v11531_v60  ;;  %v13486_v47 = vld [vmem:[#allocation60_spill] sm:$0xff] }
 0x6a0   :  { %v6463_v56 = vmul.f32 %v13486_v47, %v11477_v51 }
 0x6a1   :  { %v6606_v53 = vadd.f32 %v6568_v7, %v6462_v49  ;;  %v13488_v7 = vld [vmem:[#allocation67_spill] sm:$0xff]  ;;  %v6971_v49 = vmul.f32 %v12143_v44, %v11491_v39 }
 0x6a2   :  { %v6607_v34 = vadd.f32 %v6570_v33, %v6463_v56  ;;  %v6461_v33 = vmul.f32 %v13488_v7, %v11543_v63 }
 0x6a4   :  { %v6605_v52 = vadd.f32 %v11994_v11, %v6461_v33 }
 0x6a6   :  { %6629 = vrot.lane.b32.xlu0 %v6597_v50, %s7819_s3  ;;  %v6969_v50 = vmul.f32 %v6923_v54, %v11430_v24 }
 0x6a7   :  { %6631 = vrot.lane.b32.xlu1 %v6598_v48, %s7819_s3  ;;  %6950 = vrot.lane.b32.xlu2 %v13479_v37, %s7829_s14  ;;  %v6968_v48 = vmul.f32 %v6921_v9, %v11474_v55  ;;  %v7069_v37 = vpop.permute.xlu2 %7068  ;;  %v6970_v55 = vmul.f32 %v6925_v62, %v11507_v1  ;;  %v13490_v9 = vld [vmem:[#allocation24_spill] sm:$0xff] }
 0x6a8   :  { %v7113_v35 = vadd.f32 %v7067_v43, %v6969_v50 }
 0x6a9   :  { %v7112_v42 = vadd.f32 %v7065_v3, %v6968_v48 }
 0x6ae   :  { %6635 = vrot.lane.b32.xlu0 %v6600_v0, %s7819_s3  ;;  %v6464_v0 = vmul.f32 %v13490_v9, %v11558_v28 }
 0x6af   :  { %6637 = vrot.lane.b32.xlu1 %v6601_v14, %s7819_s3  ;;  %7094 = vrot.lane.b32.xlu2 %v7047_v26, %s7825_s11  ;;  %v7114_v14 = vadd.f32 %v7069_v37, %v6970_v55 }
 0x6b0   :  { %v6608_v11 = vadd.f32 %v6572_v61, %v6464_v0  ;;  %v6609_v61 = vadd.f32 %v6574_v41, %v6465_v16 }
 0x6b1   :  { %v12183_v30 = vpop.xlane.xlu1 %6261 }
 0x6b6   :  { %6641 = vrot.lane.b32.xlu0 %v6603_v45, %s7819_s3  ;;  %v13494_v45 = vld [vmem:[#allocation144_spill] sm:$0xff] }
 0x6b7   :  { %6643 = vrot.lane.b32.xlu1 %v6604_v31, %s7819_s3  ;;  %6633 = vrot.lane.b32.xlu2 %v6599_v13, %s7819_s3  ;;  %v6467_v31 = vmul.f32 %v13494_v45, %v11572_v2 }
 0x6bd   :  { %v5761_v27 = vpop.xlane.xlu0 %5760 }
 0x6be   :  { %7574 = vrcp.f32 %v5761_v27  ;;  %6647 = vrot.lane.b32.xlu0 %v6606_v53, %s7819_s3 }
 0x6bf   :  { %6649 = vrot.lane.b32.xlu1 %v6607_v34, %s7819_s3  ;;  %6639 = vrot.lane.b32.xlu2 %v6602_v17, %s7819_s3 }
 0x6c4   :  { %v7575_v10 = vpop.eup %7574 }
 0x6c5   :  { %v5765_v57 = vmul.f32 %v7575_v10, %v12074_v8  ;;  %v13491_v8 = vld [vmem:[#allocation61_spill] sm:$0xff] }
 0x6c6   :  { %7144 = vrot.lane.b32.xlu0 %v7112_v42, %s7827_s12  ;;  %v6466_v26 = vmul.f32 %v13491_v8, %v11494_v21 }
 0x6c7   :  { %7146 = vrot.lane.b32.xlu1 %v7113_v35, %s7827_s12  ;;  %7506 = vmatmul.msk.f32.vlgmr.msrb.gmra.mxu0 %vm13489_vm4, %v5765_v57  ;;  %vm13502_vm4 = vmmov %vm13466_vm0 }
 0x6c8   :  { %6645 = vrot.lane.b32.xlu2 %v6605_v52, %s7819_s3 }
 0x6c9   :  { %v6929_v24 = vpop.permute.xlu1 %6928 }
 0x6ca   :  { %v5758_v54 = vpop.xlane.xlu2 %5757  ;;  %v6972_v13 = vmul.f32 %v6929_v24, %v11445_v15  ;;  %v13495_v15 = vld [vmem:[#allocation62_spill] sm:$0xff]  ;;  %v6266_v24 = vsub.f32 %v12068_v12, %v12183_v30 }
 0x6cb   :  { %7576 = vrcp.f32 %v5758_v54  ;;  %v6468_v53 = vmul.f32 %v13495_v15, %v11564_v19 }
 0x6cc   :  { %v6268_v54 = vmul.f32 1.442695, %v6266_v24 }
 0x6ce   :  { %7148 = vrot.lane.b32.xlu0 %v7114_v14, %s7827_s12  ;;  %7578 = vpow2.f32 %v6268_v54 }
 0x6d0   :  { %6651 = vrot.lane.b32.xlu2 %v6608_v11, %s7819_s3  ;;  %v6576_v6 = vpop.permute.xlu0 %6575  ;;  %v6267_v11 = vsub.f32 %v12022_v59, %v12156_v32 }
 0x6d1   :  { %v6931_v23 = vpop.permute.xlu1 %6930  ;;  %v7577_v36 = vpop.eup %7576  ;;  %v6610_v46 = vadd.f32 %v6576_v6, %v6466_v26 }
 0x6d2   :  { %v5764_v1 = vmul.f32 %v7577_v36, %v12078_v5  ;;  %v7071_v62 = vpop.permute.xlu2 %7070  ;;  %v6973_v17 = vmul.f32 %v6931_v23, %v11526_v58  ;;  %v6270_v6 = vmul.f32 1.442695, %v6267_v11 }
 0x6d3   :  { %6655 = vrot.lane.b32.xlu1 %v6610_v46, %s7819_s3  ;;  %v7115_v56 = vadd.f32 %v7071_v62, %v6971_v49 }
 0x6d4   :  { %7505 = vmatmul.msk.f32.vlgmr.msra.gmra.mxu3 %vm13493_vm13, %v5764_v1  ;;  %v12231_v8 = vpop.eup %7578  ;;  %7580 = vpow2.f32 %v6270_v6  ;;  %vm13503_vm13 = vmmov %vm13466_vm0 }
 0x6d8   :  { %6653 = vrot.lane.b32.xlu2 %v6609_v61, %s7819_s3  ;;  %v6578_v43 = vpop.permute.xlu0 %6577 }
 0x6d9   :  { %v6933_v3 = vpop.permute.xlu1 %6932  ;;  %v6611_v18 = vadd.f32 %v6578_v43, %v6467_v31 }
 0x6da   :  { %v7073_v5 = vpop.permute.xlu2 %7072  ;;  %v6974_v48 = vmul.f32 %v6933_v3, %v11515_v25  ;;  %v12237_v36 = vpop.eup %7580 }
 0x6db   :  { %6657 = vrot.lane.b32.xlu0 %v6611_v18, %s7819_s3  ;;  %v7116_v47 = vadd.f32 %v7073_v5, %v6972_v13  ;;  %v6275_v59 = vsel %vm13466_vm0, %v12237_v36, 0.0 }
 0x6dd   :  { %7152 = vrot.lane.b32.xlu1 %v7116_v47, %s7827_s12 }
 0x6e0   :  { %7150 = vrot.lane.b32.xlu2 %v7115_v56, %s7827_s12  ;;  %v6580_v41 = vpop.permute.xlu0 %6579 }
 0x6e1   :  { %v6935_v20 = vpop.permute.xlu1 %6934  ;;  %v6612_v34 = vadd.f32 %v6580_v41, %v6468_v53 }
 0x6e2   :  { %v6937_v40 = vpop.permute.xlu2 %6936  ;;  %v6975_v32 = vmul.f32 %v6935_v20, %v11459_v38 }
 0x6e3   :  { %v6976_v35 = vmul.f32 %v6937_v40, %v11543_v63 }
 0x6e8   :  { %6659 = vrot.lane.b32.xlu2 %v6612_v34, %s7819_s3  ;;  %v6939_v39 = vpop.permute.xlu0 %6938 }
 0x6e9   :  { %v7075_v44 = vpop.permute.xlu1 %7074  ;;  %v6977_v16 = vmul.f32 %v6939_v39, %v11531_v60 }
 0x6ea   :  { %v7117_v27 = vadd.f32 %v7075_v44, %v6973_v17  ;;  %v6941_v50 = vpop.permute.xlu2 %6940 }
 0x6eb   :  { %v6978_v62 = vmul.f32 %v6941_v50, %v11477_v51 }
 0x6ec   :  { %7154 = vrot.lane.b32.xlu0 %v7117_v27, %s7827_s12 }
 0x6f0   :  { %v7077_v37 = vpop.permute.xlu0 %7076 }
 0x6f1   :  { %v6943_v7 = vpop.permute.xlu1 %6942  ;;  %v7118_v33 = vadd.f32 %v7077_v37, %v6974_v48 }
 0x6f2   :  { %v7079_v10 = vpop.permute.xlu2 %7078  ;;  %v6979_v55 = vmul.f32 %v6943_v7, %v11558_v28  ;;  %v6272_v28 = vsel %vm13496_vm6, %v12231_v8, 0.0  ;;  %vm13513_vm6 = vmmov %vm13466_vm0 }
 0x6f3   :  { %7156 = vrot.lane.b32.xlu1 %v7118_v33, %s7827_s12  ;;  %v7119_v46 = vadd.f32 %v7079_v10, %v6975_v32 }
 0x6f8   :  { %v7081_v42 = vpop.permute.xlu0 %7080 }
 0x6f9   :  { %v7083_v52 = vpop.permute.xlu1 %7082  ;;  %v7120_v57 = vadd.f32 %v7081_v42, %v6976_v35 }
 0x6fa   :  { %v6945_v58 = vpop.permute.xlu2 %6944  ;;  %v7121_v31 = vadd.f32 %v7083_v52, %v6977_v16 }
 0x6fb   :  { %7160 = vrot.lane.b32.xlu0 %v7120_v57, %s7827_s12  ;;  %v6980_v38 = vmul.f32 %v6945_v58, %v11549_v22 }
 0x700   :  { %v7085_v9 = vpop.permute.xlu0 %7084 }
 0x701   :  { %v6947_v25 = vpop.permute.xlu1 %6946  ;;  %v7122_v4 = vadd.f32 %v7085_v9, %v6978_v62 }
 0x702   :  { %v7087_v0 = vpop.permute.xlu2 %7086  ;;  %v6981_v61 = vmul.f32 %v6947_v25, %v11494_v21 }
 0x703   :  { %v7123_v14 = vadd.f32 %v7087_v0, %v6979_v55 }
 0x705   :  { %7166 = vrot.lane.b32.xlu0 %v7123_v14, %s7827_s12 }
 0x708   :  { %v6949_v26 = vpop.permute.xlu0 %6948 }
 0x709   :  { %v7089_v63 = vpop.permute.xlu1 %7088  ;;  %v6982_v12 = vmul.f32 %v6949_v26, %v11572_v2 }
 0x70a   :  { %v6951_v2 = vpop.permute.xlu2 %6950  ;;  %v7124_v18 = vadd.f32 %v7089_v63, %v6980_v38 }
 0x70b   :  { %v6983_v21 = vmul.f32 %v6951_v2, %v11564_v19 }
 0x710   :  { %v7091_v45 = vpop.permute.xlu0 %7090 }
 0x711   :  { %6273 = vadd.xlane.f32.xlu2 %v6272_v28  ;;  %v7093_v30 = vpop.permute.xlu1 %7092  ;;  %v7125_v3 = vadd.f32 %v7091_v45, %v6981_v61 }
 0x712   :  { %v7126_v23 = vadd.f32 %v7093_v30, %v6982_v12  ;;  %v7095_v13 = vpop.permute.xlu2 %7094 }
 0x713   :  { %v7127_v49 = vadd.f32 %v7095_v13, %v6983_v21 }
 0x714   :  { %7172 = vrot.lane.b32.xlu0 %v7126_v23, %s7827_s12 }
 0x718   :  { %v6630_v40 = vpop.permute.xlu0 %6629 }
 0x719   :  { %v6632_v1 = vpop.permute.xlu1 %6631  ;;  %v6677_v50 = vsel %vm5636_vm7, %v6630_v40, 0.0 }
 0x71a   :  { %v6680_v51 = vsel %vm5636_vm7, %v6632_v1, 0.0  ;;  %v6634_v60 = vpop.permute.xlu2 %6633 }
 0x71b   :  { %v6683_v52 = vsel %vm5636_vm7, %v6634_v60, 0.0 }
 0x71d   :  { %6276 = vadd.xlane.f32.xlu1 %v6275_v59 }
 0x720   :  { %v6636_v17 = vpop.permute.xlu0 %6635 }
 0x721   :  { %v6638_v43 = vpop.permute.xlu1 %6637  ;;  %v6686_v10 = vsel %vm5636_vm7, %v6636_v17, 0.0 }
 0x722   :  { %v6689_v47 = vsel %vm5636_vm7, %v6638_v43, 0.0  ;;  %v6640_v22 = vpop.permute.xlu2 %6639 }
 0x723   :  { %v6692_v25 = vsel %vm5636_vm7, %v6640_v22, 0.0 }
 0x728   :  { %v6642_v48 = vpop.permute.xlu0 %6641 }
 0x729   :  { %7158 = vrot.lane.b32.xlu2 %v7119_v46, %s7827_s12  ;;  %v6644_v5 = vpop.permute.xlu1 %6643  ;;  %v6695_v57 = vsel %vm5636_vm7, %v6642_v48, 0.0 }
 0x72a   :  { %v6698_v20 = vsel %vm5636_vm7, %v6644_v5, 0.0  ;;  %v6646_v15 = vpop.permute.xlu2 %6645 }
 0x72b   :  { %v6701_v14 = vsel %vm5636_vm7, %v6646_v15, 0.0 }
 0x730   :  { %v6648_v42 = vpop.permute.xlu0 %6647 }
 0x731   :  { %7164 = vrot.lane.b32.xlu2 %v7122_v4, %s7827_s12  ;;  %v6650_v41 = vpop.permute.xlu1 %6649  ;;  %v6704_v9 = vsel %vm5636_vm7, %v6648_v42, 0.0 }
 0x732   :  { %v6707_v34 = vsel %vm5636_vm7, %v6650_v41, 0.0  ;;  %v6652_v44 = vpop.permute.xlu2 %6651 }
 0x733   :  { %v6710_v6 = vsel %vm5636_vm7, %v6652_v44, 0.0 }
 0x736   :  { %7162 = vrot.lane.b32.xlu1 %v7121_v31, %s7827_s12 }
 0x738   :  { %v7145_v54 = vpop.permute.xlu0 %7144 }
 0x739   :  { %7170 = vrot.lane.b32.xlu2 %v7125_v3, %s7827_s12  ;;  %v7147_v53 = vpop.permute.xlu1 %7146  ;;  %v7192_v63 = vsel %vm5636_vm7, %v7145_v54, 0.0 }
 0x73a   :  { %v7195_v39 = vsel %vm5636_vm7, %v7147_v53, 0.0  ;;  %v6654_v7 = vpop.permute.xlu2 %6653 }
 0x73b   :  { %v6713_v59 = vsel %vm5636_vm7, %v6654_v7, 0.0 }
 0x73e   :  { %6681 = vadd.xlane.f32.xlu0 %v6680_v51  ;;  %7168 = vrot.lane.b32.xlu1 %v7124_v18, %s7827_s12 }
 0x740   :  { %v7149_v11 = vpop.permute.xlu0 %7148 }
 0x741   :  { %v7198_v12 = vsel %vm5636_vm7, %v7149_v11, 0.0 }
 0x742   :  { %v7151_v58 = vpop.permute.xlu2 %7150 }
 0x743   :  { %v7201_v62 = vsel %vm5636_vm7, %v7151_v58, 0.0 }
 0x744   :  { %v5809_v56 = vpop.f32.mrf.mxu0 }
 0x745   :  { %5813 = vst.msk [vmem:[#allocation14 + $0x8] sm:$0xff] %vm13497_vm1, %v5809_v56  ;;  %v6656_v27 = vpop.permute.xlu1 %6655  ;;  %vm13514_vm1 = vmmov %vm13466_vm0 }
 0x746   :  { %6690 = vadd.xlane.f32.xlu0 %v6689_v47  ;;  %7174 = vrot.lane.b32.xlu1 %v7127_v49, %s7827_s12  ;;  %v6716_v37 = vsel %vm5636_vm7, %v6656_v27, 0.0 }
 0x74a   :  { %v6660_v0 = vpop.permute.xlu2 %6659 }
 0x74b   :  { %v6722_v61 = vsel %vm5636_vm7, %v6660_v0, 0.0 }
 0x74d   :  { %v6658_v28 = vpop.permute.xlu0 %6657 }
 0x74e   :  { %6699 = vadd.xlane.f32.xlu0 %v6698_v20  ;;  %v6719_v32 = vsel %vm5636_vm7, %v6658_v28, 0.0 }
 0x74f   :  { %v7153_v33 = vpop.permute.xlu1 %7152 }
 0x750   :  { %v7204_v35 = vsel %vm5636_vm7, %v7153_v33, 0.0 }
 0x756   :  { %6708 = vadd.xlane.f32.xlu0 %v6707_v34 }
 0x757   :  { %v5786_v19 = vpop.f32.mrf.mxu3 }
 0x758   :  { %5812 = vst.msk [vmem:[#allocation14] sm:$0xff] %vm13498_vm3, %v5786_v19  ;;  %vm6859_vm3 = vcmask 195712  }
 0x75e   :  { %7196 = vadd.xlane.f32.xlu0 %v7195_v39  ;;  %v7155_v2 = vpop.permute.xlu0 %7154 }
 0x75f   :  { %v7207_v4 = vsel %vm5636_vm7, %v7155_v2, 0.0 }
 0x762   :  { %6678 = vadd.xlane.f32.xlu2 %v6677_v50 }
 0x765   :  { %v7157_v24 = vpop.permute.xlu1 %7156 }
 0x766   :  { %6717 = vadd.xlane.f32.xlu0 %v6716_v37  ;;  %v7210_v55 = vsel %vm5636_vm7, %v7157_v24, 0.0 }
 0x76a   :  { %6687 = vadd.xlane.f32.xlu2 %v6686_v10 }
 0x76e   :  { %7205 = vadd.xlane.f32.xlu0 %v7204_v35  ;;  %v6372_v35 = vpop.f32.mrf.mxu1 }
 0x76f   :  { %v6403_v54 = vmul.f32 2.0, %v6372_v35 }
 0x770   :  { %6684 = vadd.xlane.f32.xlu1 %v6683_v52 }
 0x772   :  { %6696 = vadd.xlane.f32.xlu2 %v6695_v57 }
 0x776   :  { %7211 = vadd.xlane.f32.xlu0 %v7210_v55 }
 0x778   :  { %6693 = vadd.xlane.f32.xlu1 %v6692_v25 }
 0x77a   :  { %6705 = vadd.xlane.f32.xlu2 %v6704_v9 }
 0x780   :  { %6702 = vadd.xlane.f32.xlu1 %v6701_v14 }
 0x782   :  { %7193 = vadd.xlane.f32.xlu2 %v7192_v63 }
 0x784   :  { %v6274_v26 = vpop.xlane.xlu2 %6273 }
 0x785   :  { %7582 = vrcp.f32 %v6274_v26 }
 0x788   :  { %6711 = vadd.xlane.f32.xlu1 %v6710_v6 }
 0x78a   :  { %7199 = vadd.xlane.f32.xlu2 %v7198_v12 }
 0x78b   :  { %v7583_v30 = vpop.eup %7582 }
 0x78c   :  { %v6280_v23 = vmul.f32 %v7583_v30, %v12231_v8  ;;  %v7161_v8 = vpop.permute.xlu0 %7160  ;;  %v7159_v31 = vpop.permute.xlu2 %7158 }
 0x78d   :  { %v7216_v45 = vsel %vm5636_vm7, %v7161_v8, 0.0  ;;  %v7213_v43 = vsel %vm5636_vm7, %v7159_v31, 0.0 }
 0x78e   :  { %7511 = vmatmul.msk.f32.vlgmr.msrb.gmra.mxu3 %vm13499_vm9, %v6280_v23  ;;  %vm7374_vm9 = vcmask 261312  }
 0x790   :  { %6714 = vadd.xlane.f32.xlu1 %v6713_v59  ;;  %v6277_v46 = vpop.xlane.xlu1 %6276 }
 0x791   :  { %7584 = vrcp.f32 %v6277_v46 }
 0x792   :  { %6720 = vadd.xlane.f32.xlu2 %v6719_v32 }
 0x794   :  { %v7167_v13 = vpop.permute.xlu0 %7166  ;;  %v7165_v18 = vpop.permute.xlu2 %7164 }
 0x795   :  { %v7225_v3 = vsel %vm5636_vm7, %v7167_v13, 0.0  ;;  %v7222_v60 = vsel %vm5636_vm7, %v7165_v18, 0.0 }
 0x797   :  { %v7585_v1 = vpop.eup %7584 }
 0x798   :  { %v6281_v16 = vmul.f32 %v7585_v1, %v12237_v36  ;;  %7202 = vadd.xlane.f32.xlu1 %v7201_v62 }
 0x79a   :  { %7208 = vadd.xlane.f32.xlu2 %v7207_v4  ;;  %7512 = vmatmul.msk.f32.vlgmr.msra.gmra.mxu0 %vm13500_vm2, %v6281_v16 }
 0x79c   :  { %v7173_v51 = vpop.permute.xlu0 %7172  ;;  %v7171_v47 = vpop.permute.xlu2 %7170 }
 0x79d   :  { %v7234_v5 = vsel %vm5636_vm7, %v7173_v51, 0.0  ;;  %v7231_v56 = vsel %vm5636_vm7, %v7171_v47, 0.0 }
 0x7a0   :  { %6723 = vadd.xlane.f32.xlu1 %v6722_v61 }
 0x7a2   :  { %7217 = vadd.xlane.f32.xlu2 %v7216_v45 }
 0x7a8   :  { %7214 = vadd.xlane.f32.xlu1 %v7213_v43  ;;  %v7163_v38 = vpop.permute.xlu1 %7162 }
 0x7a9   :  { %v7219_v36 = vsel %vm5636_vm7, %v7163_v38, 0.0 }
 0x7aa   :  { %7226 = vadd.xlane.f32.xlu2 %v7225_v3  ;;  %7220 = vadd.xlane.f32.xlu0 %v7219_v36 }
 0x7b0   :  { %7223 = vadd.xlane.f32.xlu1 %v7222_v60  ;;  %v7169_v21 = vpop.permute.xlu1 %7168  ;;  %v6400_v60 = vpop.f32.mrf.mxu2 }
 0x7b1   :  { %v7228_v49 = vsel %vm5636_vm7, %v7169_v21, 0.0  ;;  %v6682_v20 = vpop.xlane.xlu0 %6681 }
 0x7b2   :  { %7235 = vadd.xlane.f32.xlu2 %v7234_v5  ;;  %7229 = vadd.xlane.f32.xlu0 %v7228_v49  ;;  %v6742_v39 = vperm.slane %v6682_v20, %v13452_v29  ;;  %v6404_v20 = vmul.f32 2.0, %v6400_v60 }
 0x7b8   :  { %7232 = vadd.xlane.f32.xlu1 %v7231_v56  ;;  %v7175_v22 = vpop.permute.xlu1 %7174 }
 0x7b9   :  { %v7237_v41 = vsel %vm5636_vm7, %v7175_v22, 0.0  ;;  %v6691_v15 = vpop.xlane.xlu0 %6690  ;;  %vm13501_vm7 = vmmov %vm13466_vm0 }
 0x7ba   :  { %7238 = vadd.xlane.f32.xlu0 %v7237_v41  ;;  %v6745_v33 = vperm.slane %v6691_v15, %v13452_v29 }
 0x7c1   :  { %v6700_v19 = vpop.xlane.xlu0 %6699 }
 0x7c2   :  { %v6748_v55 = vperm.slane %v6700_v19, %v13452_v29 }
 0x7c9   :  { %v6709_v58 = vpop.xlane.xlu0 %6708 }
 0x7ca   :  { %v6751_v4 = vperm.slane %v6709_v58, %v13452_v29 }
 0x7d1   :  { %v7197_v12 = vpop.xlane.xlu0 %7196 }
 0x7d2   :  { %v7257_v36 = vperm.slane %v7197_v12, %v13452_v29 }
 0x7d5   :  { %v6679_v40 = vpop.xlane.xlu2 %6678 }
 0x7d6   :  { %v6741_v34 = vperm.slane %v6679_v40, %v13452_v29 }
 0x7d8   :  { %v6757_v50 = vsel %vm5717_vm15, %v6742_v39, %v6741_v34 }
 0x7d9   :  { %v6718_v23 = vpop.xlane.xlu0 %6717 }
 0x7da   :  { %v6754_v18 = vperm.slane %v6718_v23, %v13452_v29 }
 0x7dd   :  { %v6688_v53 = vpop.xlane.xlu2 %6687 }
 0x7de   :  { %v6744_v37 = vperm.slane %v6688_v53, %v13452_v29 }
 0x7e1   :  { %v7206_v16 = vpop.xlane.xlu0 %7205 }
 0x7e2   :  { %v7260_v40 = vperm.slane %v7206_v16, %v13452_v29 }
 0x7e3   :  { %v6685_v17 = vpop.xlane.xlu1 %6684 }
 0x7e4   :  { %v6743_v27 = vperm.slane %v6685_v17, %v13452_v29 }
 0x7e5   :  { %v6697_v44 = vpop.xlane.xlu2 %6696 }
 0x7e6   :  { %v6758_v48 = vsel %vm5719_vm10, %v6743_v27, %v6757_v50  ;;  %v6747_v57 = vperm.slane %v6697_v44, %v13452_v29  ;;  %v6887_v50 = vpop.f32.mrf.mxu1 }
 0x7e7   :  { %v6759_v7 = vsel %vm5721_vm11, %v6744_v37, %v6758_v48  ;;  %v6918_v35 = vmul.f32 2.0, %v6887_v50 }
 0x7e8   :  { %v6760_v24 = vsel %vm5723_vm12, %v6745_v33, %v6759_v7 }
 0x7e9   :  { %v7212_v15 = vpop.xlane.xlu0 %7211 }
 0x7ea   :  { %v7262_v37 = vperm.slane %v7212_v15, %v13452_v29 }
 0x7eb   :  { %v6694_v10 = vpop.xlane.xlu1 %6693 }
 0x7ec   :  { %v6746_v52 = vperm.slane %v6694_v10, %v13452_v29 }
 0x7ed   :  { %v6706_v42 = vpop.xlane.xlu2 %6705 }
 0x7ee   :  { %v6761_v25 = vsel %vm5725_vm14, %v6746_v52, %v6760_v24  ;;  %v6750_v2 = vperm.slane %v6706_v42, %v13452_v29 }
 0x7ef   :  { %v6762_v9 = vsel %vm5727_vm8, %v6747_v57, %v6761_v25 }
 0x7f0   :  { %v6763_v0 = vsel %vm5729_vm5, %v6748_v55, %v6762_v9 }
 0x7f1   :  { %v6773_v14 = vadd.f32 %v6763_v0, %v6403_v54 }
 0x7f3   :  { %v6703_v63 = vpop.xlane.xlu1 %6702  ;;  %v12306_v11 = vmul.f32 0.35355338, %v6773_v14 }
 0x7f4   :  { %v6749_v46 = vperm.slane %v6703_v63, %v13452_v29 }
 0x7f5   :  { %v7194_v26 = vpop.xlane.xlu2 %7193  ;;  %v6777_v6 = vsel %vm13501_vm7, %v12306_v11, -inf }
 0x7f6   :  { %6778 = vmax.xlane.f32.xlu1 %v6777_v6  ;;  %v6764_v1 = vsel %vm5717_vm15, %v6750_v2, %v6749_v46  ;;  %v7256_v13 = vperm.slane %v7194_v26, %v13452_v29 }
 0x7f7   :  { %v6765_v31 = vsel %vm5719_vm10, %v6751_v4, %v6764_v1 }
 0x7f8   :  { %v7272_v5 = vsel %vm5717_vm15, %v7257_v36, %v7256_v13 }
 0x7fb   :  { %v6712_v28 = vpop.xlane.xlu1 %6711 }
 0x7fc   :  { %v6752_v62 = vperm.slane %v6712_v28, %v13452_v29 }
 0x7fd   :  { %v7200_v30 = vpop.xlane.xlu2 %7199 }
 0x7fe   :  { %v6766_v43 = vsel %vm5721_vm11, %v6752_v62, %v6765_v31  ;;  %v7258_v3 = vperm.slane %v7200_v30, %v13452_v29 }
 0x800   :  { %v7273_v49 = vsel %vm5719_vm10, %v7258_v3, %v7272_v5 }
 0x803   :  { %v6715_v59 = vpop.xlane.xlu1 %6714 }
 0x804   :  { %v6753_v8 = vperm.slane %v6715_v59, %v13452_v29 }
 0x805   :  { %v6721_v32 = vpop.xlane.xlu2 %6720 }
 0x806   :  { %v6767_v38 = vsel %vm5723_vm12, %v6753_v8, %v6766_v43  ;;  %v6755_v47 = vperm.slane %v6721_v32, %v13452_v29  ;;  %v6915_v32 = vpop.f32.mrf.mxu2 }
 0x807   :  { %v6768_v21 = vsel %vm5725_vm14, %v6754_v18, %v6767_v38  ;;  %v6919_v8 = vmul.f32 2.0, %v6915_v32 }
 0x808   :  { %v6769_v53 = vsel %vm5727_vm8, %v6755_v47, %v6768_v21 }
 0x80b   :  { %v7203_v61 = vpop.xlane.xlu1 %7202 }
 0x80c   :  { %v7259_v51 = vperm.slane %v7203_v61, %v13452_v29 }
 0x80d   :  { %v7209_v45 = vpop.xlane.xlu2 %7208 }
 0x80e   :  { %v7274_v22 = vsel %vm5721_vm11, %v7259_v51, %v7273_v49  ;;  %v7261_v44 = vperm.slane %v7209_v45, %v13452_v29 }
 0x80f   :  { %v7275_v17 = vsel %vm5723_vm12, %v7260_v40, %v7274_v22 }
 0x810   :  { %v7276_v48 = vsel %vm5725_vm14, %v7261_v44, %v7275_v17 }
 0x811   :  { %v7277_v42 = vsel %vm5727_vm8, %v7262_v37, %v7276_v48  ;;  %v6306_v49 = vpop.f32.mrf.mxu3 }
 0x813   :  { %v6724_v56 = vpop.xlane.xlu1 %6723 }
 0x814   :  { %v6756_v41 = vperm.slane %v6724_v56, %v13452_v29 }
 0x815   :  { %v7218_v34 = vpop.xlane.xlu2 %7217 }
 0x816   :  { %v6770_v19 = vsel %vm5729_vm5, %v6756_v41, %v6769_v53  ;;  %v7264_v0 = vperm.slane %v7218_v34, %v13452_v29 }
 0x817   :  { %v6774_v39 = vadd.f32 %v6770_v19, %v6404_v20  ;;  %v6333_v44 = vpop.f32.mrf.mxu0 }
 0x819   :  { %v6776_v27 = vmul.f32 0.35355338, %v6774_v39  ;;  %v13510_v39 = vld [vmem:[#allocation191_spill] sm:$0xff] }
 0x81b   :  { %v7215_v7 = vpop.xlane.xlu1 %7214  ;;  %v6780_v33 = vsel %vm13502_vm4, %v6776_v27, -inf }
 0x81c   :  { %v7263_v10 = vperm.slane %v7215_v7, %v13452_v29  ;;  %6781 = vmax.xlane.f32.xlu2 %v6780_v33 }
 0x81d   :  { %v7221_v52 = vpop.xlane.xlu0 %7220  ;;  %v7227_v24 = vpop.xlane.xlu2 %7226 }
 0x81e   :  { %v7278_v57 = vsel %vm5729_vm5, %v7263_v10, %v7277_v42  ;;  %v7265_v25 = vperm.slane %v7221_v52, %v13452_v29  ;;  %v7267_v12 = vperm.slane %v7227_v24, %v13452_v29 }
 0x81f   :  { %v7288_v58 = vadd.f32 %v7278_v57, %v6918_v35 }
 0x820   :  { %v7279_v26 = vsel %vm5717_vm15, %v7265_v25, %v7264_v0  ;;  %vm13504_vm15 = vmmov %vm13466_vm0 }
 0x821   :  { %v7290_v55 = vmul.f32 0.35355338, %v7288_v58 }
 0x823   :  { %v7224_v54 = vpop.xlane.xlu1 %7223  ;;  %v7292_v9 = vsel %vm13503_vm13, %v7290_v55, -inf }
 0x824   :  { %v7266_v14 = vperm.slane %v7224_v54, %v13452_v29  ;;  %7293 = vmax.xlane.f32.xlu0 %v7292_v9 }
 0x825   :  { %v7230_v63 = vpop.xlane.xlu0 %7229  ;;  %v7236_v30 = vpop.xlane.xlu2 %7235 }
 0x826   :  { %v7280_v6 = vsel %vm5719_vm10, %v7266_v14, %v7279_v26  ;;  %v7268_v28 = vperm.slane %v7230_v63, %v13452_v29  ;;  %v7270_v2 = vperm.slane %v7236_v30, %v13452_v29  ;;  %vm13505_vm10 = vmmov %vm13466_vm0 }
 0x827   :  { %v7281_v23 = vsel %vm5721_vm11, %v7267_v12, %v7280_v6  ;;  %vm13507_vm11 = vmmov %vm13466_vm0 }
 0x828   :  { %v7282_v1 = vsel %vm5723_vm12, %v7268_v28, %v7281_v23  ;;  %vm13508_vm12 = vmmov %vm13466_vm0 }
 0x82b   :  { %v7233_v59 = vpop.xlane.xlu1 %7232 }
 0x82c   :  { %v7269_v46 = vperm.slane %v7233_v59, %v13452_v29 }
 0x82d   :  { %v7239_v62 = vpop.xlane.xlu0 %7238 }
 0x82e   :  { %v7283_v4 = vsel %vm5725_vm14, %v7269_v46, %v7282_v1  ;;  %v7271_v16 = vperm.slane %v7239_v62, %v13452_v29  ;;  %v13506_v29 = vld [vmem:[#allocation82_spill] sm:$0xff]  ;;  %vm13509_vm14 = vmmov %vm13466_vm0 }
 0x82f   :  { %v7284_v61 = vsel %vm5727_vm8, %v7270_v2, %v7283_v4  ;;  %vm13512_vm8 = vmmov %vm13466_vm0 }
 0x830   :  { %v7285_v45 = vsel %vm5729_vm5, %v7271_v16, %v7284_v61  ;;  %vm6344_vm5 = vcmask 130112  }
 0x831   :  { %v7289_v31 = vadd.f32 %v7285_v45, %v6919_v8 }
 0x833   :  { %v7291_v13 = vmul.f32 0.35355338, %v7289_v31 }
 0x835   :  { %v7295_v43 = vsel %vm13504_vm15, %v7291_v13, -inf }
 0x836   :  { %7296 = vmax.xlane.f32.xlu1 %v7295_v43 }
 0x869   :  { %v6779_v3 = vpop.xlane.xlu1 %6778 }
 0x86a   :  { %v6783_v38 = vsub.f32 %v12306_v11, %v6779_v3 }
 0x86c   :  { %v6785_v36 = vmul.f32 1.442695, %v6783_v38 }
 0x86e   :  { %7586 = vpow2.f32 %v6785_v36 }
 0x874   :  { %v7587_v18 = vpop.eup %7586 }
 0x875   :  { %v6789_v51 = vsel %vm13505_vm10, %v7587_v18, 0.0 }
 0x876   :  { %6790 = vadd.xlane.f32.xlu2 %v6789_v51 }
 0x88e   :  { %7561 = vrot.lane.b32.xlu2 %v13506_v29, %s7819_s3 }
 0x88f   :  { %v6782_v60 = vpop.xlane.xlu2 %6781 }
 0x890   :  { %v6784_v5 = vsub.f32 %v6776_v27, %v6782_v60  ;;  %v13511_v27 = vld [vmem:[#allocation190_spill] sm:$0xff] }
 0x892   :  { %v6787_v21 = vmul.f32 1.442695, %v6784_v5 }
 0x894   :  { %7588 = vpow2.f32 %v6787_v21 }
 0x896   :  { %6338 = vrot.lane.b32.xlu2 %v6306_v49, %s7806_s22 }
 0x897   :  { %v7294_v47 = vpop.xlane.xlu0 %7293 }
 0x898   :  { %v7298_v56 = vsub.f32 %v7290_v55, %v7294_v47 }
 0x89a   :  { %v7589_v22 = vpop.eup %7588  ;;  %v7300_v11 = vmul.f32 1.442695, %v7298_v56 }
 0x89b   :  { %v6792_v41 = vsel %vm13507_vm11, %v7589_v22, 0.0 }
 0x89c   :  { %7590 = vpow2.f32 %v7300_v11  ;;  %6793 = vadd.xlane.f32.xlu0 %v6792_v41 }
 0x8a2   :  { %v7591_v20 = vpop.eup %7590 }
 0x8a3   :  { %v7304_v40 = vsel %vm13508_vm12, %v7591_v20, 0.0 }
 0x8a4   :  { %7305 = vadd.xlane.f32.xlu1 %v7304_v40 }
 0x8a9   :  { %v7297_v15 = vpop.xlane.xlu1 %7296 }
 0x8aa   :  { %v7299_v53 = vsub.f32 %v7291_v13, %v7297_v15 }
 0x8ac   :  { %v7302_v34 = vmul.f32 1.442695, %v7299_v53 }
 0x8ae   :  { %7592 = vpow2.f32 %v7302_v34 }
 0x8b4   :  { %v7593_v19 = vpop.eup %7592 }
 0x8b5   :  { %v7307_v17 = vsel %vm13509_vm14, %v7593_v19, 0.0 }
 0x8b6   :  { %7308 = vadd.xlane.f32.xlu0 %v7307_v17 }
 0x8bd   :  { %7314 = vrot.lane.b32.xlu1 %v13510_v39, %s7827_s12 }
 0x8c5   :  { %6340 = vrot.lane.b32.xlu1 %v6333_v44, %s7806_s22 }
 0x8ca   :  { %7340 = vrot.lane.b32.xlu0 %v13511_v27, %s7827_s12 }
 0x8e9   :  { %v6791_v50 = vpop.xlane.xlu2 %6790 }
 0x8ea   :  { %7594 = vrcp.f32 %v6791_v50 }
 0x8f0   :  { %v7595_v48 = vpop.eup %7594 }
 0x8f1   :  { %v7562_v37 = vpop.permute.xlu2 %7561  ;;  %v6797_v10 = vmul.f32 %v7595_v48, %v7587_v18 }
 0x8f2   :  { %v7564_v7 = vunpack.i.h.bf16 %v7562_v37  ;;  %v7563_v33 = vunpack.i.l.bf16 %v7562_v37 }
 0x8f4   :  { %6820 = vmatpush.msra.mxu3 %v7563_v33  ;;  %6846 = vmatpush.msrb.mxu0 %v7564_v7 }
 0x8f5   :  { %7517 = vmatmul.msk.f32.vlgmr.msra.gmra.mxu3 %vm13512_vm8, %v6797_v10 }
 0x8f9   :  { %v6339_v35 = vpop.permute.xlu2 %6338 }
 0x8fa   :  { %6345 = vst.msk [vmem:[#allocation14] sm:$0xff] %vm6344_vm5, %v6339_v35 }
 0x90f   :  { %v6794_v42 = vpop.xlane.xlu0 %6793 }
 0x910   :  { %7596 = vrcp.f32 %v6794_v42 }
 0x916   :  { %v7597_v52 = vpop.eup %7596 }
 0x917   :  { %v6798_v57 = vmul.f32 %v7597_v52, %v7589_v22  ;;  %v7306_v58 = vpop.xlane.xlu1 %7305 }
 0x918   :  { %7598 = vrcp.f32 %v7306_v58 }
 0x919   :  { %7518 = vmatmul.msk.f32.vlgmr.msrb.gmra.mxu0 %vm13513_vm6, %v6798_v57 }
 0x91e   :  { %v7599_v24 = vpop.eup %7598 }
 0x91f   :  { %v7312_v55 = vmul.f32 %v7599_v24, %v7591_v20 }
 0x929   :  { %v7309_v54 = vpop.xlane.xlu0 %7308 }
 0x92a   :  { %7600 = vrcp.f32 %v7309_v54 }
 0x92f   :  { %v7315_v25 = vpop.permute.xlu1 %7314 }
 0x930   :  { %7335 = vmatpush.msrb.mxu3 %v7315_v25  ;;  %v7601_v0 = vpop.eup %7600 }
 0x931   :  { %7523 = vmatmul.msk.f32.vlgmr.msrb.gmra.mxu3 %vm13466_vm0, %v7312_v55  ;;  %v7313_v14 = vmul.f32 %v7601_v0, %v7593_v19 }
 0x937   :  { %v6341_v9 = vpop.permute.xlu1 %6340 }
 0x938   :  { %6346 = vst.msk [vmem:[#allocation14 + $0x8] sm:$0xff] %vm6344_vm5, %v6341_v9 }
 0x93c   :  { %v7341_v63 = vpop.permute.xlu0 %7340 }
 0x93d   :  { %7361 = vmatpush.msra.mxu0 %v7341_v63 }
 0x93e   :  { %7524 = vmatmul.msk.f32.vlgmr.msra.gmra.mxu0 %vm13514_vm1, %v7313_v14 }
 0x978   :  { %v6822_v26 = vpop.f32.mrf.mxu3 }
 0x979   :  { %6853 = vrot.lane.b32.xlu2 %v6822_v26, %s7824_s30 }
 0x996   :  { %v6848_v6 = vpop.f32.mrf.mxu0 }
 0x997   :  { %6855 = vrot.lane.b32.xlu1 %v6848_v6, %s7824_s30 }
 0x9b4   :  { %v7337_v12 = vpop.f32.mrf.mxu3 }
 0x9b5   :  { %7368 = vrot.lane.b32.xlu0 %v7337_v12, %s7829_s14 }
 0x9bb   :  { %v7363_v28 = vpop.f32.mrf.mxu0 }
 0x9bc   :  { %7370 = vrot.lane.b32.xlu2 %v7363_v28, %s7829_s14 }
 0x9d3   :  { %v6854_v30 = vpop.permute.xlu2 %6853 }
 0x9d4   :  { %6860 = vst.msk [vmem:[#allocation14] sm:$0xff] %vm6859_vm3, %v6854_v30 }
 0xa09   :  { %v6856_v23 = vpop.permute.xlu1 %6855 }
 0xa0a   :  { %6861 = vst.msk [vmem:[#allocation14 + $0x8] sm:$0xff] %vm6859_vm3, %v6856_v23 }
 0xa16   :  { %v7371_v59 = vpop.permute.xlu2 %7370 }
 0xa17   :  { %7376 = vst.msk [vmem:[#allocation14 + $0x8] sm:$0xff] %vm7374_vm9, %v7371_v59 }
 0xa27   :  { %v7369_v32 = vpop.permute.xlu0 %7368 }
 0xa28   :  { %7375 = vst.msk [vmem:[#allocation14] sm:$0xff] %vm7374_vm9, %v7369_v32 }
 0xa29   :  { %7389 = dma.vmem_to_hbm [thread:$0]  %s7382_s15, 256, %s7384_s18, [#allocation4], %s7805_s21, %s7805_s21, %s7806_s22  }
 0xa2a   :  { %7802 = dma.done.wait [#allocation4], 256  }
 0xa2b   :  { %7803 = vsyncadd [#allocation4], 4294967040 }
 0xa2c   :  { %7394 = vsyncpa [#allocation3], 1 }
 0xa2d   :  { %7395 = vsyncpa [#allocation6], 1 }
 0xa2e   :  { %7396 = vsyncpa [#allocation9], 1 }
 0xa2f   :  { %7397 = vsyncpa [#allocation12], 1 }
 0xa30   :  { %7398 = vsyncpa [#allocation4], 1 }

</bundles_post_ra>
